<compile_context>
chip_gen: v7x
topology: tpu7x:2x2x1
jax: 0.10.0
libtpu: 0.0.40
codegen_flags: <defaults>
</compile_context>

<pallas_src>
import functools

import numpy as np
import jax
import jax.numpy as jnp
from jax.experimental import pallas as pl
from jax.experimental.pallas import tpu as pltpu

SEQ_LEN = 24          # fixed by backbone_name == 'mobile'
LN_EPS = 1e-5         # nn.LayerNorm default
NEG_INF = -1e30       # mask value for lane-padded lexicon columns
TARGET_ROWS = 192     # ~rows per grid step fed to the MXU


# ----------------------------------------------------------------------------
# Positional encoding (standard sinusoidal table, added to the sequence)
# ----------------------------------------------------------------------------
def _sinusoidal_pe(length, dim):
    pos = np.arange(length, dtype=np.float32)[:, None]
    i = np.arange(dim, dtype=np.float32)[None, :]
    angle = pos / np.power(10000.0, (2.0 * np.floor(i / 2.0)) / dim)
    pe = np.zeros((length, dim), np.float32)
    pe[:, 0::2] = np.sin(angle[:, 0::2])
    pe[:, 1::2] = np.cos(angle[:, 1::2])
    return jnp.asarray(pe)


def _layernorm(x, gamma, beta):
    mu = jnp.mean(x, axis=-1, keepdims=True)
    var = jnp.mean((x - mu) ** 2, axis=-1, keepdims=True)
    return (x - mu) * jax.lax.rsqrt(var + LN_EPS) * gamma + beta


# ----------------------------------------------------------------------------
# Fused Pallas kernel: stem + all MixingBlocks + head for one batch tile.
# ----------------------------------------------------------------------------
def _model2_kernel(feat_ref, peb_ref, stem_w_ref,
                   ln1g_ref, ln1b_ref, wqkv_ref, bqkv_ref, wo_ref, bo_ref,
                   ln2g_ref, ln2b_ref, w1_ref, b1_ref, w2_ref, b2_ref,
                   ng_ref, nb_ref, hw_ref, hb_ref,
                   o_ref, *, num_heads, depth):
    BT, S, F = feat_ref.shape
    D = stem_w_ref.shape[1]
    hd = D // num_heads
    rows = BT * S
    bf16 = jnp.bfloat16

    # ---- stem: pointwise projection of pooled CNN features + (PE + bias) ----
    feat = feat_ref[...].reshape(rows, F).astype(bf16)
    x = jnp.dot(feat, stem_w_ref[...], preferred_element_type=jnp.float32)
    x = (x.reshape(BT, S, D) + peb_ref[...]).reshape(rows, D)    # f32 residual stream

    # ---- MixingBlocks (static unroll over depth; all weights VMEM-resident) --
    for l in range(depth):
        # attention branch (pre-LN MHSA, residual).  Scale already folded into wqkv.
        xn = _layernorm(x, ln1g_ref[l], ln1b_ref[l]).astype(bf16)
        qkv = jnp.dot(xn, wqkv_ref[l], preferred_element_type=jnp.float32) + bqkv_ref[l]
        qkv = qkv.astype(bf16)
        q = qkv[:, :D].reshape(BT, S, D)
        k = qkv[:, D:2 * D].reshape(BT, S, D)
        v = qkv[:, 2 * D:].reshape(BT, S, D)
        wo_l = wo_ref[l]
        attn = jnp.zeros((rows, D), jnp.float32)
        for h in range(num_heads):                       # static unroll over heads
            sl = slice(h * hd, (h + 1) * hd)
            s = jnp.einsum('bqd,bkd->bqk', q[:, :, sl], k[:, :, sl],
                           preferred_element_type=jnp.float32)      # (BT, S, S)
            s = s - jnp.max(s, axis=-1, keepdims=True)
            p = jnp.exp(s)
            p = p * pl.reciprocal(jnp.sum(p, axis=-1, keepdims=True), approx=True)
            ho = jnp.einsum('bqk,bkd->bqd', p.astype(bf16), v[:, :, sl],
                            preferred_element_type=jnp.float32)     # (BT, S, hd)
            # no concat: accumulate this head's contribution to the out-projection
            attn = attn + jnp.dot(ho.reshape(rows, hd).astype(bf16), wo_l[sl, :],
                                  preferred_element_type=jnp.float32)
        x = x + attn + bo_ref[l]

        # MLP branch (pre-LN, residual)
        xn2 = _layernorm(x, ln2g_ref[l], ln2b_ref[l]).astype(bf16)
        h1 = jnp.dot(xn2, w1_ref[l], preferred_element_type=jnp.float32) + b1_ref[l]
        # TODO(synk): PyTorch nn.GELU defaults to exact erf; tanh approximation used (TPU EUP).
        h1 = jax.nn.gelu(h1, approximate=True).astype(bf16)
        x = x + jnp.dot(h1, w2_ref[l], preferred_element_type=jnp.float32) + b2_ref[l]

    # ---- head: LayerNorm -> Linear(lexicon, lane-padded) -> log_softmax ------
    xn = _layernorm(x, ng_ref[...], nb_ref[...]).astype(bf16)
    logits = jnp.dot(xn, hw_ref[...], preferred_element_type=jnp.float32) + hb_ref[...]
    m = jnp.max(logits, axis=-1, keepdims=True)
    lse = jnp.log(jnp.sum(jnp.exp(logits - m), axis=-1, keepdims=True)) + m
    Vp = hw_ref.shape[1]
    o_ref[...] = (logits - lse).reshape(BT, S, Vp).astype(o_ref.dtype)


# ----------------------------------------------------------------------------
# Parameters (deterministic init; shapes follow the PyTorch module; weights are
# stored in kernel-ready layout: per-layer stacked, bf16 matmul weights, the
# attention scale folded into the Q columns, PE folded into the stem bias, the
# lexicon lane-padded to a multiple of 128).
# ----------------------------------------------------------------------------
def init_params(key, lexicon_size, hidden, depth, feat_dim, num_heads, mlp_ratio=2):
    bf16 = jnp.bfloat16
    hd = hidden // num_heads
    scale = 1.0 / np.sqrt(hd)

    def dense(k, fan_in, fan_out):
        kw, kb = jax.random.split(k)
        bound = 1.0 / np.sqrt(fan_in)
        w = jax.random.uniform(kw, (fan_in, fan_out), jnp.float32, -bound, bound)
        b = jax.random.uniform(kb, (1, fan_out), jnp.float32, -bound, bound)
        return w, b

    keys = jax.random.split(key, depth * 4 + 2)
    stem_w, stem_b = dense(keys[0], feat_dim, hidden)

    wqkv, bqkv, wo, bo, w1, b1, w2, b2 = ([] for _ in range(8))
    qscale = jnp.concatenate([jnp.full((1, hidden), scale, jnp.float32),
                              jnp.ones((1, 2 * hidden), jnp.float32)], axis=1)
    for i in range(depth):
        kk = keys[1 + i * 4: 1 + (i + 1) * 4]
        wq, bq = dense(kk[0], hidden, 3 * hidden)
        wqkv.append(wq * qscale)          # fold 1/sqrt(head_dim) into Q weight
        bqkv.append(bq * qscale)          # ...and Q bias
        a, c = dense(kk[1], hidden, hidden);               wo.append(a); bo.append(c)
        a, c = dense(kk[2], hidden, hidden * mlp_ratio);   w1.append(a); b1.append(c)
        a, c = dense(kk[3], hidden * mlp_ratio, hidden);   w2.append(a); b2.append(c)

    hw, hb = dense(keys[1 + depth * 4], hidden, lexicon_size)
    # lane-pad lexicon to a multiple of 128; padded logits get -inf bias (masked)
    Vp = max(128, -(-lexicon_size // 128) * 128)
    hw_p = jnp.zeros((hidden, Vp), jnp.float32).at[:, :lexicon_size].set(hw)
    hb_p = jnp.full((1, Vp), NEG_INF, jnp.float32).at[:, :lexicon_size].set(hb)

    ones = jnp.ones((depth, 1, hidden), jnp.float32)
    zeros = jnp.zeros((depth, 1, hidden), jnp.float32)
    return {
        # positional encoding folded into the stem bias -> one (S, D) add
        "pe_b": _sinusoidal_pe(SEQ_LEN, hidden) + stem_b,
        "stem_w": stem_w.astype(bf16),
        "ln1_g": ones, "ln1_b": zeros,
        "wqkv": jnp.stack(wqkv).astype(bf16), "bqkv": jnp.stack(bqkv),
        "wo": jnp.stack(wo).astype(bf16), "bo": jnp.stack(bo),
        "ln2_g": ones, "ln2_b": zeros,
        "w1": jnp.stack(w1).astype(bf16), "b1": jnp.stack(b1),
        "w2": jnp.stack(w2).astype(bf16), "b2": jnp.stack(b2),
        "norm_g": jnp.ones((1, hidden), jnp.float32),
        "norm_b": jnp.zeros((1, hidden), jnp.float32),
        "head_w": hw_p.astype(bf16), "head_b": hb_p,
        "lexicon_size": lexicon_size,
    }


# ----------------------------------------------------------------------------
# Full forward (mirrors Model2.forward) — one fused pallas_call
# ----------------------------------------------------------------------------
_WEIGHT_ORDER = ["pe_b", "stem_w", "ln1_g", "ln1_b", "wqkv", "bqkv",
                 "wo", "bo", "ln2_g", "ln2_b", "w1", "b1", "w2", "b2",
                 "norm_g", "norm_b", "head_w", "head_b"]


def model2_forward(x_nchw, params, num_heads):
    B, C, H, W = x_nchw.shape
    S = SEQ_LEN
    # TODO(synk): MobileNetV3Small backbone source is not provided; stand-in =
    # adaptive avg-pool to (8 height bins, SEQ_LEN width bins); the learned
    # pointwise projection to hidden_channels runs inside the fused kernel.
    HB = 8
    pooled = x_nchw.reshape(B, C, HB, H // HB, S, W // S).mean(axis=(3, 5))
    feats = pooled.reshape(B, C * HB, S).transpose(0, 2, 1)          # (B, S, F)
    F_ = feats.shape[-1]

    depth = params["wqkv"].shape[0]
    Vp = params["head_w"].shape[1]
    V = params["lexicon_size"]

    # Batch tile: ~TARGET_ROWS rows per grid step for MXU M-dim utilization;
    # grid axis kept "parallel" so a 2nd TensorCore (v7x) can take half the batch.
    BT = min(B, max(1, TARGET_ROWS // S))
    Bp = -(-B // BT) * BT
    if Bp != B:
        feats = jnp.pad(feats, ((0, Bp - B), (0, 0), (0, 0)))

    weights = [params[n] for n in _WEIGHT_ORDER]
    # Weights: whole array resident in VMEM, copied in once, no double-buffering.
    vmem_full = pl.BlockSpec(memory_space=pltpu.MemorySpace.VMEM)

    kern = functools.partial(_model2_kernel, num_heads=num_heads, depth=depth)
    out = pl.pallas_call(
        kern,
        out_shape=jax.ShapeDtypeStruct((Bp, S, Vp), jnp.float32),
        grid=(Bp // BT,),
        in_specs=[pl.BlockSpec((BT, S, F_), lambda i: (i, 0, 0))]
                 + [vmem_full] * len(weights),
        out_specs=pl.BlockSpec((BT, S, Vp), lambda i: (i, 0, 0)),
        compiler_params=pltpu.CompilerParams(
            dimension_semantics=("parallel",),
            vmem_limit_bytes=64 * 1024 * 1024),
    )(feats, *weights)

    # strip batch padding + lexicon lane padding; (B, S, V) -> (S, B, V)
    out = out[:B, :, :V]
    return out.transpose(1, 0, 2)


# ----------------------------------------------------------------------------
if __name__ == "__main__":
    batch = 2
    in_channels = 1            # 'mobile' backbone forces 1 input channel
    H, W = 16, 96
    hidden_channels = 64       # small stand-in for 512
    num_heads = 8
    depth = 2
    lexicon_size = 48

    key = jax.random.PRNGKey(0)
    kx, kp = jax.random.split(key)
    x = jax.random.normal(kx, (batch, in_channels, H, W), jnp.float32)
    params = init_params(kp, lexicon_size, hidden_channels, depth,
                         feat_dim=in_channels * 8, num_heads=num_heads, mlp_ratio=2)

    out = model2_forward(x, params, num_heads)
    out = jax.block_until_ready(out)

    assert out.shape == (SEQ_LEN, batch, lexicon_size), out.shape
    # log_softmax sanity: rows sum to 1 in prob space (padded lanes carry 0 mass)
    assert np.allclose(np.exp(np.asarray(out)).sum(-1), 1.0, atol=1e-3)
    assert np.all(np.isfinite(np.asarray(out)))
    print("KERNEL_OK")
</pallas_src>

<mosaic_0001>
module attributes {stable_mosaic.version = 11 : i64} {
  func.func @_model2_kernel(%arg0: i32, %arg1: memref<2x24x8xf32, #tpu.memory_space<vmem>>, %arg2: memref<24x64xf32, #tpu.memory_space<vmem>>, %arg3: memref<8x64xbf16, #tpu.memory_space<vmem>>, %arg4: memref<2x1x64xf32, #tpu.memory_space<vmem>>, %arg5: memref<2x1x64xf32, #tpu.memory_space<vmem>>, %arg6: memref<2x64x192xbf16, #tpu.memory_space<vmem>>, %arg7: memref<2x1x192xf32, #tpu.memory_space<vmem>>, %arg8: memref<2x64x64xbf16, #tpu.memory_space<vmem>>, %arg9: memref<2x1x64xf32, #tpu.memory_space<vmem>>, %arg10: memref<2x1x64xf32, #tpu.memory_space<vmem>>, %arg11: memref<2x1x64xf32, #tpu.memory_space<vmem>>, %arg12: memref<2x64x128xbf16, #tpu.memory_space<vmem>>, %arg13: memref<2x1x128xf32, #tpu.memory_space<vmem>>, %arg14: memref<2x128x64xbf16, #tpu.memory_space<vmem>>, %arg15: memref<2x1x64xf32, #tpu.memory_space<vmem>>, %arg16: memref<1x64xf32, #tpu.memory_space<vmem>>, %arg17: memref<1x64xf32, #tpu.memory_space<vmem>>, %arg18: memref<64x128xbf16, #tpu.memory_space<vmem>>, %arg19: memref<1x128xf32, #tpu.memory_space<vmem>>, %arg20: memref<2x24x128xf32, #tpu.memory_space<vmem>>) attributes {dimension_semantics = [#tpu.dimension_semantics<parallel>], iteration_bounds = array<i64: 1>, scalar_prefetch = 0 : i64, scratch_operands = 0 : i64, tpu.core_type = #tpu.core_type<tc>, window_params = [{transform_indices = @transform_0, window_bounds = array<i64: 2, 24, 8>}, {pipeline_mode = #tpu.pipeline_mode<synchronous>, transform_indices = @transform_1, window_bounds = array<i64: 24, 64>}, {pipeline_mode = #tpu.pipeline_mode<synchronous>, transform_indices = @transform_2, window_bounds = array<i64: 8, 64>}, {pipeline_mode = #tpu.pipeline_mode<synchronous>, transform_indices = @transform_3, window_bounds = array<i64: 2, 1, 64>}, {pipeline_mode = #tpu.pipeline_mode<synchronous>, transform_indices = @transform_4, window_bounds = array<i64: 2, 1, 64>}, {pipeline_mode = #tpu.pipeline_mode<synchronous>, transform_indices = @transform_5, window_bounds = array<i64: 2, 64, 192>}, {pipeline_mode = #tpu.pipeline_mode<synchronous>, transform_indices = @transform_6, window_bounds = array<i64: 2, 1, 192>}, {pipeline_mode = #tpu.pipeline_mode<synchronous>, transform_indices = @transform_7, window_bounds = array<i64: 2, 64, 64>}, {pipeline_mode = #tpu.pipeline_mode<synchronous>, transform_indices = @transform_8, window_bounds = array<i64: 2, 1, 64>}, {pipeline_mode = #tpu.pipeline_mode<synchronous>, transform_indices = @transform_9, window_bounds = array<i64: 2, 1, 64>}, {pipeline_mode = #tpu.pipeline_mode<synchronous>, transform_indices = @transform_10, window_bounds = array<i64: 2, 1, 64>}, {pipeline_mode = #tpu.pipeline_mode<synchronous>, transform_indices = @transform_11, window_bounds = array<i64: 2, 64, 128>}, {pipeline_mode = #tpu.pipeline_mode<synchronous>, transform_indices = @transform_12, window_bounds = array<i64: 2, 1, 128>}, {pipeline_mode = #tpu.pipeline_mode<synchronous>, transform_indices = @transform_13, window_bounds = array<i64: 2, 128, 64>}, {pipeline_mode = #tpu.pipeline_mode<synchronous>, transform_indices = @transform_14, window_bounds = array<i64: 2, 1, 64>}, {pipeline_mode = #tpu.pipeline_mode<synchronous>, transform_indices = @transform_15, window_bounds = array<i64: 1, 64>}, {pipeline_mode = #tpu.pipeline_mode<synchronous>, transform_indices = @transform_16, window_bounds = array<i64: 1, 64>}, {pipeline_mode = #tpu.pipeline_mode<synchronous>, transform_indices = @transform_17, window_bounds = array<i64: 64, 128>}, {pipeline_mode = #tpu.pipeline_mode<synchronous>, transform_indices = @transform_18, window_bounds = array<i64: 1, 128>}, {transform_indices = @transform_19, window_bounds = array<i64: 2, 24, 128>}]} {
    %c0 = arith.constant 0 : index
    %c0_0 = arith.constant 0 : index
    %c0_1 = arith.constant 0 : index
    %0 = vector.load %arg1[%c0, %c0_0, %c0_1] : memref<2x24x8xf32, #tpu.memory_space<vmem>>, vector<2x24x8xf32>
    %1 = vector.shape_cast %0 : vector<2x24x8xf32> to vector<48x8xf32>
    %2 = arith.truncf %1 : vector<48x8xf32> to vector<48x8xbf16>
    %c0_2 = arith.constant 0 : index
    %c0_3 = arith.constant 0 : index
    %3 = vector.load %arg3[%c0_2, %c0_3] : memref<8x64xbf16, #tpu.memory_space<vmem>>, vector<8x64xbf16>
    %cst = arith.constant dense<0.000000e+00> : vector<48x64xf32>
    %4 = tpu.matmul %2, %3, %cst {dimension_numbers = #tpu.dot_dimension_numbers<[1], [0], [0], [1], [0, 0, 1, 1], [], []>} : vector<48x8xbf16>, vector<8x64xbf16>, vector<48x64xf32> -> vector<48x64xf32>
    %5 = vector.shape_cast %4 : vector<48x64xf32> to vector<2x24x64xf32>
    %c0_4 = arith.constant 0 : index
    %c0_5 = arith.constant 0 : index
    %6 = vector.load %arg2[%c0_4, %c0_5] : memref<24x64xf32, #tpu.memory_space<vmem>>, vector<24x64xf32>
    %7 = vector.shape_cast %6 : vector<24x64xf32> to vector<1x24x64xf32>
    %8 = vector.broadcast %7 : vector<1x24x64xf32> to vector<2x24x64xf32>
    %9 = arith.addf %5, %8 : vector<2x24x64xf32>
    %10 = vector.shape_cast %9 : vector<2x24x64xf32> to vector<48x64xf32>
    %c0_6 = arith.constant 0 : index
    %c0_7 = arith.constant 0 : index
    %c0_8 = arith.constant 0 : index
    %11 = vector.load %arg4[%c0_6, %c0_7, %c0_8] : memref<2x1x64xf32, #tpu.memory_space<vmem>>, vector<1x1x64xf32>
    %12 = vector.shape_cast %11 : vector<1x1x64xf32> to vector<1x64xf32>
    %c0_9 = arith.constant 0 : index
    %c0_10 = arith.constant 0 : index
    %c0_11 = arith.constant 0 : index
    %13 = vector.load %arg5[%c0_9, %c0_10, %c0_11] : memref<2x1x64xf32, #tpu.memory_space<vmem>>, vector<1x1x64xf32>
    %14 = vector.shape_cast %13 : vector<1x1x64xf32> to vector<1x64xf32>
    %cst_12 = arith.constant dense<0.000000e+00> : vector<48xf32>
    %15 = vector.multi_reduction <add>, %10, %cst_12 [1] : vector<48x64xf32> to vector<48xf32>
    %16 = vector.shape_cast %15 : vector<48xf32> to vector<48x1xf32>
    %cst_13 = arith.constant 6.400000e+01 : f32
    %17 = vector.broadcast %cst_13 : f32 to vector<48x1xf32>
    %18 = arith.divf %16, %17 : vector<48x1xf32>
    %19 = vector.broadcast %18 : vector<48x1xf32> to vector<48x64xf32>
    %20 = arith.subf %10, %19 : vector<48x64xf32>
    %21 = arith.mulf %20, %20 : vector<48x64xf32>
    %cst_14 = arith.constant dense<0.000000e+00> : vector<48xf32>
    %22 = vector.multi_reduction <add>, %21, %cst_14 [1] : vector<48x64xf32> to vector<48xf32>
    %23 = vector.shape_cast %22 : vector<48xf32> to vector<48x1xf32>
    %cst_15 = arith.constant 6.400000e+01 : f32
    %24 = vector.broadcast %cst_15 : f32 to vector<48x1xf32>
    %25 = arith.divf %23, %24 : vector<48x1xf32>
    %26 = vector.broadcast %18 : vector<48x1xf32> to vector<48x64xf32>
    %27 = arith.subf %10, %26 : vector<48x64xf32>
    %cst_16 = arith.constant 9.99999974E-6 : f32
    %28 = vector.broadcast %cst_16 : f32 to vector<48x1xf32>
    %29 = arith.addf %25, %28 : vector<48x1xf32>
    %30 = math.rsqrt %29 : vector<48x1xf32>
    %31 = vector.broadcast %30 : vector<48x1xf32> to vector<48x64xf32>
    %32 = arith.mulf %27, %31 : vector<48x64xf32>
    %33 = vector.broadcast %12 : vector<1x64xf32> to vector<48x64xf32>
    %34 = arith.mulf %32, %33 : vector<48x64xf32>
    %35 = vector.broadcast %14 : vector<1x64xf32> to vector<48x64xf32>
    %36 = arith.addf %34, %35 : vector<48x64xf32>
    %37 = arith.truncf %36 : vector<48x64xf32> to vector<48x64xbf16>
    %c0_17 = arith.constant 0 : index
    %c0_18 = arith.constant 0 : index
    %c0_19 = arith.constant 0 : index
    %38 = vector.load %arg6[%c0_17, %c0_18, %c0_19] : memref<2x64x192xbf16, #tpu.memory_space<vmem>>, vector<1x64x192xbf16>
    %39 = vector.shape_cast %38 : vector<1x64x192xbf16> to vector<64x192xbf16>
    %cst_20 = arith.constant dense<0.000000e+00> : vector<48x192xf32>
    %40 = tpu.matmul %37, %39, %cst_20 {dimension_numbers = #tpu.dot_dimension_numbers<[1], [0], [0], [1], [0, 0, 1, 1], [], []>} : vector<48x64xbf16>, vector<64x192xbf16>, vector<48x192xf32> -> vector<48x192xf32>
    %c0_21 = arith.constant 0 : index
    %c0_22 = arith.constant 0 : index
    %c0_23 = arith.constant 0 : index
    %41 = vector.load %arg7[%c0_21, %c0_22, %c0_23] : memref<2x1x192xf32, #tpu.memory_space<vmem>>, vector<1x1x192xf32>
    %42 = vector.shape_cast %41 : vector<1x1x192xf32> to vector<1x192xf32>
    %43 = vector.broadcast %42 : vector<1x192xf32> to vector<48x192xf32>
    %44 = arith.addf %40, %43 : vector<48x192xf32>
    %45 = arith.truncf %44 : vector<48x192xf32> to vector<48x192xbf16>
    %46 = vector.extract_strided_slice %45 {offsets = [0, 0], sizes = [48, 64], strides = [1, 1]} : vector<48x192xbf16> to vector<48x64xbf16>
    %47 = vector.shape_cast %46 : vector<48x64xbf16> to vector<2x24x64xbf16>
    %48 = vector.extract_strided_slice %45 {offsets = [0, 64], sizes = [48, 64], strides = [1, 1]} : vector<48x192xbf16> to vector<48x64xbf16>
    %49 = vector.shape_cast %48 : vector<48x64xbf16> to vector<2x24x64xbf16>
    %50 = vector.extract_strided_slice %45 {offsets = [0, 128], sizes = [48, 64], strides = [1, 1]} : vector<48x192xbf16> to vector<48x64xbf16>
    %51 = vector.shape_cast %50 : vector<48x64xbf16> to vector<2x24x64xbf16>
    %c0_24 = arith.constant 0 : index
    %c0_25 = arith.constant 0 : index
    %c0_26 = arith.constant 0 : index
    %52 = vector.load %arg8[%c0_24, %c0_25, %c0_26] : memref<2x64x64xbf16, #tpu.memory_space<vmem>>, vector<1x64x64xbf16>
    %53 = vector.shape_cast %52 : vector<1x64x64xbf16> to vector<64x64xbf16>
    %cst_27 = arith.constant 0.000000e+00 : f32
    %54 = vector.broadcast %cst_27 : f32 to vector<48x64xf32>
    %55 = vector.extract_strided_slice %47 {offsets = [0, 0, 0], sizes = [2, 24, 8], strides = [1, 1, 1]} : vector<2x24x64xbf16> to vector<2x24x8xbf16>
    %56 = vector.extract_strided_slice %49 {offsets = [0, 0, 0], sizes = [2, 24, 8], strides = [1, 1, 1]} : vector<2x24x64xbf16> to vector<2x24x8xbf16>
    "tpu.trace_start"() <{level = 10 : i32, message = "bqd,bkd->bqk"}> : () -> ()
    %cst_28 = arith.constant dense<0.000000e+00> : vector<2x24x24xf32>
    %57 = tpu.matmul %55, %56, %cst_28 {dimension_numbers = #tpu.dot_dimension_numbers<[2], [2], [1], [1], [0, 0, 0, 1, 1, 1], [0], [0]>} : vector<2x24x8xbf16>, vector<2x24x8xbf16>, vector<2x24x24xf32> -> vector<2x24x24xf32>
    "tpu.trace_stop"() : () -> ()
    %cst_29 = arith.constant dense<0xFF800000> : vector<2x24xf32>
    %58 = vector.multi_reduction <maximumf>, %57, %cst_29 [2] : vector<2x24x24xf32> to vector<2x24xf32>
    %59 = vector.shape_cast %58 : vector<2x24xf32> to vector<2x24x1xf32>
    %60 = vector.broadcast %59 : vector<2x24x1xf32> to vector<2x24x24xf32>
    %61 = arith.subf %57, %60 : vector<2x24x24xf32>
    %62 = math.exp %61 : vector<2x24x24xf32>
    %cst_30 = arith.constant dense<0.000000e+00> : vector<2x24xf32>
    %63 = vector.multi_reduction <add>, %62, %cst_30 [2] : vector<2x24x24xf32> to vector<2x24xf32>
    %64 = vector.shape_cast %63 : vector<2x24xf32> to vector<2x24x1xf32>
    %65 = tpu.reciprocal %64 {approx = true} : vector<2x24x1xf32> -> vector<2x24x1xf32>
    %66 = vector.broadcast %65 : vector<2x24x1xf32> to vector<2x24x24xf32>
    %67 = arith.mulf %62, %66 : vector<2x24x24xf32>
    %68 = arith.truncf %67 : vector<2x24x24xf32> to vector<2x24x24xbf16>
    %69 = vector.extract_strided_slice %51 {offsets = [0, 0, 0], sizes = [2, 24, 8], strides = [1, 1, 1]} : vector<2x24x64xbf16> to vector<2x24x8xbf16>
    "tpu.trace_start"() <{level = 10 : i32, message = "bqk,bkd->bqd"}> : () -> ()
    %cst_31 = arith.constant dense<0.000000e+00> : vector<2x24x8xf32>
    %70 = tpu.matmul %68, %69, %cst_31 {dimension_numbers = #tpu.dot_dimension_numbers<[2], [1], [1], [2], [0, 0, 0, 1, 1, 2], [0], [0]>} : vector<2x24x24xbf16>, vector<2x24x8xbf16>, vector<2x24x8xf32> -> vector<2x24x8xf32>
    "tpu.trace_stop"() : () -> ()
    %71 = vector.shape_cast %70 : vector<2x24x8xf32> to vector<48x8xf32>
    %72 = arith.truncf %71 : vector<48x8xf32> to vector<48x8xbf16>
    %73 = vector.extract_strided_slice %53 {offsets = [0, 0], sizes = [8, 64], strides = [1, 1]} : vector<64x64xbf16> to vector<8x64xbf16>
    %cst_32 = arith.constant dense<0.000000e+00> : vector<48x64xf32>
    %74 = tpu.matmul %72, %73, %cst_32 {dimension_numbers = #tpu.dot_dimension_numbers<[1], [0], [0], [1], [0, 0, 1, 1], [], []>} : vector<48x8xbf16>, vector<8x64xbf16>, vector<48x64xf32> -> vector<48x64xf32>
    %75 = arith.addf %54, %74 : vector<48x64xf32>
    %76 = vector.extract_strided_slice %47 {offsets = [0, 0, 8], sizes = [2, 24, 8], strides = [1, 1, 1]} : vector<2x24x64xbf16> to vector<2x24x8xbf16>
    %77 = vector.extract_strided_slice %49 {offsets = [0, 0, 8], sizes = [2, 24, 8], strides = [1, 1, 1]} : vector<2x24x64xbf16> to vector<2x24x8xbf16>
    "tpu.trace_start"() <{level = 10 : i32, message = "bqd,bkd->bqk"}> : () -> ()
    %cst_33 = arith.constant dense<0.000000e+00> : vector<2x24x24xf32>
    %78 = tpu.matmul %76, %77, %cst_33 {dimension_numbers = #tpu.dot_dimension_numbers<[2], [2], [1], [1], [0, 0, 0, 1, 1, 1], [0], [0]>} : vector<2x24x8xbf16>, vector<2x24x8xbf16>, vector<2x24x24xf32> -> vector<2x24x24xf32>
    "tpu.trace_stop"() : () -> ()
    %cst_34 = arith.constant dense<0xFF800000> : vector<2x24xf32>
    %79 = vector.multi_reduction <maximumf>, %78, %cst_34 [2] : vector<2x24x24xf32> to vector<2x24xf32>
    %80 = vector.shape_cast %79 : vector<2x24xf32> to vector<2x24x1xf32>
    %81 = vector.broadcast %80 : vector<2x24x1xf32> to vector<2x24x24xf32>
    %82 = arith.subf %78, %81 : vector<2x24x24xf32>
    %83 = math.exp %82 : vector<2x24x24xf32>
    %cst_35 = arith.constant dense<0.000000e+00> : vector<2x24xf32>
    %84 = vector.multi_reduction <add>, %83, %cst_35 [2] : vector<2x24x24xf32> to vector<2x24xf32>
    %85 = vector.shape_cast %84 : vector<2x24xf32> to vector<2x24x1xf32>
    %86 = tpu.reciprocal %85 {approx = true} : vector<2x24x1xf32> -> vector<2x24x1xf32>
    %87 = vector.broadcast %86 : vector<2x24x1xf32> to vector<2x24x24xf32>
    %88 = arith.mulf %83, %87 : vector<2x24x24xf32>
    %89 = arith.truncf %88 : vector<2x24x24xf32> to vector<2x24x24xbf16>
    %90 = vector.extract_strided_slice %51 {offsets = [0, 0, 8], sizes = [2, 24, 8], strides = [1, 1, 1]} : vector<2x24x64xbf16> to vector<2x24x8xbf16>
    "tpu.trace_start"() <{level = 10 : i32, message = "bqk,bkd->bqd"}> : () -> ()
    %cst_36 = arith.constant dense<0.000000e+00> : vector<2x24x8xf32>
    %91 = tpu.matmul %89, %90, %cst_36 {dimension_numbers = #tpu.dot_dimension_numbers<[2], [1], [1], [2], [0, 0, 0, 1, 1, 2], [0], [0]>} : vector<2x24x24xbf16>, vector<2x24x8xbf16>, vector<2x24x8xf32> -> vector<2x24x8xf32>
    "tpu.trace_stop"() : () -> ()
    %92 = vector.shape_cast %91 : vector<2x24x8xf32> to vector<48x8xf32>
    %93 = arith.truncf %92 : vector<48x8xf32> to vector<48x8xbf16>
    %94 = vector.extract_strided_slice %53 {offsets = [8, 0], sizes = [8, 64], strides = [1, 1]} : vector<64x64xbf16> to vector<8x64xbf16>
    %cst_37 = arith.constant dense<0.000000e+00> : vector<48x64xf32>
    %95 = tpu.matmul %93, %94, %cst_37 {dimension_numbers = #tpu.dot_dimension_numbers<[1], [0], [0], [1], [0, 0, 1, 1], [], []>} : vector<48x8xbf16>, vector<8x64xbf16>, vector<48x64xf32> -> vector<48x64xf32>
    %96 = arith.addf %75, %95 : vector<48x64xf32>
    %97 = vector.extract_strided_slice %47 {offsets = [0, 0, 16], sizes = [2, 24, 8], strides = [1, 1, 1]} : vector<2x24x64xbf16> to vector<2x24x8xbf16>
    %98 = vector.extract_strided_slice %49 {offsets = [0, 0, 16], sizes = [2, 24, 8], strides = [1, 1, 1]} : vector<2x24x64xbf16> to vector<2x24x8xbf16>
    "tpu.trace_start"() <{level = 10 : i32, message = "bqd,bkd->bqk"}> : () -> ()
    %cst_38 = arith.constant dense<0.000000e+00> : vector<2x24x24xf32>
    %99 = tpu.matmul %97, %98, %cst_38 {dimension_numbers = #tpu.dot_dimension_numbers<[2], [2], [1], [1], [0, 0, 0, 1, 1, 1], [0], [0]>} : vector<2x24x8xbf16>, vector<2x24x8xbf16>, vector<2x24x24xf32> -> vector<2x24x24xf32>
    "tpu.trace_stop"() : () -> ()
    %cst_39 = arith.constant dense<0xFF800000> : vector<2x24xf32>
    %100 = vector.multi_reduction <maximumf>, %99, %cst_39 [2] : vector<2x24x24xf32> to vector<2x24xf32>
    %101 = vector.shape_cast %100 : vector<2x24xf32> to vector<2x24x1xf32>
    %102 = vector.broadcast %101 : vector<2x24x1xf32> to vector<2x24x24xf32>
    %103 = arith.subf %99, %102 : vector<2x24x24xf32>
    %104 = math.exp %103 : vector<2x24x24xf32>
    %cst_40 = arith.constant dense<0.000000e+00> : vector<2x24xf32>
    %105 = vector.multi_reduction <add>, %104, %cst_40 [2] : vector<2x24x24xf32> to vector<2x24xf32>
    %106 = vector.shape_cast %105 : vector<2x24xf32> to vector<2x24x1xf32>
    %107 = tpu.reciprocal %106 {approx = true} : vector<2x24x1xf32> -> vector<2x24x1xf32>
    %108 = vector.broadcast %107 : vector<2x24x1xf32> to vector<2x24x24xf32>
    %109 = arith.mulf %104, %108 : vector<2x24x24xf32>
    %110 = arith.truncf %109 : vector<2x24x24xf32> to vector<2x24x24xbf16>
    %111 = vector.extract_strided_slice %51 {offsets = [0, 0, 16], sizes = [2, 24, 8], strides = [1, 1, 1]} : vector<2x24x64xbf16> to vector<2x24x8xbf16>
    "tpu.trace_start"() <{level = 10 : i32, message = "bqk,bkd->bqd"}> : () -> ()
    %cst_41 = arith.constant dense<0.000000e+00> : vector<2x24x8xf32>
    %112 = tpu.matmul %110, %111, %cst_41 {dimension_numbers = #tpu.dot_dimension_numbers<[2], [1], [1], [2], [0, 0, 0, 1, 1, 2], [0], [0]>} : vector<2x24x24xbf16>, vector<2x24x8xbf16>, vector<2x24x8xf32> -> vector<2x24x8xf32>
    "tpu.trace_stop"() : () -> ()
    %113 = vector.shape_cast %112 : vector<2x24x8xf32> to vector<48x8xf32>
    %114 = arith.truncf %113 : vector<48x8xf32> to vector<48x8xbf16>
    %115 = vector.extract_strided_slice %53 {offsets = [16, 0], sizes = [8, 64], strides = [1, 1]} : vector<64x64xbf16> to vector<8x64xbf16>
    %cst_42 = arith.constant dense<0.000000e+00> : vector<48x64xf32>
    %116 = tpu.matmul %114, %115, %cst_42 {dimension_numbers = #tpu.dot_dimension_numbers<[1], [0], [0], [1], [0, 0, 1, 1], [], []>} : vector<48x8xbf16>, vector<8x64xbf16>, vector<48x64xf32> -> vector<48x64xf32>
    %117 = arith.addf %96, %116 : vector<48x64xf32>
    %118 = vector.extract_strided_slice %47 {offsets = [0, 0, 24], sizes = [2, 24, 8], strides = [1, 1, 1]} : vector<2x24x64xbf16> to vector<2x24x8xbf16>
    %119 = vector.extract_strided_slice %49 {offsets = [0, 0, 24], sizes = [2, 24, 8], strides = [1, 1, 1]} : vector<2x24x64xbf16> to vector<2x24x8xbf16>
    "tpu.trace_start"() <{level = 10 : i32, message = "bqd,bkd->bqk"}> : () -> ()
    %cst_43 = arith.constant dense<0.000000e+00> : vector<2x24x24xf32>
    %120 = tpu.matmul %118, %119, %cst_43 {dimension_numbers = #tpu.dot_dimension_numbers<[2], [2], [1], [1], [0, 0, 0, 1, 1, 1], [0], [0]>} : vector<2x24x8xbf16>, vector<2x24x8xbf16>, vector<2x24x24xf32> -> vector<2x24x24xf32>
    "tpu.trace_stop"() : () -> ()
    %cst_44 = arith.constant dense<0xFF800000> : vector<2x24xf32>
    %121 = vector.multi_reduction <maximumf>, %120, %cst_44 [2] : vector<2x24x24xf32> to vector<2x24xf32>
    %122 = vector.shape_cast %121 : vector<2x24xf32> to vector<2x24x1xf32>
    %123 = vector.broadcast %122 : vector<2x24x1xf32> to vector<2x24x24xf32>
    %124 = arith.subf %120, %123 : vector<2x24x24xf32>
    %125 = math.exp %124 : vector<2x24x24xf32>
    %cst_45 = arith.constant dense<0.000000e+00> : vector<2x24xf32>
    %126 = vector.multi_reduction <add>, %125, %cst_45 [2] : vector<2x24x24xf32> to vector<2x24xf32>
    %127 = vector.shape_cast %126 : vector<2x24xf32> to vector<2x24x1xf32>
    %128 = tpu.reciprocal %127 {approx = true} : vector<2x24x1xf32> -> vector<2x24x1xf32>
    %129 = vector.broadcast %128 : vector<2x24x1xf32> to vector<2x24x24xf32>
    %130 = arith.mulf %125, %129 : vector<2x24x24xf32>
    %131 = arith.truncf %130 : vector<2x24x24xf32> to vector<2x24x24xbf16>
    %132 = vector.extract_strided_slice %51 {offsets = [0, 0, 24], sizes = [2, 24, 8], strides = [1, 1, 1]} : vector<2x24x64xbf16> to vector<2x24x8xbf16>
    "tpu.trace_start"() <{level = 10 : i32, message = "bqk,bkd->bqd"}> : () -> ()
    %cst_46 = arith.constant dense<0.000000e+00> : vector<2x24x8xf32>
    %133 = tpu.matmul %131, %132, %cst_46 {dimension_numbers = #tpu.dot_dimension_numbers<[2], [1], [1], [2], [0, 0, 0, 1, 1, 2], [0], [0]>} : vector<2x24x24xbf16>, vector<2x24x8xbf16>, vector<2x24x8xf32> -> vector<2x24x8xf32>
    "tpu.trace_stop"() : () -> ()
    %134 = vector.shape_cast %133 : vector<2x24x8xf32> to vector<48x8xf32>
    %135 = arith.truncf %134 : vector<48x8xf32> to vector<48x8xbf16>
    %136 = vector.extract_strided_slice %53 {offsets = [24, 0], sizes = [8, 64], strides = [1, 1]} : vector<64x64xbf16> to vector<8x64xbf16>
    %cst_47 = arith.constant dense<0.000000e+00> : vector<48x64xf32>
    %137 = tpu.matmul %135, %136, %cst_47 {dimension_numbers = #tpu.dot_dimension_numbers<[1], [0], [0], [1], [0, 0, 1, 1], [], []>} : vector<48x8xbf16>, vector<8x64xbf16>, vector<48x64xf32> -> vector<48x64xf32>
    %138 = arith.addf %117, %137 : vector<48x64xf32>
    %139 = vector.extract_strided_slice %47 {offsets = [0, 0, 32], sizes = [2, 24, 8], strides = [1, 1, 1]} : vector<2x24x64xbf16> to vector<2x24x8xbf16>
    %140 = vector.extract_strided_slice %49 {offsets = [0, 0, 32], sizes = [2, 24, 8], strides = [1, 1, 1]} : vector<2x24x64xbf16> to vector<2x24x8xbf16>
    "tpu.trace_start"() <{level = 10 : i32, message = "bqd,bkd->bqk"}> : () -> ()
    %cst_48 = arith.constant dense<0.000000e+00> : vector<2x24x24xf32>
    %141 = tpu.matmul %139, %140, %cst_48 {dimension_numbers = #tpu.dot_dimension_numbers<[2], [2], [1], [1], [0, 0, 0, 1, 1, 1], [0], [0]>} : vector<2x24x8xbf16>, vector<2x24x8xbf16>, vector<2x24x24xf32> -> vector<2x24x24xf32>
    "tpu.trace_stop"() : () -> ()
    %cst_49 = arith.constant dense<0xFF800000> : vector<2x24xf32>
    %142 = vector.multi_reduction <maximumf>, %141, %cst_49 [2] : vector<2x24x24xf32> to vector<2x24xf32>
    %143 = vector.shape_cast %142 : vector<2x24xf32> to vector<2x24x1xf32>
    %144 = vector.broadcast %143 : vector<2x24x1xf32> to vector<2x24x24xf32>
    %145 = arith.subf %141, %144 : vector<2x24x24xf32>
    %146 = math.exp %145 : vector<2x24x24xf32>
    %cst_50 = arith.constant dense<0.000000e+00> : vector<2x24xf32>
    %147 = vector.multi_reduction <add>, %146, %cst_50 [2] : vector<2x24x24xf32> to vector<2x24xf32>
    %148 = vector.shape_cast %147 : vector<2x24xf32> to vector<2x24x1xf32>
    %149 = tpu.reciprocal %148 {approx = true} : vector<2x24x1xf32> -> vector<2x24x1xf32>
    %150 = vector.broadcast %149 : vector<2x24x1xf32> to vector<2x24x24xf32>
    %151 = arith.mulf %146, %150 : vector<2x24x24xf32>
    %152 = arith.truncf %151 : vector<2x24x24xf32> to vector<2x24x24xbf16>
    %153 = vector.extract_strided_slice %51 {offsets = [0, 0, 32], sizes = [2, 24, 8], strides = [1, 1, 1]} : vector<2x24x64xbf16> to vector<2x24x8xbf16>
    "tpu.trace_start"() <{level = 10 : i32, message = "bqk,bkd->bqd"}> : () -> ()
    %cst_51 = arith.constant dense<0.000000e+00> : vector<2x24x8xf32>
    %154 = tpu.matmul %152, %153, %cst_51 {dimension_numbers = #tpu.dot_dimension_numbers<[2], [1], [1], [2], [0, 0, 0, 1, 1, 2], [0], [0]>} : vector<2x24x24xbf16>, vector<2x24x8xbf16>, vector<2x24x8xf32> -> vector<2x24x8xf32>
    "tpu.trace_stop"() : () -> ()
    %155 = vector.shape_cast %154 : vector<2x24x8xf32> to vector<48x8xf32>
    %156 = arith.truncf %155 : vector<48x8xf32> to vector<48x8xbf16>
    %157 = vector.extract_strided_slice %53 {offsets = [32, 0], sizes = [8, 64], strides = [1, 1]} : vector<64x64xbf16> to vector<8x64xbf16>
    %cst_52 = arith.constant dense<0.000000e+00> : vector<48x64xf32>
    %158 = tpu.matmul %156, %157, %cst_52 {dimension_numbers = #tpu.dot_dimension_numbers<[1], [0], [0], [1], [0, 0, 1, 1], [], []>} : vector<48x8xbf16>, vector<8x64xbf16>, vector<48x64xf32> -> vector<48x64xf32>
    %159 = arith.addf %138, %158 : vector<48x64xf32>
    %160 = vector.extract_strided_slice %47 {offsets = [0, 0, 40], sizes = [2, 24, 8], strides = [1, 1, 1]} : vector<2x24x64xbf16> to vector<2x24x8xbf16>
    %161 = vector.extract_strided_slice %49 {offsets = [0, 0, 40], sizes = [2, 24, 8], strides = [1, 1, 1]} : vector<2x24x64xbf16> to vector<2x24x8xbf16>
    "tpu.trace_start"() <{level = 10 : i32, message = "bqd,bkd->bqk"}> : () -> ()
    %cst_53 = arith.constant dense<0.000000e+00> : vector<2x24x24xf32>
    %162 = tpu.matmul %160, %161, %cst_53 {dimension_numbers = #tpu.dot_dimension_numbers<[2], [2], [1], [1], [0, 0, 0, 1, 1, 1], [0], [0]>} : vector<2x24x8xbf16>, vector<2x24x8xbf16>, vector<2x24x24xf32> -> vector<2x24x24xf32>
    "tpu.trace_stop"() : () -> ()
    %cst_54 = arith.constant dense<0xFF800000> : vector<2x24xf32>
    %163 = vector.multi_reduction <maximumf>, %162, %cst_54 [2] : vector<2x24x24xf32> to vector<2x24xf32>
    %164 = vector.shape_cast %163 : vector<2x24xf32> to vector<2x24x1xf32>
    %165 = vector.broadcast %164 : vector<2x24x1xf32> to vector<2x24x24xf32>
    %166 = arith.subf %162, %165 : vector<2x24x24xf32>
    %167 = math.exp %166 : vector<2x24x24xf32>
    %cst_55 = arith.constant dense<0.000000e+00> : vector<2x24xf32>
    %168 = vector.multi_reduction <add>, %167, %cst_55 [2] : vector<2x24x24xf32> to vector<2x24xf32>
    %169 = vector.shape_cast %168 : vector<2x24xf32> to vector<2x24x1xf32>
    %170 = tpu.reciprocal %169 {approx = true} : vector<2x24x1xf32> -> vector<2x24x1xf32>
    %171 = vector.broadcast %170 : vector<2x24x1xf32> to vector<2x24x24xf32>
    %172 = arith.mulf %167, %171 : vector<2x24x24xf32>
    %173 = arith.truncf %172 : vector<2x24x24xf32> to vector<2x24x24xbf16>
    %174 = vector.extract_strided_slice %51 {offsets = [0, 0, 40], sizes = [2, 24, 8], strides = [1, 1, 1]} : vector<2x24x64xbf16> to vector<2x24x8xbf16>
    "tpu.trace_start"() <{level = 10 : i32, message = "bqk,bkd->bqd"}> : () -> ()
    %cst_56 = arith.constant dense<0.000000e+00> : vector<2x24x8xf32>
    %175 = tpu.matmul %173, %174, %cst_56 {dimension_numbers = #tpu.dot_dimension_numbers<[2], [1], [1], [2], [0, 0, 0, 1, 1, 2], [0], [0]>} : vector<2x24x24xbf16>, vector<2x24x8xbf16>, vector<2x24x8xf32> -> vector<2x24x8xf32>
    "tpu.trace_stop"() : () -> ()
    %176 = vector.shape_cast %175 : vector<2x24x8xf32> to vector<48x8xf32>
    %177 = arith.truncf %176 : vector<48x8xf32> to vector<48x8xbf16>
    %178 = vector.extract_strided_slice %53 {offsets = [40, 0], sizes = [8, 64], strides = [1, 1]} : vector<64x64xbf16> to vector<8x64xbf16>
    %cst_57 = arith.constant dense<0.000000e+00> : vector<48x64xf32>
    %179 = tpu.matmul %177, %178, %cst_57 {dimension_numbers = #tpu.dot_dimension_numbers<[1], [0], [0], [1], [0, 0, 1, 1], [], []>} : vector<48x8xbf16>, vector<8x64xbf16>, vector<48x64xf32> -> vector<48x64xf32>
    %180 = arith.addf %159, %179 : vector<48x64xf32>
    %181 = vector.extract_strided_slice %47 {offsets = [0, 0, 48], sizes = [2, 24, 8], strides = [1, 1, 1]} : vector<2x24x64xbf16> to vector<2x24x8xbf16>
    %182 = vector.extract_strided_slice %49 {offsets = [0, 0, 48], sizes = [2, 24, 8], strides = [1, 1, 1]} : vector<2x24x64xbf16> to vector<2x24x8xbf16>
    "tpu.trace_start"() <{level = 10 : i32, message = "bqd,bkd->bqk"}> : () -> ()
    %cst_58 = arith.constant dense<0.000000e+00> : vector<2x24x24xf32>
    %183 = tpu.matmul %181, %182, %cst_58 {dimension_numbers = #tpu.dot_dimension_numbers<[2], [2], [1], [1], [0, 0, 0, 1, 1, 1], [0], [0]>} : vector<2x24x8xbf16>, vector<2x24x8xbf16>, vector<2x24x24xf32> -> vector<2x24x24xf32>
    "tpu.trace_stop"() : () -> ()
    %cst_59 = arith.constant dense<0xFF800000> : vector<2x24xf32>
    %184 = vector.multi_reduction <maximumf>, %183, %cst_59 [2] : vector<2x24x24xf32> to vector<2x24xf32>
    %185 = vector.shape_cast %184 : vector<2x24xf32> to vector<2x24x1xf32>
    %186 = vector.broadcast %185 : vector<2x24x1xf32> to vector<2x24x24xf32>
    %187 = arith.subf %183, %186 : vector<2x24x24xf32>
    %188 = math.exp %187 : vector<2x24x24xf32>
    %cst_60 = arith.constant dense<0.000000e+00> : vector<2x24xf32>
    %189 = vector.multi_reduction <add>, %188, %cst_60 [2] : vector<2x24x24xf32> to vector<2x24xf32>
    %190 = vector.shape_cast %189 : vector<2x24xf32> to vector<2x24x1xf32>
    %191 = tpu.reciprocal %190 {approx = true} : vector<2x24x1xf32> -> vector<2x24x1xf32>
    %192 = vector.broadcast %191 : vector<2x24x1xf32> to vector<2x24x24xf32>
    %193 = arith.mulf %188, %192 : vector<2x24x24xf32>
    %194 = arith.truncf %193 : vector<2x24x24xf32> to vector<2x24x24xbf16>
    %195 = vector.extract_strided_slice %51 {offsets = [0, 0, 48], sizes = [2, 24, 8], strides = [1, 1, 1]} : vector<2x24x64xbf16> to vector<2x24x8xbf16>
    "tpu.trace_start"() <{level = 10 : i32, message = "bqk,bkd->bqd"}> : () -> ()
    %cst_61 = arith.constant dense<0.000000e+00> : vector<2x24x8xf32>
    %196 = tpu.matmul %194, %195, %cst_61 {dimension_numbers = #tpu.dot_dimension_numbers<[2], [1], [1], [2], [0, 0, 0, 1, 1, 2], [0], [0]>} : vector<2x24x24xbf16>, vector<2x24x8xbf16>, vector<2x24x8xf32> -> vector<2x24x8xf32>
    "tpu.trace_stop"() : () -> ()
    %197 = vector.shape_cast %196 : vector<2x24x8xf32> to vector<48x8xf32>
    %198 = arith.truncf %197 : vector<48x8xf32> to vector<48x8xbf16>
    %199 = vector.extract_strided_slice %53 {offsets = [48, 0], sizes = [8, 64], strides = [1, 1]} : vector<64x64xbf16> to vector<8x64xbf16>
    %cst_62 = arith.constant dense<0.000000e+00> : vector<48x64xf32>
    %200 = tpu.matmul %198, %199, %cst_62 {dimension_numbers = #tpu.dot_dimension_numbers<[1], [0], [0], [1], [0, 0, 1, 1], [], []>} : vector<48x8xbf16>, vector<8x64xbf16>, vector<48x64xf32> -> vector<48x64xf32>
    %201 = arith.addf %180, %200 : vector<48x64xf32>
    %202 = vector.extract_strided_slice %47 {offsets = [0, 0, 56], sizes = [2, 24, 8], strides = [1, 1, 1]} : vector<2x24x64xbf16> to vector<2x24x8xbf16>
    %203 = vector.extract_strided_slice %49 {offsets = [0, 0, 56], sizes = [2, 24, 8], strides = [1, 1, 1]} : vector<2x24x64xbf16> to vector<2x24x8xbf16>
    "tpu.trace_start"() <{level = 10 : i32, message = "bqd,bkd->bqk"}> : () -> ()
    %cst_63 = arith.constant dense<0.000000e+00> : vector<2x24x24xf32>
    %204 = tpu.matmul %202, %203, %cst_63 {dimension_numbers = #tpu.dot_dimension_numbers<[2], [2], [1], [1], [0, 0, 0, 1, 1, 1], [0], [0]>} : vector<2x24x8xbf16>, vector<2x24x8xbf16>, vector<2x24x24xf32> -> vector<2x24x24xf32>
    "tpu.trace_stop"() : () -> ()
    %cst_64 = arith.constant dense<0xFF800000> : vector<2x24xf32>
    %205 = vector.multi_reduction <maximumf>, %204, %cst_64 [2] : vector<2x24x24xf32> to vector<2x24xf32>
    %206 = vector.shape_cast %205 : vector<2x24xf32> to vector<2x24x1xf32>
    %207 = vector.broadcast %206 : vector<2x24x1xf32> to vector<2x24x24xf32>
    %208 = arith.subf %204, %207 : vector<2x24x24xf32>
    %209 = math.exp %208 : vector<2x24x24xf32>
    %cst_65 = arith.constant dense<0.000000e+00> : vector<2x24xf32>
    %210 = vector.multi_reduction <add>, %209, %cst_65 [2] : vector<2x24x24xf32> to vector<2x24xf32>
    %211 = vector.shape_cast %210 : vector<2x24xf32> to vector<2x24x1xf32>
    %212 = tpu.reciprocal %211 {approx = true} : vector<2x24x1xf32> -> vector<2x24x1xf32>
    %213 = vector.broadcast %212 : vector<2x24x1xf32> to vector<2x24x24xf32>
    %214 = arith.mulf %209, %213 : vector<2x24x24xf32>
    %215 = arith.truncf %214 : vector<2x24x24xf32> to vector<2x24x24xbf16>
    %216 = vector.extract_strided_slice %51 {offsets = [0, 0, 56], sizes = [2, 24, 8], strides = [1, 1, 1]} : vector<2x24x64xbf16> to vector<2x24x8xbf16>
    "tpu.trace_start"() <{level = 10 : i32, message = "bqk,bkd->bqd"}> : () -> ()
    %cst_66 = arith.constant dense<0.000000e+00> : vector<2x24x8xf32>
    %217 = tpu.matmul %215, %216, %cst_66 {dimension_numbers = #tpu.dot_dimension_numbers<[2], [1], [1], [2], [0, 0, 0, 1, 1, 2], [0], [0]>} : vector<2x24x24xbf16>, vector<2x24x8xbf16>, vector<2x24x8xf32> -> vector<2x24x8xf32>
    "tpu.trace_stop"() : () -> ()
    %218 = vector.shape_cast %217 : vector<2x24x8xf32> to vector<48x8xf32>
    %219 = arith.truncf %218 : vector<48x8xf32> to vector<48x8xbf16>
    %220 = vector.extract_strided_slice %53 {offsets = [56, 0], sizes = [8, 64], strides = [1, 1]} : vector<64x64xbf16> to vector<8x64xbf16>
    %cst_67 = arith.constant dense<0.000000e+00> : vector<48x64xf32>
    %221 = tpu.matmul %219, %220, %cst_67 {dimension_numbers = #tpu.dot_dimension_numbers<[1], [0], [0], [1], [0, 0, 1, 1], [], []>} : vector<48x8xbf16>, vector<8x64xbf16>, vector<48x64xf32> -> vector<48x64xf32>
    %222 = arith.addf %201, %221 : vector<48x64xf32>
    %223 = arith.addf %10, %222 : vector<48x64xf32>
    %c0_68 = arith.constant 0 : index
    %c0_69 = arith.constant 0 : index
    %c0_70 = arith.constant 0 : index
    %224 = vector.load %arg9[%c0_68, %c0_69, %c0_70] : memref<2x1x64xf32, #tpu.memory_space<vmem>>, vector<1x1x64xf32>
    %225 = vector.shape_cast %224 : vector<1x1x64xf32> to vector<1x64xf32>
    %226 = vector.broadcast %225 : vector<1x64xf32> to vector<48x64xf32>
    %227 = arith.addf %223, %226 : vector<48x64xf32>
    %c0_71 = arith.constant 0 : index
    %c0_72 = arith.constant 0 : index
    %c0_73 = arith.constant 0 : index
    %228 = vector.load %arg10[%c0_71, %c0_72, %c0_73] : memref<2x1x64xf32, #tpu.memory_space<vmem>>, vector<1x1x64xf32>
    %229 = vector.shape_cast %228 : vector<1x1x64xf32> to vector<1x64xf32>
    %c0_74 = arith.constant 0 : index
    %c0_75 = arith.constant 0 : index
    %c0_76 = arith.constant 0 : index
    %230 = vector.load %arg11[%c0_74, %c0_75, %c0_76] : memref<2x1x64xf32, #tpu.memory_space<vmem>>, vector<1x1x64xf32>
    %231 = vector.shape_cast %230 : vector<1x1x64xf32> to vector<1x64xf32>
    %cst_77 = arith.constant dense<0.000000e+00> : vector<48xf32>
    %232 = vector.multi_reduction <add>, %227, %cst_77 [1] : vector<48x64xf32> to vector<48xf32>
    %233 = vector.shape_cast %232 : vector<48xf32> to vector<48x1xf32>
    %cst_78 = arith.constant 6.400000e+01 : f32
    %234 = vector.broadcast %cst_78 : f32 to vector<48x1xf32>
    %235 = arith.divf %233, %234 : vector<48x1xf32>
    %236 = vector.broadcast %235 : vector<48x1xf32> to vector<48x64xf32>
    %237 = arith.subf %227, %236 : vector<48x64xf32>
    %238 = arith.mulf %237, %237 : vector<48x64xf32>
    %cst_79 = arith.constant dense<0.000000e+00> : vector<48xf32>
    %239 = vector.multi_reduction <add>, %238, %cst_79 [1] : vector<48x64xf32> to vector<48xf32>
    %240 = vector.shape_cast %239 : vector<48xf32> to vector<48x1xf32>
    %cst_80 = arith.constant 6.400000e+01 : f32
    %241 = vector.broadcast %cst_80 : f32 to vector<48x1xf32>
    %242 = arith.divf %240, %241 : vector<48x1xf32>
    %243 = vector.broadcast %235 : vector<48x1xf32> to vector<48x64xf32>
    %244 = arith.subf %227, %243 : vector<48x64xf32>
    %cst_81 = arith.constant 9.99999974E-6 : f32
    %245 = vector.broadcast %cst_81 : f32 to vector<48x1xf32>
    %246 = arith.addf %242, %245 : vector<48x1xf32>
    %247 = math.rsqrt %246 : vector<48x1xf32>
    %248 = vector.broadcast %247 : vector<48x1xf32> to vector<48x64xf32>
    %249 = arith.mulf %244, %248 : vector<48x64xf32>
    %250 = vector.broadcast %229 : vector<1x64xf32> to vector<48x64xf32>
    %251 = arith.mulf %249, %250 : vector<48x64xf32>
    %252 = vector.broadcast %231 : vector<1x64xf32> to vector<48x64xf32>
    %253 = arith.addf %251, %252 : vector<48x64xf32>
    %254 = arith.truncf %253 : vector<48x64xf32> to vector<48x64xbf16>
    %c0_82 = arith.constant 0 : index
    %c0_83 = arith.constant 0 : index
    %c0_84 = arith.constant 0 : index
    %255 = vector.load %arg12[%c0_82, %c0_83, %c0_84] : memref<2x64x128xbf16, #tpu.memory_space<vmem>>, vector<1x64x128xbf16>
    %256 = vector.shape_cast %255 : vector<1x64x128xbf16> to vector<64x128xbf16>
    %cst_85 = arith.constant dense<0.000000e+00> : vector<48x128xf32>
    %257 = tpu.matmul %254, %256, %cst_85 {dimension_numbers = #tpu.dot_dimension_numbers<[1], [0], [0], [1], [0, 0, 1, 1], [], []>} : vector<48x64xbf16>, vector<64x128xbf16>, vector<48x128xf32> -> vector<48x128xf32>
    %c0_86 = arith.constant 0 : index
    %c0_87 = arith.constant 0 : index
    %c0_88 = arith.constant 0 : index
    %258 = vector.load %arg13[%c0_86, %c0_87, %c0_88] : memref<2x1x128xf32, #tpu.memory_space<vmem>>, vector<1x1x128xf32>
    %259 = vector.shape_cast %258 : vector<1x1x128xf32> to vector<1x128xf32>
    %260 = vector.broadcast %259 : vector<1x128xf32> to vector<48x128xf32>
    %261 = arith.addf %257, %260 : vector<48x128xf32>
    %262 = arith.mulf %261, %261 : vector<48x128xf32>
    %263 = arith.mulf %261, %262 : vector<48x128xf32>
    %cst_89 = arith.constant 4.471500e-02 : f32
    %264 = vector.broadcast %cst_89 : f32 to vector<48x128xf32>
    %265 = arith.mulf %264, %263 : vector<48x128xf32>
    %266 = arith.addf %261, %265 : vector<48x128xf32>
    %cst_90 = arith.constant 0.797884583 : f32
    %267 = vector.broadcast %cst_90 : f32 to vector<48x128xf32>
    %268 = arith.mulf %267, %266 : vector<48x128xf32>
    %269 = math.tanh %268 : vector<48x128xf32>
    %cst_91 = arith.constant 1.000000e+00 : f32
    %270 = vector.broadcast %cst_91 : f32 to vector<48x128xf32>
    %271 = arith.addf %270, %269 : vector<48x128xf32>
    %cst_92 = arith.constant 5.000000e-01 : f32
    %272 = vector.broadcast %cst_92 : f32 to vector<48x128xf32>
    %273 = arith.mulf %272, %271 : vector<48x128xf32>
    %274 = arith.mulf %261, %273 : vector<48x128xf32>
    %275 = arith.truncf %274 : vector<48x128xf32> to vector<48x128xbf16>
    %c0_93 = arith.constant 0 : index
    %c0_94 = arith.constant 0 : index
    %c0_95 = arith.constant 0 : index
    %276 = vector.load %arg14[%c0_93, %c0_94, %c0_95] : memref<2x128x64xbf16, #tpu.memory_space<vmem>>, vector<1x128x64xbf16>
    %277 = vector.shape_cast %276 : vector<1x128x64xbf16> to vector<128x64xbf16>
    %cst_96 = arith.constant dense<0.000000e+00> : vector<48x64xf32>
    %278 = tpu.matmul %275, %277, %cst_96 {dimension_numbers = #tpu.dot_dimension_numbers<[1], [0], [0], [1], [0, 0, 1, 1], [], []>} : vector<48x128xbf16>, vector<128x64xbf16>, vector<48x64xf32> -> vector<48x64xf32>
    %279 = arith.addf %227, %278 : vector<48x64xf32>
    %c0_97 = arith.constant 0 : index
    %c0_98 = arith.constant 0 : index
    %c0_99 = arith.constant 0 : index
    %280 = vector.load %arg15[%c0_97, %c0_98, %c0_99] : memref<2x1x64xf32, #tpu.memory_space<vmem>>, vector<1x1x64xf32>
    %281 = vector.shape_cast %280 : vector<1x1x64xf32> to vector<1x64xf32>
    %282 = vector.broadcast %281 : vector<1x64xf32> to vector<48x64xf32>
    %283 = arith.addf %279, %282 : vector<48x64xf32>
    %c1 = arith.constant 1 : index
    %c0_100 = arith.constant 0 : index
    %c0_101 = arith.constant 0 : index
    %284 = vector.load %arg4[%c1, %c0_100, %c0_101] : memref<2x1x64xf32, #tpu.memory_space<vmem>>, vector<1x1x64xf32>
    %285 = vector.shape_cast %284 : vector<1x1x64xf32> to vector<1x64xf32>
    %c1_102 = arith.constant 1 : index
    %c0_103 = arith.constant 0 : index
    %c0_104 = arith.constant 0 : index
    %286 = vector.load %arg5[%c1_102, %c0_103, %c0_104] : memref<2x1x64xf32, #tpu.memory_space<vmem>>, vector<1x1x64xf32>
    %287 = vector.shape_cast %286 : vector<1x1x64xf32> to vector<1x64xf32>
    %cst_105 = arith.constant dense<0.000000e+00> : vector<48xf32>
    %288 = vector.multi_reduction <add>, %283, %cst_105 [1] : vector<48x64xf32> to vector<48xf32>
    %289 = vector.shape_cast %288 : vector<48xf32> to vector<48x1xf32>
    %cst_106 = arith.constant 6.400000e+01 : f32
    %290 = vector.broadcast %cst_106 : f32 to vector<48x1xf32>
    %291 = arith.divf %289, %290 : vector<48x1xf32>
    %292 = vector.broadcast %291 : vector<48x1xf32> to vector<48x64xf32>
    %293 = arith.subf %283, %292 : vector<48x64xf32>
    %294 = arith.mulf %293, %293 : vector<48x64xf32>
    %cst_107 = arith.constant dense<0.000000e+00> : vector<48xf32>
    %295 = vector.multi_reduction <add>, %294, %cst_107 [1] : vector<48x64xf32> to vector<48xf32>
    %296 = vector.shape_cast %295 : vector<48xf32> to vector<48x1xf32>
    %cst_108 = arith.constant 6.400000e+01 : f32
    %297 = vector.broadcast %cst_108 : f32 to vector<48x1xf32>
    %298 = arith.divf %296, %297 : vector<48x1xf32>
    %299 = vector.broadcast %291 : vector<48x1xf32> to vector<48x64xf32>
    %300 = arith.subf %283, %299 : vector<48x64xf32>
    %cst_109 = arith.constant 9.99999974E-6 : f32
    %301 = vector.broadcast %cst_109 : f32 to vector<48x1xf32>
    %302 = arith.addf %298, %301 : vector<48x1xf32>
    %303 = math.rsqrt %302 : vector<48x1xf32>
    %304 = vector.broadcast %303 : vector<48x1xf32> to vector<48x64xf32>
    %305 = arith.mulf %300, %304 : vector<48x64xf32>
    %306 = vector.broadcast %285 : vector<1x64xf32> to vector<48x64xf32>
    %307 = arith.mulf %305, %306 : vector<48x64xf32>
    %308 = vector.broadcast %287 : vector<1x64xf32> to vector<48x64xf32>
    %309 = arith.addf %307, %308 : vector<48x64xf32>
    %310 = arith.truncf %309 : vector<48x64xf32> to vector<48x64xbf16>
    %c1_110 = arith.constant 1 : index
    %c0_111 = arith.constant 0 : index
    %c0_112 = arith.constant 0 : index
    %311 = vector.load %arg6[%c1_110, %c0_111, %c0_112] : memref<2x64x192xbf16, #tpu.memory_space<vmem>>, vector<1x64x192xbf16>
    %312 = vector.shape_cast %311 : vector<1x64x192xbf16> to vector<64x192xbf16>
    %cst_113 = arith.constant dense<0.000000e+00> : vector<48x192xf32>
    %313 = tpu.matmul %310, %312, %cst_113 {dimension_numbers = #tpu.dot_dimension_numbers<[1], [0], [0], [1], [0, 0, 1, 1], [], []>} : vector<48x64xbf16>, vector<64x192xbf16>, vector<48x192xf32> -> vector<48x192xf32>
    %c1_114 = arith.constant 1 : index
    %c0_115 = arith.constant 0 : index
    %c0_116 = arith.constant 0 : index
    %314 = vector.load %arg7[%c1_114, %c0_115, %c0_116] : memref<2x1x192xf32, #tpu.memory_space<vmem>>, vector<1x1x192xf32>
    %315 = vector.shape_cast %314 : vector<1x1x192xf32> to vector<1x192xf32>
    %316 = vector.broadcast %315 : vector<1x192xf32> to vector<48x192xf32>
    %317 = arith.addf %313, %316 : vector<48x192xf32>
    %318 = arith.truncf %317 : vector<48x192xf32> to vector<48x192xbf16>
    %319 = vector.extract_strided_slice %318 {offsets = [0, 0], sizes = [48, 64], strides = [1, 1]} : vector<48x192xbf16> to vector<48x64xbf16>
    %320 = vector.shape_cast %319 : vector<48x64xbf16> to vector<2x24x64xbf16>
    %321 = vector.extract_strided_slice %318 {offsets = [0, 64], sizes = [48, 64], strides = [1, 1]} : vector<48x192xbf16> to vector<48x64xbf16>
    %322 = vector.shape_cast %321 : vector<48x64xbf16> to vector<2x24x64xbf16>
    %323 = vector.extract_strided_slice %318 {offsets = [0, 128], sizes = [48, 64], strides = [1, 1]} : vector<48x192xbf16> to vector<48x64xbf16>
    %324 = vector.shape_cast %323 : vector<48x64xbf16> to vector<2x24x64xbf16>
    %c1_117 = arith.constant 1 : index
    %c0_118 = arith.constant 0 : index
    %c0_119 = arith.constant 0 : index
    %325 = vector.load %arg8[%c1_117, %c0_118, %c0_119] : memref<2x64x64xbf16, #tpu.memory_space<vmem>>, vector<1x64x64xbf16>
    %326 = vector.shape_cast %325 : vector<1x64x64xbf16> to vector<64x64xbf16>
    %cst_120 = arith.constant 0.000000e+00 : f32
    %327 = vector.broadcast %cst_120 : f32 to vector<48x64xf32>
    %328 = vector.extract_strided_slice %320 {offsets = [0, 0, 0], sizes = [2, 24, 8], strides = [1, 1, 1]} : vector<2x24x64xbf16> to vector<2x24x8xbf16>
    %329 = vector.extract_strided_slice %322 {offsets = [0, 0, 0], sizes = [2, 24, 8], strides = [1, 1, 1]} : vector<2x24x64xbf16> to vector<2x24x8xbf16>
    "tpu.trace_start"() <{level = 10 : i32, message = "bqd,bkd->bqk"}> : () -> ()
    %cst_121 = arith.constant dense<0.000000e+00> : vector<2x24x24xf32>
    %330 = tpu.matmul %328, %329, %cst_121 {dimension_numbers = #tpu.dot_dimension_numbers<[2], [2], [1], [1], [0, 0, 0, 1, 1, 1], [0], [0]>} : vector<2x24x8xbf16>, vector<2x24x8xbf16>, vector<2x24x24xf32> -> vector<2x24x24xf32>
    "tpu.trace_stop"() : () -> ()
    %cst_122 = arith.constant dense<0xFF800000> : vector<2x24xf32>
    %331 = vector.multi_reduction <maximumf>, %330, %cst_122 [2] : vector<2x24x24xf32> to vector<2x24xf32>
    %332 = vector.shape_cast %331 : vector<2x24xf32> to vector<2x24x1xf32>
    %333 = vector.broadcast %332 : vector<2x24x1xf32> to vector<2x24x24xf32>
    %334 = arith.subf %330, %333 : vector<2x24x24xf32>
    %335 = math.exp %334 : vector<2x24x24xf32>
    %cst_123 = arith.constant dense<0.000000e+00> : vector<2x24xf32>
    %336 = vector.multi_reduction <add>, %335, %cst_123 [2] : vector<2x24x24xf32> to vector<2x24xf32>
    %337 = vector.shape_cast %336 : vector<2x24xf32> to vector<2x24x1xf32>
    %338 = tpu.reciprocal %337 {approx = true} : vector<2x24x1xf32> -> vector<2x24x1xf32>
    %339 = vector.broadcast %338 : vector<2x24x1xf32> to vector<2x24x24xf32>
    %340 = arith.mulf %335, %339 : vector<2x24x24xf32>
    %341 = arith.truncf %340 : vector<2x24x24xf32> to vector<2x24x24xbf16>
    %342 = vector.extract_strided_slice %324 {offsets = [0, 0, 0], sizes = [2, 24, 8], strides = [1, 1, 1]} : vector<2x24x64xbf16> to vector<2x24x8xbf16>
    "tpu.trace_start"() <{level = 10 : i32, message = "bqk,bkd->bqd"}> : () -> ()
    %cst_124 = arith.constant dense<0.000000e+00> : vector<2x24x8xf32>
    %343 = tpu.matmul %341, %342, %cst_124 {dimension_numbers = #tpu.dot_dimension_numbers<[2], [1], [1], [2], [0, 0, 0, 1, 1, 2], [0], [0]>} : vector<2x24x24xbf16>, vector<2x24x8xbf16>, vector<2x24x8xf32> -> vector<2x24x8xf32>
    "tpu.trace_stop"() : () -> ()
    %344 = vector.shape_cast %343 : vector<2x24x8xf32> to vector<48x8xf32>
    %345 = arith.truncf %344 : vector<48x8xf32> to vector<48x8xbf16>
    %346 = vector.extract_strided_slice %326 {offsets = [0, 0], sizes = [8, 64], strides = [1, 1]} : vector<64x64xbf16> to vector<8x64xbf16>
    %cst_125 = arith.constant dense<0.000000e+00> : vector<48x64xf32>
    %347 = tpu.matmul %345, %346, %cst_125 {dimension_numbers = #tpu.dot_dimension_numbers<[1], [0], [0], [1], [0, 0, 1, 1], [], []>} : vector<48x8xbf16>, vector<8x64xbf16>, vector<48x64xf32> -> vector<48x64xf32>
    %348 = arith.addf %327, %347 : vector<48x64xf32>
    %349 = vector.extract_strided_slice %320 {offsets = [0, 0, 8], sizes = [2, 24, 8], strides = [1, 1, 1]} : vector<2x24x64xbf16> to vector<2x24x8xbf16>
    %350 = vector.extract_strided_slice %322 {offsets = [0, 0, 8], sizes = [2, 24, 8], strides = [1, 1, 1]} : vector<2x24x64xbf16> to vector<2x24x8xbf16>
    "tpu.trace_start"() <{level = 10 : i32, message = "bqd,bkd->bqk"}> : () -> ()
    %cst_126 = arith.constant dense<0.000000e+00> : vector<2x24x24xf32>
    %351 = tpu.matmul %349, %350, %cst_126 {dimension_numbers = #tpu.dot_dimension_numbers<[2], [2], [1], [1], [0, 0, 0, 1, 1, 1], [0], [0]>} : vector<2x24x8xbf16>, vector<2x24x8xbf16>, vector<2x24x24xf32> -> vector<2x24x24xf32>
    "tpu.trace_stop"() : () -> ()
    %cst_127 = arith.constant dense<0xFF800000> : vector<2x24xf32>
    %352 = vector.multi_reduction <maximumf>, %351, %cst_127 [2] : vector<2x24x24xf32> to vector<2x24xf32>
    %353 = vector.shape_cast %352 : vector<2x24xf32> to vector<2x24x1xf32>
    %354 = vector.broadcast %353 : vector<2x24x1xf32> to vector<2x24x24xf32>
    %355 = arith.subf %351, %354 : vector<2x24x24xf32>
    %356 = math.exp %355 : vector<2x24x24xf32>
    %cst_128 = arith.constant dense<0.000000e+00> : vector<2x24xf32>
    %357 = vector.multi_reduction <add>, %356, %cst_128 [2] : vector<2x24x24xf32> to vector<2x24xf32>
    %358 = vector.shape_cast %357 : vector<2x24xf32> to vector<2x24x1xf32>
    %359 = tpu.reciprocal %358 {approx = true} : vector<2x24x1xf32> -> vector<2x24x1xf32>
    %360 = vector.broadcast %359 : vector<2x24x1xf32> to vector<2x24x24xf32>
    %361 = arith.mulf %356, %360 : vector<2x24x24xf32>
    %362 = arith.truncf %361 : vector<2x24x24xf32> to vector<2x24x24xbf16>
    %363 = vector.extract_strided_slice %324 {offsets = [0, 0, 8], sizes = [2, 24, 8], strides = [1, 1, 1]} : vector<2x24x64xbf16> to vector<2x24x8xbf16>
    "tpu.trace_start"() <{level = 10 : i32, message = "bqk,bkd->bqd"}> : () -> ()
    %cst_129 = arith.constant dense<0.000000e+00> : vector<2x24x8xf32>
    %364 = tpu.matmul %362, %363, %cst_129 {dimension_numbers = #tpu.dot_dimension_numbers<[2], [1], [1], [2], [0, 0, 0, 1, 1, 2], [0], [0]>} : vector<2x24x24xbf16>, vector<2x24x8xbf16>, vector<2x24x8xf32> -> vector<2x24x8xf32>
    "tpu.trace_stop"() : () -> ()
    %365 = vector.shape_cast %364 : vector<2x24x8xf32> to vector<48x8xf32>
    %366 = arith.truncf %365 : vector<48x8xf32> to vector<48x8xbf16>
    %367 = vector.extract_strided_slice %326 {offsets = [8, 0], sizes = [8, 64], strides = [1, 1]} : vector<64x64xbf16> to vector<8x64xbf16>
    %cst_130 = arith.constant dense<0.000000e+00> : vector<48x64xf32>
    %368 = tpu.matmul %366, %367, %cst_130 {dimension_numbers = #tpu.dot_dimension_numbers<[1], [0], [0], [1], [0, 0, 1, 1], [], []>} : vector<48x8xbf16>, vector<8x64xbf16>, vector<48x64xf32> -> vector<48x64xf32>
    %369 = arith.addf %348, %368 : vector<48x64xf32>
    %370 = vector.extract_strided_slice %320 {offsets = [0, 0, 16], sizes = [2, 24, 8], strides = [1, 1, 1]} : vector<2x24x64xbf16> to vector<2x24x8xbf16>
    %371 = vector.extract_strided_slice %322 {offsets = [0, 0, 16], sizes = [2, 24, 8], strides = [1, 1, 1]} : vector<2x24x64xbf16> to vector<2x24x8xbf16>
    "tpu.trace_start"() <{level = 10 : i32, message = "bqd,bkd->bqk"}> : () -> ()
    %cst_131 = arith.constant dense<0.000000e+00> : vector<2x24x24xf32>
    %372 = tpu.matmul %370, %371, %cst_131 {dimension_numbers = #tpu.dot_dimension_numbers<[2], [2], [1], [1], [0, 0, 0, 1, 1, 1], [0], [0]>} : vector<2x24x8xbf16>, vector<2x24x8xbf16>, vector<2x24x24xf32> -> vector<2x24x24xf32>
    "tpu.trace_stop"() : () -> ()
    %cst_132 = arith.constant dense<0xFF800000> : vector<2x24xf32>
    %373 = vector.multi_reduction <maximumf>, %372, %cst_132 [2] : vector<2x24x24xf32> to vector<2x24xf32>
    %374 = vector.shape_cast %373 : vector<2x24xf32> to vector<2x24x1xf32>
    %375 = vector.broadcast %374 : vector<2x24x1xf32> to vector<2x24x24xf32>
    %376 = arith.subf %372, %375 : vector<2x24x24xf32>
    %377 = math.exp %376 : vector<2x24x24xf32>
    %cst_133 = arith.constant dense<0.000000e+00> : vector<2x24xf32>
    %378 = vector.multi_reduction <add>, %377, %cst_133 [2] : vector<2x24x24xf32> to vector<2x24xf32>
    %379 = vector.shape_cast %378 : vector<2x24xf32> to vector<2x24x1xf32>
    %380 = tpu.reciprocal %379 {approx = true} : vector<2x24x1xf32> -> vector<2x24x1xf32>
    %381 = vector.broadcast %380 : vector<2x24x1xf32> to vector<2x24x24xf32>
    %382 = arith.mulf %377, %381 : vector<2x24x24xf32>
    %383 = arith.truncf %382 : vector<2x24x24xf32> to vector<2x24x24xbf16>
    %384 = vector.extract_strided_slice %324 {offsets = [0, 0, 16], sizes = [2, 24, 8], strides = [1, 1, 1]} : vector<2x24x64xbf16> to vector<2x24x8xbf16>
    "tpu.trace_start"() <{level = 10 : i32, message = "bqk,bkd->bqd"}> : () -> ()
    %cst_134 = arith.constant dense<0.000000e+00> : vector<2x24x8xf32>
    %385 = tpu.matmul %383, %384, %cst_134 {dimension_numbers = #tpu.dot_dimension_numbers<[2], [1], [1], [2], [0, 0, 0, 1, 1, 2], [0], [0]>} : vector<2x24x24xbf16>, vector<2x24x8xbf16>, vector<2x24x8xf32> -> vector<2x24x8xf32>
    "tpu.trace_stop"() : () -> ()
    %386 = vector.shape_cast %385 : vector<2x24x8xf32> to vector<48x8xf32>
    %387 = arith.truncf %386 : vector<48x8xf32> to vector<48x8xbf16>
    %388 = vector.extract_strided_slice %326 {offsets = [16, 0], sizes = [8, 64], strides = [1, 1]} : vector<64x64xbf16> to vector<8x64xbf16>
    %cst_135 = arith.constant dense<0.000000e+00> : vector<48x64xf32>
    %389 = tpu.matmul %387, %388, %cst_135 {dimension_numbers = #tpu.dot_dimension_numbers<[1], [0], [0], [1], [0, 0, 1, 1], [], []>} : vector<48x8xbf16>, vector<8x64xbf16>, vector<48x64xf32> -> vector<48x64xf32>
    %390 = arith.addf %369, %389 : vector<48x64xf32>
    %391 = vector.extract_strided_slice %320 {offsets = [0, 0, 24], sizes = [2, 24, 8], strides = [1, 1, 1]} : vector<2x24x64xbf16> to vector<2x24x8xbf16>
    %392 = vector.extract_strided_slice %322 {offsets = [0, 0, 24], sizes = [2, 24, 8], strides = [1, 1, 1]} : vector<2x24x64xbf16> to vector<2x24x8xbf16>
    "tpu.trace_start"() <{level = 10 : i32, message = "bqd,bkd->bqk"}> : () -> ()
    %cst_136 = arith.constant dense<0.000000e+00> : vector<2x24x24xf32>
    %393 = tpu.matmul %391, %392, %cst_136 {dimension_numbers = #tpu.dot_dimension_numbers<[2], [2], [1], [1], [0, 0, 0, 1, 1, 1], [0], [0]>} : vector<2x24x8xbf16>, vector<2x24x8xbf16>, vector<2x24x24xf32> -> vector<2x24x24xf32>
    "tpu.trace_stop"() : () -> ()
    %cst_137 = arith.constant dense<0xFF800000> : vector<2x24xf32>
    %394 = vector.multi_reduction <maximumf>, %393, %cst_137 [2] : vector<2x24x24xf32> to vector<2x24xf32>
    %395 = vector.shape_cast %394 : vector<2x24xf32> to vector<2x24x1xf32>
    %396 = vector.broadcast %395 : vector<2x24x1xf32> to vector<2x24x24xf32>
    %397 = arith.subf %393, %396 : vector<2x24x24xf32>
    %398 = math.exp %397 : vector<2x24x24xf32>
    %cst_138 = arith.constant dense<0.000000e+00> : vector<2x24xf32>
    %399 = vector.multi_reduction <add>, %398, %cst_138 [2] : vector<2x24x24xf32> to vector<2x24xf32>
    %400 = vector.shape_cast %399 : vector<2x24xf32> to vector<2x24x1xf32>
    %401 = tpu.reciprocal %400 {approx = true} : vector<2x24x1xf32> -> vector<2x24x1xf32>
    %402 = vector.broadcast %401 : vector<2x24x1xf32> to vector<2x24x24xf32>
    %403 = arith.mulf %398, %402 : vector<2x24x24xf32>
    %404 = arith.truncf %403 : vector<2x24x24xf32> to vector<2x24x24xbf16>
    %405 = vector.extract_strided_slice %324 {offsets = [0, 0, 24], sizes = [2, 24, 8], strides = [1, 1, 1]} : vector<2x24x64xbf16> to vector<2x24x8xbf16>
    "tpu.trace_start"() <{level = 10 : i32, message = "bqk,bkd->bqd"}> : () -> ()
    %cst_139 = arith.constant dense<0.000000e+00> : vector<2x24x8xf32>
    %406 = tpu.matmul %404, %405, %cst_139 {dimension_numbers = #tpu.dot_dimension_numbers<[2], [1], [1], [2], [0, 0, 0, 1, 1, 2], [0], [0]>} : vector<2x24x24xbf16>, vector<2x24x8xbf16>, vector<2x24x8xf32> -> vector<2x24x8xf32>
    "tpu.trace_stop"() : () -> ()
    %407 = vector.shape_cast %406 : vector<2x24x8xf32> to vector<48x8xf32>
    %408 = arith.truncf %407 : vector<48x8xf32> to vector<48x8xbf16>
    %409 = vector.extract_strided_slice %326 {offsets = [24, 0], sizes = [8, 64], strides = [1, 1]} : vector<64x64xbf16> to vector<8x64xbf16>
    %cst_140 = arith.constant dense<0.000000e+00> : vector<48x64xf32>
    %410 = tpu.matmul %408, %409, %cst_140 {dimension_numbers = #tpu.dot_dimension_numbers<[1], [0], [0], [1], [0, 0, 1, 1], [], []>} : vector<48x8xbf16>, vector<8x64xbf16>, vector<48x64xf32> -> vector<48x64xf32>
    %411 = arith.addf %390, %410 : vector<48x64xf32>
    %412 = vector.extract_strided_slice %320 {offsets = [0, 0, 32], sizes = [2, 24, 8], strides = [1, 1, 1]} : vector<2x24x64xbf16> to vector<2x24x8xbf16>
    %413 = vector.extract_strided_slice %322 {offsets = [0, 0, 32], sizes = [2, 24, 8], strides = [1, 1, 1]} : vector<2x24x64xbf16> to vector<2x24x8xbf16>
    "tpu.trace_start"() <{level = 10 : i32, message = "bqd,bkd->bqk"}> : () -> ()
    %cst_141 = arith.constant dense<0.000000e+00> : vector<2x24x24xf32>
    %414 = tpu.matmul %412, %413, %cst_141 {dimension_numbers = #tpu.dot_dimension_numbers<[2], [2], [1], [1], [0, 0, 0, 1, 1, 1], [0], [0]>} : vector<2x24x8xbf16>, vector<2x24x8xbf16>, vector<2x24x24xf32> -> vector<2x24x24xf32>
    "tpu.trace_stop"() : () -> ()
    %cst_142 = arith.constant dense<0xFF800000> : vector<2x24xf32>
    %415 = vector.multi_reduction <maximumf>, %414, %cst_142 [2] : vector<2x24x24xf32> to vector<2x24xf32>
    %416 = vector.shape_cast %415 : vector<2x24xf32> to vector<2x24x1xf32>
    %417 = vector.broadcast %416 : vector<2x24x1xf32> to vector<2x24x24xf32>
    %418 = arith.subf %414, %417 : vector<2x24x24xf32>
    %419 = math.exp %418 : vector<2x24x24xf32>
    %cst_143 = arith.constant dense<0.000000e+00> : vector<2x24xf32>
    %420 = vector.multi_reduction <add>, %419, %cst_143 [2] : vector<2x24x24xf32> to vector<2x24xf32>
    %421 = vector.shape_cast %420 : vector<2x24xf32> to vector<2x24x1xf32>
    %422 = tpu.reciprocal %421 {approx = true} : vector<2x24x1xf32> -> vector<2x24x1xf32>
    %423 = vector.broadcast %422 : vector<2x24x1xf32> to vector<2x24x24xf32>
    %424 = arith.mulf %419, %423 : vector<2x24x24xf32>
    %425 = arith.truncf %424 : vector<2x24x24xf32> to vector<2x24x24xbf16>
    %426 = vector.extract_strided_slice %324 {offsets = [0, 0, 32], sizes = [2, 24, 8], strides = [1, 1, 1]} : vector<2x24x64xbf16> to vector<2x24x8xbf16>
    "tpu.trace_start"() <{level = 10 : i32, message = "bqk,bkd->bqd"}> : () -> ()
    %cst_144 = arith.constant dense<0.000000e+00> : vector<2x24x8xf32>
    %427 = tpu.matmul %425, %426, %cst_144 {dimension_numbers = #tpu.dot_dimension_numbers<[2], [1], [1], [2], [0, 0, 0, 1, 1, 2], [0], [0]>} : vector<2x24x24xbf16>, vector<2x24x8xbf16>, vector<2x24x8xf32> -> vector<2x24x8xf32>
    "tpu.trace_stop"() : () -> ()
    %428 = vector.shape_cast %427 : vector<2x24x8xf32> to vector<48x8xf32>
    %429 = arith.truncf %428 : vector<48x8xf32> to vector<48x8xbf16>
    %430 = vector.extract_strided_slice %326 {offsets = [32, 0], sizes = [8, 64], strides = [1, 1]} : vector<64x64xbf16> to vector<8x64xbf16>
    %cst_145 = arith.constant dense<0.000000e+00> : vector<48x64xf32>
    %431 = tpu.matmul %429, %430, %cst_145 {dimension_numbers = #tpu.dot_dimension_numbers<[1], [0], [0], [1], [0, 0, 1, 1], [], []>} : vector<48x8xbf16>, vector<8x64xbf16>, vector<48x64xf32> -> vector<48x64xf32>
    %432 = arith.addf %411, %431 : vector<48x64xf32>
    %433 = vector.extract_strided_slice %320 {offsets = [0, 0, 40], sizes = [2, 24, 8], strides = [1, 1, 1]} : vector<2x24x64xbf16> to vector<2x24x8xbf16>
    %434 = vector.extract_strided_slice %322 {offsets = [0, 0, 40], sizes = [2, 24, 8], strides = [1, 1, 1]} : vector<2x24x64xbf16> to vector<2x24x8xbf16>
    "tpu.trace_start"() <{level = 10 : i32, message = "bqd,bkd->bqk"}> : () -> ()
    %cst_146 = arith.constant dense<0.000000e+00> : vector<2x24x24xf32>
    %435 = tpu.matmul %433, %434, %cst_146 {dimension_numbers = #tpu.dot_dimension_numbers<[2], [2], [1], [1], [0, 0, 0, 1, 1, 1], [0], [0]>} : vector<2x24x8xbf16>, vector<2x24x8xbf16>, vector<2x24x24xf32> -> vector<2x24x24xf32>
    "tpu.trace_stop"() : () -> ()
    %cst_147 = arith.constant dense<0xFF800000> : vector<2x24xf32>
    %436 = vector.multi_reduction <maximumf>, %435, %cst_147 [2] : vector<2x24x24xf32> to vector<2x24xf32>
    %437 = vector.shape_cast %436 : vector<2x24xf32> to vector<2x24x1xf32>
    %438 = vector.broadcast %437 : vector<2x24x1xf32> to vector<2x24x24xf32>
    %439 = arith.subf %435, %438 : vector<2x24x24xf32>
    %440 = math.exp %439 : vector<2x24x24xf32>
    %cst_148 = arith.constant dense<0.000000e+00> : vector<2x24xf32>
    %441 = vector.multi_reduction <add>, %440, %cst_148 [2] : vector<2x24x24xf32> to vector<2x24xf32>
    %442 = vector.shape_cast %441 : vector<2x24xf32> to vector<2x24x1xf32>
    %443 = tpu.reciprocal %442 {approx = true} : vector<2x24x1xf32> -> vector<2x24x1xf32>
    %444 = vector.broadcast %443 : vector<2x24x1xf32> to vector<2x24x24xf32>
    %445 = arith.mulf %440, %444 : vector<2x24x24xf32>
    %446 = arith.truncf %445 : vector<2x24x24xf32> to vector<2x24x24xbf16>
    %447 = vector.extract_strided_slice %324 {offsets = [0, 0, 40], sizes = [2, 24, 8], strides = [1, 1, 1]} : vector<2x24x64xbf16> to vector<2x24x8xbf16>
    "tpu.trace_start"() <{level = 10 : i32, message = "bqk,bkd->bqd"}> : () -> ()
    %cst_149 = arith.constant dense<0.000000e+00> : vector<2x24x8xf32>
    %448 = tpu.matmul %446, %447, %cst_149 {dimension_numbers = #tpu.dot_dimension_numbers<[2], [1], [1], [2], [0, 0, 0, 1, 1, 2], [0], [0]>} : vector<2x24x24xbf16>, vector<2x24x8xbf16>, vector<2x24x8xf32> -> vector<2x24x8xf32>
    "tpu.trace_stop"() : () -> ()
    %449 = vector.shape_cast %448 : vector<2x24x8xf32> to vector<48x8xf32>
    %450 = arith.truncf %449 : vector<48x8xf32> to vector<48x8xbf16>
    %451 = vector.extract_strided_slice %326 {offsets = [40, 0], sizes = [8, 64], strides = [1, 1]} : vector<64x64xbf16> to vector<8x64xbf16>
    %cst_150 = arith.constant dense<0.000000e+00> : vector<48x64xf32>
    %452 = tpu.matmul %450, %451, %cst_150 {dimension_numbers = #tpu.dot_dimension_numbers<[1], [0], [0], [1], [0, 0, 1, 1], [], []>} : vector<48x8xbf16>, vector<8x64xbf16>, vector<48x64xf32> -> vector<48x64xf32>
    %453 = arith.addf %432, %452 : vector<48x64xf32>
    %454 = vector.extract_strided_slice %320 {offsets = [0, 0, 48], sizes = [2, 24, 8], strides = [1, 1, 1]} : vector<2x24x64xbf16> to vector<2x24x8xbf16>
    %455 = vector.extract_strided_slice %322 {offsets = [0, 0, 48], sizes = [2, 24, 8], strides = [1, 1, 1]} : vector<2x24x64xbf16> to vector<2x24x8xbf16>
    "tpu.trace_start"() <{level = 10 : i32, message = "bqd,bkd->bqk"}> : () -> ()
    %cst_151 = arith.constant dense<0.000000e+00> : vector<2x24x24xf32>
    %456 = tpu.matmul %454, %455, %cst_151 {dimension_numbers = #tpu.dot_dimension_numbers<[2], [2], [1], [1], [0, 0, 0, 1, 1, 1], [0], [0]>} : vector<2x24x8xbf16>, vector<2x24x8xbf16>, vector<2x24x24xf32> -> vector<2x24x24xf32>
    "tpu.trace_stop"() : () -> ()
    %cst_152 = arith.constant dense<0xFF800000> : vector<2x24xf32>
    %457 = vector.multi_reduction <maximumf>, %456, %cst_152 [2] : vector<2x24x24xf32> to vector<2x24xf32>
    %458 = vector.shape_cast %457 : vector<2x24xf32> to vector<2x24x1xf32>
    %459 = vector.broadcast %458 : vector<2x24x1xf32> to vector<2x24x24xf32>
    %460 = arith.subf %456, %459 : vector<2x24x24xf32>
    %461 = math.exp %460 : vector<2x24x24xf32>
    %cst_153 = arith.constant dense<0.000000e+00> : vector<2x24xf32>
    %462 = vector.multi_reduction <add>, %461, %cst_153 [2] : vector<2x24x24xf32> to vector<2x24xf32>
    %463 = vector.shape_cast %462 : vector<2x24xf32> to vector<2x24x1xf32>
    %464 = tpu.reciprocal %463 {approx = true} : vector<2x24x1xf32> -> vector<2x24x1xf32>
    %465 = vector.broadcast %464 : vector<2x24x1xf32> to vector<2x24x24xf32>
    %466 = arith.mulf %461, %465 : vector<2x24x24xf32>
    %467 = arith.truncf %466 : vector<2x24x24xf32> to vector<2x24x24xbf16>
    %468 = vector.extract_strided_slice %324 {offsets = [0, 0, 48], sizes = [2, 24, 8], strides = [1, 1, 1]} : vector<2x24x64xbf16> to vector<2x24x8xbf16>
    "tpu.trace_start"() <{level = 10 : i32, message = "bqk,bkd->bqd"}> : () -> ()
    %cst_154 = arith.constant dense<0.000000e+00> : vector<2x24x8xf32>
    %469 = tpu.matmul %467, %468, %cst_154 {dimension_numbers = #tpu.dot_dimension_numbers<[2], [1], [1], [2], [0, 0, 0, 1, 1, 2], [0], [0]>} : vector<2x24x24xbf16>, vector<2x24x8xbf16>, vector<2x24x8xf32> -> vector<2x24x8xf32>
    "tpu.trace_stop"() : () -> ()
    %470 = vector.shape_cast %469 : vector<2x24x8xf32> to vector<48x8xf32>
    %471 = arith.truncf %470 : vector<48x8xf32> to vector<48x8xbf16>
    %472 = vector.extract_strided_slice %326 {offsets = [48, 0], sizes = [8, 64], strides = [1, 1]} : vector<64x64xbf16> to vector<8x64xbf16>
    %cst_155 = arith.constant dense<0.000000e+00> : vector<48x64xf32>
    %473 = tpu.matmul %471, %472, %cst_155 {dimension_numbers = #tpu.dot_dimension_numbers<[1], [0], [0], [1], [0, 0, 1, 1], [], []>} : vector<48x8xbf16>, vector<8x64xbf16>, vector<48x64xf32> -> vector<48x64xf32>
    %474 = arith.addf %453, %473 : vector<48x64xf32>
    %475 = vector.extract_strided_slice %320 {offsets = [0, 0, 56], sizes = [2, 24, 8], strides = [1, 1, 1]} : vector<2x24x64xbf16> to vector<2x24x8xbf16>
    %476 = vector.extract_strided_slice %322 {offsets = [0, 0, 56], sizes = [2, 24, 8], strides = [1, 1, 1]} : vector<2x24x64xbf16> to vector<2x24x8xbf16>
    "tpu.trace_start"() <{level = 10 : i32, message = "bqd,bkd->bqk"}> : () -> ()
    %cst_156 = arith.constant dense<0.000000e+00> : vector<2x24x24xf32>
    %477 = tpu.matmul %475, %476, %cst_156 {dimension_numbers = #tpu.dot_dimension_numbers<[2], [2], [1], [1], [0, 0, 0, 1, 1, 1], [0], [0]>} : vector<2x24x8xbf16>, vector<2x24x8xbf16>, vector<2x24x24xf32> -> vector<2x24x24xf32>
    "tpu.trace_stop"() : () -> ()
    %cst_157 = arith.constant dense<0xFF800000> : vector<2x24xf32>
    %478 = vector.multi_reduction <maximumf>, %477, %cst_157 [2] : vector<2x24x24xf32> to vector<2x24xf32>
    %479 = vector.shape_cast %478 : vector<2x24xf32> to vector<2x24x1xf32>
    %480 = vector.broadcast %479 : vector<2x24x1xf32> to vector<2x24x24xf32>
    %481 = arith.subf %477, %480 : vector<2x24x24xf32>
    %482 = math.exp %481 : vector<2x24x24xf32>
    %cst_158 = arith.constant dense<0.000000e+00> : vector<2x24xf32>
    %483 = vector.multi_reduction <add>, %482, %cst_158 [2] : vector<2x24x24xf32> to vector<2x24xf32>
    %484 = vector.shape_cast %483 : vector<2x24xf32> to vector<2x24x1xf32>
    %485 = tpu.reciprocal %484 {approx = true} : vector<2x24x1xf32> -> vector<2x24x1xf32>
    %486 = vector.broadcast %485 : vector<2x24x1xf32> to vector<2x24x24xf32>
    %487 = arith.mulf %482, %486 : vector<2x24x24xf32>
    %488 = arith.truncf %487 : vector<2x24x24xf32> to vector<2x24x24xbf16>
    %489 = vector.extract_strided_slice %324 {offsets = [0, 0, 56], sizes = [2, 24, 8], strides = [1, 1, 1]} : vector<2x24x64xbf16> to vector<2x24x8xbf16>
    "tpu.trace_start"() <{level = 10 : i32, message = "bqk,bkd->bqd"}> : () -> ()
    %cst_159 = arith.constant dense<0.000000e+00> : vector<2x24x8xf32>
    %490 = tpu.matmul %488, %489, %cst_159 {dimension_numbers = #tpu.dot_dimension_numbers<[2], [1], [1], [2], [0, 0, 0, 1, 1, 2], [0], [0]>} : vector<2x24x24xbf16>, vector<2x24x8xbf16>, vector<2x24x8xf32> -> vector<2x24x8xf32>
    "tpu.trace_stop"() : () -> ()
    %491 = vector.shape_cast %490 : vector<2x24x8xf32> to vector<48x8xf32>
    %492 = arith.truncf %491 : vector<48x8xf32> to vector<48x8xbf16>
    %493 = vector.extract_strided_slice %326 {offsets = [56, 0], sizes = [8, 64], strides = [1, 1]} : vector<64x64xbf16> to vector<8x64xbf16>
    %cst_160 = arith.constant dense<0.000000e+00> : vector<48x64xf32>
    %494 = tpu.matmul %492, %493, %cst_160 {dimension_numbers = #tpu.dot_dimension_numbers<[1], [0], [0], [1], [0, 0, 1, 1], [], []>} : vector<48x8xbf16>, vector<8x64xbf16>, vector<48x64xf32> -> vector<48x64xf32>
    %495 = arith.addf %474, %494 : vector<48x64xf32>
    %496 = arith.addf %283, %495 : vector<48x64xf32>
    %c1_161 = arith.constant 1 : index
    %c0_162 = arith.constant 0 : index
    %c0_163 = arith.constant 0 : index
    %497 = vector.load %arg9[%c1_161, %c0_162, %c0_163] : memref<2x1x64xf32, #tpu.memory_space<vmem>>, vector<1x1x64xf32>
    %498 = vector.shape_cast %497 : vector<1x1x64xf32> to vector<1x64xf32>
    %499 = vector.broadcast %498 : vector<1x64xf32> to vector<48x64xf32>
    %500 = arith.addf %496, %499 : vector<48x64xf32>
    %c1_164 = arith.constant 1 : index
    %c0_165 = arith.constant 0 : index
    %c0_166 = arith.constant 0 : index
    %501 = vector.load %arg10[%c1_164, %c0_165, %c0_166] : memref<2x1x64xf32, #tpu.memory_space<vmem>>, vector<1x1x64xf32>
    %502 = vector.shape_cast %501 : vector<1x1x64xf32> to vector<1x64xf32>
    %c1_167 = arith.constant 1 : index
    %c0_168 = arith.constant 0 : index
    %c0_169 = arith.constant 0 : index
    %503 = vector.load %arg11[%c1_167, %c0_168, %c0_169] : memref<2x1x64xf32, #tpu.memory_space<vmem>>, vector<1x1x64xf32>
    %504 = vector.shape_cast %503 : vector<1x1x64xf32> to vector<1x64xf32>
    %cst_170 = arith.constant dense<0.000000e+00> : vector<48xf32>
    %505 = vector.multi_reduction <add>, %500, %cst_170 [1] : vector<48x64xf32> to vector<48xf32>
    %506 = vector.shape_cast %505 : vector<48xf32> to vector<48x1xf32>
    %cst_171 = arith.constant 6.400000e+01 : f32
    %507 = vector.broadcast %cst_171 : f32 to vector<48x1xf32>
    %508 = arith.divf %506, %507 : vector<48x1xf32>
    %509 = vector.broadcast %508 : vector<48x1xf32> to vector<48x64xf32>
    %510 = arith.subf %500, %509 : vector<48x64xf32>
    %511 = arith.mulf %510, %510 : vector<48x64xf32>
    %cst_172 = arith.constant dense<0.000000e+00> : vector<48xf32>
    %512 = vector.multi_reduction <add>, %511, %cst_172 [1] : vector<48x64xf32> to vector<48xf32>
    %513 = vector.shape_cast %512 : vector<48xf32> to vector<48x1xf32>
    %cst_173 = arith.constant 6.400000e+01 : f32
    %514 = vector.broadcast %cst_173 : f32 to vector<48x1xf32>
    %515 = arith.divf %513, %514 : vector<48x1xf32>
    %516 = vector.broadcast %508 : vector<48x1xf32> to vector<48x64xf32>
    %517 = arith.subf %500, %516 : vector<48x64xf32>
    %cst_174 = arith.constant 9.99999974E-6 : f32
    %518 = vector.broadcast %cst_174 : f32 to vector<48x1xf32>
    %519 = arith.addf %515, %518 : vector<48x1xf32>
    %520 = math.rsqrt %519 : vector<48x1xf32>
    %521 = vector.broadcast %520 : vector<48x1xf32> to vector<48x64xf32>
    %522 = arith.mulf %517, %521 : vector<48x64xf32>
    %523 = vector.broadcast %502 : vector<1x64xf32> to vector<48x64xf32>
    %524 = arith.mulf %522, %523 : vector<48x64xf32>
    %525 = vector.broadcast %504 : vector<1x64xf32> to vector<48x64xf32>
    %526 = arith.addf %524, %525 : vector<48x64xf32>
    %527 = arith.truncf %526 : vector<48x64xf32> to vector<48x64xbf16>
    %c1_175 = arith.constant 1 : index
    %c0_176 = arith.constant 0 : index
    %c0_177 = arith.constant 0 : index
    %528 = vector.load %arg12[%c1_175, %c0_176, %c0_177] : memref<2x64x128xbf16, #tpu.memory_space<vmem>>, vector<1x64x128xbf16>
    %529 = vector.shape_cast %528 : vector<1x64x128xbf16> to vector<64x128xbf16>
    %cst_178 = arith.constant dense<0.000000e+00> : vector<48x128xf32>
    %530 = tpu.matmul %527, %529, %cst_178 {dimension_numbers = #tpu.dot_dimension_numbers<[1], [0], [0], [1], [0, 0, 1, 1], [], []>} : vector<48x64xbf16>, vector<64x128xbf16>, vector<48x128xf32> -> vector<48x128xf32>
    %c1_179 = arith.constant 1 : index
    %c0_180 = arith.constant 0 : index
    %c0_181 = arith.constant 0 : index
    %531 = vector.load %arg13[%c1_179, %c0_180, %c0_181] : memref<2x1x128xf32, #tpu.memory_space<vmem>>, vector<1x1x128xf32>
    %532 = vector.shape_cast %531 : vector<1x1x128xf32> to vector<1x128xf32>
    %533 = vector.broadcast %532 : vector<1x128xf32> to vector<48x128xf32>
    %534 = arith.addf %530, %533 : vector<48x128xf32>
    %535 = arith.mulf %534, %534 : vector<48x128xf32>
    %536 = arith.mulf %534, %535 : vector<48x128xf32>
    %cst_182 = arith.constant 4.471500e-02 : f32
    %537 = vector.broadcast %cst_182 : f32 to vector<48x128xf32>
    %538 = arith.mulf %537, %536 : vector<48x128xf32>
    %539 = arith.addf %534, %538 : vector<48x128xf32>
    %cst_183 = arith.constant 0.797884583 : f32
    %540 = vector.broadcast %cst_183 : f32 to vector<48x128xf32>
    %541 = arith.mulf %540, %539 : vector<48x128xf32>
    %542 = math.tanh %541 : vector<48x128xf32>
    %cst_184 = arith.constant 1.000000e+00 : f32
    %543 = vector.broadcast %cst_184 : f32 to vector<48x128xf32>
    %544 = arith.addf %543, %542 : vector<48x128xf32>
    %cst_185 = arith.constant 5.000000e-01 : f32
    %545 = vector.broadcast %cst_185 : f32 to vector<48x128xf32>
    %546 = arith.mulf %545, %544 : vector<48x128xf32>
    %547 = arith.mulf %534, %546 : vector<48x128xf32>
    %548 = arith.truncf %547 : vector<48x128xf32> to vector<48x128xbf16>
    %c1_186 = arith.constant 1 : index
    %c0_187 = arith.constant 0 : index
    %c0_188 = arith.constant 0 : index
    %549 = vector.load %arg14[%c1_186, %c0_187, %c0_188] : memref<2x128x64xbf16, #tpu.memory_space<vmem>>, vector<1x128x64xbf16>
    %550 = vector.shape_cast %549 : vector<1x128x64xbf16> to vector<128x64xbf16>
    %cst_189 = arith.constant dense<0.000000e+00> : vector<48x64xf32>
    %551 = tpu.matmul %548, %550, %cst_189 {dimension_numbers = #tpu.dot_dimension_numbers<[1], [0], [0], [1], [0, 0, 1, 1], [], []>} : vector<48x128xbf16>, vector<128x64xbf16>, vector<48x64xf32> -> vector<48x64xf32>
    %552 = arith.addf %500, %551 : vector<48x64xf32>
    %c1_190 = arith.constant 1 : index
    %c0_191 = arith.constant 0 : index
    %c0_192 = arith.constant 0 : index
    %553 = vector.load %arg15[%c1_190, %c0_191, %c0_192] : memref<2x1x64xf32, #tpu.memory_space<vmem>>, vector<1x1x64xf32>
    %554 = vector.shape_cast %553 : vector<1x1x64xf32> to vector<1x64xf32>
    %555 = vector.broadcast %554 : vector<1x64xf32> to vector<48x64xf32>
    %556 = arith.addf %552, %555 : vector<48x64xf32>
    %c0_193 = arith.constant 0 : index
    %c0_194 = arith.constant 0 : index
    %557 = vector.load %arg16[%c0_193, %c0_194] : memref<1x64xf32, #tpu.memory_space<vmem>>, vector<1x64xf32>
    %c0_195 = arith.constant 0 : index
    %c0_196 = arith.constant 0 : index
    %558 = vector.load %arg17[%c0_195, %c0_196] : memref<1x64xf32, #tpu.memory_space<vmem>>, vector<1x64xf32>
    %cst_197 = arith.constant dense<0.000000e+00> : vector<48xf32>
    %559 = vector.multi_reduction <add>, %556, %cst_197 [1] : vector<48x64xf32> to vector<48xf32>
    %560 = vector.shape_cast %559 : vector<48xf32> to vector<48x1xf32>
    %cst_198 = arith.constant 6.400000e+01 : f32
    %561 = vector.broadcast %cst_198 : f32 to vector<48x1xf32>
    %562 = arith.divf %560, %561 : vector<48x1xf32>
    %563 = vector.broadcast %562 : vector<48x1xf32> to vector<48x64xf32>
    %564 = arith.subf %556, %563 : vector<48x64xf32>
    %565 = arith.mulf %564, %564 : vector<48x64xf32>
    %cst_199 = arith.constant dense<0.000000e+00> : vector<48xf32>
    %566 = vector.multi_reduction <add>, %565, %cst_199 [1] : vector<48x64xf32> to vector<48xf32>
    %567 = vector.shape_cast %566 : vector<48xf32> to vector<48x1xf32>
    %cst_200 = arith.constant 6.400000e+01 : f32
    %568 = vector.broadcast %cst_200 : f32 to vector<48x1xf32>
    %569 = arith.divf %567, %568 : vector<48x1xf32>
    %570 = vector.broadcast %562 : vector<48x1xf32> to vector<48x64xf32>
    %571 = arith.subf %556, %570 : vector<48x64xf32>
    %cst_201 = arith.constant 9.99999974E-6 : f32
    %572 = vector.broadcast %cst_201 : f32 to vector<48x1xf32>
    %573 = arith.addf %569, %572 : vector<48x1xf32>
    %574 = math.rsqrt %573 : vector<48x1xf32>
    %575 = vector.broadcast %574 : vector<48x1xf32> to vector<48x64xf32>
    %576 = arith.mulf %571, %575 : vector<48x64xf32>
    %577 = vector.broadcast %557 : vector<1x64xf32> to vector<48x64xf32>
    %578 = arith.mulf %576, %577 : vector<48x64xf32>
    %579 = vector.broadcast %558 : vector<1x64xf32> to vector<48x64xf32>
    %580 = arith.addf %578, %579 : vector<48x64xf32>
    %581 = arith.truncf %580 : vector<48x64xf32> to vector<48x64xbf16>
    %c0_202 = arith.constant 0 : index
    %c0_203 = arith.constant 0 : index
    %582 = vector.load %arg18[%c0_202, %c0_203] : memref<64x128xbf16, #tpu.memory_space<vmem>>, vector<64x128xbf16>
    %cst_204 = arith.constant dense<0.000000e+00> : vector<48x128xf32>
    %583 = tpu.matmul %581, %582, %cst_204 {dimension_numbers = #tpu.dot_dimension_numbers<[1], [0], [0], [1], [0, 0, 1, 1], [], []>} : vector<48x64xbf16>, vector<64x128xbf16>, vector<48x128xf32> -> vector<48x128xf32>
    %c0_205 = arith.constant 0 : index
    %c0_206 = arith.constant 0 : index
    %584 = vector.load %arg19[%c0_205, %c0_206] : memref<1x128xf32, #tpu.memory_space<vmem>>, vector<1x128xf32>
    %585 = vector.broadcast %584 : vector<1x128xf32> to vector<48x128xf32>
    %586 = arith.addf %583, %585 : vector<48x128xf32>
    %cst_207 = arith.constant dense<0xFF800000> : vector<48xf32>
    %587 = vector.multi_reduction <maximumf>, %586, %cst_207 [1] : vector<48x128xf32> to vector<48xf32>
    %588 = vector.shape_cast %587 : vector<48xf32> to vector<48x1xf32>
    %589 = vector.broadcast %588 : vector<48x1xf32> to vector<48x128xf32>
    %590 = arith.subf %586, %589 : vector<48x128xf32>
    %591 = math.exp %590 : vector<48x128xf32>
    %cst_208 = arith.constant dense<0.000000e+00> : vector<48xf32>
    %592 = vector.multi_reduction <add>, %591, %cst_208 [1] : vector<48x128xf32> to vector<48xf32>
    %593 = vector.shape_cast %592 : vector<48xf32> to vector<48x1xf32>
    %594 = math.log %593 : vector<48x1xf32>
    %595 = arith.addf %594, %588 : vector<48x1xf32>
    %596 = vector.broadcast %595 : vector<48x1xf32> to vector<48x128xf32>
    %597 = arith.subf %586, %596 : vector<48x128xf32>
    %598 = vector.shape_cast %597 : vector<48x128xf32> to vector<2x24x128xf32>
    %c0_209 = arith.constant 0 : index
    %c0_210 = arith.constant 0 : index
    %c0_211 = arith.constant 0 : index
    %599 = vector.load %arg20[%c0_209, %c0_210, %c0_211] : memref<2x24x128xf32, #tpu.memory_space<vmem>>, vector<2x24x128xf32>
    tpu.vector_store %arg20[%c0_209, %c0_210, %c0_211], %598 {strides = array<i32>} : memref<2x24x128xf32, #tpu.memory_space<vmem>>, vector<2x24x128xf32>,
    return
  }
  func.func @transform_0(%arg0: i32) -> (i32, i32, i32) {
    %c0_i32 = arith.constant 0 : i32
    %c0_i32_0 = arith.constant 0 : i32
    %c0_i32_1 = arith.constant 0 : i32
    return %arg0, %c0_i32, %c0_i32_0 : i32, i32, i32
  }
  func.func @transform_1(%arg0: i32) -> (i32, i32) {
    %c0_i32 = arith.constant 0 : i32
    %c0_i32_0 = arith.constant 0 : i32
    %c0_i32_1 = arith.constant 0 : i32
    return %c0_i32, %c0_i32_0 : i32, i32
  }
  func.func @transform_2(%arg0: i32) -> (i32, i32) {
    %c0_i32 = arith.constant 0 : i32
    %c0_i32_0 = arith.constant 0 : i32
    %c0_i32_1 = arith.constant 0 : i32
    return %c0_i32, %c0_i32_0 : i32, i32
  }
  func.func @transform_3(%arg0: i32) -> (i32, i32, i32) {
    %c0_i32 = arith.constant 0 : i32
    %c0_i32_0 = arith.constant 0 : i32
    %c0_i32_1 = arith.constant 0 : i32
    %c0_i32_2 = arith.constant 0 : i32
    return %c0_i32, %c0_i32_0, %c0_i32_1 : i32, i32, i32
  }
  func.func @transform_4(%arg0: i32) -> (i32, i32, i32) {
    %c0_i32 = arith.constant 0 : i32
    %c0_i32_0 = arith.constant 0 : i32
    %c0_i32_1 = arith.constant 0 : i32
    %c0_i32_2 = arith.constant 0 : i32
    return %c0_i32, %c0_i32_0, %c0_i32_1 : i32, i32, i32
  }
  func.func @transform_5(%arg0: i32) -> (i32, i32, i32) {
    %c0_i32 = arith.constant 0 : i32
    %c0_i32_0 = arith.constant 0 : i32
    %c0_i32_1 = arith.constant 0 : i32
    %c0_i32_2 = arith.constant 0 : i32
    return %c0_i32, %c0_i32_0, %c0_i32_1 : i32, i32, i32
  }
  func.func @transform_6(%arg0: i32) -> (i32, i32, i32) {
    %c0_i32 = arith.constant 0 : i32
    %c0_i32_0 = arith.constant 0 : i32
    %c0_i32_1 = arith.constant 0 : i32
    %c0_i32_2 = arith.constant 0 : i32
    return %c0_i32, %c0_i32_0, %c0_i32_1 : i32, i32, i32
  }
  func.func @transform_7(%arg0: i32) -> (i32, i32, i32) {
    %c0_i32 = arith.constant 0 : i32
    %c0_i32_0 = arith.constant 0 : i32
    %c0_i32_1 = arith.constant 0 : i32
    %c0_i32_2 = arith.constant 0 : i32
    return %c0_i32, %c0_i32_0, %c0_i32_1 : i32, i32, i32
  }
  func.func @transform_8(%arg0: i32) -> (i32, i32, i32) {
    %c0_i32 = arith.constant 0 : i32
    %c0_i32_0 = arith.constant 0 : i32
    %c0_i32_1 = arith.constant 0 : i32
    %c0_i32_2 = arith.constant 0 : i32
    return %c0_i32, %c0_i32_0, %c0_i32_1 : i32, i32, i32
  }
  func.func @transform_9(%arg0: i32) -> (i32, i32, i32) {
    %c0_i32 = arith.constant 0 : i32
    %c0_i32_0 = arith.constant 0 : i32
    %c0_i32_1 = arith.constant 0 : i32
    %c0_i32_2 = arith.constant 0 : i32
    return %c0_i32, %c0_i32_0, %c0_i32_1 : i32, i32, i32
  }
  func.func @transform_10(%arg0: i32) -> (i32, i32, i32) {
    %c0_i32 = arith.constant 0 : i32
    %c0_i32_0 = arith.constant 0 : i32
    %c0_i32_1 = arith.constant 0 : i32
    %c0_i32_2 = arith.constant 0 : i32
    return %c0_i32, %c0_i32_0, %c0_i32_1 : i32, i32, i32
  }
  func.func @transform_11(%arg0: i32) -> (i32, i32, i32) {
    %c0_i32 = arith.constant 0 : i32
    %c0_i32_0 = arith.constant 0 : i32
    %c0_i32_1 = arith.constant 0 : i32
    %c0_i32_2 = arith.constant 0 : i32
    return %c0_i32, %c0_i32_0, %c0_i32_1 : i32, i32, i32
  }
  func.func @transform_12(%arg0: i32) -> (i32, i32, i32) {
    %c0_i32 = arith.constant 0 : i32
    %c0_i32_0 = arith.constant 0 : i32
    %c0_i32_1 = arith.constant 0 : i32
    %c0_i32_2 = arith.constant 0 : i32
    return %c0_i32, %c0_i32_0, %c0_i32_1 : i32, i32, i32
  }
  func.func @transform_13(%arg0: i32) -> (i32, i32, i32) {
    %c0_i32 = arith.constant 0 : i32
    %c0_i32_0 = arith.constant 0 : i32
    %c0_i32_1 = arith.constant 0 : i32
    %c0_i32_2 = arith.constant 0 : i32
    return %c0_i32, %c0_i32_0, %c0_i32_1 : i32, i32, i32
  }
  func.func @transform_14(%arg0: i32) -> (i32, i32, i32) {
    %c0_i32 = arith.constant 0 : i32
    %c0_i32_0 = arith.constant 0 : i32
    %c0_i32_1 = arith.constant 0 : i32
    %c0_i32_2 = arith.constant 0 : i32
    return %c0_i32, %c0_i32_0, %c0_i32_1 : i32, i32, i32
  }
  func.func @transform_15(%arg0: i32) -> (i32, i32) {
    %c0_i32 = arith.constant 0 : i32
    %c0_i32_0 = arith.constant 0 : i32
    %c0_i32_1 = arith.constant 0 : i32
    return %c0_i32, %c0_i32_0 : i32, i32
  }
  func.func @transform_16(%arg0: i32) -> (i32, i32) {
    %c0_i32 = arith.constant 0 : i32
    %c0_i32_0 = arith.constant 0 : i32
    %c0_i32_1 = arith.constant 0 : i32
    return %c0_i32, %c0_i32_0 : i32, i32
  }
  func.func @transform_17(%arg0: i32) -> (i32, i32) {
    %c0_i32 = arith.constant 0 : i32
    %c0_i32_0 = arith.constant 0 : i32
    %c0_i32_1 = arith.constant 0 : i32
    return %c0_i32, %c0_i32_0 : i32, i32
  }
  func.func @transform_18(%arg0: i32) -> (i32, i32) {
    %c0_i32 = arith.constant 0 : i32
    %c0_i32_0 = arith.constant 0 : i32
    %c0_i32_1 = arith.constant 0 : i32
    return %c0_i32, %c0_i32_0 : i32, i32
  }
  func.func @transform_19(%arg0: i32) -> (i32, i32, i32) {
    %c0_i32 = arith.constant 0 : i32
    %c0_i32_0 = arith.constant 0 : i32
    %c0_i32_1 = arith.constant 0 : i32
    return %arg0, %c0_i32, %c0_i32_0 : i32, i32, i32
  }
}

</mosaic_0001>

<bundles_post_ra>
// kernel: tpu_custom_call.1
= control target key start
LH: loop header
LB: loop body
LE: loop exit
PB: predicated region body
PF: predicated region fallthrough
CT: control target
= control target key end

     0   :  { %s13620_s0 = inlined_call_operand.hbm [shape: f32[2,24,8], index: 0, kind: input, shape index: {}]   ;;  %s13621_s1 = inlined_call_operand.hbm [shape: f32[24,64], index: 1, kind: input, shape index: {}]   ;;  %s13622_s2 = inlined_call_operand.hbm [shape: bf16[8,64], index: 2, kind: input, shape index: {}]   ;;  %s13623_s3 = inlined_call_operand.hbm [shape: f32[2,1,64], index: 3, kind: input, shape index: {}]   ;;  %s13624_s4 = inlined_call_operand.hbm [shape: f32[2,1,64], index: 4, kind: input, shape index: {}]   ;;  %s13625_s5 = inlined_call_operand.hbm [shape: bf16[2,64,192], index: 5, kind: input, shape index: {}]   ;;  %s13626_s6 = inlined_call_operand.hbm [shape: f32[2,1,192], index: 6, kind: input, shape index: {}]   ;;  %s13627_s7 = inlined_call_operand.hbm [shape: bf16[2,64,64], index: 7, kind: input, shape index: {}]   ;;  %s13628_s8 = inlined_call_operand.hbm [shape: f32[2,1,64], index: 8, kind: input, shape index: {}]   ;;  %s13629_s9 = inlined_call_operand.hbm [shape: f32[2,1,64], index: 9, kind: input, shape index: {}]   ;;  %s13630_s10 = inlined_call_operand.hbm [shape: f32[2,1,64], index: 10, kind: input, shape index: {}]   ;;  %s13631_s11 = inlined_call_operand.hbm [shape: bf16[2,64,128], index: 11, kind: input, shape index: {}]   ;;  %s13632_s12 = inlined_call_operand.hbm [shape: f32[2,1,128], index: 12, kind: input, shape index: {}]   ;;  %s13633_s13 = inlined_call_operand.hbm [shape: bf16[2,128,64], index: 13, kind: input, shape index: {}]   ;;  %s13634_s14 = inlined_call_operand.hbm [shape: f32[2,1,64], index: 14, kind: input, shape index: {}]   ;;  %s13635_s15 = inlined_call_operand.hbm [shape: f32[1,64], index: 15, kind: input, shape index: {}]   ;;  %s13636_s16 = inlined_call_operand.hbm [shape: f32[1,64], index: 16, kind: input, shape index: {}]   ;;  %s13637_s17 = inlined_call_operand.hbm [shape: bf16[64,128], index: 17, kind: input, shape index: {}]   ;;  %s13638_s18 = inlined_call_operand.hbm [shape: f32[1,128], index: 18, kind: input, shape index: {}]   ;;  %s13639_s19 = inlined_call_operand.hbm [shape: f32[2,24,128], index: 19, kind: output, shape index: {}]  }
   0x1   :  { %13654 = sst [smem:[#allocation44_spill]] %s13620_s0 }
   0x2   :  { %13655 = sst [smem:[#allocation45_spill]] %s13621_s1 }
   0x3   :  { %13656 = sst [smem:[#allocation46_spill]] %s13622_s2 }
   0x4   :  { %13657 = sst [smem:[#allocation47_spill]] %s13623_s3 }
   0x5   :  { %13658 = sst [smem:[#allocation48_spill]] %s13638_s18 }
   0x6   :  { %13659 = sst [smem:[#allocation49_spill]] %s13639_s19 }
   0x7   :  { %24 = vsyncpa [#allocation3], 0 }
   0x8   :  { %25 = vsyncpa [#allocation6], 0 }
   0x9   :  { %26 = vsyncpa [#allocation9], 0 }
   0xa   :  { %27 = vsyncpa [#allocation12], 0 }
   0xb   :  { %28 = vsyncpa [#allocation15], 0 }
   0xc   :  { %29 = vsyncpa [#allocation18], 0 }
   0xd   :  { %30 = vsyncpa [#allocation21], 0 }
   0xe   :  { %31 = vsyncpa [#allocation24], 0 }
   0xf   :  { %32 = vsyncpa [#allocation27], 0 }
  0x10   :  { %33 = vsyncpa [#allocation30], 0 }
  0x11   :  { %34 = vsyncpa [#allocation4], 0  ;;  %s11262_s0 = smov [#allocation5]   ;;  %s11263_s20 = smov [#allocation8]  }
  0x12   :  { %s52_s30 = sshll.u32 %s11262_s0, 4  ;;  %s74_s21 = sshll.u32 %s11263_s20, 4  ;;  %s53_s30 = int_to_ptr.vmem [resolvable:$true] %s52_s30  ;;  %s11404_s21 = int_to_ptr.vmem [resolvable:$true] %s74_s21 }
  0x13   :  { %s13660_s2 = sld [smem:[#allocation45_spill]] }
  0x19   :  { %s10800_s23 = scalar_lea.hbm %s13660_s2, 384 }
  0x1a   :  { %p10801_p0 = scmp.ne.s32.totalorder %s13660_s2, %s10800_s23  ;;  %p10804_p1 = scmp.lt.u32.totalorder %s10800_s23, %s13660_s2 }
  0x1c   :  { %p10806_p2 = pnand %p10804_p1, %p10801_p0 }
  0x1e   :  { %10809 = shalt.err (!%p10806_p2)
}
  0x1f   :  { %s10810_s27 = scalar_lea.vmem %s53_s30, 384  ;;  %p10815_p4 = scmp.lt.s32.totalorder %s53_s30, %s53_s30 }
  0x20   :  { %p10811_p3 = scmp.ne.s32.totalorder %s53_s30, %s10810_s27  ;;  %p10816_p5 = scmp.lt.s32.totalorder %s10810_s27, %s10810_s27 }
  0x22   :  { %p10817_p6 = por %p10816_p5, %p10815_p4 }
  0x24   :  { %p10818_p7 = pnand %p10817_p6, %p10811_p3 }
  0x26   :  { %10821 = shalt.err (!%p10818_p7)
}
  0x27   :  { %s13645_s28 = smov 128   ;;  %s13647_s29 = smov 8  }
  0x28   :  { %58 = dma.hbm_to_vmem [thread:$0]  %s13660_s2, 384, %s53_s30, [#allocation6], %s13645_s28, %s13645_s28, %s13647_s29  }
  0x29   :  { %s13661_s23 = sld [smem:[#allocation47_spill]] }
  0x2f   :  { %s10822_s24 = scalar_lea.hbm %s13661_s23, 32 }
  0x30   :  { %p10823_p8 = scmp.ne.s32.totalorder %s13661_s23, %s10822_s24  ;;  %p10826_p9 = scmp.lt.u32.totalorder %s10822_s24, %s13661_s23 }
  0x32   :  { %p10828_p10 = pnand %p10826_p9, %p10823_p8 }
  0x34   :  { %10831 = shalt.err (!%p10828_p10)
}
  0x35   :  { %s10832_s19 = scalar_lea.vmem %s11404_s21, 32  ;;  %p10837_p12 = scmp.lt.s32.totalorder %s11404_s21, %s11404_s21 }
  0x36   :  { %p10833_p11 = scmp.ne.s32.totalorder %s11404_s21, %s10832_s19  ;;  %p10838_p13 = scmp.lt.s32.totalorder %s10832_s19, %s10832_s19 }
  0x38   :  { %p10839_p0 = por %p10838_p13, %p10837_p12 }
  0x3a   :  { %p10840_p1 = pnand %p10839_p0, %p10833_p11 }
  0x3c   :  { %10843 = shalt.err (!%p10840_p1)
}
  0x3d   :  { %s13650_s30 = smov 16   ;;  %s13652_s2 = smov 1  }
  0x3e   :  { %80 = dma.hbm_to_vmem [thread:$0]  %s13661_s23, 32, %s11404_s21, [#allocation9], %s13650_s30, %s13650_s30, %s13652_s2  }
  0x3f   :  { %s11268_s1 = smov [#allocation11]   ;;  %s11269_s24 = smov [#allocation14]  }
  0x40   :  { %s98_s22 = sshll.u32 %s11268_s1, 4  ;;  %s122_s25 = sshll.u32 %s11269_s24, 4  ;;  %s99_s22 = int_to_ptr.vmem [resolvable:$true] %s98_s22  ;;  %s11441_s25 = int_to_ptr.vmem [resolvable:$true] %s122_s25 }
  0x41   :  { %s10844_s26 = scalar_lea.hbm %s13625_s5, 2048 }
  0x42   :  { %p10845_p2 = scmp.ne.s32.totalorder %s13625_s5, %s10844_s26  ;;  %p10848_p3 = scmp.lt.u32.totalorder %s10844_s26, %s13625_s5 }
  0x44   :  { %p10850_p4 = pnand %p10848_p3, %p10845_p2 }
  0x46   :  { %10853 = shalt.err (!%p10850_p4)
}
  0x47   :  { %s10854_s21 = scalar_lea.vmem %s99_s22, 2048  ;;  %p10859_p6 = scmp.lt.s32.totalorder %s99_s22, %s99_s22 }
  0x48   :  { %p10855_p5 = scmp.ne.s32.totalorder %s99_s22, %s10854_s21  ;;  %p10860_p7 = scmp.lt.s32.totalorder %s10854_s21, %s10854_s21 }
  0x4a   :  { %p10861_p8 = por %p10860_p7, %p10859_p6 }
  0x4c   :  { %p10862_p9 = pnand %p10861_p8, %p10855_p5 }
  0x4e   :  { %10865 = shalt.err (!%p10862_p9)
}
  0x4f   :  { %s13662_s23 = smov 8   ;;  %s13663_s0 = smov 128  }
  0x50   :  { %104 = dma.hbm_to_vmem [thread:$0]  %s13625_s5, 2048, %s99_s22, [#allocation12], %s13663_s0, %s13663_s0, %s13662_s23  }
  0x51   :  { %s10866_s18 = scalar_lea.hbm %s13627_s7, 1024 }
  0x52   :  { %p10867_p10 = scmp.ne.s32.totalorder %s13627_s7, %s10866_s18  ;;  %p10870_p11 = scmp.lt.u32.totalorder %s10866_s18, %s13627_s7 }
  0x54   :  { %p10872_p12 = pnand %p10870_p11, %p10867_p10 }
  0x56   :  { %10875 = shalt.err (!%p10872_p12)
}
  0x57   :  { %s10876_s27 = scalar_lea.vmem %s11441_s25, 1024  ;;  %p10881_p0 = scmp.lt.s32.totalorder %s11441_s25, %s11441_s25 }
  0x58   :  { %p10877_p13 = scmp.ne.s32.totalorder %s11441_s25, %s10876_s27  ;;  %p10882_p1 = scmp.lt.s32.totalorder %s10876_s27, %s10876_s27 }
  0x5a   :  { %p10883_p2 = por %p10882_p1, %p10881_p0 }
  0x5c   :  { %p10884_p3 = pnand %p10883_p2, %p10877_p13 }
  0x5e   :  { %10887 = shalt.err (!%p10884_p3)
}
  0x5f   :  { %s11270_s5 = smov 64   ;;  %s11271_s22 = smov 4  }
  0x60   :  { %128 = dma.hbm_to_vmem [thread:$0]  %s13627_s7, 1024, %s11441_s25, [#allocation15], %s11270_s5, %s11270_s5, %s11271_s22  }
  0x61   :  { %s11272_s1 = smov [#allocation17]   ;;  %s11273_s24 = smov [#allocation20]  }
  0x62   :  { %s146_s28 = sshll.u32 %s11272_s1, 4  ;;  %s170_s18 = sshll.u32 %s11273_s24, 4  ;;  %s147_s28 = int_to_ptr.vmem [resolvable:$true] %s146_s28  ;;  %s11478_s18 = int_to_ptr.vmem [resolvable:$true] %s170_s18 }
  0x63   :  { %s10888_s3 = scalar_lea.hbm %s13629_s9, 32 }
  0x64   :  { %p10889_p4 = scmp.ne.s32.totalorder %s13629_s9, %s10888_s3  ;;  %p10892_p5 = scmp.lt.u32.totalorder %s10888_s3, %s13629_s9 }
  0x66   :  { %p10894_p6 = pnand %p10892_p5, %p10889_p4 }
  0x68   :  { %10897 = shalt.err (!%p10894_p6)
}
  0x69   :  { %s10898_s7 = scalar_lea.vmem %s147_s28, 32  ;;  %p10903_p8 = scmp.lt.s32.totalorder %s147_s28, %s147_s28 }
  0x6a   :  { %p10899_p7 = scmp.ne.s32.totalorder %s147_s28, %s10898_s7  ;;  %p10904_p9 = scmp.lt.s32.totalorder %s10898_s7, %s10898_s7 }
  0x6c   :  { %p10905_p10 = por %p10904_p9, %p10903_p8 }
  0x6e   :  { %p10906_p11 = pnand %p10905_p10, %p10899_p7 }
  0x70   :  { %10909 = shalt.err (!%p10906_p11)
}
  0x71   :  { %s13664_s25 = smov 1   ;;  %s13665_s21 = smov 16  }
  0x72   :  { %152 = dma.hbm_to_vmem [thread:$0]  %s13629_s9, 32, %s147_s28, [#allocation18], %s13665_s21, %s13665_s21, %s13664_s25  }
  0x73   :  { %s10910_s30 = scalar_lea.hbm %s13631_s11, 1024 }
  0x74   :  { %p10911_p12 = scmp.ne.s32.totalorder %s13631_s11, %s10910_s30  ;;  %p10914_p13 = scmp.lt.u32.totalorder %s10910_s30, %s13631_s11 }
  0x76   :  { %p10916_p0 = pnand %p10914_p13, %p10911_p12 }
  0x78   :  { %10919 = shalt.err (!%p10916_p0)
}
  0x79   :  { %s10920_s27 = scalar_lea.vmem %s11478_s18, 1024  ;;  %p10925_p2 = scmp.lt.s32.totalorder %s11478_s18, %s11478_s18 }
  0x7a   :  { %p10921_p1 = scmp.ne.s32.totalorder %s11478_s18, %s10920_s27  ;;  %p10926_p3 = scmp.lt.s32.totalorder %s10920_s27, %s10920_s27 }
  0x7c   :  { %p10927_p4 = por %p10926_p3, %p10925_p2 }
  0x7e   :  { %p10928_p5 = pnand %p10927_p4, %p10921_p1 }
  0x80   :  { %10931 = shalt.err (!%p10928_p5)
}
  0x81   :  { %176 = dma.hbm_to_vmem [thread:$0]  %s13631_s11, 1024, %s11478_s18, [#allocation21], %s11270_s5, %s11270_s5, %s11271_s22  }
  0x82   :  { %s11274_s7 = smov [#allocation23]   ;;  %s11275_s1 = smov [#allocation26]  }
  0x83   :  { %s194_s20 = sshll.u32 %s11274_s7, 4  ;;  %s219_s24 = sshll.u32 %s11275_s1, 4  ;;  %s195_s20 = int_to_ptr.vmem [resolvable:$true] %s194_s20  ;;  %s220_s24 = int_to_ptr.vmem [resolvable:$true] %s219_s24 }
  0x84   :  { %s10932_s2 = scalar_lea.hbm %s13633_s13, 2048 }
  0x85   :  { %p10933_p6 = scmp.ne.s32.totalorder %s13633_s13, %s10932_s2  ;;  %p10936_p7 = scmp.lt.u32.totalorder %s10932_s2, %s13633_s13 }
  0x87   :  { %p10938_p8 = pnand %p10936_p7, %p10933_p6 }
  0x89   :  { %10941 = shalt.err (!%p10938_p8)
}
  0x8a   :  { %s10942_s11 = scalar_lea.vmem %s195_s20, 2048  ;;  %p10947_p10 = scmp.lt.s32.totalorder %s195_s20, %s195_s20 }
  0x8b   :  { %p10943_p9 = scmp.ne.s32.totalorder %s195_s20, %s10942_s11  ;;  %p10948_p11 = scmp.lt.s32.totalorder %s10942_s11, %s10942_s11 }
  0x8d   :  { %p10949_p12 = por %p10948_p11, %p10947_p10 }
  0x8f   :  { %p10950_p13 = pnand %p10949_p12, %p10943_p9 }
  0x91   :  { %10953 = shalt.err (!%p10950_p13)
}
  0x92   :  { %200 = dma.hbm_to_vmem [thread:$0]  %s13633_s13, 2048, %s195_s20, [#allocation24], %s11270_s5, %s11270_s5, %s11271_s22  }
  0x93   :  { %s10954_s1 = scalar_lea.hbm %s13635_s15, 16 }
  0x94   :  { %p10955_p0 = scmp.ne.s32.totalorder %s13635_s15, %s10954_s1  ;;  %p10958_p1 = scmp.lt.u32.totalorder %s10954_s1, %s13635_s15 }
  0x96   :  { %p10960_p2 = pnand %p10958_p1, %p10955_p0 }
  0x98   :  { %10963 = shalt.err (!%p10960_p2)
}
  0x99   :  { %s10964_s3 = scalar_lea.vmem %s220_s24, 16  ;;  %s10968_s26 = scalar_lea.vmem %s220_s24, 32 }
  0x9a   :  { %p10965_p3 = scmp.ne.s32.totalorder %s220_s24, %s10964_s3  ;;  %p10969_p4 = scmp.lt.s32.totalorder %s220_s24, %s220_s24 }
  0x9b   :  { %p10970_p5 = scmp.lt.s32.totalorder %s10968_s26, %s10964_s3 }
  0x9d   :  { %p10971_p6 = por %p10970_p5, %p10969_p4 }
  0x9f   :  { %p10972_p7 = pnand %p10971_p6, %p10965_p3 }
  0xa1   :  { %10975 = shalt.err (!%p10972_p7)
}
  0xa2   :  { %222 = dma.hbm_to_vmem [thread:$0]  %s13635_s15, 16, %s220_s24, [#allocation27]  }
  0xa3   :  { %s11276_s27 = smov [#allocation29]   ;;  %s11277_s18 = smov [#allocation2]  }
  0xa4   :  { %s238_s11 = sshll.u32 %s11276_s27, 4  ;;  %s40_s9 = sshll.u32 %s11277_s18, 4  ;;  %s239_s11 = int_to_ptr.vmem [resolvable:$true] %s238_s11  ;;  %s11542_s9 = int_to_ptr.vmem [resolvable:$true] %s40_s9 }
  0xa5   :  { %s10976_s1 = scalar_lea.hbm %s13637_s17, 512 }
  0xa6   :  { %p10977_p8 = scmp.ne.s32.totalorder %s13637_s17, %s10976_s1  ;;  %p10980_p9 = scmp.lt.u32.totalorder %s10976_s1, %s13637_s17 }
  0xa8   :  { %p10982_p10 = pnand %p10980_p9, %p10977_p8 }
  0xaa   :  { %10985 = shalt.err (!%p10982_p10)
}
  0xab   :  { %s10986_s15 = scalar_lea.vmem %s239_s11, 512  ;;  %p10991_p12 = scmp.lt.s32.totalorder %s239_s11, %s239_s11 }
  0xac   :  { %p10987_p11 = scmp.ne.s32.totalorder %s239_s11, %s10986_s15  ;;  %p10992_p13 = scmp.lt.s32.totalorder %s10986_s15, %s10986_s15 }
  0xae   :  { %p10993_p0 = por %p10992_p13, %p10991_p12 }
  0xb0   :  { %p10994_p1 = pnand %p10993_p0, %p10987_p11 }
  0xb2   :  { %10997 = shalt.err (!%p10994_p1)
}
  0xb3   :  { %244 = dma.hbm_to_vmem [thread:$0]  %s13637_s17, 512, %s239_s11, [#allocation30], %s11270_s5, %s11270_s5, %s11271_s22  }
  0xb4   :  { %s13666_s20 = sld [smem:[#allocation44_spill]] }
  0xba   :  { %s10998_s27 = scalar_lea.hbm %s13666_s20, 768 }
  0xbb   :  { %p10999_p2 = scmp.ne.s32.totalorder %s13666_s20, %s10998_s27  ;;  %p11002_p3 = scmp.lt.u32.totalorder %s10998_s27, %s13666_s20 }
  0xbd   :  { %p11004_p4 = pnand %p11002_p3, %p10999_p2 }
  0xbf   :  { %11007 = shalt.err (!%p11004_p4)
}
  0xc0   :  { %s11008_s29 = scalar_lea.vmem %s11542_s9, 768  ;;  %p11013_p6 = scmp.lt.s32.totalorder %s11542_s9, %s11542_s9 }
  0xc1   :  { %p11009_p5 = scmp.ne.s32.totalorder %s11542_s9, %s11008_s29  ;;  %p11014_p7 = scmp.lt.s32.totalorder %s11008_s29, %s11008_s29 }
  0xc3   :  { %p11015_p8 = por %p11014_p7, %p11013_p6 }
  0xc5   :  { %p11016_p9 = pnand %p11015_p8, %p11009_p5 }
  0xc7   :  { %11019 = shalt.err (!%p11016_p9)
}
  0xc8   :  { %46 = dma.hbm_to_vmem [thread:$0]  %s13666_s20, 768, %s11542_s9, [#allocation3], %s13663_s0, %s13663_s0, %s13662_s23  }
  0xc9   :  { %s11278_s11 = smov [#allocation7]   ;;  %s11279_s2 = smov [#allocation10]  }
  0xca   :  { %s65_s30 = sshll.u32 %s11278_s11, 4  ;;  %s86_s19 = sshll.u32 %s11279_s2, 4  ;;  %s66_s30 = int_to_ptr.vmem [resolvable:$true] %s65_s30  ;;  %s11579_s19 = int_to_ptr.vmem [resolvable:$true] %s86_s19 }
  0xcb   :  { %s13667_s3 = sld [smem:[#allocation46_spill]] }
  0xd1   :  { %s11020_s26 = scalar_lea.hbm %s13667_s3, 64 }
  0xd2   :  { %p11021_p10 = scmp.ne.s32.totalorder %s13667_s3, %s11020_s26  ;;  %p11024_p11 = scmp.lt.u32.totalorder %s11020_s26, %s13667_s3 }
  0xd4   :  { %p11026_p12 = pnand %p11024_p11, %p11021_p10 }
  0xd6   :  { %11029 = shalt.err (!%p11026_p12)
}
  0xd7   :  { %s11030_s9 = scalar_lea.vmem %s66_s30, 64  ;;  %p11035_p0 = scmp.lt.s32.totalorder %s66_s30, %s66_s30 }
  0xd8   :  { %p11031_p13 = scmp.ne.s32.totalorder %s66_s30, %s11030_s9  ;;  %p11036_p1 = scmp.lt.s32.totalorder %s11030_s9, %s11030_s9 }
  0xda   :  { %p11037_p2 = por %p11036_p1, %p11035_p0 }
  0xdc   :  { %p11038_p3 = pnand %p11037_p2, %p11031_p13 }
  0xde   :  { %11041 = shalt.err (!%p11038_p3)
}
  0xdf   :  { %68 = dma.hbm_to_vmem [thread:$0]  %s13667_s3, 64, %s66_s30, [#allocation6]  }
  0xe0   :  { %s11042_s17 = scalar_lea.hbm %s13624_s4, 32 }
  0xe1   :  { %p11043_p4 = scmp.ne.s32.totalorder %s13624_s4, %s11042_s17  ;;  %p11046_p5 = scmp.lt.u32.totalorder %s11042_s17, %s13624_s4 }
  0xe3   :  { %p11048_p6 = pnand %p11046_p5, %p11043_p4 }
  0xe5   :  { %11051 = shalt.err (!%p11048_p6)
}
  0xe6   :  { %s11052_s24 = scalar_lea.vmem %s11579_s19, 32  ;;  %p11057_p8 = scmp.lt.s32.totalorder %s11579_s19, %s11579_s19 }
  0xe7   :  { %p11053_p7 = scmp.ne.s32.totalorder %s11579_s19, %s11052_s24  ;;  %p11058_p9 = scmp.lt.s32.totalorder %s11052_s24, %s11052_s24 }
  0xe9   :  { %p11059_p10 = por %p11058_p9, %p11057_p8 }
  0xeb   :  { %p11060_p11 = pnand %p11059_p10, %p11053_p7 }
  0xed   :  { %11063 = shalt.err (!%p11060_p11)
}
  0xee   :  { %92 = dma.hbm_to_vmem [thread:$0]  %s13624_s4, 32, %s11579_s19, [#allocation9], %s13665_s21, %s13665_s21, %s13664_s25  }
  0xef   :  { %s11280_s26 = smov [#allocation13]   ;;  %s11064_s28 = scalar_lea.hbm %s13626_s6, 64 }
  0xf0   :  { %s110_s13 = sshll.u32 %s11280_s26, 4  ;;  %p11065_p12 = scmp.ne.s32.totalorder %s13626_s6, %s11064_s28  ;;  %s111_s13 = int_to_ptr.vmem [resolvable:$true] %s110_s13 }
  0xf1   :  { %p11068_p13 = scmp.lt.u32.totalorder %s11064_s28, %s13626_s6 }
  0xf3   :  { %p11070_p0 = pnand %p11068_p13, %p11065_p12 }
  0xf5   :  { %11073 = shalt.err (!%p11070_p0)
}
  0xf6   :  { %s11074_s29 = scalar_lea.vmem %s111_s13, 64  ;;  %p11079_p2 = scmp.lt.s32.totalorder %s111_s13, %s111_s13 }
  0xf7   :  { %p11075_p1 = scmp.ne.s32.totalorder %s111_s13, %s11074_s29  ;;  %p11080_p3 = scmp.lt.s32.totalorder %s11074_s29, %s11074_s29 }
  0xf9   :  { %p11081_p4 = por %p11080_p3, %p11079_p2 }
  0xfb   :  { %p11082_p5 = pnand %p11081_p4, %p11075_p1 }
  0xfd   :  { %11085 = shalt.err (!%p11082_p5)
}
  0xfe   :  { %s11281_s4 = smov 32   ;;  %s11282_s19 = smov 2  }
  0xff   :  { %116 = dma.hbm_to_vmem [thread:$0]  %s13626_s6, 64, %s111_s13, [#allocation12], %s11281_s4, %s11281_s4, %s11282_s19  }
 0x100   :  { %s11283_s11 = smov [#allocation16]   ;;  %s11284_s15 = smov [#allocation19]  }
 0x101   :  { %s134_s2 = sshll.u32 %s11283_s11, 4  ;;  %s158_s24 = sshll.u32 %s11284_s15, 4  ;;  %s135_s2 = int_to_ptr.vmem [resolvable:$true] %s134_s2  ;;  %s159_s24 = int_to_ptr.vmem [resolvable:$true] %s158_s24 }
 0x102   :  { %s11086_s26 = scalar_lea.hbm %s13628_s8, 32 }
 0x103   :  { %p11087_p6 = scmp.ne.s32.totalorder %s13628_s8, %s11086_s26  ;;  %p11090_p7 = scmp.lt.u32.totalorder %s11086_s26, %s13628_s8 }
 0x105   :  { %p11092_p8 = pnand %p11090_p7, %p11087_p6 }
 0x107   :  { %11095 = shalt.err (!%p11092_p8)
}
 0x108   :  { %s11096_s6 = scalar_lea.vmem %s135_s2, 32  ;;  %p11101_p10 = scmp.lt.s32.totalorder %s135_s2, %s135_s2 }
 0x109   :  { %p11097_p9 = scmp.ne.s32.totalorder %s135_s2, %s11096_s6  ;;  %p11102_p11 = scmp.lt.s32.totalorder %s11096_s6, %s11096_s6 }
 0x10b   :  { %p11103_p12 = por %p11102_p11, %p11101_p10 }
 0x10d   :  { %p11104_p13 = pnand %p11103_p12, %p11097_p9 }
 0x10f   :  { %11107 = shalt.err (!%p11104_p13)
}
 0x110   :  { %140 = dma.hbm_to_vmem [thread:$0]  %s13628_s8, 32, %s135_s2, [#allocation15], %s13665_s21, %s13665_s21, %s13664_s25  }
 0x111   :  { %s11108_s29 = scalar_lea.hbm %s13630_s10, 32 }
 0x112   :  { %p11109_p0 = scmp.ne.s32.totalorder %s13630_s10, %s11108_s29  ;;  %p11112_p1 = scmp.lt.u32.totalorder %s11108_s29, %s13630_s10 }
 0x114   :  { %p11114_p2 = pnand %p11112_p1, %p11109_p0 }
 0x116   :  { %11117 = shalt.err (!%p11114_p2)
}
 0x117   :  { %s11118_s15 = scalar_lea.vmem %s159_s24, 32  ;;  %p11123_p4 = scmp.lt.s32.totalorder %s159_s24, %s159_s24 }
 0x118   :  { %p11119_p3 = scmp.ne.s32.totalorder %s159_s24, %s11118_s15  ;;  %p11124_p5 = scmp.lt.s32.totalorder %s11118_s15, %s11118_s15 }
 0x11a   :  { %p11125_p6 = por %p11124_p5, %p11123_p4 }
 0x11c   :  { %p11126_p7 = pnand %p11125_p6, %p11119_p3 }
 0x11e   :  { %11129 = shalt.err (!%p11126_p7)
}
 0x11f   :  { %164 = dma.hbm_to_vmem [thread:$0]  %s13630_s10, 32, %s159_s24, [#allocation18], %s13665_s21, %s13665_s21, %s13664_s25  }
 0x120   :  { %s11285_s30 = smov [#allocation22]   ;;  %s11286_s26 = smov [#allocation25]  }
 0x121   :  { %s182_s3 = sshll.u32 %s11285_s30, 4  ;;  %s206_s27 = sshll.u32 %s11286_s26, 4  ;;  %s183_s3 = int_to_ptr.vmem [resolvable:$true] %s182_s3  ;;  %s207_s27 = int_to_ptr.vmem [resolvable:$true] %s206_s27 }
 0x122   :  { %s11130_s9 = scalar_lea.hbm %s13632_s12, 32 }
 0x123   :  { %p11131_p8 = scmp.ne.s32.totalorder %s13632_s12, %s11130_s9  ;;  %p11134_p9 = scmp.lt.u32.totalorder %s11130_s9, %s13632_s12 }
 0x125   :  { %p11136_p10 = pnand %p11134_p9, %p11131_p8 }
 0x127   :  { %11139 = shalt.err (!%p11136_p10)
}
 0x128   :  { %s11140_s10 = scalar_lea.vmem %s183_s3, 32  ;;  %p11145_p12 = scmp.lt.s32.totalorder %s183_s3, %s183_s3 }
 0x129   :  { %p11141_p11 = scmp.ne.s32.totalorder %s183_s3, %s11140_s10  ;;  %p11146_p13 = scmp.lt.s32.totalorder %s11140_s10, %s11140_s10 }
 0x12b   :  { %p11147_p0 = por %p11146_p13, %p11145_p12 }
 0x12d   :  { %p11148_p1 = pnand %p11147_p0, %p11141_p11 }
 0x12f   :  { %11151 = shalt.err (!%p11148_p1)
}
 0x130   :  { %188 = dma.hbm_to_vmem [thread:$0]  %s13632_s12, 32, %s183_s3, [#allocation21], %s13665_s21, %s13665_s21, %s13664_s25  }
 0x131   :  { %s11152_s17 = scalar_lea.hbm %s13634_s14, 32 }
 0x132   :  { %p11153_p2 = scmp.ne.s32.totalorder %s13634_s14, %s11152_s17  ;;  %p11156_p3 = scmp.lt.u32.totalorder %s11152_s17, %s13634_s14 }
 0x134   :  { %p11158_p4 = pnand %p11156_p3, %p11153_p2 }
 0x136   :  { %11161 = shalt.err (!%p11158_p4)
}
 0x137   :  { %s11162_s2 = scalar_lea.vmem %s207_s27, 32  ;;  %p11167_p6 = scmp.lt.s32.totalorder %s207_s27, %s207_s27 }
 0x138   :  { %p11163_p5 = scmp.ne.s32.totalorder %s207_s27, %s11162_s2  ;;  %p11168_p7 = scmp.lt.s32.totalorder %s11162_s2, %s11162_s2 }
 0x13a   :  { %p11169_p8 = por %p11168_p7, %p11167_p6 }
 0x13c   :  { %p11170_p9 = pnand %p11169_p8, %p11163_p5 }
 0x13e   :  { %11173 = shalt.err (!%p11170_p9)
}
 0x13f   :  { %212 = dma.hbm_to_vmem [thread:$0]  %s13634_s14, 32, %s207_s27, [#allocation24], %s13665_s21, %s13665_s21, %s13664_s25  }
 0x140   :  { %s11287_s3 = smov [#allocation28]   ;;  %s11288_s18 = smov [#allocation31]  }
 0x141   :  { %s229_s26 = sshll.u32 %s11287_s3, 4  ;;  %s251_s28 = sshll.u32 %s11288_s18, 4  ;;  %s230_s26 = int_to_ptr.vmem [resolvable:$true] %s229_s26  ;;  %s252_s28 = int_to_ptr.vmem [resolvable:$true] %s251_s28 }
 0x142   :  { %s11174_s13 = scalar_lea.hbm %s13636_s16, 16 }
 0x143   :  { %p11175_p10 = scmp.ne.s32.totalorder %s13636_s16, %s11174_s13  ;;  %p11178_p11 = scmp.lt.u32.totalorder %s11174_s13, %s13636_s16 }
 0x145   :  { %p11180_p12 = pnand %p11178_p11, %p11175_p10 }
 0x147   :  { %11183 = shalt.err (!%p11180_p12)
}
 0x148   :  { %s11184_s14 = scalar_lea.vmem %s230_s26, 16  ;;  %s11188_s25 = scalar_lea.vmem %s230_s26, 32 }
 0x149   :  { %p11185_p13 = scmp.ne.s32.totalorder %s230_s26, %s11184_s14  ;;  %p11189_p0 = scmp.lt.s32.totalorder %s230_s26, %s230_s26 }
 0x14a   :  { %p11190_p1 = scmp.lt.s32.totalorder %s11188_s25, %s11184_s14 }
 0x14c   :  { %p11191_p2 = por %p11190_p1, %p11189_p0 }
 0x14e   :  { %p11192_p3 = pnand %p11191_p2, %p11185_p13 }
 0x150   :  { %11195 = shalt.err (!%p11192_p3)
}
 0x151   :  { %232 = dma.hbm_to_vmem [thread:$0]  %s13636_s16, 16, %s230_s26, [#allocation27]  }
 0x152   :  { %s13668_s17 = sld [smem:[#allocation48_spill]] }
 0x158   :  { %s11196_s22 = scalar_lea.hbm %s13668_s17, 16 }
 0x159   :  { %p11197_p4 = scmp.ne.s32.totalorder %s13668_s17, %s11196_s22  ;;  %p11200_p5 = scmp.lt.u32.totalorder %s11196_s22, %s13668_s17 }
 0x15b   :  { %p11202_p6 = pnand %p11200_p5, %p11197_p4 }
 0x15d   :  { %11205 = shalt.err (!%p11202_p6)
}
 0x15e   :  { %s11206_s12 = scalar_lea.vmem %s252_s28, 16  ;;  %s11210_s30 = scalar_lea.vmem %s252_s28, 32 }
 0x15f   :  { %p11207_p7 = scmp.ne.s32.totalorder %s252_s28, %s11206_s12  ;;  %p11211_p8 = scmp.lt.s32.totalorder %s252_s28, %s252_s28 }
 0x160   :  { %p11212_p9 = scmp.lt.s32.totalorder %s11210_s30, %s11206_s12 }
 0x162   :  { %p11213_p10 = por %p11212_p9, %p11211_p8 }
 0x164   :  { %p11214_p11 = pnand %p11213_p10, %p11207_p7 }
 0x166   :  { %11217 = shalt.err (!%p11214_p11)
}
 0x167   :  { %254 = dma.hbm_to_vmem [thread:$0]  %s13668_s17, 16, %s252_s28, [#allocation30]  }
 0x168   :  { %11240 = dma.done.wait [#allocation3], 768  }
 0x169   :  { %11241 = vsyncadd [#allocation3], 4294966528 }
 0x16a   :  { %11242 = dma.done.wait [#allocation6], 448  }
 0x16b   :  { %11243 = vsyncadd [#allocation6], 4294966848 }
 0x16c   :  { %11244 = dma.done.wait [#allocation9], 64  }
 0x16d   :  { %11245 = vsyncadd [#allocation9], 4294967232 }
 0x16e   :  { %11246 = dma.done.wait [#allocation12], 2112  }
 0x16f   :  { %11247 = vsyncadd [#allocation12], 4294965184 }
 0x170   :  { %11248 = dma.done.wait [#allocation15], 1056  }
 0x171   :  { %11249 = vsyncadd [#allocation15], 4294966240 }
 0x172   :  { %11250 = dma.done.wait [#allocation18], 64  }
 0x173   :  { %11251 = vsyncadd [#allocation18], 4294967232 }
 0x174   :  { %11252 = dma.done.wait [#allocation21], 1056  }
 0x175   :  { %11253 = vsyncadd [#allocation21], 4294966240 }
 0x176   :  { %11254 = dma.done.wait [#allocation24], 2080  }
 0x177   :  { %11255 = vsyncadd [#allocation24], 4294965216 }
 0x178   :  { %11256 = dma.done.wait [#allocation27], 32  }
 0x179   :  { %11257 = vsyncadd [#allocation27], 4294967264 }
 0x17a   :  { %11258 = dma.done.wait [#allocation30], 528  }
 0x17b   :  { %11259 = vsyncadd [#allocation30], 4294966768  ;;  %v11289_v0 = vmov 0.0   ;;  %vm11290_vm0 = vmmov 0   ;;  %vm333_vm1 = vcmask 1043456   ;;  %v313_v2 = vld [vmem:[#allocation2] sm:$0xff] }
 0x17c   :  { %9252 = vmatprep.subr.bf16.mxu0 %v11289_v0  ;;  %9254 = vmatprep.mubr.msk.bf16.mxu0 %vm11290_vm0, %v11289_v0  ;;  %v322_v1 = vld [vmem:[#allocation7] sm:$0xf]  ;;  %vm323_vm2 = vcmask 64512   ;;  %v315_v6 = vld [vmem:[#allocation2 + $0x10] sm:$0xff]  ;;  %v316_v7 = vld [vmem:[#allocation2 + $0x18] sm:$0xff]  ;;  %vm405_vm3 = vcmask 523264  }
 0x17d   :  { %v314_v3 = vld [vmem:[#allocation2 + $0x8] sm:$0xff]  ;;  %v335_v4 = vsel %vm333_vm1, %v322_v1, 0  ;;  %v320_v8 = vpack.c.bf16 %v316_v7, %v315_v6  ;;  %v317_v9 = vld [vmem:[#allocation2 + $0x20] sm:$0xff]  ;;  %v394_v12 = vld [vmem:[#allocation5] sm:$0xff]  ;;  %vm808_vm4 = vcmask 195584   ;;  %s11292_s26 = smov 56  }
 0x17e   :  { %v319_v5 = vpack.c.bf16 %v314_v3, %v313_v2  ;;  %9253 = vmatpush3.bf16.msra.mxu0 %v335_v4  ;;  %v318_v10 = vld [vmem:[#allocation2 + $0x28] sm:$0xff]  ;;  %v395_v14 = vld [vmem:[#allocation5 + $0x8] sm:$0xff]  ;;  %v396_v21 = vld [vmem:[#allocation5 + $0x10] sm:$0xff]  ;;  %s11293_s18 = smov 120   ;;  %s11294_s28 = smov 48  }
 0x17f   :  { %v321_v11 = vpack.c.bf16 %v318_v10, %v317_v9  ;;  %v10256_v6 = vld [vmem:[#allocation11 + $0x4] ss:$8 sps:$4 sm:$0xff]   ;;  %v10258_v7 = vld [vmem:[#allocation11] ss:$8 sps:$4 sm:$0xff]   ;;  %v10261_v9 = vld [vmem:[#allocation11 + $0x10] ss:$8 sps:$4 sm:$0xff]  }
 0x180   :  { %581 = vmatprep.subr.bf16.mxu1 %v10256_v6  ;;  %v10262_v10 = vld [vmem:[#allocation11 + $0x24] ss:$8 sps:$4 sm:$0xff]   ;;  %s11295_s9 = smov 112   ;;  %s11296_s6 = smov 40  }
 0x181   :  { %9255 = vmatmul.mubr.msk.bf16.vlgmr.msra.gmra.mrb[0].mxu0 %vm323_vm2, %v319_v5  ;;  %582 = vmatpush1.bf16.msra.mxu1 %v10258_v7  ;;  %v522_v7 = vlaneseq  ;;  %s11297_s13 = smov 104   ;;  %s11298_s20 = smov 96  }
 0x182   :  { %9258 = vmatprep.mubr.msk.bf16.mxu0 %vm11290_vm0, %v11289_v0  ;;  %s11299_s7 = smov 24   ;;  %s11300_s10 = smov 88  }
 0x183   :  { %s11301_s24 = smov 80   ;;  %s11302_s14 = smov 72  }
 0x189   :  { %9259 = vmatmul.mubr.msk.bf16.gmra.mrb[4].mxu0 %vm323_vm2, %v320_v8  ;;  %v10259_v8 = vld [vmem:[#allocation11 + $0x14] ss:$8 sps:$4 sm:$0xff]  }
 0x18a   :  { %9262 = vmatprep.mubr.msk.bf16.mxu0 %vm11290_vm0, %v11289_v0  ;;  %583 = vmatprep.subr.bf16.mxu1 %v10259_v8  ;;  %v11794_v8 = vshrl.u32 %v522_v7, 7 }
 0x18b   :  { %584 = vmatpush1.bf16.msra.mxu1 %v10261_v9  ;;  %v520_v9 = vld [vmem:[#allocation13] sm:$0x3] }
 0x18c   :  { %585 = vmatprep.subr.bf16.mxu1 %v10262_v10  ;;  %v528_v10 = vsub.s32 1, %v11794_v8 }
 0x191   :  { %9263 = vmatmul.mubr.msk.bf16.gmra.mrb[8].mxu0 %vm323_vm2, %v321_v11  ;;  %v10264_v11 = vld [vmem:[#allocation11 + $0x20] ss:$8 sps:$4 sm:$0xff]  }
 0x192   :  { %586 = vmatpush1.bf16.msra.mxu1 %v10264_v11 }
 0x254   :  { %v371_v13 = vpop.f32.mrb[0].mxu0 }
 0x255   :  { %v11722_v15 = vadd.f32 %v394_v12, %v371_v13  ;;  %v9256_v16 = vpop.f32.mrb[1].mxu0  ;;  %v10267_v13 = vld [vmem:[#allocation11 + $0x30] ss:$8 sps:$4 sm:$0xff]  }
 0x256   :  { %v374_v17 = vpop.f32.mrb[2].mxu0 }
 0x257   :  { %v11724_v18 = vadd.f32 %v395_v14, %v374_v17  ;;  %v9257_v19 = vpop.f32.mrb[3].mxu0  ;;  %v406_v20 = vsel %vm405_vm3, %v11722_v15, 0.0 }
 0x258   :  { %407 = vadd.xlane.f32.xlu0 %v406_v20 }
 0x259   :  { %v409_v22 = vsel %vm405_vm3, %v11724_v18, 0.0 }
 0x25c   :  { %410 = vadd.xlane.f32.xlu0 %v409_v22  ;;  %v379_v23 = vpop.f32.mrb[4].mxu0 }
 0x25d   :  { %v11730_v24 = vadd.f32 %v396_v21, %v379_v23  ;;  %v9260_v25 = vpop.f32.mrb[5].mxu0 }
 0x25e   :  { %v382_v26 = vpop.f32.mrb[6].mxu0 }
 0x25f   :  { %v11732_v27 = vadd.f32 %v394_v12, %v382_v26  ;;  %v9261_v28 = vpop.f32.mrb[7].mxu0  ;;  %v412_v29 = vsel %vm405_vm3, %v11730_v24, 0.0  ;;  %v10265_v12 = vld [vmem:[#allocation11 + $0x34] ss:$8 sps:$4 sm:$0xff]  }
 0x260   :  { %413 = vadd.xlane.f32.xlu1 %v412_v29  ;;  %587 = vmatprep.subr.bf16.mxu1 %v10265_v12  ;;  %v529_v12 = vrot.slane %v520_v9, %v528_v10 }
 0x261   :  { %v415_v30 = vsel %vm405_vm3, %v11732_v27, 0.0  ;;  %588 = vmatpush1.bf16.msra.mxu1 %v10267_v13 }
 0x264   :  { %416 = vadd.xlane.f32.xlu1 %v415_v30  ;;  %v387_v31 = vpop.f32.mrb[8].mxu0 }
 0x265   :  { %v11738_v32 = vadd.f32 %v395_v14, %v387_v31  ;;  %v9264_v33 = vpop.f32.mrb[9].mxu0  ;;  %v11291_v14 = vmov 0  }
 0x266   :  { %v390_v34 = vpop.f32.mrb[10].mxu0  ;;  %613 = vmatprep.mubr.bf16.mxu1 %v11291_v14 }
 0x267   :  { %v11740_v35 = vadd.f32 %v396_v21, %v390_v34  ;;  %v9265_v36 = vpop.f32.mrb[11].mxu0  ;;  %v418_v37 = vsel %vm405_vm3, %v11738_v32, 0.0 }
 0x268   :  { %419 = vadd.xlane.f32.xlu0 %v418_v37  ;;  %v8617_v37 = vld [vmem:[#allocation8] ss:$0 sm:$0xff] }
 0x269   :  { %v421_v38 = vsel %vm405_vm3, %v11740_v35, 0.0 }
 0x26a   :  { %422 = vadd.xlane.f32.xlu1 %v421_v38 }
 0x2e5   :  { %v408_v39 = vpop.xlane.xlu0 %407 }
 0x2e6   :  { %v425_v40 = vmul.f32 0.015625, %v408_v39 }
 0x2e8   :  { %v11747_v41 = vsub.f32 %v11722_v15, %v425_v40 }
 0x2e9   :  { %v411_v42 = vpop.xlane.xlu0 %410 }
 0x2ea   :  { %v426_v43 = vmul.f32 0.015625, %v411_v42  ;;  %v437_v44 = vmul.f32 %v11747_v41, %v11747_v41 }
 0x2ec   :  { %v11752_v45 = vsub.f32 %v11724_v18, %v426_v43  ;;  %v443_v46 = vsel %vm405_vm3, %v437_v44, 0.0 }
 0x2ed   :  { %v414_v47 = vpop.xlane.xlu1 %413  ;;  %444 = vadd.xlane.f32.xlu0 %v443_v46 }
 0x2ee   :  { %v427_v48 = vmul.f32 0.015625, %v414_v47  ;;  %v438_v49 = vmul.f32 %v11752_v45, %v11752_v45  ;;  %v8618_v47 = vld [vmem:[#allocation10] ss:$0 sm:$0xff] }
 0x2f0   :  { %v11758_v50 = vsub.f32 %v11730_v24, %v427_v48  ;;  %v446_v51 = vsel %vm405_vm3, %v438_v49, 0.0 }
 0x2f1   :  { %v417_v52 = vpop.xlane.xlu1 %416  ;;  %447 = vadd.xlane.f32.xlu1 %v446_v51 }
 0x2f2   :  { %v428_v53 = vmul.f32 0.015625, %v417_v52  ;;  %v439_v54 = vmul.f32 %v11758_v50, %v11758_v50 }
 0x2f4   :  { %v11764_v55 = vsub.f32 %v11732_v27, %v428_v53  ;;  %v449_v56 = vsel %vm405_vm3, %v439_v54, 0.0 }
 0x2f5   :  { %450 = vadd.xlane.f32.xlu0 %v449_v56  ;;  %v420_v57 = vpop.xlane.xlu0 %419 }
 0x2f6   :  { %v429_v58 = vmul.f32 0.015625, %v420_v57  ;;  %v440_v59 = vmul.f32 %v11764_v55, %v11764_v55 }
 0x2f7   :  { %v423_v60 = vpop.xlane.xlu1 %422 }
 0x2f8   :  { %v11770_v61 = vsub.f32 %v11738_v32, %v429_v58  ;;  %v430_v62 = vmul.f32 0.015625, %v423_v60  ;;  %v452_v63 = vsel %vm405_vm3, %v440_v59, 0.0 }
 0x2f9   :  { %453 = vadd.xlane.f32.xlu1 %v452_v63 }
 0x2fa   :  { %v11774_v1 = vsub.f32 %v11740_v35, %v430_v62  ;;  %v441_v2 = vmul.f32 %v11770_v61, %v11770_v61 }
 0x2fc   :  { %v455_v3 = vsel %vm405_vm3, %v441_v2, 0.0  ;;  %v442_v4 = vmul.f32 %v11774_v1, %v11774_v1 }
 0x2fd   :  { %456 = vadd.xlane.f32.xlu0 %v455_v3 }
 0x2fe   :  { %v458_v5 = vsel %vm405_vm3, %v442_v4, 0.0 }
 0x2ff   :  { %459 = vadd.xlane.f32.xlu1 %v458_v5 }
 0x37a   :  { %v445_v16 = vpop.xlane.xlu0 %444 }
 0x37b   :  { %v461_v17 = vmul.f32 0.015625, %v445_v16 }
 0x37d   :  { %v467_v19 = vadd.f32 1e-05, %v461_v17 }
 0x37e   :  { %v448_v20 = vpop.xlane.xlu1 %447 }
 0x37f   :  { %10308 = vrsqrt.f32 %v467_v19  ;;  %v462_v21 = vmul.f32 0.015625, %v448_v20 }
 0x381   :  { %v468_v22 = vadd.f32 1e-05, %v462_v21 }
 0x382   :  { %v451_v23 = vpop.xlane.xlu0 %450 }
 0x383   :  { %10310 = vrsqrt.f32 %v468_v22  ;;  %v463_v25 = vmul.f32 0.015625, %v451_v23 }
 0x385   :  { %v469_v26 = vadd.f32 1e-05, %v463_v25 }
 0x386   :  { %v454_v28 = vpop.xlane.xlu1 %453 }
 0x387   :  { %10312 = vrsqrt.f32 %v469_v26  ;;  %v464_v29 = vmul.f32 0.015625, %v454_v28 }
 0x389   :  { %v10309_v30 = vpop.eup %10308  ;;  %v470_v31 = vadd.f32 1e-05, %v464_v29 }
 0x38a   :  { %v457_v33 = vpop.xlane.xlu0 %456  ;;  %v479_v34 = vmul.f32 %v10309_v30, %v11747_v41 }
 0x38b   :  { %10314 = vrsqrt.f32 %v470_v31  ;;  %v465_v36 = vmul.f32 0.015625, %v457_v33 }
 0x38c   :  { %v460_v38 = vpop.xlane.xlu1 %459  ;;  %v491_v44 = vmul.f32 %v8617_v37, %v479_v34 }
 0x38d   :  { %v10311_v39 = vpop.eup %10310  ;;  %v471_v40 = vadd.f32 1e-05, %v465_v36  ;;  %v466_v42 = vmul.f32 0.015625, %v460_v38 }
 0x38e   :  { %v480_v43 = vmul.f32 %v10311_v39, %v11752_v45  ;;  %v503_v51 = vadd.f32 %v8618_v47, %v491_v44 }
 0x38f   :  { %10316 = vrsqrt.f32 %v471_v40  ;;  %v472_v46 = vadd.f32 1e-05, %v466_v42 }
 0x390   :  { %v492_v48 = vmul.f32 %v8617_v37, %v480_v43 }
 0x391   :  { %v10313_v49 = vpop.eup %10312  ;;  %10318 = vrsqrt.f32 %v472_v46 }
 0x392   :  { %v504_v52 = vadd.f32 %v8618_v47, %v492_v48  ;;  %v481_v41 = vmul.f32 %v10313_v49, %v11758_v50 }
 0x394   :  { %v509_v53 = vpack.c.bf16 %v504_v52, %v503_v51  ;;  %v493_v57 = vmul.f32 %v8617_v37, %v481_v41 }
 0x395   :  { %v10315_v54 = vpop.eup %10314 }
 0x396   :  { %8627 = vmatmul.mubr.msk.bf16.vlgmr.msra.gmra.mrb[0].mxu1 %vm405_vm3, %v509_v53  ;;  %v482_v56 = vmul.f32 %v10315_v54, %v11764_v55  ;;  %v505_v59 = vadd.f32 %v8618_v47, %v493_v57 }
 0x397   :  { %623 = vmatprep.mubr.bf16.mxu1 %v11291_v14 }
 0x398   :  { %v494_v45 = vmul.f32 %v8617_v37, %v482_v56 }
 0x399   :  { %v10317_v58 = vpop.eup %10316 }
 0x39a   :  { %v506_v60 = vadd.f32 %v8618_v47, %v494_v45  ;;  %v483_v62 = vmul.f32 %v10317_v58, %v11770_v61  ;;  %v524_v61 = vsub.s32 0, %v11794_v8 }
 0x39b   :  { %v10319_v63 = vpop.eup %10318 }
 0x39c   :  { %v510_v2 = vpack.c.bf16 %v506_v60, %v505_v59  ;;  %v484_v3 = vmul.f32 %v10319_v63, %v11774_v1  ;;  %v495_v50 = vmul.f32 %v8617_v37, %v483_v62  ;;  %v525_v1 = vrot.slane %v520_v9, %v524_v61 }
 0x39e   :  { %8628 = vmatmul.mubr.msk.bf16.gmra.mrb[4].mxu1 %vm405_vm3, %v510_v2  ;;  %v496_v4 = vmul.f32 %v8617_v37, %v484_v3  ;;  %v507_v5 = vadd.f32 %v8618_v47, %v495_v50 }
 0x39f   :  { %633 = vmatprep.mubr.bf16.mxu1 %v11291_v14 }
 0x3a0   :  { %v508_v55 = vadd.f32 %v8618_v47, %v496_v4 }
 0x3a2   :  { %v511_v6 = vpack.c.bf16 %v508_v55, %v507_v5 }
 0x3a6   :  { %8629 = vmatmul.mubr.msk.bf16.gmra.mrb[8].mxu1 %vm405_vm3, %v511_v6 }
 0x469   :  { %v615_v11 = vpop.f32.mrb[0].mxu1 }
 0x46a   :  { %v617_v13 = vpop.f32.mrb[1].mxu1  ;;  %v616_v17 = vadd.f32 %v615_v11, %v525_v1 }
 0x46b   :  { %v619_v16 = vpop.f32.mrb[2].mxu1  ;;  %v618_v21 = vadd.f32 %v617_v13, %v529_v12 }
 0x46c   :  { %v620_v19 = vadd.f32 %v619_v16, %v525_v1  ;;  %v621_v20 = vpop.f32.mrb[3].mxu1 }
 0x46d   :  { %v622_v22 = vadd.f32 %v621_v20, %v529_v12 }
 0x46e   :  { %v11802_v23 = vpack.c.bf16 %v620_v19, %v616_v17 }
 0x46f   :  { %v11804_v25 = vpack.c.bf16 %v622_v22, %v618_v21 }
 0x470   :  { %678 = vrot.lane.b32.xlu0 %v11802_v23, %s11270_s5  ;;  %9270 = vmatprep.mubr.msk.bf16.mxu0 %vm323_vm2, %v11802_v23 }
 0x471   :  { %v625_v26 = vpop.f32.mrb[4].mxu1 }
 0x472   :  { %v626_v28 = vadd.f32 %v625_v26, %v525_v1  ;;  %v627_v29 = vpop.f32.mrb[5].mxu1 }
 0x473   :  { %v629_v30 = vpop.f32.mrb[6].mxu1  ;;  %v628_v36 = vadd.f32 %v627_v29, %v529_v12 }
 0x474   :  { %v11810_v31 = vpack.c.bf16 %v626_v28, %v626_v28  ;;  %v630_v33 = vadd.f32 %v629_v30, %v525_v1  ;;  %v631_v34 = vpop.f32.mrb[7].mxu1 }
 0x475   :  { %v632_v37 = vadd.f32 %v631_v34, %v529_v12  ;;  %v11834_v2 = vpack.c.bf16 %v628_v36, %v628_v36 }
 0x476   :  { %v646_v38 = vpack.c.bf16 %v630_v33, %v626_v28  ;;  %680 = vrot.lane.b32.xlu1 %v11810_v31, %s11270_s5 }
 0x477   :  { %v647_v39 = vpack.c.bf16 %v632_v37, %v628_v36  ;;  %v889_v4 = vsel %vm333_vm1, %v11834_v2, 0 }
 0x478   :  { %v656_v41 = vunpack.c.h.b16 %v646_v38 }
 0x479   :  { %v635_v40 = vpop.f32.mrb[8].mxu1  ;;  %v665_v54 = vunpack.c.h.b16 %v647_v39 }
 0x47a   :  { %v637_v42 = vpop.f32.mrb[9].mxu1  ;;  %v636_v44 = vadd.f32 %v635_v40, %v525_v1 }
 0x47b   :  { %v639_v43 = vpop.f32.mrb[10].mxu1  ;;  %v638_v48 = vadd.f32 %v637_v42, %v529_v12 }
 0x47c   :  { %v640_v46 = vadd.f32 %v639_v43, %v525_v1  ;;  %v641_v47 = vpop.f32.mrb[11].mxu1 }
 0x47d   :  { %v11814_v49 = vadd.f32 %v641_v47, %v529_v12 }
 0x47e   :  { %v648_v51 = vpack.c.bf16 %v640_v46, %v636_v44  ;;  %v11825_v58 = vpack.c.bf16 %v640_v46, %v640_v46 }
 0x47f   :  { %v649_v52 = vpack.c.bf16 %v11814_v49, %v638_v48 }
 0x480   :  { %v657_v53 = vunpack.c.l.b16 %v648_v51 }
 0x481   :  { %v666_v56 = vunpack.c.l.b16 %v649_v52 }
 0x482   :  { %v11817_v57 = vpack.c.b16 %v657_v53, %v656_v41 }
 0x483   :  { %v11819_v45 = vpack.c.b16 %v666_v56, %v665_v54 }
 0x484   :  { %744 = vrot.lane.b32.xlu1 %v11817_v57, %s11270_s5  ;;  %9278 = vmatprep.mubr.msk.bf16.mxu1 %vm323_vm2, %v11817_v57 }
 0x488   :  { %746 = vrot.lane.b32.xlu1 %v11825_v58, %s11270_s5 }
 0x4e2   :  { %v679_v59 = vpop.permute.xlu0 %678 }
 0x4e3   :  { %10118 = vmatprep.subr.msk.bf16.mxu0 %vm323_vm2, %v679_v59  ;;  %v689_v60 = vsel %vm323_vm2, %v679_v59, 0 }
 0x4e4   :  { %9267 = vmatpush3.bf16.xpose.msra.mxu0 %v689_v60 }
 0x4e8   :  { %v681_v62 = vpop.permute.xlu1 %680 }
 0x4e9   :  { %10119 = vmatprep.subr.msk.bf16.mxu0 %vm323_vm2, %v681_v62  ;;  %v692_v63 = vsel %vm323_vm2, %v681_v62, 0 }
 0x4ec   :  { %9269 = vmatpush3.bf16.xpose.msra.mxu0 %v692_v63 }
 0x4ed   :  { %9282 = vmatprep.subr.bf16.mxu0 %v11804_v25 }
 0x4f3   :  { %9271 = vmatmul.mubr.msk.bf16.vlgmr.msra.gmra.mrb[12].mxu0 %vm323_vm2, %v11810_v31 }
 0x4f4   :  { %9283 = vmatpush3.bf16.msra.mxu0 %v11804_v25 }
 0x4f5   :  { %10122 = vmatprep.subr.msk.bf16.mxu0 %vm333_vm1, %v11834_v2 }
 0x4f6   :  { %v745_v3 = vpop.permute.xlu1 %744 }
 0x4f7   :  { %10120 = vmatprep.subr.msk.bf16.mxu1 %vm323_vm2, %v745_v3  ;;  %v755_v50 = vsel %vm323_vm2, %v745_v3, 0 }
 0x4f8   :  { %9275 = vmatpush3.bf16.xpose.msra.mxu1 %v755_v50  ;;  %9285 = vmatpush3.bf16.msra.mxu0 %v889_v4 }
 0x4f9   :  { %9290 = vmatprep.subr.bf16.mxu0 %v11819_v45 }
 0x4fa   :  { %v747_v55 = vpop.permute.xlu1 %746 }
 0x4fb   :  { %10121 = vmatprep.subr.msk.bf16.mxu1 %vm323_vm2, %v747_v55  ;;  %v758_v5 = vsel %vm323_vm2, %v747_v55, 0 }
 0x500   :  { %9277 = vmatpush3.bf16.xpose.msra.mxu1 %v758_v5 }
 0x507   :  { %9279 = vmatmul.mubr.msk.bf16.vlgmr.msra.gmra.mrb[12].mxu1 %vm323_vm2, %v11825_v58 }
 0x5c6   :  { %v9272_v6 = vpop.f32.mrb[12].mxu0 }
 0x5c7   :  { %v728_v7 = vpop.f32.mrb[13].mxu0  ;;  %v815_v13 = vsel %vm808_vm4, %v9272_v6, -inf }
 0x5c8   :  { %v9273_v9 = vpop.f32.mrb[14].mxu0  ;;  %v809_v1 = vsel %vm808_vm4, %v728_v7, -inf }
 0x5c9   :  { %810 = vmax.xlane.f32.xlu0 %v809_v1  ;;  %v731_v11 = vpop.f32.mrb[15].mxu0 }
 0x5ca   :  { %v812_v12 = vsel %vm808_vm4, %v731_v11, -inf }
 0x5cb   :  { %813 = vmax.xlane.f32.xlu1 %v812_v12 }
 0x5cd   :  { %816 = vmax.xlane.f32.xlu0 %v815_v13 }
 0x5da   :  { %v9280_v16 = vpop.f32.mrb[12].mxu1 }
 0x5db   :  { %v794_v17 = vpop.f32.mrb[13].mxu1  ;;  %v824_v19 = vsel %vm808_vm4, %v9280_v16, -inf }
 0x5dc   :  { %v9281_v20 = vpop.f32.mrb[14].mxu1  ;;  %825 = vmax.xlane.f32.xlu1 %v824_v19  ;;  %v818_v21 = vsel %vm808_vm4, %v794_v17, -inf }
 0x5dd   :  { %v797_v22 = vpop.f32.mrb[15].mxu1  ;;  %819 = vmax.xlane.f32.xlu0 %v818_v21 }
 0x5de   :  { %v821_v26 = vsel %vm808_vm4, %v797_v22, -inf }
 0x5e1   :  { %822 = vmax.xlane.f32.xlu0 %v821_v26  ;;  %v11881_v26 = vpack.c.bf16 %v11814_v49, %v11814_v49 }
 0x656   :  { %v811_v28 = vpop.xlane.xlu0 %810 }
 0x657   :  { %v827_v30 = vsub.f32 %v728_v7, %v811_v28 }
 0x658   :  { %v814_v29 = vpop.xlane.xlu1 %813 }
 0x659   :  { %v828_v33 = vsub.f32 %v731_v11, %v814_v29  ;;  %v833_v38 = vmul.f32 1.442695, %v827_v30  ;;  %v949_v30 = vsel %vm333_vm1, %v11881_v26, 0 }
 0x65a   :  { %v817_v34 = vpop.xlane.xlu0 %816 }
 0x65b   :  { %v835_v36 = vmul.f32 1.442695, %v828_v33  ;;  %v829_v37 = vsub.f32 %v9272_v6, %v817_v34 }
 0x65d   :  { %10320 = vpow2.f32 %v835_v36  ;;  %v837_v39 = vmul.f32 1.442695, %v829_v37 }
 0x65f   :  { %10322 = vpow2.f32 %v837_v39 }
 0x660   :  { %10324 = vpow2.f32 %v833_v38 }
 0x667   :  { %v10321_v40 = vpop.eup %10320 }
 0x668   :  { %v848_v42 = vsel %vm808_vm4, %v10321_v40, 0.0 }
 0x669   :  { %v10323_v43 = vpop.eup %10322  ;;  %849 = vadd.xlane.f32.xlu1 %v848_v42  ;;  %v826_v44 = vpop.xlane.xlu1 %825 }
 0x66a   :  { %v832_v46 = vsub.f32 %v9280_v16, %v826_v44  ;;  %v820_v47 = vpop.xlane.xlu0 %819  ;;  %v851_v48 = vsel %vm808_vm4, %v10323_v43, 0.0  ;;  %v10325_v51 = vpop.eup %10324 }
 0x66b   :  { %v830_v52 = vsub.f32 %v794_v17, %v820_v47  ;;  %852 = vadd.xlane.f32.xlu0 %v851_v48  ;;  %v845_v56 = vsel %vm808_vm4, %v10325_v51, 0.0 }
 0x66c   :  { %v843_v41 = vmul.f32 1.442695, %v832_v46 }
 0x66d   :  { %v839_v53 = vmul.f32 1.442695, %v830_v52 }
 0x66e   :  { %10326 = vpow2.f32 %v843_v41  ;;  %v823_v54 = vpop.xlane.xlu0 %822 }
 0x66f   :  { %v831_v59 = vsub.f32 %v797_v22, %v823_v54  ;;  %846 = vadd.xlane.f32.xlu0 %v845_v56  ;;  %10328 = vpow2.f32 %v839_v53 }
 0x671   :  { %v841_v60 = vmul.f32 1.442695, %v831_v59 }
 0x673   :  { %10330 = vpow2.f32 %v841_v60 }
 0x678   :  { %v10327_v62 = vpop.eup %10326 }
 0x679   :  { %v860_v63 = vsel %vm808_vm4, %v10327_v62, 0.0  ;;  %v10329_v3 = vpop.eup %10328 }
 0x67a   :  { %861 = vadd.xlane.f32.xlu1 %v860_v63  ;;  %v854_v4 = vsel %vm808_vm4, %v10329_v3, 0.0 }
 0x67d   :  { %v10331_v50 = vpop.eup %10330 }
 0x67e   :  { %855 = vadd.xlane.f32.xlu1 %v854_v4  ;;  %v857_v55 = vsel %vm808_vm4, %v10331_v50, 0.0 }
 0x67f   :  { %858 = vadd.xlane.f32.xlu0 %v857_v55 }
 0x68f   :  { %1008 = vrot.lane.b32.xlu1 %v11810_v31, %s11292_s26 }
 0x693   :  { %1074 = vrot.lane.b32.xlu1 %v11817_v57, %s11292_s26 }
 0x695   :  { %1006 = vrot.lane.b32.xlu0 %v11802_v23, %s11292_s26 }
 0x697   :  { %1002 = vrot.lane.b32.xlu1 %v11802_v23, %s11293_s18 }
 0x699   :  { %1004 = vrot.lane.b32.xlu0 %v11810_v31, %s11293_s18 }
 0x69b   :  { %1076 = vrot.lane.b32.xlu1 %v11825_v58, %s11292_s26 }
 0x69d   :  { %1070 = vrot.lane.b32.xlu0 %v11817_v57, %s11293_s18 }
 0x69f   :  { %1072 = vrot.lane.b32.xlu1 %v11825_v58, %s11293_s18 }
 0x6f6   :  { %v850_v5 = vpop.xlane.xlu1 %849 }
 0x6f8   :  { %v853_v6 = vpop.xlane.xlu0 %852 }
 0x6f9   :  { %10332 = vrcp.f32 %v853_v6 }
 0x6fa   :  { %10334 = vrcp.f32 %v850_v5 }
 0x6fc   :  { %v847_v7 = vpop.xlane.xlu0 %846 }
 0x6fd   :  { %10336 = vrcp.f32 %v847_v7 }
 0x703   :  { %v10333_v9 = vpop.eup %10332 }
 0x704   :  { %v10335_v1 = vpop.eup %10334  ;;  %v871_v13 = vmul.f32 %v10333_v9, %v10323_v43 }
 0x705   :  { %v870_v17 = vmul.f32 %v10335_v1, %v10321_v40 }
 0x706   :  { %v876_v21 = vpack.c.bf16 %v871_v13, %v871_v13 }
 0x707   :  { %v10337_v11 = vpop.eup %10336  ;;  %v862_v12 = vpop.xlane.xlu1 %861 }
 0x708   :  { %v869_v16 = vmul.f32 %v10337_v11, %v10325_v51  ;;  %10338 = vrcp.f32 %v862_v12 }
 0x70a   :  { %v875_v19 = vpack.c.bf16 %v870_v17, %v869_v16 }
 0x70b   :  { %v856_v20 = vpop.xlane.xlu1 %855 }
 0x70c   :  { %10340 = vrcp.f32 %v856_v20  ;;  %v859_v22 = vpop.xlane.xlu0 %858  ;;  %9286 = vmatprep.mubr.msk.bf16.mxu0 %vm808_vm4, %v875_v19 }
 0x70d   :  { %10342 = vrcp.f32 %v859_v22  ;;  %9287 = vmatmul.mubr.msk.bf16.vlgmr.msra.gmra.mrb[16].mxu0 %vm808_vm4, %v876_v21 }
 0x70e   :  { %9291 = vmatpush3.bf16.msra.mxu0 %v11819_v45 }
 0x70f   :  { %10123 = vmatprep.subr.msk.bf16.mxu0 %vm333_vm1, %v11881_v26  ;;  %v1009_v28 = vpop.permute.xlu1 %1008 }
 0x710   :  { %v1007_v29 = vpop.permute.xlu0 %1006  ;;  %v1020_v44 = vsel %vm323_vm2, %v1009_v28, 0 }
 0x711   :  { %10124 = vmatprep.subr.msk.bf16.mxu1 %vm323_vm2, %v1007_v29  ;;  %v1017_v33 = vsel %vm323_vm2, %v1007_v29, 0 }
 0x712   :  { %9293 = vmatpush3.bf16.msra.mxu0 %v949_v30  ;;  %9299 = vmatpush3.bf16.xpose.msra.mxu1 %v1017_v33  ;;  %v10339_v34 = vpop.eup %10338 }
 0x713   :  { %10125 = vmatprep.subr.msk.bf16.mxu1 %vm323_vm2, %v1009_v28  ;;  %v1075_v49 = vpop.permute.xlu1 %1074  ;;  %v874_v42 = vmul.f32 %v10339_v34, %v10327_v62 }
 0x714   :  { %10126 = vmatprep.subr.msk.bf16.mxu0 %vm323_vm2, %v1075_v49  ;;  %v1005_v38 = vpop.permute.xlu0 %1004  ;;  %v1085_v51 = vsel %vm323_vm2, %v1075_v49, 0 }
 0x715   :  { %v878_v47 = vpack.c.bf16 %v874_v42, %v874_v42 }
 0x716   :  { %v10341_v36 = vpop.eup %10340 }
 0x717   :  { %v10343_v37 = vpop.eup %10342  ;;  %v1003_v39 = vpop.permute.xlu1 %1002  ;;  %v872_v40 = vmul.f32 %v10341_v36, %v10329_v3 }
 0x718   :  { %9302 = vmatprep.mubr.msk.bf16.mxu1 %vm323_vm2, %v1003_v39  ;;  %v873_v43 = vmul.f32 %v10343_v37, %v10331_v50  ;;  %v1071_v48 = vpop.permute.xlu0 %1070 }
 0x71a   :  { %9301 = vmatpush3.bf16.xpose.msra.mxu1 %v1020_v44  ;;  %v877_v46 = vpack.c.bf16 %v873_v43, %v872_v40 }
 0x71b   :  { %v1077_v52 = vpop.permute.xlu1 %1076 }
 0x71c   :  { %9294 = vmatprep.mubr.msk.bf16.mxu0 %vm808_vm4, %v877_v46  ;;  %v1088_v41 = vsel %vm323_vm2, %v1077_v52, 0 }
 0x71d   :  { %9295 = vmatmul.mubr.msk.bf16.vlgmr.msra.gmra.mrb[20].mxu0 %vm808_vm4, %v878_v47 }
 0x71e   :  { %9307 = vmatpush3.bf16.xpose.msra.mxu0 %v1085_v51  ;;  %9310 = vmatprep.mubr.msk.bf16.mxu0 %vm323_vm2, %v1071_v48 }
 0x71f   :  { %10127 = vmatprep.subr.msk.bf16.mxu0 %vm323_vm2, %v1077_v52  ;;  %v1073_v53 = vpop.permute.xlu1 %1072 }
 0x721   :  { %9303 = vmatmul.mubr.msk.bf16.vlgmr.msra.gmra.mrb[16].mxu1 %vm323_vm2, %v1005_v38 }
 0x726   :  { %9309 = vmatpush3.bf16.xpose.msra.mxu0 %v1088_v41 }
 0x72d   :  { %9311 = vmatmul.mubr.msk.bf16.vlgmr.msra.gmra.mrb[24].mxu0 %vm323_vm2, %v1073_v53 }
 0x7e0   :  { %v11903_v54 = vpop.f32.mrb[16].mxu0 }
 0x7e1   :  { %v11905_v56 = vpop.f32.mrb[17].mxu0 }
 0x7e2   :  { %v9289_v59 = vpop.f32.mrb[18].mxu0 }
 0x7e3   :  { %v11907_v60 = vpop.f32.mrb[19].mxu0 }
 0x7e4   :  { %v999_v62 = vpack.c.bf16 %v11907_v60, %v11905_v56 }
 0x7f0   :  { %v11911_v63 = vpop.f32.mrb[20].mxu0 }
 0x7f1   :  { %v11913_v3 = vpop.f32.mrb[21].mxu0 }
 0x7f2   :  { %v1000_v50 = vpack.c.bf16 %v11913_v3, %v11903_v54  ;;  %v9297_v4 = vpop.f32.mrb[22].mxu0 }
 0x7f3   :  { %v11917_v55 = vpop.f32.mrb[23].mxu0 }
 0x7f4   :  { %v1001_v5 = vpack.c.bf16 %v11911_v63, %v11917_v55  ;;  %v9304_v6 = vpop.f32.mrb[16].mxu1 }
 0x7f5   :  { %v1056_v7 = vpop.f32.mrb[17].mxu1  ;;  %v1144_v13 = vsel %vm808_vm4, %v9304_v6, -inf }
 0x7f6   :  { %v9305_v9 = vpop.f32.mrb[18].mxu1  ;;  %v1138_v1 = vsel %vm808_vm4, %v1056_v7, -inf }
 0x7f7   :  { %1139 = vmax.xlane.f32.xlu0 %v1138_v1  ;;  %v1059_v11 = vpop.f32.mrb[19].mxu1 }
 0x7f8   :  { %v1141_v12 = vsel %vm808_vm4, %v1059_v11, -inf }
 0x7f9   :  { %1142 = vmax.xlane.f32.xlu1 %v1141_v12 }
 0x7fb   :  { %1145 = vmax.xlane.f32.xlu0 %v1144_v13 }
 0x800   :  { %v9312_v16 = vpop.f32.mrb[24].mxu0 }
 0x801   :  { %v1124_v17 = vpop.f32.mrb[25].mxu0  ;;  %v1153_v19 = vsel %vm808_vm4, %v9312_v16, -inf }
 0x802   :  { %1154 = vmax.xlane.f32.xlu1 %v1153_v19  ;;  %v9313_v20 = vpop.f32.mrb[26].mxu0  ;;  %v1147_v21 = vsel %vm808_vm4, %v1124_v17, -inf }
 0x803   :  { %1148 = vmax.xlane.f32.xlu0 %v1147_v21  ;;  %v1127_v22 = vpop.f32.mrb[27].mxu0 }
 0x804   :  { %v1150_v28 = vsel %vm808_vm4, %v1127_v22, -inf }
 0x807   :  { %1151 = vmax.xlane.f32.xlu0 %v1150_v28 }
 0x884   :  { %v1140_v29 = vpop.xlane.xlu0 %1139 }
 0x885   :  { %v1156_v30 = vsub.f32 %v1056_v7, %v1140_v29 }
 0x886   :  { %v1143_v33 = vpop.xlane.xlu1 %1142 }
 0x887   :  { %v1162_v49 = vmul.f32 1.442695, %v1156_v30  ;;  %v1157_v34 = vsub.f32 %v1059_v11, %v1143_v33 }
 0x888   :  { %v1146_v36 = vpop.xlane.xlu0 %1145 }
 0x889   :  { %10344 = vpow2.f32 %v1162_v49  ;;  %v1164_v37 = vmul.f32 1.442695, %v1157_v34  ;;  %v1158_v38 = vsub.f32 %v9304_v6, %v1146_v36 }
 0x88b   :  { %10346 = vpow2.f32 %v1164_v37  ;;  %v1166_v39 = vmul.f32 1.442695, %v1158_v38 }
 0x88d   :  { %10348 = vpow2.f32 %v1166_v39 }
 0x88f   :  { %v1155_v40 = vpop.xlane.xlu1 %1154 }
 0x890   :  { %v1161_v42 = vsub.f32 %v9312_v16, %v1155_v40  ;;  %v1149_v43 = vpop.xlane.xlu0 %1148 }
 0x891   :  { %v1159_v44 = vsub.f32 %v1124_v17, %v1149_v43  ;;  %v669_v43 = vld [vmem:[#allocation14 + $0x4] sm:$0xf] }
 0x892   :  { %v1172_v46 = vmul.f32 1.442695, %v1161_v42 }
 0x893   :  { %v10345_v47 = vpop.eup %10344  ;;  %v1168_v48 = vmul.f32 1.442695, %v1159_v44 }
 0x894   :  { %10350 = vpow2.f32 %v1172_v46  ;;  %v1152_v51 = vpop.xlane.xlu0 %1151  ;;  %v1174_v52 = vsel %vm808_vm4, %v10345_v47, 0.0 }
 0x895   :  { %v10347_v41 = vpop.eup %10346  ;;  %v1160_v53 = vsub.f32 %v1127_v22, %v1152_v51  ;;  %1175 = vadd.xlane.f32.xlu0 %v1174_v52  ;;  %10352 = vpow2.f32 %v1168_v48  ;;  %v1345_v52 = vsel %vm333_vm1, %v669_v43, 0 }
 0x896   :  { %v1177_v59 = vsel %vm808_vm4, %v10347_v41, 0.0 }
 0x897   :  { %v10349_v4 = vpop.eup %10348  ;;  %v1170_v6 = vmul.f32 1.442695, %v1160_v53  ;;  %1178 = vadd.xlane.f32.xlu1 %v1177_v59 }
 0x898   :  { %v1180_v7 = vsel %vm808_vm4, %v10349_v4, 0.0 }
 0x899   :  { %10354 = vpow2.f32 %v1170_v6  ;;  %1181 = vadd.xlane.f32.xlu0 %v1180_v7  ;;  %v668_v7 = vld [vmem:[#allocation14] sm:$0xf] }
 0x89e   :  { %v10351_v9 = vpop.eup %10350 }
 0x89f   :  { %v1189_v1 = vsel %vm808_vm4, %v10351_v9, 0.0  ;;  %v10353_v11 = vpop.eup %10352 }
 0x8a0   :  { %1190 = vadd.xlane.f32.xlu1 %v1189_v1  ;;  %v1183_v13 = vsel %vm808_vm4, %v10353_v11, 0.0 }
 0x8a3   :  { %v10355_v12 = vpop.eup %10354 }
 0x8a4   :  { %1184 = vadd.xlane.f32.xlu1 %v1183_v13  ;;  %v1186_v16 = vsel %vm808_vm4, %v10355_v12, 0.0 }
 0x8a5   :  { %1187 = vadd.xlane.f32.xlu0 %v1186_v16 }
 0x8b5   :  { %1210 = vrot.lane.b32.xlu1 %v11834_v2, %s11293_s18 }
 0x8b9   :  { %1270 = vrot.lane.b32.xlu1 %v11819_v45, %s11293_s18 }
 0x8bb   :  { %1208 = vrot.lane.b32.xlu0 %v11804_v25, %s11293_s18 }
 0x8bd   :  { %1272 = vrot.lane.b32.xlu1 %v11881_v26, %s11293_s18 }
 0x8bf   :  { %1477 = vrot.lane.b32.xlu0 %v11802_v23, %s11294_s28 }
 0x8c1   :  { %1479 = vrot.lane.b32.xlu1 %v11810_v31, %s11294_s28 }
 0x8c3   :  { %1545 = vrot.lane.b32.xlu0 %v11817_v57, %s11294_s28 }
 0x8c5   :  { %1473 = vrot.lane.b32.xlu1 %v11802_v23, %s11295_s9 }
 0x8c7   :  { %1475 = vrot.lane.b32.xlu0 %v11810_v31, %s11295_s9 }
 0x8c9   :  { %1547 = vrot.lane.b32.xlu1 %v11825_v58, %s11294_s28 }
 0x8cb   :  { %1541 = vrot.lane.b32.xlu0 %v11817_v57, %s11295_s9 }
 0x8cd   :  { %1543 = vrot.lane.b32.xlu1 %v11825_v58, %s11295_s9 }
 0x922   :  { %v1176_v17 = vpop.xlane.xlu0 %1175 }
 0x923   :  { %10356 = vrcp.f32 %v1176_v17 }
 0x924   :  { %v1179_v19 = vpop.xlane.xlu1 %1178 }
 0x925   :  { %10358 = vrcp.f32 %v1179_v19 }
 0x926   :  { %v1182_v20 = vpop.xlane.xlu0 %1181 }
 0x927   :  { %10360 = vrcp.f32 %v1182_v20 }
 0x92d   :  { %v10357_v21 = vpop.eup %10356  ;;  %v1191_v22 = vpop.xlane.xlu1 %1190 }
 0x92e   :  { %10362 = vrcp.f32 %v1191_v22  ;;  %v1198_v29 = vmul.f32 %v10357_v21, %v10345_v47 }
 0x92f   :  { %v10359_v28 = vpop.eup %10358 }
 0x930   :  { %v1199_v30 = vmul.f32 %v10359_v28, %v10347_v41 }
 0x931   :  { %v1185_v33 = vpop.xlane.xlu1 %1184  ;;  %v10361_v37 = vpop.eup %10360 }
 0x932   :  { %10364 = vrcp.f32 %v1185_v33  ;;  %v1188_v49 = vpop.xlane.xlu0 %1187  ;;  %v1204_v34 = vpack.c.bf16 %v1199_v30, %v1198_v29  ;;  %v1200_v40 = vmul.f32 %v10361_v37, %v10349_v4 }
 0x933   :  { %10366 = vrcp.f32 %v1188_v49 }
 0x934   :  { %9318 = vmatprep.mubr.msk.bf16.mxu1 %vm808_vm4, %v1204_v34  ;;  %v1205_v51 = vpack.c.bf16 %v1200_v40, %v1200_v40 }
 0x935   :  { %v1211_v36 = vpop.permute.xlu1 %1210 }
 0x936   :  { %v1209_v38 = vpop.permute.xlu0 %1208  ;;  %v1220_v44 = vsel %vm333_vm1, %v1211_v36, 0 }
 0x937   :  { %9314 = vmatprep.subr.bf16.mxu1 %v1209_v38 }
 0x938   :  { %9315 = vmatpush3.bf16.msra.mxu1 %v1209_v38  ;;  %v10363_v42 = vpop.eup %10362 }
 0x939   :  { %10128 = vmatprep.subr.msk.bf16.mxu1 %vm333_vm1, %v1211_v36  ;;  %v1271_v39 = vpop.permute.xlu1 %1270  ;;  %v1203_v53 = vmul.f32 %v10363_v42, %v10351_v9  ;;  %v1414_v9 = vsel %vm333_vm1, %v668_v7, 0 }
 0x93a   :  { %9322 = vmatprep.subr.bf16.mxu0 %v1271_v39  ;;  %v1478_v59 = vpop.permute.xlu0 %1477 }
 0x93b   :  { %9323 = vmatpush3.bf16.msra.mxu0 %v1271_v39  ;;  %v1207_v16 = vpack.c.bf16 %v1203_v53, %v1203_v53  ;;  %v1488_v63 = vsel %vm323_vm2, %v1478_v59, 0 }
 0x93c   :  { %v10365_v46 = vpop.eup %10364  ;;  %9317 = vmatpush3.bf16.msra.mxu1 %v1220_v44 }
 0x93d   :  { %v10367_v47 = vpop.eup %10366  ;;  %v1273_v48 = vpop.permute.xlu1 %1272  ;;  %9330 = vmatprep.subr.bf16.mxu1 %v11289_v0  ;;  %v1201_v41 = vmul.f32 %v10365_v46, %v10353_v11 }
 0x93e   :  { %10129 = vmatprep.subr.msk.bf16.mxu0 %vm333_vm1, %v1273_v48  ;;  %v1282_v4 = vsel %vm333_vm1, %v1273_v48, 0  ;;  %v1202_v6 = vmul.f32 %v10367_v47, %v10355_v12  ;;  %v1546_v11 = vpop.permute.xlu0 %1545 }
 0x93f   :  { %9319 = vmatmul.mubr.msk.bf16.vlgmr.msra.gmra.mrb[20].mxu1 %vm808_vm4, %v1205_v51  ;;  %9325 = vmatpush3.bf16.msra.mxu0 %v1282_v4  ;;  %v1556_v17 = vsel %vm323_vm2, %v1546_v11, 0 }
 0x940   :  { %9331 = vmatpush3.bf16.msra.mxu1 %v1345_v52  ;;  %v1206_v1 = vpack.c.bf16 %v1202_v6, %v1201_v41  ;;  %9344 = vmatprep.subr.bf16.mxu0 %v11289_v0 }
 0x941   :  { %10130 = vmatprep.subr.msk.bf16.mxu1 %vm323_vm2, %v1478_v59  ;;  %v1480_v13 = vpop.permute.xlu1 %1479  ;;  %9332 = vmatprep.mubr.msk.bf16.mxu1 %vm11290_vm0, %v11289_v0 }
 0x942   :  { %9326 = vmatprep.mubr.msk.bf16.mxu0 %vm808_vm4, %v1206_v1  ;;  %v1476_v56 = vpop.permute.xlu0 %1475  ;;  %v1491_v37 = vsel %vm323_vm2, %v1480_v13, 0 }
 0x943   :  { %9327 = vmatmul.mubr.msk.bf16.vlgmr.msra.gmra.mrb[28].mxu0 %vm808_vm4, %v1207_v16 }
 0x944   :  { %9345 = vmatpush3.bf16.msra.mxu0 %v1414_v9  ;;  %9346 = vmatprep.mubr.msk.bf16.mxu0 %vm11290_vm0, %v11289_v0 }
 0x945   :  { %10132 = vmatprep.subr.msk.bf16.mxu0 %vm323_vm2, %v1546_v11  ;;  %v1474_v12 = vpop.permute.xlu1 %1473 }
 0x946   :  { %v1542_v60 = vpop.permute.xlu0 %1541 }
 0x949   :  { %v1548_v19 = vpop.permute.xlu1 %1547 }
 0x94a   :  { %v1559_v20 = vsel %vm323_vm2, %v1548_v19, 0 }
 0x94b   :  { %9347 = vmatmul.mubr.msk.bf16.vlgmr.msra.gmra.mrb[32].mxu0 %vm323_vm2, %v999_v62 }
 0x94c   :  { %9350 = vmatprep.mubr.msk.bf16.mxu0 %vm11290_vm0, %v11289_v0 }
 0x94d   :  { %9367 = vmatpush3.bf16.xpose.msra.mxu0 %v1556_v17  ;;  %v1544_v62 = vpop.permute.xlu1 %1543 }
 0x94e   :  { %10133 = vmatprep.subr.msk.bf16.mxu0 %vm323_vm2, %v1548_v19 }
 0x953   :  { %9351 = vmatmul.mubr.msk.bf16.gmra.mrb[36].mxu0 %vm323_vm2, %v1000_v50 }
 0x954   :  { %9354 = vmatprep.mubr.msk.bf16.mxu0 %vm11290_vm0, %v11289_v0 }
 0x955   :  { %9369 = vmatpush3.bf16.xpose.msra.mxu0 %v1559_v20 }
 0x95b   :  { %9355 = vmatmul.mubr.msk.bf16.gmra.mrb[40].mxu0 %vm323_vm2, %v1001_v5 }
 0x95c   :  { %9370 = vmatprep.mubr.msk.bf16.mxu0 %vm323_vm2, %v1542_v60 }
 0x963   :  { %9371 = vmatmul.mubr.msk.bf16.vlgmr.msra.gmra.mrb[44].mxu0 %vm323_vm2, %v1544_v62 }
 0xa12   :  { %v9320_v54 = vpop.f32.mrb[20].mxu1 }
 0xa13   :  { %v1256_v3 = vpop.f32.mrb[21].mxu1 }
 0xa14   :  { %v9321_v50 = vpop.f32.mrb[22].mxu1 }
 0xa15   :  { %v1259_v21 = vpop.f32.mrb[23].mxu1 }
 0xa16   :  { %v1332_v22 = vpack.c.bf16 %v1259_v21, %v1256_v3  ;;  %v9328_v28 = vpop.f32.mrb[28].mxu0 }
 0xa17   :  { %v1318_v29 = vpop.f32.mrb[29].mxu0 }
 0xa18   :  { %v1333_v30 = vpack.c.bf16 %v1318_v29, %v9320_v54  ;;  %v9329_v33 = vpop.f32.mrb[30].mxu0  ;;  %9333 = vmatmul.mubr.msk.bf16.vlgmr.msra.gmra.mrb[24].mxu1 %vm323_vm2, %v1332_v22 }
 0xa19   :  { %9359 = vmatpush3.bf16.xpose.msra.mxu1 %v1488_v63  ;;  %v1321_v55 = vpop.f32.mrb[31].mxu0  ;;  %9336 = vmatprep.mubr.msk.bf16.mxu1 %vm11290_vm0, %v11289_v0 }
 0xa1a   :  { %v1334_v5 = vpack.c.bf16 %v9328_v28, %v1321_v55  ;;  %10131 = vmatprep.subr.msk.bf16.mxu1 %vm323_vm2, %v1480_v13 }
 0xa1e   :  { %v1450_v49 = vpop.f32.mrb[32].mxu0 }
 0xa1f   :  { %v9348_v34 = vpop.f32.mrb[33].mxu0 }
 0xa20   :  { %9337 = vmatmul.mubr.msk.bf16.gmra.mrb[28].mxu1 %vm323_vm2, %v1333_v30  ;;  %v1453_v36 = vpop.f32.mrb[34].mxu0 }
 0xa21   :  { %9361 = vmatpush3.bf16.xpose.msra.mxu1 %v1491_v37  ;;  %v9349_v38 = vpop.f32.mrb[35].mxu0  ;;  %9340 = vmatprep.mubr.msk.bf16.mxu1 %vm11290_vm0, %v11289_v0 }
 0xa26   :  { %v1458_v39 = vpop.f32.mrb[36].mxu0 }
 0xa27   :  { %v9352_v40 = vpop.f32.mrb[37].mxu0 }
 0xa28   :  { %9341 = vmatmul.mubr.msk.bf16.gmra.mrb[32].mxu1 %vm323_vm2, %v1334_v5  ;;  %v1461_v42 = vpop.f32.mrb[38].mxu0 }
 0xa29   :  { %v9353_v43 = vpop.f32.mrb[39].mxu0  ;;  %9362 = vmatprep.mubr.msk.bf16.mxu1 %vm323_vm2, %v1474_v12 }
 0xa2e   :  { %v1466_v44 = vpop.f32.mrb[40].mxu0 }
 0xa2f   :  { %v9356_v46 = vpop.f32.mrb[41].mxu0 }
 0xa30   :  { %v1469_v47 = vpop.f32.mrb[42].mxu0  ;;  %9363 = vmatmul.mubr.msk.bf16.vlgmr.msra.gmra.mrb[36].mxu1 %vm323_vm2, %v1476_v56 }
 0xa31   :  { %v9357_v48 = vpop.f32.mrb[43].mxu0 }
 0xa36   :  { %v9372_v51 = vpop.f32.mrb[44].mxu0 }
 0xa37   :  { %v1595_v52 = vpop.f32.mrb[45].mxu0  ;;  %v1624_v63 = vsel %vm808_vm4, %v9372_v51, -inf }
 0xa38   :  { %v9373_v41 = vpop.f32.mrb[46].mxu0  ;;  %v1618_v55 = vsel %vm808_vm4, %v1595_v52, -inf }
 0xa39   :  { %v1598_v53 = vpop.f32.mrb[47].mxu0 }
 0xa3a   :  { %v1621_v5 = vsel %vm808_vm4, %v1598_v53, -inf }
 0xaeb   :  { %v1381_v59 = vpop.f32.mrb[24].mxu1 }
 0xaec   :  { %v9334_v4 = vpop.f32.mrb[25].mxu1  ;;  %v12008_v6 = vadd.f32 %v1450_v49, %v1381_v59 }
 0xaed   :  { %v1384_v7 = vpop.f32.mrb[26].mxu1 }
 0xaee   :  { %v9335_v1 = vpop.f32.mrb[27].mxu1  ;;  %v12010_v13 = vadd.f32 %v1453_v36, %v1384_v7 }
 0xaf3   :  { %v1389_v16 = vpop.f32.mrb[28].mxu1 }
 0xaf4   :  { %v9338_v9 = vpop.f32.mrb[29].mxu1  ;;  %v12012_v11 = vadd.f32 %v1458_v39, %v1389_v16 }
 0xaf5   :  { %v1392_v12 = vpop.f32.mrb[30].mxu1 }
 0xaf6   :  { %v9339_v17 = vpop.f32.mrb[31].mxu1  ;;  %v12014_v19 = vadd.f32 %v1461_v42, %v1392_v12 }
 0xafb   :  { %v1397_v20 = vpop.f32.mrb[32].mxu1 }
 0xafc   :  { %v12016_v56 = vadd.f32 %v1466_v44, %v1397_v20  ;;  %v9342_v60 = vpop.f32.mrb[33].mxu1 }
 0xafd   :  { %v1400_v62 = vpop.f32.mrb[34].mxu1 }
 0xafe   :  { %v12018_v54 = vadd.f32 %v1469_v47, %v1400_v62  ;;  %v9343_v3 = vpop.f32.mrb[35].mxu1 }
 0xb03   :  { %v9364_v50 = vpop.f32.mrb[36].mxu1 }
 0xb04   :  { %v1527_v21 = vpop.f32.mrb[37].mxu1  ;;  %v1615_v33 = vsel %vm808_vm4, %v9364_v50, -inf }
 0xb05   :  { %v9365_v22 = vpop.f32.mrb[38].mxu1  ;;  %v1609_v28 = vsel %vm808_vm4, %v1527_v21, -inf }
 0xb06   :  { %1610 = vmax.xlane.f32.xlu0 %v1609_v28  ;;  %v1530_v29 = vpop.f32.mrb[39].mxu1 }
 0xb07   :  { %v1612_v30 = vsel %vm808_vm4, %v1530_v29, -inf }
 0xb08   :  { %1613 = vmax.xlane.f32.xlu1 %v1612_v30 }
 0xb0a   :  { %1616 = vmax.xlane.f32.xlu0 %v1615_v33 }
 0xb0c   :  { %1625 = vmax.xlane.f32.xlu1 %v1624_v63 }
 0xb0e   :  { %1619 = vmax.xlane.f32.xlu0 %v1618_v55 }
 0xb12   :  { %1622 = vmax.xlane.f32.xlu0 %v1621_v5 }
 0xb93   :  { %v1611_v49 = vpop.xlane.xlu0 %1610 }
 0xb94   :  { %v1627_v48 = vsub.f32 %v1527_v21, %v1611_v49 }
 0xb95   :  { %v1614_v34 = vpop.xlane.xlu1 %1613 }
 0xb96   :  { %v1633_v4 = vmul.f32 1.442695, %v1627_v48  ;;  %v1628_v60 = vsub.f32 %v1530_v29, %v1614_v34 }
 0xb97   :  { %v1617_v36 = vpop.xlane.xlu0 %1616 }
 0xb98   :  { %v1629_v42 = vsub.f32 %v9364_v50, %v1617_v36  ;;  %v1635_v62 = vmul.f32 1.442695, %v1628_v60 }
 0xb99   :  { %v1626_v37 = vpop.xlane.xlu1 %1625 }
 0xb9a   :  { %v1632_v38 = vsub.f32 %v9372_v51, %v1626_v37  ;;  %v1637_v41 = vmul.f32 1.442695, %v1629_v42 }
 0xb9b   :  { %v1620_v39 = vpop.xlane.xlu0 %1619 }
 0xb9c   :  { %v1630_v40 = vsub.f32 %v1595_v52, %v1620_v39  ;;  %v1643_v43 = vmul.f32 1.442695, %v1632_v38 }
 0xb9e   :  { %v1639_v44 = vmul.f32 1.442695, %v1630_v40 }
 0xb9f   :  { %v1623_v46 = vpop.xlane.xlu0 %1622 }
 0xba0   :  { %10368 = vpow2.f32 %v1639_v44  ;;  %v1631_v47 = vsub.f32 %v1598_v53, %v1623_v46 }
 0xba1   :  { %10370 = vpow2.f32 %v1643_v43 }
 0xba2   :  { %v1641_v59 = vmul.f32 1.442695, %v1631_v47 }
 0xba4   :  { %10372 = vpow2.f32 %v1641_v59 }
 0xba5   :  { %10374 = vpow2.f32 %v1637_v41 }
 0xba6   :  { %10376 = vpow2.f32 %v1633_v4 }
 0xba7   :  { %10378 = vpow2.f32 %v1635_v62 }
 0xbaa   :  { %v10369_v7 = vpop.eup %10368 }
 0xbab   :  { %v1654_v1 = vsel %vm808_vm4, %v10369_v7, 0.0  ;;  %v12027_v51 = vpop.eup %10370 }
 0xbac   :  { %1655 = vadd.xlane.f32.xlu1 %v1654_v1  ;;  %v1660_v53 = vsel %vm808_vm4, %v12027_v51, 0.0 }
 0xbae   :  { %v10373_v52 = vpop.eup %10372 }
 0xbaf   :  { %v1657_v16 = vsel %vm808_vm4, %v10373_v52, 0.0  ;;  %v12032_v9 = vpop.eup %10374 }
 0xbb0   :  { %1658 = vadd.xlane.f32.xlu0 %v1657_v16  ;;  %1661 = vadd.xlane.f32.xlu1 %v1660_v53  ;;  %v1651_v12 = vsel %vm808_vm4, %v12032_v9, 0.0  ;;  %v12036_v17 = vpop.eup %10376  ;;  %v670_v16 = vld [vmem:[#allocation14 + $0x8] sm:$0xf] }
 0xbb1   :  { %v1645_v20 = vsel %vm808_vm4, %v12036_v17, 0.0  ;;  %v10379_v3 = vpop.eup %10378  ;;  %v1816_v60 = vsel %vm333_vm1, %v670_v16, 0 }
 0xbb2   :  { %v1648_v50 = vsel %vm808_vm4, %v10379_v3, 0.0 }
 0xbb4   :  { %1652 = vadd.xlane.f32.xlu0 %v1651_v12 }
 0xbb8   :  { %1646 = vadd.xlane.f32.xlu0 %v1645_v20 }
 0xbc1   :  { %1681 = vrot.lane.b32.xlu1 %v11834_v2, %s11295_s9 }
 0xbc5   :  { %1741 = vrot.lane.b32.xlu1 %v11819_v45, %s11295_s9 }
 0xbce   :  { %1679 = vrot.lane.b32.xlu0 %v11804_v25, %s11295_s9 }
 0xbd2   :  { %1885 = vrot.lane.b32.xlu0 %v11802_v23, %s11296_s6 }
 0xbd6   :  { %1953 = vrot.lane.b32.xlu0 %v11817_v57, %s11296_s6 }
 0xbda   :  { %1883 = vrot.lane.b32.xlu0 %v11810_v31, %s11297_s13 }
 0xbde   :  { %1949 = vrot.lane.b32.xlu0 %v11817_v57, %s11297_s13 }
 0xbe9   :  { %1649 = vadd.xlane.f32.xlu1 %v1648_v50 }
 0xbfa   :  { %1743 = vrot.lane.b32.xlu1 %v11881_v26, %s11295_s9 }
 0xbfe   :  { %1887 = vrot.lane.b32.xlu1 %v11810_v31, %s11296_s6 }
 0xc02   :  { %1881 = vrot.lane.b32.xlu1 %v11802_v23, %s11297_s13 }
 0xc06   :  { %1955 = vrot.lane.b32.xlu1 %v11825_v58, %s11296_s6 }
 0xc0a   :  { %1951 = vrot.lane.b32.xlu1 %v11825_v58, %s11297_s13 }
 0xc39   :  { %v1656_v21 = vpop.xlane.xlu1 %1655 }
 0xc3a   :  { %10380 = vrcp.f32 %v1656_v21 }
 0xc3d   :  { %v1659_v22 = vpop.xlane.xlu0 %1658  ;;  %v1662_v28 = vpop.xlane.xlu1 %1661 }
 0xc3e   :  { %10382 = vrcp.f32 %v1659_v22 }
 0xc3f   :  { %10384 = vrcp.f32 %v1662_v28 }
 0xc41   :  { %v1653_v29 = vpop.xlane.xlu0 %1652  ;;  %v1682_v30 = vpop.permute.xlu1 %1681 }
 0xc42   :  { %v1691_v38 = vsel %vm333_vm1, %v1682_v30, 0  ;;  %10386 = vrcp.f32 %v1653_v29 }
 0xc44   :  { %v10381_v55 = vpop.eup %10380 }
 0xc45   :  { %v1647_v33 = vpop.xlane.xlu0 %1646  ;;  %v1742_v63 = vpop.permute.xlu1 %1741  ;;  %v1672_v34 = vmul.f32 %v10381_v55, %v10369_v7 }
 0xc46   :  { %9382 = vmatprep.subr.bf16.mxu0 %v1742_v63  ;;  %10388 = vrcp.f32 %v1647_v33 }
 0xc47   :  { %9383 = vmatpush3.bf16.msra.mxu0 %v1742_v63 }
 0xc48   :  { %v10383_v5 = vpop.eup %10382 }
 0xc49   :  { %v1680_v49 = vpop.permute.xlu0 %1679  ;;  %v1673_v36 = vmul.f32 %v10383_v5, %v10373_v52  ;;  %v10385_v39 = vpop.eup %10384 }
 0xc4a   :  { %9374 = vmatprep.subr.bf16.mxu1 %v1680_v49  ;;  %v1674_v42 = vmul.f32 %v10385_v39, %v12027_v51 }
 0xc4b   :  { %9375 = vmatpush3.bf16.msra.mxu1 %v1680_v49  ;;  %v1677_v37 = vpack.c.bf16 %v1673_v36, %v1672_v34 }
 0xc4c   :  { %10134 = vmatprep.subr.msk.bf16.mxu1 %vm333_vm1, %v1682_v30  ;;  %v1678_v47 = vpack.c.bf16 %v1674_v42, %v1674_v42  ;;  %v10387_v48 = vpop.eup %10386 }
 0xc4d   :  { %9386 = vmatprep.mubr.msk.bf16.mxu0 %vm808_vm4, %v1677_v37  ;;  %v1886_v46 = vpop.permute.xlu0 %1885  ;;  %v1671_v7 = vmul.f32 %v10387_v48, %v12032_v9 }
 0xc4e   :  { %v1896_v53 = vsel %vm323_vm2, %v1886_v46, 0 }
 0xc4f   :  { %9377 = vmatpush3.bf16.msra.mxu1 %v1691_v38  ;;  %v1676_v20 = vpack.c.bf16 %v1671_v7, %v1671_v7 }
 0xc50   :  { %9390 = vmatprep.subr.bf16.mxu1 %v11289_v0  ;;  %v10389_v59 = vpop.eup %10388 }
 0xc51   :  { %v1669_v51 = vmul.f32 %v10389_v59, %v12036_v17  ;;  %v1954_v9 = vpop.permute.xlu0 %1953 }
 0xc52   :  { %v1964_v49 = vsel %vm323_vm2, %v1954_v9, 0 }
 0xc55   :  { %v1884_v62 = vpop.permute.xlu0 %1883 }
 0xc76   :  { %v1650_v40 = vpop.xlane.xlu1 %1649 }
 0xc77   :  { %10390 = vrcp.f32 %v1650_v40 }
 0xc7a   :  { %v1744_v43 = vpop.permute.xlu1 %1743 }
 0xc7b   :  { %10135 = vmatprep.subr.msk.bf16.mxu0 %vm333_vm1, %v1744_v43  ;;  %v1753_v44 = vsel %vm333_vm1, %v1744_v43, 0 }
 0xc7c   :  { %9385 = vmatpush3.bf16.msra.mxu0 %v1753_v44 }
 0xc7d   :  { %10136 = vmatprep.subr.msk.bf16.mxu0 %vm323_vm2, %v1886_v46  ;;  %v1950_v46 = vpop.permute.xlu0 %1949 }
 0xc7e   :  { %v1888_v41 = vpop.permute.xlu1 %1887 }
 0xc7f   :  { %9387 = vmatmul.mubr.msk.bf16.vlgmr.msra.gmra.mrb[48].mxu0 %vm808_vm4, %v1678_v47  ;;  %v1899_v17 = vsel %vm323_vm2, %v1888_v41, 0 }
 0xc81   :  { %v10391_v4 = vpop.eup %10390 }
 0xc82   :  { %v1882_v1 = vpop.permute.xlu1 %1881  ;;  %v1670_v52 = vmul.f32 %v10391_v4, %v10379_v3 }
 0xc83   :  { %9408 = vmatprep.mubr.msk.bf16.mxu0 %vm323_vm2, %v1882_v1 }
 0xc84   :  { %v1675_v12 = vpack.c.bf16 %v1670_v52, %v1669_v51 }
 0xc85   :  { %9405 = vmatpush3.bf16.xpose.msra.mxu0 %v1896_v53 }
 0xc86   :  { %9378 = vmatprep.mubr.msk.bf16.mxu1 %vm808_vm4, %v1675_v12  ;;  %10137 = vmatprep.subr.msk.bf16.mxu0 %vm323_vm2, %v1888_v41  ;;  %v1956_v34 = vpop.permute.xlu1 %1955 }
 0xc87   :  { %9379 = vmatmul.mubr.msk.bf16.vlgmr.msra.gmra.mrb[40].mxu1 %vm808_vm4, %v1676_v20  ;;  %v1967_v38 = vsel %vm323_vm2, %v1956_v34, 0 }
 0xc88   :  { %9391 = vmatpush3.bf16.msra.mxu1 %v1816_v60  ;;  %9392 = vmatprep.mubr.msk.bf16.mxu1 %vm11290_vm0, %v11289_v0 }
 0xc89   :  { %10138 = vmatprep.subr.msk.bf16.mxu1 %vm323_vm2, %v1954_v9 }
 0xc8a   :  { %v1952_v47 = vpop.permute.xlu1 %1951 }
 0xc8d   :  { %9407 = vmatpush3.bf16.xpose.msra.mxu0 %v1899_v17 }
 0xc94   :  { %9409 = vmatmul.mubr.msk.bf16.vlgmr.msra.gmra.mrb[52].mxu0 %vm323_vm2, %v1884_v62 }
 0xd52   :  { %v9388_v3 = vpop.f32.mrb[48].mxu0 }
 0xd53   :  { %v1789_v50 = vpop.f32.mrb[49].mxu0 }
 0xd54   :  { %v9389_v21 = vpop.f32.mrb[50].mxu0 }
 0xd55   :  { %v1792_v22 = vpop.f32.mrb[51].mxu0 }
 0xd56   :  { %v1805_v28 = vpack.c.bf16 %v9388_v3, %v1792_v22 }
 0xd5a   :  { %v9380_v29 = vpop.f32.mrb[40].mxu1 }
 0xd5b   :  { %v1804_v30 = vpack.c.bf16 %v1789_v50, %v9380_v29  ;;  %v1727_v33 = vpop.f32.mrb[41].mxu1 }
 0xd5c   :  { %v9381_v63 = vpop.f32.mrb[42].mxu1 }
 0xd5d   :  { %v1730_v55 = vpop.f32.mrb[43].mxu1 }
 0xd5e   :  { %v1803_v5 = vpack.c.bf16 %v1730_v55, %v1727_v33 }
 0xd60   :  { %9393 = vmatmul.mubr.msk.bf16.vlgmr.msra.gmra.mrb[44].mxu1 %vm323_vm2, %v1803_v5 }
 0xd61   :  { %9413 = vmatpush3.bf16.xpose.msra.mxu1 %v1964_v49  ;;  %9396 = vmatprep.mubr.msk.bf16.mxu1 %vm11290_vm0, %v11289_v0 }
 0xd62   :  { %10139 = vmatprep.subr.msk.bf16.mxu1 %vm323_vm2, %v1956_v34 }
 0xd67   :  { %v9410_v36 = vpop.f32.mrb[52].mxu0 }
 0xd68   :  { %9397 = vmatmul.mubr.msk.bf16.gmra.mrb[48].mxu1 %vm323_vm2, %v1804_v30  ;;  %v1935_v37 = vpop.f32.mrb[53].mxu0  ;;  %v2023_v44 = vsel %vm808_vm4, %v9410_v36, -inf }
 0xd69   :  { %9415 = vmatpush3.bf16.xpose.msra.mxu1 %v1967_v38  ;;  %v9411_v39 = vpop.f32.mrb[54].mxu0  ;;  %v2017_v40 = vsel %vm808_vm4, %v1935_v37, -inf  ;;  %9400 = vmatprep.mubr.msk.bf16.mxu1 %vm11290_vm0, %v11289_v0 }
 0xd6a   :  { %2018 = vmax.xlane.f32.xlu0 %v2017_v40  ;;  %v1938_v42 = vpop.f32.mrb[55].mxu0  ;;  %9436 = vmatprep.subr.bf16.mxu1 %v11289_v0 }
 0xd6b   :  { %v2020_v43 = vsel %vm808_vm4, %v1938_v42, -inf }
 0xd6c   :  { %2021 = vmax.xlane.f32.xlu1 %v2020_v43 }
 0xd6e   :  { %2024 = vmax.xlane.f32.xlu0 %v2023_v44 }
 0xd70   :  { %9401 = vmatmul.mubr.msk.bf16.gmra.mrb[52].mxu1 %vm323_vm2, %v1805_v28 }
 0xd71   :  { %9416 = vmatprep.mubr.msk.bf16.mxu1 %vm323_vm2, %v1950_v46 }
 0xd78   :  { %9417 = vmatmul.mubr.msk.bf16.vlgmr.msra.gmra.mrb[56].mxu1 %vm323_vm2, %v1952_v47 }
 0xd79   :  { %9438 = vmatprep.mubr.msk.bf16.mxu1 %vm11290_vm0, %v11289_v0 }
 0xdf7   :  { %v2019_v52 = vpop.xlane.xlu0 %2018 }
 0xdf8   :  { %v2035_v62 = vsub.f32 %v1935_v37, %v2019_v52 }
 0xdf9   :  { %v2022_v51 = vpop.xlane.xlu1 %2021 }
 0xdfa   :  { %v2036_v16 = vsub.f32 %v1938_v42, %v2022_v51  ;;  %v2041_v50 = vmul.f32 1.442695, %v2035_v62 }
 0xdfb   :  { %v2025_v3 = vpop.xlane.xlu0 %2024 }
 0xdfc   :  { %v2043_v17 = vmul.f32 1.442695, %v2036_v16  ;;  %v2037_v21 = vsub.f32 %v9410_v36, %v2025_v3 }
 0xdfe   :  { %10392 = vpow2.f32 %v2043_v17 }
 0xdff   :  { %10394 = vpow2.f32 %v2041_v50 }
 0xe08   :  { %v10393_v5 = vpop.eup %10392 }
 0xe09   :  { %v2056_v36 = vsel %vm808_vm4, %v10393_v5, 0.0  ;;  %v10395_v37 = vpop.eup %10394 }
 0xe0a   :  { %v2053_v38 = vsel %vm808_vm4, %v10395_v37, 0.0 }
 0xe33   :  { %v1852_v48 = vpop.f32.mrb[44].mxu1 }
 0xe34   :  { %v12106_v41 = vadd.f32 %v1852_v48, %v12008_v6  ;;  %v9394_v59 = vpop.f32.mrb[45].mxu1 }
 0xe35   :  { %v1855_v4 = vpop.f32.mrb[46].mxu1 }
 0xe36   :  { %v12109_v7 = vadd.f32 %v1855_v4, %v12010_v13  ;;  %v9395_v1 = vpop.f32.mrb[47].mxu1 }
 0xe3b   :  { %v1860_v53 = vpop.f32.mrb[48].mxu1 }
 0xe3c   :  { %v12112_v12 = vadd.f32 %v1860_v53, %v12012_v11  ;;  %v9398_v20 = vpop.f32.mrb[49].mxu1 }
 0xe3d   :  { %v1863_v60 = vpop.f32.mrb[50].mxu1 }
 0xe3e   :  { %v12115_v9 = vadd.f32 %v1863_v60, %v12014_v19  ;;  %v9399_v6 = vpop.f32.mrb[51].mxu1  ;;  %v2045_v19 = vmul.f32 1.442695, %v2037_v21 }
 0xe40   :  { %10396 = vpow2.f32 %v2045_v19 }
 0xe43   :  { %v1868_v13 = vpop.f32.mrb[52].mxu1 }
 0xe44   :  { %v12118_v22 = vadd.f32 %v1868_v13, %v12016_v56  ;;  %v9402_v28 = vpop.f32.mrb[53].mxu1 }
 0xe45   :  { %v1871_v29 = vpop.f32.mrb[54].mxu1  ;;  %v671_v28 = vld [vmem:[#allocation14 + $0xc] sm:$0xf] }
 0xe46   :  { %v12121_v11 = vadd.f32 %v1871_v29, %v12018_v54  ;;  %v9403_v30 = vpop.f32.mrb[55].mxu1  ;;  %v2224_v29 = vsel %vm333_vm1, %v671_v28, 0 }
 0xe47   :  { %9437 = vmatpush3.bf16.msra.mxu1 %v2224_v29 }
 0xe4a   :  { %v12128_v39 = vpop.eup %10396 }
 0xe4b   :  { %v9418_v33 = vpop.f32.mrb[56].mxu1  ;;  %v2059_v40 = vsel %vm808_vm4, %v12128_v39, 0.0 }
 0xe4c   :  { %v2003_v63 = vpop.f32.mrb[57].mxu1  ;;  %v2032_v55 = vsel %vm808_vm4, %v9418_v33, -inf }
 0xe4d   :  { %2033 = vmax.xlane.f32.xlu1 %v2032_v55  ;;  %v9419_v49 = vpop.f32.mrb[58].mxu1  ;;  %v2026_v34 = vsel %vm808_vm4, %v2003_v63, -inf }
 0xe4e   :  { %2027 = vmax.xlane.f32.xlu0 %v2026_v34  ;;  %v2006_v56 = vpop.f32.mrb[59].mxu1 }
 0xe4f   :  { %v2029_v54 = vsel %vm808_vm4, %v2006_v56, -inf }
 0xe51   :  { %2057 = vadd.xlane.f32.xlu1 %v2056_v36 }
 0xe52   :  { %2030 = vmax.xlane.f32.xlu0 %v2029_v54 }
 0xe56   :  { %2054 = vadd.xlane.f32.xlu0 %v2053_v38 }
 0xe5a   :  { %2060 = vadd.xlane.f32.xlu0 %v2059_v40 }
 0xeda   :  { %v2034_v42 = vpop.xlane.xlu1 %2033 }
 0xedb   :  { %v2040_v43 = vsub.f32 %v9418_v33, %v2034_v42  ;;  %v2028_v44 = vpop.xlane.xlu0 %2027 }
 0xedc   :  { %v2038_v46 = vsub.f32 %v2003_v63, %v2028_v44 }
 0xedd   :  { %v2051_v47 = vmul.f32 1.442695, %v2040_v43 }
 0xede   :  { %v2047_v48 = vmul.f32 1.442695, %v2038_v46  ;;  %v2058_v4 = vpop.xlane.xlu1 %2057 }
 0xedf   :  { %10398 = vpow2.f32 %v2051_v47  ;;  %v2031_v59 = vpop.xlane.xlu0 %2030 }
 0xee0   :  { %v2039_v1 = vsub.f32 %v2006_v56, %v2031_v59  ;;  %10400 = vpow2.f32 %v2047_v48 }
 0xee1   :  { %10402 = vrcp.f32 %v2058_v4 }
 0xee2   :  { %v2049_v51 = vmul.f32 1.442695, %v2039_v1 }
 0xee3   :  { %v2055_v52 = vpop.xlane.xlu0 %2054 }
 0xee4   :  { %10404 = vpow2.f32 %v2049_v51 }
 0xee5   :  { %10406 = vrcp.f32 %v2055_v52 }
 0xee7   :  { %v2061_v30 = vpop.xlane.xlu0 %2060 }
 0xee8   :  { %10408 = vrcp.f32 %v2061_v30 }
 0xee9   :  { %v12132_v16 = vpop.eup %10398 }
 0xeea   :  { %v2068_v53 = vsel %vm808_vm4, %v12132_v16, 0.0  ;;  %v10401_v20 = vpop.eup %10400 }
 0xeeb   :  { %2069 = vadd.xlane.f32.xlu1 %v2068_v53  ;;  %v10403_v60 = vpop.eup %10402  ;;  %v2062_v17 = vsel %vm808_vm4, %v10401_v20, 0.0 }
 0xeec   :  { %v2078_v50 = vmul.f32 %v10403_v60, %v10393_v5 }
 0xeee   :  { %v10405_v6 = vpop.eup %10404 }
 0xeef   :  { %v10407_v62 = vpop.eup %10406  ;;  %2063 = vadd.xlane.f32.xlu1 %v2062_v17  ;;  %v2065_v3 = vsel %vm808_vm4, %v10405_v6, 0.0 }
 0xef0   :  { %2066 = vadd.xlane.f32.xlu0 %v2065_v3  ;;  %v2077_v13 = vmul.f32 %v10407_v62, %v10395_v37 }
 0xef2   :  { %v2083_v21 = vpack.c.bf16 %v2078_v50, %v2077_v13  ;;  %v10409_v5 = vpop.eup %10408 }
 0xef3   :  { %v2079_v56 = vmul.f32 %v10409_v5, %v12128_v39 }
 0xef4   :  { %9424 = vmatprep.mubr.msk.bf16.mxu0 %vm808_vm4, %v2083_v21 }
 0xef5   :  { %v2084_v42 = vpack.c.bf16 %v2079_v56, %v2079_v56 }
 0xf00   :  { %2089 = vrot.lane.b32.xlu1 %v11834_v2, %s11297_s13 }
 0xf04   :  { %2149 = vrot.lane.b32.xlu1 %v11819_v45, %s11297_s13 }
 0xf06   :  { %2087 = vrot.lane.b32.xlu0 %v11804_v25, %s11297_s13 }
 0xf08   :  { %2151 = vrot.lane.b32.xlu1 %v11881_v26, %s11297_s13 }
 0xf0a   :  { %2293 = vrot.lane.b32.xlu0 %v11802_v23, %s11281_s4 }
 0xf0c   :  { %2295 = vrot.lane.b32.xlu1 %v11810_v31, %s11281_s4 }
 0xf0e   :  { %2361 = vrot.lane.b32.xlu0 %v11817_v57, %s11281_s4 }
 0xf10   :  { %2289 = vrot.lane.b32.xlu1 %v11802_v23, %s11298_s20 }
 0xf12   :  { %2291 = vrot.lane.b32.xlu0 %v11810_v31, %s11298_s20 }
 0xf14   :  { %2363 = vrot.lane.b32.xlu1 %v11825_v58, %s11281_s4 }
 0xf16   :  { %2357 = vrot.lane.b32.xlu0 %v11817_v57, %s11298_s20 }
 0xf18   :  { %2359 = vrot.lane.b32.xlu1 %v11825_v58, %s11298_s20 }
 0xf78   :  { %v2070_v19 = vpop.xlane.xlu1 %2069 }
 0xf7c   :  { %v2064_v33 = vpop.xlane.xlu1 %2063 }
 0xf7d   :  { %10410 = vrcp.f32 %v2064_v33  ;;  %v2067_v63 = vpop.xlane.xlu0 %2066 }
 0xf7e   :  { %10412 = vrcp.f32 %v2067_v63 }
 0xf7f   :  { %10414 = vrcp.f32 %v2070_v19 }
 0xf80   :  { %v2090_v55 = vpop.permute.xlu1 %2089 }
 0xf81   :  { %v2088_v49 = vpop.permute.xlu0 %2087  ;;  %v2099_v54 = vsel %vm333_vm1, %v2090_v55, 0 }
 0xf82   :  { %9420 = vmatprep.subr.bf16.mxu0 %v2088_v49 }
 0xf83   :  { %9421 = vmatpush3.bf16.msra.mxu0 %v2088_v49 }
 0xf84   :  { %10140 = vmatprep.subr.msk.bf16.mxu0 %vm333_vm1, %v2090_v55  ;;  %v2150_v34 = vpop.permute.xlu1 %2149 }
 0xf85   :  { %v2294_v36 = vpop.permute.xlu0 %2293 }
 0xf86   :  { %v2304_v52 = vsel %vm323_vm2, %v2294_v36, 0 }
 0xf87   :  { %v10411_v37 = vpop.eup %10410  ;;  %9423 = vmatpush3.bf16.msra.mxu0 %v2099_v54 }
 0xf88   :  { %v10413_v38 = vpop.eup %10412  ;;  %9428 = vmatprep.subr.bf16.mxu0 %v2150_v34  ;;  %v2152_v40 = vpop.permute.xlu1 %2151  ;;  %v2080_v43 = vmul.f32 %v10411_v37, %v10401_v20 }
 0xf89   :  { %v10415_v44 = vpop.eup %10414  ;;  %v2362_v46 = vpop.permute.xlu0 %2361  ;;  %v2081_v47 = vmul.f32 %v10413_v38, %v10405_v6  ;;  %v2161_v4 = vsel %vm333_vm1, %v2152_v40, 0 }
 0xf8a   :  { %9425 = vmatmul.mubr.msk.bf16.vlgmr.msra.gmra.mrb[56].mxu0 %vm808_vm4, %v2084_v42  ;;  %10144 = vmatprep.subr.msk.bf16.mxu1 %vm323_vm2, %v2362_v46  ;;  %v2082_v59 = vmul.f32 %v10415_v44, %v12132_v16  ;;  %v2372_v3 = vsel %vm323_vm2, %v2362_v46, 0 }
 0xf8b   :  { %9429 = vmatpush3.bf16.msra.mxu0 %v2150_v34  ;;  %v2085_v48 = vpack.c.bf16 %v2081_v47, %v2080_v43 }
 0xf8c   :  { %10141 = vmatprep.subr.msk.bf16.mxu0 %vm333_vm1, %v2152_v40  ;;  %v2296_v39 = vpop.permute.xlu1 %2295  ;;  %v2086_v1 = vpack.c.bf16 %v2082_v59, %v2082_v59 }
 0xf8d   :  { %9432 = vmatprep.mubr.msk.bf16.mxu0 %vm808_vm4, %v2085_v48  ;;  %v2307_v16 = vsel %vm323_vm2, %v2296_v39, 0  ;;  %v2292_v53 = vpop.permute.xlu0 %2291 }
 0xf8f   :  { %9431 = vmatpush3.bf16.msra.mxu0 %v2161_v4 }
 0xf90   :  { %10142 = vmatprep.subr.msk.bf16.mxu0 %vm323_vm2, %v2294_v36  ;;  %v2290_v51 = vpop.permute.xlu1 %2289 }
 0xf91   :  { %v2358_v63 = vpop.permute.xlu0 %2357 }
 0xf92   :  { %9433 = vmatmul.mubr.msk.bf16.vlgmr.msra.gmra.mrb[60].mxu0 %vm808_vm4, %v2086_v1 }
 0xf93   :  { %9454 = vmatprep.mubr.msk.bf16.mxu0 %vm323_vm2, %v2290_v51 }
 0xf94   :  { %v2364_v13 = vpop.permute.xlu1 %2363 }
 0xf95   :  { %v2375_v33 = vsel %vm323_vm2, %v2364_v13, 0 }
 0xf98   :  { %9451 = vmatpush3.bf16.xpose.msra.mxu0 %v2304_v52  ;;  %v2360_v55 = vpop.permute.xlu1 %2359 }
 0xf99   :  { %10143 = vmatprep.subr.msk.bf16.mxu0 %vm323_vm2, %v2296_v39 }
 0xfa0   :  { %9453 = vmatpush3.bf16.xpose.msra.mxu0 %v2307_v16 }
 0xfa7   :  { %9455 = vmatmul.mubr.msk.bf16.vlgmr.msra.gmra.mrb[64].mxu0 %vm323_vm2, %v2292_v53 }
0x105d   :  { %v9426_v20 = vpop.f32.mrb[56].mxu0 }
0x105e   :  { %v2135_v60 = vpop.f32.mrb[57].mxu0 }
0x105f   :  { %v9427_v6 = vpop.f32.mrb[58].mxu0 }
0x1060   :  { %v2138_v17 = vpop.f32.mrb[59].mxu0 }
0x1061   :  { %v2211_v62 = vpack.c.bf16 %v2138_v17, %v2135_v60 }
0x1063   :  { %9439 = vmatmul.mubr.msk.bf16.vlgmr.msra.gmra.mrb[60].mxu1 %vm323_vm2, %v2211_v62 }
0x1064   :  { %9459 = vmatpush3.bf16.xpose.msra.mxu1 %v2372_v3  ;;  %9442 = vmatprep.mubr.msk.bf16.mxu1 %vm11290_vm0, %v11289_v0 }
0x1065   :  { %10145 = vmatprep.subr.msk.bf16.mxu1 %vm323_vm2, %v2364_v13  ;;  %v9434_v50 = vpop.f32.mrb[60].mxu0 }
0x1066   :  { %v2197_v21 = vpop.f32.mrb[61].mxu0 }
0x1067   :  { %v2212_v28 = vpack.c.bf16 %v2197_v21, %v9426_v20  ;;  %v9435_v29 = vpop.f32.mrb[62].mxu0 }
0x1068   :  { %v2200_v30 = vpop.f32.mrb[63].mxu0 }
0x1069   :  { %v2213_v19 = vpack.c.bf16 %v9434_v50, %v2200_v30 }
0x106b   :  { %9443 = vmatmul.mubr.msk.bf16.gmra.mrb[64].mxu1 %vm323_vm2, %v2212_v28 }
0x106c   :  { %9461 = vmatpush3.bf16.xpose.msra.mxu1 %v2375_v33  ;;  %9446 = vmatprep.mubr.msk.bf16.mxu1 %vm11290_vm0, %v11289_v0 }
0x106d   :  { %9482 = vmatprep.subr.bf16.mxu1 %v11289_v0 }
0x1073   :  { %9447 = vmatmul.mubr.msk.bf16.gmra.mrb[68].mxu1 %vm323_vm2, %v2213_v19 }
0x1074   :  { %9462 = vmatprep.mubr.msk.bf16.mxu1 %vm323_vm2, %v2358_v63 }
0x107a   :  { %v9456_v5 = vpop.f32.mrb[64].mxu0 }
0x107b   :  { %v2343_v49 = vpop.f32.mrb[65].mxu0  ;;  %9463 = vmatmul.mubr.msk.bf16.vlgmr.msra.gmra.mrb[72].mxu1 %vm323_vm2, %v2360_v55  ;;  %v2431_v37 = vsel %vm808_vm4, %v9456_v5, -inf }
0x107c   :  { %v9457_v34 = vpop.f32.mrb[66].mxu0  ;;  %v2425_v56 = vsel %vm808_vm4, %v2343_v49, -inf  ;;  %9484 = vmatprep.mubr.msk.bf16.mxu1 %vm11290_vm0, %v11289_v0 }
0x107d   :  { %2426 = vmax.xlane.f32.xlu0 %v2425_v56  ;;  %v2346_v36 = vpop.f32.mrb[67].mxu0 }
0x107e   :  { %v2428_v54 = vsel %vm808_vm4, %v2346_v36, -inf }
0x107f   :  { %2429 = vmax.xlane.f32.xlu1 %v2428_v54 }
0x1081   :  { %2432 = vmax.xlane.f32.xlu0 %v2431_v37 }
0x110a   :  { %v2427_v48 = vpop.xlane.xlu0 %2426 }
0x110b   :  { %v2443_v53 = vsub.f32 %v2343_v49, %v2427_v48 }
0x110c   :  { %v2430_v47 = vpop.xlane.xlu1 %2429 }
0x110d   :  { %v2444_v39 = vsub.f32 %v2346_v36, %v2430_v47  ;;  %v2449_v60 = vmul.f32 1.442695, %v2443_v53 }
0x110e   :  { %v2433_v20 = vpop.xlane.xlu0 %2432 }
0x110f   :  { %v2451_v16 = vmul.f32 1.442695, %v2444_v39  ;;  %v2445_v6 = vsub.f32 %v9456_v5, %v2433_v20 }
0x1111   :  { %10416 = vpow2.f32 %v2451_v16 }
0x1112   :  { %10418 = vpow2.f32 %v2449_v60 }
0x111b   :  { %v10417_v29 = vpop.eup %10416 }
0x111c   :  { %v2464_v33 = vsel %vm808_vm4, %v10417_v29, 0.0  ;;  %v10419_v63 = vpop.eup %10418 }
0x111d   :  { %v2461_v55 = vsel %vm808_vm4, %v10419_v63, 0.0 }
0x1136   :  { %v2260_v38 = vpop.f32.mrb[60].mxu1 }
0x1137   :  { %v12199_v40 = vadd.f32 %v2260_v38, %v12106_v41  ;;  %v9440_v42 = vpop.f32.mrb[61].mxu1 }
0x1138   :  { %v2263_v43 = vpop.f32.mrb[62].mxu1 }
0x1139   :  { %v12202_v44 = vadd.f32 %v2263_v43, %v12109_v7  ;;  %v9441_v46 = vpop.f32.mrb[63].mxu1 }
0x113e   :  { %v2268_v59 = vpop.f32.mrb[64].mxu1 }
0x113f   :  { %v12205_v4 = vadd.f32 %v2268_v59, %v12112_v12  ;;  %v9444_v1 = vpop.f32.mrb[65].mxu1 }
0x1140   :  { %v2271_v51 = vpop.f32.mrb[66].mxu1 }
0x1141   :  { %v12208_v52 = vadd.f32 %v2271_v51, %v12115_v9  ;;  %v9445_v41 = vpop.f32.mrb[67].mxu1  ;;  %v2453_v9 = vmul.f32 1.442695, %v2445_v6 }
0x1143   :  { %10420 = vpow2.f32 %v2453_v9 }
0x1146   :  { %v2276_v7 = vpop.f32.mrb[68].mxu1 }
0x1147   :  { %v12211_v17 = vadd.f32 %v2276_v7, %v12118_v22  ;;  %v9448_v62 = vpop.f32.mrb[69].mxu1 }
0x1148   :  { %v2279_v3 = vpop.f32.mrb[70].mxu1  ;;  %v672_v62 = vld [vmem:[#allocation14 + $0x10] sm:$0xf] }
0x1149   :  { %v12214_v12 = vadd.f32 %v2279_v3, %v12121_v11  ;;  %v9449_v13 = vpop.f32.mrb[71].mxu1  ;;  %v2632_v3 = vsel %vm333_vm1, %v672_v62, 0 }
0x114a   :  { %9483 = vmatpush3.bf16.msra.mxu1 %v2632_v3 }
0x114d   :  { %v12221_v5 = vpop.eup %10420 }
0x114e   :  { %v9464_v50 = vpop.f32.mrb[72].mxu1  ;;  %v2467_v49 = vsel %vm808_vm4, %v12221_v5, 0.0 }
0x114f   :  { %v2411_v21 = vpop.f32.mrb[73].mxu1  ;;  %v2440_v28 = vsel %vm808_vm4, %v9464_v50, -inf }
0x1150   :  { %2441 = vmax.xlane.f32.xlu1 %v2440_v28  ;;  %v9465_v30 = vpop.f32.mrb[74].mxu1  ;;  %v2434_v19 = vsel %vm808_vm4, %v2411_v21, -inf }
0x1151   :  { %2435 = vmax.xlane.f32.xlu0 %v2434_v19  ;;  %v2414_v22 = vpop.f32.mrb[75].mxu1 }
0x1152   :  { %v2437_v11 = vsel %vm808_vm4, %v2414_v22, -inf }
0x1154   :  { %2465 = vadd.xlane.f32.xlu1 %v2464_v33 }
0x1155   :  { %2438 = vmax.xlane.f32.xlu0 %v2437_v11 }
0x1159   :  { %2462 = vadd.xlane.f32.xlu0 %v2461_v55 }
0x115d   :  { %2468 = vadd.xlane.f32.xlu0 %v2467_v49 }
0x11dd   :  { %v2442_v34 = vpop.xlane.xlu1 %2441 }
0x11de   :  { %v2448_v56 = vsub.f32 %v9464_v50, %v2442_v34  ;;  %v2436_v36 = vpop.xlane.xlu0 %2435 }
0x11df   :  { %v2446_v54 = vsub.f32 %v2411_v21, %v2436_v36 }
0x11e0   :  { %v2459_v37 = vmul.f32 1.442695, %v2448_v56 }
0x11e1   :  { %v2455_v38 = vmul.f32 1.442695, %v2446_v54  ;;  %v2466_v43 = vpop.xlane.xlu1 %2465 }
0x11e2   :  { %10422 = vpow2.f32 %v2459_v37  ;;  %v2439_v42 = vpop.xlane.xlu0 %2438 }
0x11e3   :  { %v2447_v46 = vsub.f32 %v2414_v22, %v2439_v42  ;;  %10424 = vpow2.f32 %v2455_v38 }
0x11e4   :  { %10426 = vrcp.f32 %v2466_v43 }
0x11e5   :  { %v2457_v47 = vmul.f32 1.442695, %v2447_v46 }
0x11e6   :  { %v2463_v48 = vpop.xlane.xlu0 %2462 }
0x11e7   :  { %10428 = vpow2.f32 %v2457_v47 }
0x11e8   :  { %10430 = vrcp.f32 %v2463_v48 }
0x11ea   :  { %v2469_v13 = vpop.xlane.xlu0 %2468 }
0x11eb   :  { %10432 = vrcp.f32 %v2469_v13 }
0x11ec   :  { %v12225_v39 = vpop.eup %10422 }
0x11ed   :  { %v2476_v59 = vsel %vm808_vm4, %v12225_v39, 0.0  ;;  %v10425_v1 = vpop.eup %10424 }
0x11ee   :  { %2477 = vadd.xlane.f32.xlu1 %v2476_v59  ;;  %v10427_v51 = vpop.eup %10426  ;;  %v2470_v16 = vsel %vm808_vm4, %v10425_v1, 0.0 }
0x11ef   :  { %v2486_v60 = vmul.f32 %v10427_v51, %v10417_v29 }
0x11f1   :  { %v10429_v41 = vpop.eup %10428 }
0x11f2   :  { %v10431_v53 = vpop.eup %10430  ;;  %2471 = vadd.xlane.f32.xlu1 %v2470_v16  ;;  %v2473_v20 = vsel %vm808_vm4, %v10429_v41, 0.0 }
0x11f3   :  { %2474 = vadd.xlane.f32.xlu0 %v2473_v20  ;;  %v2485_v7 = vmul.f32 %v10431_v53, %v10419_v63 }
0x11f5   :  { %v2491_v6 = vpack.c.bf16 %v2486_v60, %v2485_v7  ;;  %v10433_v29 = vpop.eup %10432 }
0x11f6   :  { %v2487_v22 = vmul.f32 %v10433_v29, %v12221_v5 }
0x11f7   :  { %9470 = vmatprep.mubr.msk.bf16.mxu0 %vm808_vm4, %v2491_v6 }
0x11f8   :  { %v2492_v34 = vpack.c.bf16 %v2487_v22, %v2487_v22 }
0x1203   :  { %2497 = vrot.lane.b32.xlu1 %v11834_v2, %s11298_s20 }
0x1207   :  { %2557 = vrot.lane.b32.xlu1 %v11819_v45, %s11298_s20 }
0x1209   :  { %2495 = vrot.lane.b32.xlu0 %v11804_v25, %s11298_s20 }
0x120b   :  { %2559 = vrot.lane.b32.xlu1 %v11881_v26, %s11298_s20 }
0x120d   :  { %2701 = vrot.lane.b32.xlu0 %v11802_v23, %s11299_s7 }
0x120f   :  { %2703 = vrot.lane.b32.xlu1 %v11810_v31, %s11299_s7 }
0x1211   :  { %2769 = vrot.lane.b32.xlu0 %v11817_v57, %s11299_s7 }
0x1213   :  { %2697 = vrot.lane.b32.xlu1 %v11802_v23, %s11300_s10 }
0x1215   :  { %2699 = vrot.lane.b32.xlu0 %v11810_v31, %s11300_s10 }
0x1217   :  { %2771 = vrot.lane.b32.xlu1 %v11825_v58, %s11299_s7 }
0x1219   :  { %2765 = vrot.lane.b32.xlu0 %v11817_v57, %s11300_s10 }
0x121b   :  { %2767 = vrot.lane.b32.xlu1 %v11825_v58, %s11300_s10 }
0x127b   :  { %v2478_v9 = vpop.xlane.xlu1 %2477 }
0x127f   :  { %v2472_v50 = vpop.xlane.xlu1 %2471 }
0x1280   :  { %10434 = vrcp.f32 %v2472_v50  ;;  %v2475_v21 = vpop.xlane.xlu0 %2474 }
0x1281   :  { %10436 = vrcp.f32 %v2475_v21 }
0x1282   :  { %10438 = vrcp.f32 %v2478_v9 }
0x1283   :  { %v2498_v28 = vpop.permute.xlu1 %2497 }
0x1284   :  { %v2496_v30 = vpop.permute.xlu0 %2495  ;;  %v2507_v11 = vsel %vm333_vm1, %v2498_v28, 0 }
0x1285   :  { %9466 = vmatprep.subr.bf16.mxu0 %v2496_v30 }
0x1286   :  { %9467 = vmatpush3.bf16.msra.mxu0 %v2496_v30 }
0x1287   :  { %10146 = vmatprep.subr.msk.bf16.mxu0 %vm333_vm1, %v2498_v28  ;;  %v2558_v19 = vpop.permute.xlu1 %2557 }
0x1288   :  { %v2702_v33 = vpop.permute.xlu0 %2701 }
0x1289   :  { %v2712_v48 = vsel %vm323_vm2, %v2702_v33, 0 }
0x128a   :  { %v10435_v63 = vpop.eup %10434  ;;  %9469 = vmatpush3.bf16.msra.mxu0 %v2507_v11 }
0x128b   :  { %v10437_v55 = vpop.eup %10436  ;;  %9474 = vmatprep.subr.bf16.mxu0 %v2558_v19  ;;  %v2560_v49 = vpop.permute.xlu1 %2559  ;;  %v2488_v56 = vmul.f32 %v10435_v63, %v10425_v1 }
0x128c   :  { %v10439_v36 = vpop.eup %10438  ;;  %v2770_v54 = vpop.permute.xlu0 %2769  ;;  %v2489_v37 = vmul.f32 %v10437_v55, %v10429_v41  ;;  %v2569_v43 = vsel %vm333_vm1, %v2560_v49, 0 }
0x128d   :  { %9471 = vmatmul.mubr.msk.bf16.vlgmr.msra.gmra.mrb[68].mxu0 %vm808_vm4, %v2492_v34  ;;  %10150 = vmatprep.subr.msk.bf16.mxu1 %vm323_vm2, %v2770_v54  ;;  %v2490_v42 = vmul.f32 %v10439_v36, %v12225_v39  ;;  %v2780_v20 = vsel %vm323_vm2, %v2770_v54, 0 }
0x128e   :  { %9475 = vmatpush3.bf16.msra.mxu0 %v2558_v19  ;;  %v2493_v38 = vpack.c.bf16 %v2489_v37, %v2488_v56 }
0x128f   :  { %10147 = vmatprep.subr.msk.bf16.mxu0 %vm333_vm1, %v2560_v49  ;;  %v2704_v5 = vpop.permute.xlu1 %2703  ;;  %v2494_v46 = vpack.c.bf16 %v2490_v42, %v2490_v42 }
0x1290   :  { %9478 = vmatprep.mubr.msk.bf16.mxu0 %vm808_vm4, %v2493_v38  ;;  %v2715_v39 = vsel %vm323_vm2, %v2704_v5, 0  ;;  %v2700_v59 = vpop.permute.xlu0 %2699 }
0x1292   :  { %9477 = vmatpush3.bf16.msra.mxu0 %v2569_v43 }
0x1293   :  { %10148 = vmatprep.subr.msk.bf16.mxu0 %vm323_vm2, %v2702_v33  ;;  %v2698_v47 = vpop.permute.xlu1 %2697 }
0x1294   :  { %v2766_v21 = vpop.permute.xlu0 %2765 }
0x1295   :  { %9479 = vmatmul.mubr.msk.bf16.vlgmr.msra.gmra.mrb[72].mxu0 %vm808_vm4, %v2494_v46 }
0x1296   :  { %9500 = vmatprep.mubr.msk.bf16.mxu0 %vm323_vm2, %v2698_v47 }
0x1297   :  { %v2772_v7 = vpop.permute.xlu1 %2771 }
0x1298   :  { %v2783_v50 = vsel %vm323_vm2, %v2772_v7, 0 }
0x129b   :  { %9497 = vmatpush3.bf16.xpose.msra.mxu0 %v2712_v48  ;;  %v2768_v28 = vpop.permute.xlu1 %2767 }
0x129c   :  { %10149 = vmatprep.subr.msk.bf16.mxu0 %vm323_vm2, %v2704_v5 }
0x12a3   :  { %9499 = vmatpush3.bf16.xpose.msra.mxu0 %v2715_v39 }
0x12aa   :  { %9501 = vmatmul.mubr.msk.bf16.vlgmr.msra.gmra.mrb[76].mxu0 %vm323_vm2, %v2700_v59 }
0x1360   :  { %v9472_v1 = vpop.f32.mrb[68].mxu0 }
0x1361   :  { %v2543_v51 = vpop.f32.mrb[69].mxu0 }
0x1362   :  { %v9473_v41 = vpop.f32.mrb[70].mxu0 }
0x1363   :  { %v2546_v16 = vpop.f32.mrb[71].mxu0 }
0x1364   :  { %v2619_v53 = vpack.c.bf16 %v2546_v16, %v2543_v51 }
0x1366   :  { %9485 = vmatmul.mubr.msk.bf16.vlgmr.msra.gmra.mrb[76].mxu1 %vm323_vm2, %v2619_v53 }
0x1367   :  { %9505 = vmatpush3.bf16.xpose.msra.mxu1 %v2780_v20  ;;  %9488 = vmatprep.mubr.msk.bf16.mxu1 %vm11290_vm0, %v11289_v0 }
0x1368   :  { %10151 = vmatprep.subr.msk.bf16.mxu1 %vm323_vm2, %v2772_v7  ;;  %v9480_v60 = vpop.f32.mrb[72].mxu0 }
0x1369   :  { %v2605_v6 = vpop.f32.mrb[73].mxu0 }
0x136a   :  { %v2620_v62 = vpack.c.bf16 %v2605_v6, %v9472_v1  ;;  %v9481_v3 = vpop.f32.mrb[74].mxu0 }
0x136b   :  { %v2608_v13 = vpop.f32.mrb[75].mxu0 }
0x136c   :  { %v2621_v9 = vpack.c.bf16 %v9480_v60, %v2608_v13 }
0x136e   :  { %9489 = vmatmul.mubr.msk.bf16.gmra.mrb[80].mxu1 %vm323_vm2, %v2620_v62 }
0x136f   :  { %9507 = vmatpush3.bf16.xpose.msra.mxu1 %v2783_v50  ;;  %9492 = vmatprep.mubr.msk.bf16.mxu1 %vm11290_vm0, %v11289_v0 }
0x1370   :  { %9528 = vmatprep.subr.bf16.mxu1 %v11289_v0 }
0x1376   :  { %9493 = vmatmul.mubr.msk.bf16.gmra.mrb[84].mxu1 %vm323_vm2, %v2621_v9 }
0x1377   :  { %9508 = vmatprep.mubr.msk.bf16.mxu1 %vm323_vm2, %v2766_v21 }
0x137d   :  { %v9502_v29 = vpop.f32.mrb[76].mxu0 }
0x137e   :  { %v2751_v30 = vpop.f32.mrb[77].mxu0  ;;  %9509 = vmatmul.mubr.msk.bf16.vlgmr.msra.gmra.mrb[88].mxu1 %vm323_vm2, %v2768_v28  ;;  %v2839_v63 = vsel %vm808_vm4, %v9502_v29, -inf }
0x137f   :  { %v9503_v19 = vpop.f32.mrb[78].mxu0  ;;  %v2833_v22 = vsel %vm808_vm4, %v2751_v30, -inf  ;;  %9530 = vmatprep.mubr.msk.bf16.mxu1 %vm11290_vm0, %v11289_v0 }
0x1380   :  { %2834 = vmax.xlane.f32.xlu0 %v2833_v22  ;;  %v2754_v33 = vpop.f32.mrb[79].mxu0 }
0x1381   :  { %v2836_v11 = vsel %vm808_vm4, %v2754_v33, -inf }
0x1382   :  { %2837 = vmax.xlane.f32.xlu1 %v2836_v11 }
0x1384   :  { %2840 = vmax.xlane.f32.xlu0 %v2839_v63 }
0x140d   :  { %v2835_v38 = vpop.xlane.xlu0 %2834 }
0x140e   :  { %v2851_v59 = vsub.f32 %v2751_v30, %v2835_v38 }
0x140f   :  { %v2838_v37 = vpop.xlane.xlu1 %2837 }
0x1410   :  { %v2852_v5 = vsub.f32 %v2754_v33, %v2838_v37  ;;  %v2857_v51 = vmul.f32 1.442695, %v2851_v59 }
0x1411   :  { %v2841_v1 = vpop.xlane.xlu0 %2840 }
0x1412   :  { %v2859_v39 = vmul.f32 1.442695, %v2852_v5  ;;  %v2853_v41 = vsub.f32 %v9502_v29, %v2841_v1 }
0x1414   :  { %10440 = vpow2.f32 %v2859_v39 }
0x1415   :  { %10442 = vpow2.f32 %v2857_v51 }
0x141e   :  { %v10441_v3 = vpop.eup %10440 }
0x141f   :  { %v2872_v50 = vsel %vm808_vm4, %v10441_v3, 0.0  ;;  %v10443_v21 = vpop.eup %10442 }
0x1420   :  { %v2869_v28 = vsel %vm808_vm4, %v10443_v21, 0.0 }
0x1439   :  { %v2668_v55 = vpop.f32.mrb[76].mxu1 }
0x143a   :  { %v12292_v49 = vadd.f32 %v2668_v55, %v12199_v40  ;;  %v9486_v34 = vpop.f32.mrb[77].mxu1 }
0x143b   :  { %v2671_v56 = vpop.f32.mrb[78].mxu1 }
0x143c   :  { %v12295_v36 = vadd.f32 %v2671_v56, %v12202_v44  ;;  %v9487_v54 = vpop.f32.mrb[79].mxu1 }
0x1441   :  { %v2676_v42 = vpop.f32.mrb[80].mxu1 }
0x1442   :  { %v12298_v43 = vadd.f32 %v2676_v42, %v12205_v4  ;;  %v9490_v46 = vpop.f32.mrb[81].mxu1 }
0x1443   :  { %v2679_v47 = vpop.f32.mrb[82].mxu1 }
0x1444   :  { %v12301_v48 = vadd.f32 %v2679_v47, %v12208_v52  ;;  %v9491_v40 = vpop.f32.mrb[83].mxu1  ;;  %v2861_v52 = vmul.f32 1.442695, %v2853_v41 }
0x1446   :  { %10444 = vpow2.f32 %v2861_v52 }
0x1449   :  { %v2684_v44 = vpop.f32.mrb[84].mxu1 }
0x144a   :  { %v12304_v16 = vadd.f32 %v2684_v44, %v12211_v17  ;;  %v9494_v53 = vpop.f32.mrb[85].mxu1 }
0x144b   :  { %v2687_v20 = vpop.f32.mrb[86].mxu1  ;;  %v673_v53 = vld [vmem:[#allocation14 + $0x14] sm:$0xf] }
0x144c   :  { %v12307_v4 = vadd.f32 %v2687_v20, %v12214_v12  ;;  %v9495_v7 = vpop.f32.mrb[87].mxu1  ;;  %v3040_v20 = vsel %vm333_vm1, %v673_v53, 0 }
0x144d   :  { %9529 = vmatpush3.bf16.msra.mxu1 %v3040_v20 }
0x1450   :  { %v12314_v29 = vpop.eup %10444 }
0x1451   :  { %v9510_v60 = vpop.f32.mrb[88].mxu1  ;;  %v2875_v30 = vsel %vm808_vm4, %v12314_v29, 0.0 }
0x1452   :  { %v2819_v6 = vpop.f32.mrb[89].mxu1  ;;  %v2848_v62 = vsel %vm808_vm4, %v9510_v60, -inf }
0x1453   :  { %2849 = vmax.xlane.f32.xlu1 %v2848_v62  ;;  %v9511_v13 = vpop.f32.mrb[90].mxu1  ;;  %v2842_v9 = vsel %vm808_vm4, %v2819_v6, -inf }
0x1454   :  { %2843 = vmax.xlane.f32.xlu0 %v2842_v9  ;;  %v2822_v17 = vpop.f32.mrb[91].mxu1 }
0x1455   :  { %v2845_v12 = vsel %vm808_vm4, %v2822_v17, -inf }
0x1457   :  { %2873 = vadd.xlane.f32.xlu1 %v2872_v50 }
0x1458   :  { %2846 = vmax.xlane.f32.xlu0 %v2845_v12 }
0x145c   :  { %2870 = vadd.xlane.f32.xlu0 %v2869_v28 }
0x1460   :  { %2876 = vadd.xlane.f32.xlu0 %v2875_v30 }
0x14e0   :  { %v2850_v19 = vpop.xlane.xlu1 %2849 }
0x14e1   :  { %v2856_v22 = vsub.f32 %v9510_v60, %v2850_v19  ;;  %v2844_v33 = vpop.xlane.xlu0 %2843 }
0x14e2   :  { %v2854_v11 = vsub.f32 %v2819_v6, %v2844_v33 }
0x14e3   :  { %v2867_v63 = vmul.f32 1.442695, %v2856_v22 }
0x14e4   :  { %v2863_v55 = vmul.f32 1.442695, %v2854_v11  ;;  %v2874_v56 = vpop.xlane.xlu1 %2873 }
0x14e5   :  { %10446 = vpow2.f32 %v2867_v63  ;;  %v2847_v34 = vpop.xlane.xlu0 %2846 }
0x14e6   :  { %v2855_v54 = vsub.f32 %v2822_v17, %v2847_v34  ;;  %10448 = vpow2.f32 %v2863_v55 }
0x14e7   :  { %10450 = vrcp.f32 %v2874_v56 }
0x14e8   :  { %v2865_v37 = vmul.f32 1.442695, %v2855_v54 }
0x14e9   :  { %v2871_v38 = vpop.xlane.xlu0 %2870 }
0x14ea   :  { %10452 = vpow2.f32 %v2865_v37 }
0x14eb   :  { %10454 = vrcp.f32 %v2871_v38 }
0x14ed   :  { %v2877_v7 = vpop.xlane.xlu0 %2876 }
0x14ee   :  { %10456 = vrcp.f32 %v2877_v7 }
0x14ef   :  { %v12318_v5 = vpop.eup %10446 }
0x14f0   :  { %v2884_v42 = vsel %vm808_vm4, %v12318_v5, 0.0  ;;  %v10449_v46 = vpop.eup %10448 }
0x14f1   :  { %2885 = vadd.xlane.f32.xlu1 %v2884_v42  ;;  %v10451_v47 = vpop.eup %10450  ;;  %v2878_v39 = vsel %vm808_vm4, %v10449_v46, 0.0 }
0x14f2   :  { %v2894_v51 = vmul.f32 %v10451_v47, %v10441_v3 }
0x14f4   :  { %v10453_v40 = vpop.eup %10452 }
0x14f5   :  { %v10455_v59 = vpop.eup %10454  ;;  %2879 = vadd.xlane.f32.xlu1 %v2878_v39  ;;  %v2881_v1 = vsel %vm808_vm4, %v10453_v40, 0.0 }
0x14f6   :  { %2882 = vadd.xlane.f32.xlu0 %v2881_v1  ;;  %v2893_v44 = vmul.f32 %v10455_v59, %v10443_v21 }
0x14f8   :  { %v2899_v41 = vpack.c.bf16 %v2894_v51, %v2893_v44  ;;  %v10457_v3 = vpop.eup %10456 }
0x14f9   :  { %v2895_v17 = vmul.f32 %v10457_v3, %v12314_v29 }
0x14fa   :  { %9516 = vmatprep.mubr.msk.bf16.mxu0 %vm808_vm4, %v2899_v41 }
0x14fb   :  { %v2900_v19 = vpack.c.bf16 %v2895_v17, %v2895_v17 }
0x1506   :  { %2905 = vrot.lane.b32.xlu1 %v11834_v2, %s11300_s10 }
0x150a   :  { %2965 = vrot.lane.b32.xlu1 %v11819_v45, %s11300_s10 }
0x150c   :  { %2903 = vrot.lane.b32.xlu0 %v11804_v25, %s11300_s10 }
0x150e   :  { %2967 = vrot.lane.b32.xlu1 %v11881_v26, %s11300_s10 }
0x1510   :  { %3109 = vrot.lane.b32.xlu0 %v11802_v23, %s13665_s21 }
0x1512   :  { %3111 = vrot.lane.b32.xlu1 %v11810_v31, %s13665_s21 }
0x1514   :  { %3177 = vrot.lane.b32.xlu0 %v11817_v57, %s13665_s21 }
0x1516   :  { %3105 = vrot.lane.b32.xlu1 %v11802_v23, %s11301_s24 }
0x1518   :  { %3107 = vrot.lane.b32.xlu0 %v11810_v31, %s11301_s24 }
0x151a   :  { %3179 = vrot.lane.b32.xlu1 %v11825_v58, %s13665_s21 }
0x151c   :  { %3173 = vrot.lane.b32.xlu0 %v11817_v57, %s11301_s24 }
0x151e   :  { %3175 = vrot.lane.b32.xlu1 %v11825_v58, %s11301_s24 }
0x157e   :  { %v2886_v52 = vpop.xlane.xlu1 %2885 }
0x1582   :  { %v2880_v60 = vpop.xlane.xlu1 %2879 }
0x1583   :  { %10458 = vrcp.f32 %v2880_v60  ;;  %v2883_v6 = vpop.xlane.xlu0 %2882 }
0x1584   :  { %10460 = vrcp.f32 %v2883_v6 }
0x1585   :  { %10462 = vrcp.f32 %v2886_v52 }
0x1586   :  { %v2906_v62 = vpop.permute.xlu1 %2905 }
0x1587   :  { %v2904_v13 = vpop.permute.xlu0 %2903  ;;  %v2915_v12 = vsel %vm333_vm1, %v2906_v62, 0 }
0x1588   :  { %9512 = vmatprep.subr.bf16.mxu0 %v2904_v13 }
0x1589   :  { %9513 = vmatpush3.bf16.msra.mxu0 %v2904_v13 }
0x158a   :  { %10152 = vmatprep.subr.msk.bf16.mxu0 %vm333_vm1, %v2906_v62  ;;  %v2966_v9 = vpop.permute.xlu1 %2965 }
0x158b   :  { %v3110_v50 = vpop.permute.xlu0 %3109 }
0x158c   :  { %v3120_v38 = vsel %vm323_vm2, %v3110_v50, 0 }
0x158d   :  { %v10459_v21 = vpop.eup %10458  ;;  %9515 = vmatpush3.bf16.msra.mxu0 %v2915_v12 }
0x158e   :  { %v10461_v28 = vpop.eup %10460  ;;  %9520 = vmatprep.subr.bf16.mxu0 %v2966_v9  ;;  %v2968_v30 = vpop.permute.xlu1 %2967  ;;  %v2896_v22 = vmul.f32 %v10459_v21, %v10449_v46 }
0x158f   :  { %v10463_v33 = vpop.eup %10462  ;;  %v3178_v11 = vpop.permute.xlu0 %3177  ;;  %v2897_v63 = vmul.f32 %v10461_v28, %v10453_v40  ;;  %v2977_v56 = vsel %vm333_vm1, %v2968_v30, 0 }
0x1590   :  { %9517 = vmatmul.mubr.msk.bf16.vlgmr.msra.gmra.mrb[80].mxu0 %vm808_vm4, %v2900_v19  ;;  %10156 = vmatprep.subr.msk.bf16.mxu1 %vm323_vm2, %v3178_v11  ;;  %v2898_v34 = vmul.f32 %v10463_v33, %v12318_v5  ;;  %v3188_v1 = vsel %vm323_vm2, %v3178_v11, 0 }
0x1591   :  { %9521 = vmatpush3.bf16.msra.mxu0 %v2966_v9  ;;  %v2901_v55 = vpack.c.bf16 %v2897_v63, %v2896_v22 }
0x1592   :  { %10153 = vmatprep.subr.msk.bf16.mxu0 %vm333_vm1, %v2968_v30  ;;  %v3112_v29 = vpop.permute.xlu1 %3111  ;;  %v2902_v54 = vpack.c.bf16 %v2898_v34, %v2898_v34 }
0x1593   :  { %9524 = vmatprep.mubr.msk.bf16.mxu0 %vm808_vm4, %v2901_v55  ;;  %v3123_v5 = vsel %vm323_vm2, %v3112_v29, 0  ;;  %v3108_v42 = vpop.permute.xlu0 %3107 }
0x1595   :  { %9523 = vmatpush3.bf16.msra.mxu0 %v2977_v56 }
0x1596   :  { %10154 = vmatprep.subr.msk.bf16.mxu0 %vm323_vm2, %v3110_v50  ;;  %v3106_v37 = vpop.permute.xlu1 %3105 }
0x1597   :  { %v3174_v6 = vpop.permute.xlu0 %3173 }
0x1598   :  { %9525 = vmatmul.mubr.msk.bf16.vlgmr.msra.gmra.mrb[84].mxu0 %vm808_vm4, %v2902_v54 }
0x1599   :  { %9546 = vmatprep.mubr.msk.bf16.mxu0 %vm323_vm2, %v3106_v37 }
0x159a   :  { %v3180_v44 = vpop.permute.xlu1 %3179 }
0x159b   :  { %v3191_v60 = vsel %vm323_vm2, %v3180_v44, 0 }
0x159e   :  { %9543 = vmatpush3.bf16.xpose.msra.mxu0 %v3120_v38  ;;  %v3176_v62 = vpop.permute.xlu1 %3175 }
0x159f   :  { %10155 = vmatprep.subr.msk.bf16.mxu0 %vm323_vm2, %v3112_v29 }
0x15a6   :  { %9545 = vmatpush3.bf16.xpose.msra.mxu0 %v3123_v5 }
0x15ad   :  { %9547 = vmatmul.mubr.msk.bf16.vlgmr.msra.gmra.mrb[88].mxu0 %vm323_vm2, %v3108_v42 }
0x1663   :  { %v9518_v46 = vpop.f32.mrb[80].mxu0 }
0x1664   :  { %v2951_v47 = vpop.f32.mrb[81].mxu0 }
0x1665   :  { %v9519_v40 = vpop.f32.mrb[82].mxu0 }
0x1666   :  { %v2954_v39 = vpop.f32.mrb[83].mxu0 }
0x1667   :  { %v3027_v59 = vpack.c.bf16 %v2954_v39, %v2951_v47 }
0x1669   :  { %9531 = vmatmul.mubr.msk.bf16.vlgmr.msra.gmra.mrb[92].mxu1 %vm323_vm2, %v3027_v59 }
0x166a   :  { %9551 = vmatpush3.bf16.xpose.msra.mxu1 %v3188_v1  ;;  %9534 = vmatprep.mubr.msk.bf16.mxu1 %vm11290_vm0, %v11289_v0 }
0x166b   :  { %10157 = vmatprep.subr.msk.bf16.mxu1 %vm323_vm2, %v3180_v44  ;;  %v9526_v51 = vpop.f32.mrb[84].mxu0 }
0x166c   :  { %v3013_v41 = vpop.f32.mrb[85].mxu0 }
0x166d   :  { %v3028_v53 = vpack.c.bf16 %v3013_v41, %v9518_v46  ;;  %v9527_v20 = vpop.f32.mrb[86].mxu0 }
0x166e   :  { %v3016_v7 = vpop.f32.mrb[87].mxu0 }
0x166f   :  { %v3029_v52 = vpack.c.bf16 %v9526_v51, %v3016_v7 }
0x1671   :  { %9535 = vmatmul.mubr.msk.bf16.gmra.mrb[96].mxu1 %vm323_vm2, %v3028_v53 }
0x1672   :  { %9553 = vmatpush3.bf16.xpose.msra.mxu1 %v3191_v60  ;;  %9538 = vmatprep.mubr.msk.bf16.mxu1 %vm11290_vm0, %v11289_v0 }
0x1673   :  { %9574 = vmatprep.subr.bf16.mxu1 %v11289_v0 }
0x1679   :  { %9539 = vmatmul.mubr.msk.bf16.gmra.mrb[100].mxu1 %vm323_vm2, %v3029_v52 }
0x167a   :  { %9554 = vmatprep.mubr.msk.bf16.mxu1 %vm323_vm2, %v3174_v6 }
0x1680   :  { %v9548_v3 = vpop.f32.mrb[88].mxu0 }
0x1681   :  { %v3159_v13 = vpop.f32.mrb[89].mxu0  ;;  %9555 = vmatmul.mubr.msk.bf16.vlgmr.msra.gmra.mrb[104].mxu1 %vm323_vm2, %v3176_v62  ;;  %v3247_v21 = vsel %vm808_vm4, %v9548_v3, -inf }
0x1682   :  { %v9549_v9 = vpop.f32.mrb[90].mxu0  ;;  %v3241_v17 = vsel %vm808_vm4, %v3159_v13, -inf  ;;  %9576 = vmatprep.mubr.msk.bf16.mxu1 %vm11290_vm0, %v11289_v0 }
0x1683   :  { %3242 = vmax.xlane.f32.xlu0 %v3241_v17  ;;  %v3162_v50 = vpop.f32.mrb[91].mxu0 }
0x1684   :  { %v3244_v12 = vsel %vm808_vm4, %v3162_v50, -inf }
0x1685   :  { %3245 = vmax.xlane.f32.xlu1 %v3244_v12 }
0x1687   :  { %3248 = vmax.xlane.f32.xlu0 %v3247_v21 }
0x1710   :  { %v3243_v55 = vpop.xlane.xlu0 %3242 }
0x1711   :  { %v3259_v42 = vsub.f32 %v3159_v13, %v3243_v55 }
0x1712   :  { %v3246_v63 = vpop.xlane.xlu1 %3245 }
0x1713   :  { %v3260_v29 = vsub.f32 %v3162_v50, %v3246_v63  ;;  %v3265_v47 = vmul.f32 1.442695, %v3259_v42 }
0x1714   :  { %v3249_v46 = vpop.xlane.xlu0 %3248 }
0x1715   :  { %v3267_v5 = vmul.f32 1.442695, %v3260_v29  ;;  %v3261_v40 = vsub.f32 %v9548_v3, %v3249_v46 }
0x1717   :  { %10464 = vpow2.f32 %v3267_v5 }
0x1718   :  { %10466 = vpow2.f32 %v3265_v47 }
0x1721   :  { %v10465_v20 = vpop.eup %10464 }
0x1722   :  { %v3280_v60 = vsel %vm808_vm4, %v10465_v20, 0.0  ;;  %v10467_v6 = vpop.eup %10466 }
0x1723   :  { %v3277_v62 = vsel %vm808_vm4, %v10467_v6, 0.0 }
0x173c   :  { %v3076_v28 = vpop.f32.mrb[92].mxu1 }
0x173d   :  { %v12385_v30 = vadd.f32 %v3076_v28, %v12292_v49  ;;  %v9532_v19 = vpop.f32.mrb[93].mxu1 }
0x173e   :  { %v3079_v22 = vpop.f32.mrb[94].mxu1 }
0x173f   :  { %v12388_v33 = vadd.f32 %v3079_v22, %v12295_v36  ;;  %v9533_v11 = vpop.f32.mrb[95].mxu1 }
0x1744   :  { %v3084_v34 = vpop.f32.mrb[96].mxu1 }
0x1745   :  { %v12391_v56 = vadd.f32 %v3084_v34, %v12298_v43  ;;  %v9536_v54 = vpop.f32.mrb[97].mxu1 }
0x1746   :  { %v3087_v37 = vpop.f32.mrb[98].mxu1 }
0x1747   :  { %v12394_v38 = vadd.f32 %v3087_v37, %v12301_v48  ;;  %v9537_v49 = vpop.f32.mrb[99].mxu1  ;;  %v3269_v48 = vmul.f32 1.442695, %v3261_v40 }
0x1749   :  { %10468 = vpow2.f32 %v3269_v48 }
0x174c   :  { %v3092_v36 = vpop.f32.mrb[100].mxu1 }
0x174d   :  { %v12397_v39 = vadd.f32 %v3092_v36, %v12304_v16  ;;  %v9540_v59 = vpop.f32.mrb[101].mxu1 }
0x174e   :  { %v3095_v1 = vpop.f32.mrb[102].mxu1  ;;  %v674_v59 = vld [vmem:[#allocation14 + $0x18] sm:$0xf] }
0x174f   :  { %v12400_v43 = vadd.f32 %v3095_v1, %v12307_v4  ;;  %v9541_v44 = vpop.f32.mrb[103].mxu1  ;;  %v3448_v1 = vsel %vm333_vm1, %v674_v59, 0 }
0x1750   :  { %9575 = vmatpush3.bf16.msra.mxu1 %v3448_v1 }
0x1753   :  { %v12407_v3 = vpop.eup %10468 }
0x1754   :  { %v9556_v51 = vpop.f32.mrb[104].mxu1  ;;  %v3283_v13 = vsel %vm808_vm4, %v12407_v3, 0.0 }
0x1755   :  { %v3227_v41 = vpop.f32.mrb[105].mxu1  ;;  %v3256_v53 = vsel %vm808_vm4, %v9556_v51, -inf }
0x1756   :  { %3257 = vmax.xlane.f32.xlu1 %v3256_v53  ;;  %v9557_v7 = vpop.f32.mrb[106].mxu1  ;;  %v3250_v52 = vsel %vm808_vm4, %v3227_v41, -inf }
0x1757   :  { %3251 = vmax.xlane.f32.xlu0 %v3250_v52  ;;  %v3230_v16 = vpop.f32.mrb[107].mxu1 }
0x1758   :  { %v3253_v4 = vsel %vm808_vm4, %v3230_v16, -inf }
0x175a   :  { %3281 = vadd.xlane.f32.xlu1 %v3280_v60 }
0x175b   :  { %3254 = vmax.xlane.f32.xlu0 %v3253_v4 }
0x175f   :  { %3278 = vadd.xlane.f32.xlu0 %v3277_v62 }
0x1763   :  { %3284 = vadd.xlane.f32.xlu0 %v3283_v13 }
0x17e3   :  { %v3258_v9 = vpop.xlane.xlu1 %3257 }
0x17e4   :  { %v3264_v17 = vsub.f32 %v9556_v51, %v3258_v9  ;;  %v3252_v50 = vpop.xlane.xlu0 %3251 }
0x17e5   :  { %v3262_v12 = vsub.f32 %v3227_v41, %v3252_v50 }
0x17e6   :  { %v3275_v21 = vmul.f32 1.442695, %v3264_v17 }
0x17e7   :  { %v3271_v28 = vmul.f32 1.442695, %v3262_v12  ;;  %v3282_v22 = vpop.xlane.xlu1 %3281 }
0x17e8   :  { %10470 = vpow2.f32 %v3275_v21  ;;  %v3255_v19 = vpop.xlane.xlu0 %3254 }
0x17e9   :  { %v3263_v11 = vsub.f32 %v3230_v16, %v3255_v19  ;;  %10472 = vpow2.f32 %v3271_v28 }
0x17ea   :  { %10474 = vrcp.f32 %v3282_v22 }
0x17eb   :  { %v3273_v63 = vmul.f32 1.442695, %v3263_v11 }
0x17ec   :  { %v3279_v55 = vpop.xlane.xlu0 %3278 }
0x17ed   :  { %10476 = vpow2.f32 %v3273_v63 }
0x17ee   :  { %10478 = vrcp.f32 %v3279_v55 }
0x17f0   :  { %v3285_v44 = vpop.xlane.xlu0 %3284 }
0x17f1   :  { %10480 = vrcp.f32 %v3285_v44 }
0x17f2   :  { %v12411_v29 = vpop.eup %10470 }
0x17f3   :  { %v3292_v34 = vsel %vm808_vm4, %v12411_v29, 0.0  ;;  %v10473_v54 = vpop.eup %10472 }
0x17f4   :  { %3293 = vadd.xlane.f32.xlu1 %v3292_v34  ;;  %v10475_v37 = vpop.eup %10474  ;;  %v3286_v5 = vsel %vm808_vm4, %v10473_v54, 0.0 }
0x17f5   :  { %v3302_v47 = vmul.f32 %v10475_v37, %v10465_v20 }
0x17f7   :  { %v10477_v49 = vpop.eup %10476 }
0x17f8   :  { %v10479_v42 = vpop.eup %10478  ;;  %3287 = vadd.xlane.f32.xlu1 %v3286_v5  ;;  %v3289_v46 = vsel %vm808_vm4, %v10477_v49, 0.0 }
0x17f9   :  { %3290 = vadd.xlane.f32.xlu0 %v3289_v46  ;;  %v3301_v36 = vmul.f32 %v10479_v42, %v10467_v6 }
0x17fb   :  { %v3307_v40 = vpack.c.bf16 %v3302_v47, %v3301_v36  ;;  %v10481_v53 = vpop.eup %10480 }
0x17fd   :  { %9562 = vmatprep.mubr.msk.bf16.mxu0 %vm808_vm4, %v3307_v40 }
0x1809   :  { %3313 = vrot.lane.b32.xlu1 %v11834_v2, %s11301_s24 }
0x180d   :  { %3373 = vrot.lane.b32.xlu1 %v11819_v45, %s11301_s24 }
0x180f   :  { %3311 = vrot.lane.b32.xlu0 %v11804_v25, %s11301_s24 }
0x1811   :  { %3375 = vrot.lane.b32.xlu1 %v11881_v26, %s11301_s24 }
0x1813   :  { %3517 = vrot.lane.b32.xlu0 %v11802_v23, %s13662_s23 }
0x1815   :  { %3519 = vrot.lane.b32.xlu1 %v11810_v31, %s13662_s23 }
0x1817   :  { %3585 = vrot.lane.b32.xlu0 %v11817_v57, %s13662_s23 }
0x1819   :  { %3513 = vrot.lane.b32.xlu1 %v11802_v23, %s11302_s14 }
0x181b   :  { %3515 = vrot.lane.b32.xlu0 %v11810_v31, %s11302_s14 }
0x181d   :  { %3587 = vrot.lane.b32.xlu1 %v11825_v58, %s13662_s23 }
0x181f   :  { %3581 = vrot.lane.b32.xlu0 %v11817_v57, %s11302_s14  ;;  %v3303_v57 = vmul.f32 %v10481_v53, %v12407_v3 }
0x1821   :  { %3583 = vrot.lane.b32.xlu1 %v11825_v58, %s11302_s14  ;;  %v3308_v4 = vpack.c.bf16 %v3303_v57, %v3303_v57 }
0x1881   :  { %v3294_v48 = vpop.xlane.xlu1 %3293 }
0x1885   :  { %v3288_v51 = vpop.xlane.xlu1 %3287 }
0x1886   :  { %10482 = vrcp.f32 %v3288_v51  ;;  %v3291_v41 = vpop.xlane.xlu0 %3290 }
0x1887   :  { %10484 = vrcp.f32 %v3291_v41 }
0x1888   :  { %10486 = vrcp.f32 %v3294_v48 }
0x1889   :  { %v3314_v23 = vpop.permute.xlu1 %3313 }
0x188a   :  { %v3312_v31 = vpop.permute.xlu0 %3311  ;;  %v3323_v58 = vsel %vm333_vm1, %v3314_v23, 0 }
0x188b   :  { %9558 = vmatprep.subr.bf16.mxu0 %v3312_v31 }
0x188c   :  { %9559 = vmatpush3.bf16.msra.mxu0 %v3312_v31 }
0x188d   :  { %10158 = vmatprep.subr.msk.bf16.mxu0 %vm333_vm1, %v3314_v23  ;;  %v3374_v20 = vpop.permute.xlu1 %3373 }
0x188e   :  { %v3518_v7 = vpop.permute.xlu0 %3517 }
0x188f   :  { %v3528_v19 = vsel %vm323_vm2, %v3518_v7, 0 }
0x1890   :  { %v10483_v52 = vpop.eup %10482  ;;  %9561 = vmatpush3.bf16.msra.mxu0 %v3323_v58 }
0x1891   :  { %v10485_v16 = vpop.eup %10484  ;;  %9566 = vmatprep.subr.bf16.mxu0 %v3374_v20  ;;  %v3376_v60 = vpop.permute.xlu1 %3375  ;;  %v3304_v6 = vmul.f32 %v10483_v52, %v10473_v54 }
0x1892   :  { %v10487_v62 = vpop.eup %10486  ;;  %v3586_v13 = vpop.permute.xlu0 %3585  ;;  %v3305_v9 = vmul.f32 %v10485_v16, %v10477_v49  ;;  %v3385_v12 = vsel %vm333_vm1, %v3376_v60, 0 }
0x1893   :  { %9563 = vmatmul.mubr.msk.bf16.vlgmr.msra.gmra.mrb[92].mxu0 %vm808_vm4, %v3308_v4  ;;  %10162 = vmatprep.subr.msk.bf16.mxu1 %vm323_vm2, %v3586_v13  ;;  %v3306_v50 = vmul.f32 %v10487_v62, %v12411_v29  ;;  %v3596_v37 = vsel %vm323_vm2, %v3586_v13, 0 }
0x1894   :  { %9567 = vmatpush3.bf16.msra.mxu0 %v3374_v20  ;;  %v3309_v17 = vpack.c.bf16 %v3305_v9, %v3304_v6 }
0x1895   :  { %10159 = vmatprep.subr.msk.bf16.mxu0 %vm333_vm1, %v3376_v60  ;;  %v3520_v3 = vpop.permute.xlu1 %3519  ;;  %v3310_v21 = vpack.c.bf16 %v3306_v50, %v3306_v50 }
0x1896   :  { %9570 = vmatprep.mubr.msk.bf16.mxu0 %vm808_vm4, %v3309_v17  ;;  %v3531_v22 = vsel %vm323_vm2, %v3520_v3, 0  ;;  %v3516_v11 = vpop.permute.xlu0 %3515 }
0x1898   :  { %9569 = vmatpush3.bf16.msra.mxu0 %v3385_v12 }
0x1899   :  { %10160 = vmatprep.subr.msk.bf16.mxu0 %vm323_vm2, %v3518_v7  ;;  %v3514_v28 = vpop.permute.xlu1 %3513 }
0x189a   :  { %v3582_v1 = vpop.permute.xlu0 %3581 }
0x189b   :  { %9571 = vmatmul.mubr.msk.bf16.vlgmr.msra.gmra.mrb[96].mxu0 %vm808_vm4, %v3310_v21 }
0x189c   :  { %9592 = vmatprep.mubr.msk.bf16.mxu0 %vm323_vm2, %v3514_v28 }
0x189d   :  { %v3588_v49 = vpop.permute.xlu1 %3587 }
0x189e   :  { %v3599_v59 = vsel %vm323_vm2, %v3588_v49, 0 }
0x18a1   :  { %9589 = vmatpush3.bf16.xpose.msra.mxu0 %v3528_v19  ;;  %v3584_v44 = vpop.permute.xlu1 %3583 }
0x18a2   :  { %10161 = vmatprep.subr.msk.bf16.mxu0 %vm323_vm2, %v3520_v3 }
0x18a9   :  { %9591 = vmatpush3.bf16.xpose.msra.mxu0 %v3531_v22 }
0x18b0   :  { %9593 = vmatmul.mubr.msk.bf16.vlgmr.msra.gmra.mrb[100].mxu0 %vm323_vm2, %v3516_v11 }
0x1966   :  { %v9564_v63 = vpop.f32.mrb[92].mxu0 }
0x1967   :  { %v3359_v55 = vpop.f32.mrb[93].mxu0 }
0x1968   :  { %v9565_v29 = vpop.f32.mrb[94].mxu0 }
0x1969   :  { %v3362_v34 = vpop.f32.mrb[95].mxu0 }
0x196a   :  { %v3435_v54 = vpack.c.bf16 %v3362_v34, %v3359_v55 }
0x196c   :  { %9577 = vmatmul.mubr.msk.bf16.vlgmr.msra.gmra.mrb[108].mxu1 %vm323_vm2, %v3435_v54 }
0x196d   :  { %9597 = vmatpush3.bf16.xpose.msra.mxu1 %v3596_v37  ;;  %9580 = vmatprep.mubr.msk.bf16.mxu1 %vm11290_vm0, %v11289_v0 }
0x196e   :  { %10163 = vmatprep.subr.msk.bf16.mxu1 %vm323_vm2, %v3588_v49  ;;  %v9572_v5 = vpop.f32.mrb[96].mxu0 }
0x196f   :  { %v3421_v42 = vpop.f32.mrb[97].mxu0 }
0x1970   :  { %v3436_v46 = vpack.c.bf16 %v3421_v42, %v9564_v63  ;;  %v9573_v36 = vpop.f32.mrb[98].mxu0 }
0x1971   :  { %v3424_v47 = vpop.f32.mrb[99].mxu0 }
0x1972   :  { %v3437_v40 = vpack.c.bf16 %v9572_v5, %v3424_v47 }
0x1974   :  { %9581 = vmatmul.mubr.msk.bf16.gmra.mrb[112].mxu1 %vm323_vm2, %v3436_v46 }
0x1975   :  { %9599 = vmatpush3.bf16.xpose.msra.mxu1 %v3599_v59  ;;  %9584 = vmatprep.mubr.msk.bf16.mxu1 %vm11290_vm0, %v11289_v0 }
0x1976   :  { %9620 = vmatprep.subr.bf16.mxu1 %v11289_v0 }
0x197c   :  { %9585 = vmatmul.mubr.msk.bf16.gmra.mrb[116].mxu1 %vm323_vm2, %v3437_v40 }
0x197d   :  { %9600 = vmatprep.mubr.msk.bf16.mxu1 %vm323_vm2, %v3582_v1 }
0x1983   :  { %v9594_v48 = vpop.f32.mrb[100].mxu0 }
0x1984   :  { %v3567_v51 = vpop.f32.mrb[101].mxu0  ;;  %9601 = vmatmul.mubr.msk.bf16.vlgmr.msra.gmra.mrb[120].mxu1 %vm323_vm2, %v3584_v44  ;;  %v3655_v20 = vsel %vm808_vm4, %v9594_v48, -inf }
0x1985   :  { %v9595_v41 = vpop.f32.mrb[102].mxu0  ;;  %v3649_v23 = vsel %vm808_vm4, %v3567_v51, -inf  ;;  %9622 = vmatprep.mubr.msk.bf16.mxu1 %vm11290_vm0, %v11289_v0 }
0x1986   :  { %3650 = vmax.xlane.f32.xlu0 %v3649_v23  ;;  %v3570_v53 = vpop.f32.mrb[103].mxu0 }
0x1987   :  { %v3652_v31 = vsel %vm808_vm4, %v3570_v53, -inf }
0x1988   :  { %3653 = vmax.xlane.f32.xlu1 %v3652_v31 }
0x198a   :  { %3656 = vmax.xlane.f32.xlu0 %v3655_v20 }
0x1a13   :  { %v3651_v6 = vpop.xlane.xlu0 %3650 }
0x1a14   :  { %v3667_v21 = vsub.f32 %v3567_v51, %v3651_v6 }
0x1a15   :  { %v3654_v4 = vpop.xlane.xlu1 %3653 }
0x1a16   :  { %v3668_v62 = vsub.f32 %v3570_v53, %v3654_v4  ;;  %v3673_v19 = vmul.f32 1.442695, %v3667_v21 }
0x1a17   :  { %v3657_v28 = vpop.xlane.xlu0 %3656 }
0x1a18   :  { %v3675_v12 = vmul.f32 1.442695, %v3668_v62  ;;  %v3669_v22 = vsub.f32 %v9594_v48, %v3657_v28 }
0x1a1a   :  { %10488 = vpow2.f32 %v3675_v12 }
0x1a1b   :  { %10490 = vpow2.f32 %v3673_v19 }
0x1a24   :  { %v10489_v49 = vpop.eup %10488 }
0x1a25   :  { %v3688_v46 = vsel %vm808_vm4, %v10489_v49, 0.0  ;;  %v10491_v36 = vpop.eup %10490 }
0x1a26   :  { %v3685_v47 = vsel %vm808_vm4, %v10491_v36, 0.0 }
0x1a3f   :  { %v3484_v57 = vpop.f32.mrb[108].mxu1 }
0x1a40   :  { %v12478_v7 = vadd.f32 %v3484_v57, %v12385_v30  ;;  %v9578_v58 = vpop.f32.mrb[109].mxu1 }
0x1a41   :  { %v3487_v52 = vpop.f32.mrb[110].mxu1 }
0x1a42   :  { %v12481_v16 = vadd.f32 %v3487_v52, %v12388_v33  ;;  %v9579_v60 = vpop.f32.mrb[111].mxu1 }
0x1a47   :  { %v3492_v13 = vpop.f32.mrb[112].mxu1 }
0x1a48   :  { %v12484_v9 = vadd.f32 %v3492_v13, %v12391_v56  ;;  %v9582_v17 = vpop.f32.mrb[113].mxu1 }
0x1a49   :  { %v3495_v3 = vpop.f32.mrb[114].mxu1 }
0x1a4a   :  { %v12487_v50 = vadd.f32 %v3495_v3, %v12394_v38  ;;  %v9583_v30 = vpop.f32.mrb[115].mxu1  ;;  %v3677_v38 = vmul.f32 1.442695, %v3669_v22 }
0x1a4c   :  { %10492 = vpow2.f32 %v3677_v38 }
0x1a4f   :  { %v3500_v33 = vpop.f32.mrb[116].mxu1 }
0x1a50   :  { %v12490_v11 = vadd.f32 %v3500_v33, %v12397_v39  ;;  %v9586_v63 = vpop.f32.mrb[117].mxu1 }
0x1a51   :  { %v3503_v55 = vpop.f32.mrb[118].mxu1 }
0x1a52   :  { %v12493_v56 = vadd.f32 %v3503_v55, %v12400_v43  ;;  %v9587_v29 = vpop.f32.mrb[119].mxu1 }
0x1a56   :  { %v10493_v40 = vpop.eup %10492 }
0x1a57   :  { %v9602_v34 = vpop.f32.mrb[120].mxu1  ;;  %v3691_v59 = vsel %vm808_vm4, %v10493_v40, 0.0 }
0x1a58   :  { %v3635_v54 = vpop.f32.mrb[121].mxu1  ;;  %v3664_v37 = vsel %vm808_vm4, %v9602_v34, -inf }
0x1a59   :  { %3665 = vmax.xlane.f32.xlu1 %v3664_v37  ;;  %v9603_v5 = vpop.f32.mrb[122].mxu1  ;;  %v3658_v42 = vsel %vm808_vm4, %v3635_v54, -inf }
0x1a5a   :  { %3659 = vmax.xlane.f32.xlu0 %v3658_v42  ;;  %v3638_v39 = vpop.f32.mrb[123].mxu1 }
0x1a5b   :  { %v3661_v43 = vsel %vm808_vm4, %v3638_v39, -inf }
0x1a5d   :  { %3689 = vadd.xlane.f32.xlu1 %v3688_v46 }
0x1a5e   :  { %3662 = vmax.xlane.f32.xlu0 %v3661_v43 }
0x1a62   :  { %3686 = vadd.xlane.f32.xlu0 %v3685_v47 }
0x1a66   :  { %3692 = vadd.xlane.f32.xlu0 %v3691_v59 }
0x1ae6   :  { %v3666_v1 = vpop.xlane.xlu1 %3665 }
0x1ae7   :  { %v3672_v44 = vsub.f32 %v9602_v34, %v3666_v1  ;;  %v3660_v48 = vpop.xlane.xlu0 %3659 }
0x1ae8   :  { %v3670_v51 = vsub.f32 %v3635_v54, %v3660_v48 }
0x1ae9   :  { %v3683_v41 = vmul.f32 1.442695, %v3672_v44 }
0x1aea   :  { %v3679_v23 = vmul.f32 1.442695, %v3670_v51  ;;  %v3690_v31 = vpop.xlane.xlu1 %3689 }
0x1aeb   :  { %10494 = vpow2.f32 %v3683_v41  ;;  %v3663_v53 = vpop.xlane.xlu0 %3662 }
0x1aec   :  { %v3671_v20 = vsub.f32 %v3638_v39, %v3663_v53  ;;  %10496 = vpow2.f32 %v3679_v23 }
0x1aed   :  { %10498 = vrcp.f32 %v3690_v31 }
0x1aee   :  { %v3681_v57 = vmul.f32 1.442695, %v3671_v20 }
0x1aef   :  { %v3687_v58 = vpop.xlane.xlu0 %3686 }
0x1af0   :  { %10500 = vpow2.f32 %v3681_v57 }
0x1af1   :  { %10502 = vrcp.f32 %v3687_v58 }
0x1af3   :  { %v3693_v28 = vpop.xlane.xlu0 %3692 }
0x1af4   :  { %10504 = vrcp.f32 %v3693_v28 }
0x1af5   :  { %v10495_v52 = vpop.eup %10494 }
0x1af6   :  { %v3700_v60 = vsel %vm808_vm4, %v10495_v52, 0.0  ;;  %v10497_v4 = vpop.eup %10496 }
0x1af7   :  { %3701 = vadd.xlane.f32.xlu1 %v3700_v60  ;;  %v10499_v6 = vpop.eup %10498  ;;  %v3694_v13 = vsel %vm808_vm4, %v10497_v4, 0.0  ;;  %v8722_v60 = vld [vmem:[#allocation16] ss:$0 sm:$0xff] }
0x1af8   :  { %v3710_v12 = vmul.f32 %v10499_v6, %v10489_v49 }
0x1afa   :  { %v10501_v62 = vpop.eup %10500 }
0x1afb   :  { %v10503_v17 = vpop.eup %10502  ;;  %3695 = vadd.xlane.f32.xlu1 %v3694_v13  ;;  %v3697_v3 = vsel %vm808_vm4, %v10501_v62, 0.0 }
0x1afc   :  { %3698 = vadd.xlane.f32.xlu0 %v3697_v3  ;;  %v3709_v30 = vmul.f32 %v10503_v17, %v10491_v36  ;;  %v675_v36 = vld [vmem:[#allocation14 + $0x1c] sm:$0xf] }
0x1afd   :  { %v3856_v47 = vsel %vm333_vm1, %v675_v36, 0 }
0x1afe   :  { %v3715_v21 = vpack.c.bf16 %v3710_v12, %v3709_v30  ;;  %v10505_v55 = vpop.eup %10504  ;;  %9621 = vmatpush3.bf16.msra.mxu1 %v3856_v47 }
0x1aff   :  { %9654 = vmatprep.subr.bf16.mxu1 %v11289_v0 }
0x1b00   :  { %9608 = vmatprep.mubr.msk.bf16.mxu0 %vm808_vm4, %v3715_v21 }
0x1b0c   :  { %3721 = vrot.lane.b32.xlu1 %v11834_v2, %s11302_s14 }
0x1b10   :  { %3781 = vrot.lane.b32.xlu1 %v11819_v45, %s11302_s14  ;;  %v3711_v45 = vmul.f32 %v10505_v55, %v10493_v40 }
0x1b12   :  { %3719 = vrot.lane.b32.xlu0 %v11804_v25, %s11302_s14  ;;  %v3716_v34 = vpack.c.bf16 %v3711_v45, %v3711_v45 }
0x1b14   :  { %3783 = vrot.lane.b32.xlu1 %v11881_v26, %s11302_s14 }
0x1b84   :  { %v3702_v33 = vpop.xlane.xlu1 %3701 }
0x1b88   :  { %v3696_v19 = vpop.xlane.xlu1 %3695 }
0x1b89   :  { %10506 = vrcp.f32 %v3696_v19  ;;  %v3699_v22 = vpop.xlane.xlu0 %3698 }
0x1b8a   :  { %10508 = vrcp.f32 %v3699_v22 }
0x1b8b   :  { %10510 = vrcp.f32 %v3702_v33 }
0x1b8c   :  { %v3722_v63 = vpop.permute.xlu1 %3721 }
0x1b8d   :  { %v3720_v2 = vpop.permute.xlu0 %3719  ;;  %v3731_v29 = vsel %vm333_vm1, %v3722_v63, 0 }
0x1b8e   :  { %9604 = vmatprep.subr.bf16.mxu0 %v3720_v2 }
0x1b8f   :  { %9605 = vmatpush3.bf16.msra.mxu0 %v3720_v2 }
0x1b90   :  { %10164 = vmatprep.subr.msk.bf16.mxu0 %vm333_vm1, %v3722_v63  ;;  %v3782_v25 = vpop.permute.xlu1 %3781 }
0x1b93   :  { %v10507_v26 = vpop.eup %10506  ;;  %9607 = vmatpush3.bf16.msra.mxu0 %v3731_v29 }
0x1b94   :  { %v10509_v38 = vpop.eup %10508  ;;  %9612 = vmatprep.subr.bf16.mxu0 %v3782_v25  ;;  %v3712_v54 = vmul.f32 %v10507_v26, %v10497_v4  ;;  %v3784_v5 = vpop.permute.xlu1 %3783 }
0x1b95   :  { %v10511_v37 = vpop.eup %10510  ;;  %v3713_v49 = vmul.f32 %v10509_v38, %v10501_v62  ;;  %v3793_v46 = vsel %vm333_vm1, %v3784_v5, 0 }
0x1b96   :  { %9609 = vmatmul.mubr.msk.bf16.vlgmr.msra.gmra.mrb[104].mxu0 %vm808_vm4, %v3716_v34  ;;  %v3714_v39 = vmul.f32 %v10511_v37, %v10495_v52 }
0x1b97   :  { %9613 = vmatpush3.bf16.msra.mxu0 %v3782_v25  ;;  %v3717_v42 = vpack.c.bf16 %v3713_v49, %v3712_v54 }
0x1b98   :  { %10165 = vmatprep.subr.msk.bf16.mxu0 %vm333_vm1, %v3784_v5  ;;  %v3718_v43 = vpack.c.bf16 %v3714_v39, %v3714_v39 }
0x1b99   :  { %9616 = vmatprep.mubr.msk.bf16.mxu0 %vm808_vm4, %v3717_v42 }
0x1b9b   :  { %9615 = vmatpush3.bf16.msra.mxu0 %v3793_v46 }
0x1b9c   :  { %9634 = vmatprep.subr.bf16.mxu0 %v11289_v0 }
0x1b9e   :  { %9617 = vmatmul.mubr.msk.bf16.vlgmr.msra.gmra.mrb[108].mxu0 %vm808_vm4, %v3718_v43 }
0x1b9f   :  { %9642 = vmatprep.mubr.msk.bf16.mxu0 %vm11290_vm0, %v11289_v0 }
0x1c69   :  { %v9610_v40 = vpop.f32.mrb[104].mxu0 }
0x1c6a   :  { %v3767_v59 = vpop.f32.mrb[105].mxu0 }
0x1c6b   :  { %v9611_v1 = vpop.f32.mrb[106].mxu0 }
0x1c6c   :  { %v3770_v44 = vpop.f32.mrb[107].mxu0 }
0x1c6d   :  { %v3843_v48 = vpack.c.bf16 %v3770_v44, %v3767_v59 }
0x1c6f   :  { %9623 = vmatmul.mubr.msk.bf16.vlgmr.msra.gmra.mrb[124].mxu1 %vm323_vm2, %v3843_v48 }
0x1c70   :  { %9626 = vmatprep.mubr.msk.bf16.mxu1 %vm11290_vm0, %v11289_v0 }
0x1c71   :  { %v9618_v51 = vpop.f32.mrb[108].mxu0 }
0x1c72   :  { %v3829_v41 = vpop.f32.mrb[109].mxu0 }
0x1c73   :  { %v3844_v23 = vpack.c.bf16 %v3829_v41, %v9610_v40  ;;  %v9619_v53 = vpop.f32.mrb[110].mxu0 }
0x1c74   :  { %v3832_v31 = vpop.f32.mrb[111].mxu0 }
0x1c75   :  { %v3845_v20 = vpack.c.bf16 %v9618_v51, %v3832_v31 }
0x1c77   :  { %9627 = vmatmul.mubr.msk.bf16.gmra.mrb[128].mxu1 %vm323_vm2, %v3844_v23 }
0x1c78   :  { %9630 = vmatprep.mubr.msk.bf16.mxu1 %vm11290_vm0, %v11289_v0 }
0x1c7f   :  { %9631 = vmatmul.mubr.msk.bf16.gmra.mrb[132].mxu1 %vm323_vm2, %v3845_v20 }
0x1c80   :  { %9670 = vmatprep.mubr.msk.bf16.mxu1 %vm11290_vm0, %v11289_v0 }
0x1d42   :  { %v3892_v57 = vpop.f32.mrb[124].mxu1 }
0x1d43   :  { %v3915_v58 = vadd.f32 %v3892_v57, %v12478_v7  ;;  %v9624_v52 = vpop.f32.mrb[125].mxu1 }
0x1d44   :  { %v3895_v4 = vpop.f32.mrb[126].mxu1 }
0x1d45   :  { %v3921_v6 = vadd.f32 %v3915_v58, %v11722_v15  ;;  %v3916_v62 = vadd.f32 %v3895_v4, %v12481_v16  ;;  %v9625_v13 = vpop.f32.mrb[127].mxu1 }
0x1d47   :  { %v12537_v17 = vadd.f32 %v8722_v60, %v3921_v6  ;;  %v3922_v3 = vadd.f32 %v3916_v62, %v11724_v18 }
0x1d49   :  { %v12540_v30 = vadd.f32 %v8722_v60, %v3922_v3  ;;  %v3942_v12 = vsel %vm405_vm3, %v12537_v17, 0.0  ;;  %v10268_v3 = vld [vmem:[#allocation20] sm:$0xff]  }
0x1d4a   :  { %3943 = vadd.xlane.f32.xlu0 %v3942_v12  ;;  %v3900_v21 = vpop.f32.mrb[128].mxu1  ;;  %9635 = vmatpush3.bf16.msra.mxu0 %v10268_v3  ;;  %v10269_v12 = vld [vmem:[#allocation20 + $0x8] sm:$0xff]  }
0x1d4b   :  { %v3917_v7 = vadd.f32 %v3900_v21, %v12484_v9  ;;  %v9628_v28 = vpop.f32.mrb[129].mxu1  ;;  %v3945_v15 = vsel %vm405_vm3, %v12540_v30, 0.0  ;;  %9636 = vmatprep.subr.bf16.mxu0 %v11289_v0  ;;  %v10270_v21 = vld [vmem:[#allocation20 + $0x10] sm:$0xff]   ;;  %v10272_v3 = vld [vmem:[#allocation23] sm:$0xff]  }
0x1d4c   :  { %3946 = vadd.xlane.f32.xlu1 %v3945_v15  ;;  %v3903_v16 = vpop.f32.mrb[130].mxu1  ;;  %9655 = vmatpush3.bf16.msra.mxu1 %v10272_v3 }
0x1d4d   :  { %v3923_v33 = vadd.f32 %v3917_v7, %v11730_v24  ;;  %v3918_v19 = vadd.f32 %v3903_v16, %v12487_v50  ;;  %v9629_v18 = vpop.f32.mrb[131].mxu1  ;;  %v10271_v7 = vld [vmem:[#allocation20 + $0x18] sm:$0xff]   ;;  %9656 = vmatprep.subr.bf16.mxu1 %v11289_v0 }
0x1d4e   :  { %9637 = vmatpush3.bf16.msra.mxu0 %v10269_v12  ;;  %v10275_v12 = vld [vmem:[#allocation23 + $0x18] sm:$0xff]  }
0x1d4f   :  { %v12549_v22 = vadd.f32 %v8722_v60, %v3923_v33  ;;  %v3924_v63 = vadd.f32 %v3918_v19, %v11732_v27  ;;  %9638 = vmatprep.subr.bf16.mxu0 %v11289_v0 }
0x1d51   :  { %v12552_v55 = vadd.f32 %v8722_v60, %v3924_v63  ;;  %v3948_v9 = vsel %vm405_vm3, %v12549_v22, 0.0 }
0x1d52   :  { %3949 = vadd.xlane.f32.xlu0 %v3948_v9  ;;  %v3908_v2 = vpop.f32.mrb[132].mxu1  ;;  %9639 = vmatpush3.bf16.msra.mxu0 %v10270_v21  ;;  %v10276_v21 = vld [vmem:[#allocation23 + $0x20] sm:$0xff]  }
0x1d53   :  { %v3919_v45 = vadd.f32 %v3908_v2, %v12490_v11  ;;  %v9632_v25 = vpop.f32.mrb[133].mxu1  ;;  %v3951_v38 = vsel %vm405_vm3, %v12552_v55, 0.0  ;;  %9640 = vmatprep.subr.bf16.mxu0 %v11289_v0 }
0x1d54   :  { %v3911_v29 = vpop.f32.mrb[134].mxu1 }
0x1d55   :  { %v3925_v24 = vadd.f32 %v3919_v45, %v11738_v32  ;;  %v3920_v50 = vadd.f32 %v3911_v29, %v12493_v56  ;;  %v9633_v26 = vpop.f32.mrb[135].mxu1 }
0x1d56   :  { %3952 = vadd.xlane.f32.xlu0 %v3951_v38  ;;  %9641 = vmatpush3.bf16.msra.mxu0 %v10271_v7  ;;  %v10277_v7 = vld [vmem:[#allocation23 + $0x28] sm:$0xff]  }
0x1d57   :  { %v12561_v27 = vadd.f32 %v8722_v60, %v3925_v24  ;;  %v3926_v34 = vadd.f32 %v3920_v50, %v11740_v35  ;;  %v8723_v24 = vld [vmem:[#allocation17] ss:$0 sm:$0xff] }
0x1d59   :  { %v12564_v54 = vadd.f32 %v8722_v60, %v3926_v34  ;;  %v3954_v11 = vsel %vm405_vm3, %v12561_v27, 0.0 }
0x1d5a   :  { %3955 = vadd.xlane.f32.xlu0 %v3954_v11 }
0x1d5b   :  { %v3957_v32 = vsel %vm405_vm3, %v12564_v54, 0.0 }
0x1d5c   :  { %3958 = vadd.xlane.f32.xlu1 %v3957_v32 }
0x1dd7   :  { %v3944_v56 = vpop.xlane.xlu0 %3943 }
0x1dd8   :  { %v3960_v37 = vmul.f32 0.015625, %v3944_v56 }
0x1dd9   :  { %v3947_v49 = vpop.xlane.xlu1 %3946 }
0x1dda   :  { %v3966_v5 = vsub.f32 %v12537_v17, %v3960_v37  ;;  %v3961_v42 = vmul.f32 0.015625, %v3947_v49 }
0x1ddc   :  { %v12572_v39 = vsub.f32 %v12540_v30, %v3961_v42  ;;  %v3972_v35 = vmul.f32 %v3966_v5, %v3966_v5 }
0x1dde   :  { %v3978_v46 = vsel %vm405_vm3, %v3972_v35, 0.0  ;;  %v3973_v43 = vmul.f32 %v12572_v39, %v12572_v39  ;;  %v8724_v35 = vld [vmem:[#allocation19] ss:$0 sm:$0xff] }
0x1ddf   :  { %v3950_v36 = vpop.xlane.xlu0 %3949  ;;  %3979 = vadd.xlane.f32.xlu0 %v3978_v46 }
0x1de0   :  { %v3962_v47 = vmul.f32 0.015625, %v3950_v36  ;;  %v3981_v40 = vsel %vm405_vm3, %v3973_v43, 0.0 }
0x1de1   :  { %3982 = vadd.xlane.f32.xlu1 %v3981_v40 }
0x1de2   :  { %v12579_v59 = vsub.f32 %v12549_v22, %v3962_v47 }
0x1de3   :  { %v3953_v1 = vpop.xlane.xlu0 %3952 }
0x1de4   :  { %v3963_v44 = vmul.f32 0.015625, %v3953_v1  ;;  %v3974_v48 = vmul.f32 %v12579_v59, %v12579_v59 }
0x1de6   :  { %v12584_v51 = vsub.f32 %v12552_v55, %v3963_v44  ;;  %v3984_v41 = vsel %vm405_vm3, %v3974_v48, 0.0 }
0x1de7   :  { %3985 = vadd.xlane.f32.xlu0 %v3984_v41  ;;  %v3956_v23 = vpop.xlane.xlu0 %3955 }
0x1de8   :  { %v3964_v53 = vmul.f32 0.015625, %v3956_v23  ;;  %v3975_v31 = vmul.f32 %v12584_v51, %v12584_v51 }
0x1de9   :  { %v3959_v20 = vpop.xlane.xlu1 %3958 }
0x1dea   :  { %v12590_v57 = vsub.f32 %v12561_v27, %v3964_v53  ;;  %v3965_v58 = vmul.f32 0.015625, %v3959_v20  ;;  %v3987_v52 = vsel %vm405_vm3, %v3975_v31, 0.0 }
0x1deb   :  { %3988 = vadd.xlane.f32.xlu1 %v3987_v52 }
0x1dec   :  { %v12594_v60 = vsub.f32 %v12564_v54, %v3965_v58  ;;  %v3976_v4 = vmul.f32 %v12590_v57, %v12590_v57 }
0x1dee   :  { %v3990_v6 = vsel %vm405_vm3, %v3976_v4, 0.0  ;;  %v3977_v62 = vmul.f32 %v12594_v60, %v12594_v60 }
0x1def   :  { %3991 = vadd.xlane.f32.xlu0 %v3990_v6 }
0x1df0   :  { %v3993_v13 = vsel %vm405_vm3, %v3977_v62, 0.0 }
0x1df1   :  { %3994 = vadd.xlane.f32.xlu1 %v3993_v13 }
0x1e6c   :  { %v3980_v28 = vpop.xlane.xlu0 %3979 }
0x1e6d   :  { %v3996_v15 = vmul.f32 0.015625, %v3980_v28  ;;  %v10278_v28 = vld [vmem:[#allocation23 + $0x30] sm:$0xff]  }
0x1e6e   :  { %v3983_v16 = vpop.xlane.xlu1 %3982 }
0x1e6f   :  { %v4002_v33 = vadd.f32 1e-05, %v3996_v15  ;;  %v3997_v19 = vmul.f32 0.015625, %v3983_v16  ;;  %v10279_v15 = vld [vmem:[#allocation23 + $0x38] sm:$0xff]  }
0x1e70   :  { %v8725_v16 = vld [vmem:[#allocation22] ss:$0 sm:$0xff] }
0x1e71   :  { %10512 = vrsqrt.f32 %v4002_v33  ;;  %v4003_v18 = vadd.f32 1e-05, %v3997_v19 }
0x1e73   :  { %10514 = vrsqrt.f32 %v4003_v18 }
0x1e74   :  { %v3986_v63 = vpop.xlane.xlu0 %3985 }
0x1e75   :  { %v3998_v9 = vmul.f32 0.015625, %v3986_v63 }
0x1e77   :  { %v4004_v2 = vadd.f32 1e-05, %v3998_v9 }
0x1e78   :  { %v3989_v45 = vpop.xlane.xlu1 %3988 }
0x1e79   :  { %10516 = vrsqrt.f32 %v4004_v2  ;;  %v3999_v25 = vmul.f32 0.015625, %v3989_v45 }
0x1e7b   :  { %v10513_v29 = vpop.eup %10512  ;;  %v4005_v50 = vadd.f32 1e-05, %v3999_v25 }
0x1e7c   :  { %v4014_v26 = vmul.f32 %v10513_v29, %v3966_v5  ;;  %v3992_v38 = vpop.xlane.xlu0 %3991 }
0x1e7d   :  { %v10515_v34 = vpop.eup %10514  ;;  %10518 = vrsqrt.f32 %v4005_v50  ;;  %v4000_v11 = vmul.f32 0.015625, %v3992_v38 }
0x1e7e   :  { %v4026_v32 = vmul.f32 %v8723_v24, %v4014_v26  ;;  %v4015_v56 = vmul.f32 %v10515_v34, %v12572_v39  ;;  %v3995_v37 = vpop.xlane.xlu1 %3994 }
0x1e7f   :  { %v4006_v49 = vadd.f32 1e-05, %v4000_v11  ;;  %v4001_v42 = vmul.f32 0.015625, %v3995_v37 }
0x1e80   :  { %v4027_v46 = vmul.f32 %v8723_v24, %v4015_v56  ;;  %v4038_v36 = vadd.f32 %v8724_v35, %v4026_v32 }
0x1e81   :  { %10520 = vrsqrt.f32 %v4006_v49  ;;  %v4007_v43 = vadd.f32 1e-05, %v4001_v42 }
0x1e82   :  { %v4039_v47 = vadd.f32 %v8724_v35, %v4027_v46 }
0x1e83   :  { %v10517_v40 = vpop.eup %10516  ;;  %10522 = vrsqrt.f32 %v4007_v43 }
0x1e84   :  { %v4044_v1 = vpack.c.bf16 %v4039_v47, %v4038_v36  ;;  %v4016_v5 = vmul.f32 %v10517_v40, %v12579_v59 }
0x1e86   :  { %9643 = vmatmul.mubr.msk.bf16.vlgmr.msra.gmra.mrb[112].mxu0 %vm405_vm3, %v4044_v1  ;;  %v4028_v48 = vmul.f32 %v8723_v24, %v4016_v5 }
0x1e87   :  { %v10519_v44 = vpop.eup %10518  ;;  %9646 = vmatprep.mubr.msk.bf16.mxu0 %vm11290_vm0, %v11289_v0 }
0x1e88   :  { %v4017_v39 = vmul.f32 %v10519_v44, %v12584_v51  ;;  %v4040_v53 = vadd.f32 %v8724_v35, %v4028_v48 }
0x1e8a   :  { %v4029_v41 = vmul.f32 %v8723_v24, %v4017_v39 }
0x1e8b   :  { %v10521_v23 = vpop.eup %10520 }
0x1e8c   :  { %v4041_v31 = vadd.f32 %v8724_v35, %v4029_v41  ;;  %v4018_v20 = vmul.f32 %v10521_v23, %v12590_v57  ;;  %v10273_v57 = vld [vmem:[#allocation23 + $0x8] sm:$0xff]  }
0x1e8d   :  { %v10523_v58 = vpop.eup %10522  ;;  %9657 = vmatpush3.bf16.msra.mxu1 %v10273_v57 }
0x1e8e   :  { %v4045_v52 = vpack.c.bf16 %v4041_v31, %v4040_v53  ;;  %v4019_v4 = vmul.f32 %v10523_v58, %v12594_v60  ;;  %v4030_v59 = vmul.f32 %v8723_v24, %v4018_v20  ;;  %9658 = vmatprep.subr.bf16.mxu1 %v11289_v0  ;;  %v10274_v60 = vld [vmem:[#allocation23 + $0x10] sm:$0xff]  }
0x1e90   :  { %9647 = vmatmul.mubr.msk.bf16.gmra.mrb[116].mxu0 %vm405_vm3, %v4045_v52  ;;  %v4031_v6 = vmul.f32 %v8723_v24, %v4019_v4  ;;  %v4042_v51 = vadd.f32 %v8724_v35, %v4030_v59 }
0x1e91   :  { %9650 = vmatprep.mubr.msk.bf16.mxu0 %vm11290_vm0, %v11289_v0  ;;  %9659 = vmatpush3.bf16.msra.mxu1 %v10274_v60 }
0x1e92   :  { %v4043_v62 = vadd.f32 %v8724_v35, %v4031_v6  ;;  %9660 = vmatprep.subr.bf16.mxu1 %v11289_v0 }
0x1e94   :  { %v4046_v13 = vpack.c.bf16 %v4043_v62, %v4042_v51 }
0x1e95   :  { %9661 = vmatpush3.bf16.msra.mxu1 %v10275_v12 }
0x1e96   :  { %9662 = vmatprep.subr.bf16.mxu1 %v11289_v0 }
0x1e98   :  { %9651 = vmatmul.mubr.msk.bf16.gmra.mrb[120].mxu0 %vm405_vm3, %v4046_v13 }
0x1e99   :  { %4561 = vmatprep.mubr.bf16.mxu0 %v11291_v14  ;;  %9663 = vmatpush3.bf16.msra.mxu1 %v10276_v21 }
0x1e9a   :  { %9664 = vmatprep.subr.bf16.mxu1 %v11289_v0 }
0x1e9d   :  { %9665 = vmatpush3.bf16.msra.mxu1 %v10277_v7 }
0x1e9e   :  { %9666 = vmatprep.subr.bf16.mxu1 %v11289_v0 }
0x1ea1   :  { %9667 = vmatpush3.bf16.msra.mxu1 %v10278_v28 }
0x1ea2   :  { %9668 = vmatprep.subr.bf16.mxu1 %v11289_v0 }
0x1ea5   :  { %9669 = vmatpush3.bf16.msra.mxu1 %v10279_v15 }
0x1f59   :  { %v4129_v33 = vpop.f32.mrb[112].mxu0 }
0x1f5a   :  { %v4130_v19 = vadd.f32 %v8725_v16, %v4129_v33  ;;  %v9644_v18 = vpop.f32.mrb[113].mxu0 }
0x1f5b   :  { %v4132_v63 = vpop.f32.mrb[114].mxu0 }
0x1f5c   :  { %v4152_v9 = vmul.f32 %v4130_v19, %v4130_v19  ;;  %v4133_v2 = vadd.f32 %v8725_v16, %v4132_v63  ;;  %v9645_v45 = vpop.f32.mrb[115].mxu0 }
0x1f5e   :  { %v4158_v25 = vmul.f32 %v4152_v9, %v4130_v19  ;;  %v4153_v29 = vmul.f32 %v4133_v2, %v4133_v2 }
0x1f60   :  { %v4164_v24 = vmul.f32 0.044715, %v4158_v25  ;;  %v4159_v50 = vmul.f32 %v4153_v29, %v4133_v2 }
0x1f62   :  { %v4170_v26 = vadd.f32 %v4164_v24, %v4130_v19  ;;  %v4165_v38 = vmul.f32 0.044715, %v4159_v50 }
0x1f63   :  { %v4137_v34 = vpop.f32.mrb[116].mxu0 }
0x1f64   :  { %v4176_v11 = vmul.f32 0.7978846, %v4170_v26  ;;  %v4171_v32 = vadd.f32 %v4165_v38, %v4133_v2  ;;  %v4138_v56 = vadd.f32 %v8725_v16, %v4137_v34  ;;  %v9648_v37 = vpop.f32.mrb[117].mxu0 }
0x1f65   :  { %v4140_v49 = vpop.f32.mrb[118].mxu0 }
0x1f66   :  { %10524 = vtanh.f32 %v4176_v11  ;;  %v4177_v42 = vmul.f32 0.7978846, %v4171_v32  ;;  %v4154_v35 = vmul.f32 %v4138_v56, %v4138_v56  ;;  %v4141_v46 = vadd.f32 %v8725_v16, %v4140_v49  ;;  %v9649_v43 = vpop.f32.mrb[119].mxu0 }
0x1f68   :  { %10526 = vtanh.f32 %v4177_v42  ;;  %v4160_v36 = vmul.f32 %v4154_v35, %v4138_v56  ;;  %v4155_v47 = vmul.f32 %v4141_v46, %v4141_v46 }
0x1f6a   :  { %v4166_v40 = vmul.f32 0.044715, %v4160_v36  ;;  %v4161_v1 = vmul.f32 %v4155_v47, %v4141_v46 }
0x1f6b   :  { %v4145_v5 = vpop.f32.mrb[120].mxu0 }
0x1f6c   :  { %v4172_v44 = vadd.f32 %v4166_v40, %v4138_v56  ;;  %v4167_v39 = vmul.f32 0.044715, %v4161_v1  ;;  %v4146_v48 = vadd.f32 %v8725_v16, %v4145_v5  ;;  %v9652_v41 = vpop.f32.mrb[121].mxu0  ;;  %v8741_v40 = vld [vmem:[#allocation25] ss:$0 sm:$0xff] }
0x1f6d   :  { %v4148_v23 = vpop.f32.mrb[122].mxu0 }
0x1f6e   :  { %v4178_v53 = vmul.f32 0.7978846, %v4172_v44  ;;  %v4173_v31 = vadd.f32 %v4167_v39, %v4141_v46  ;;  %v4156_v20 = vmul.f32 %v4146_v48, %v4146_v48  ;;  %v4149_v58 = vadd.f32 %v8725_v16, %v4148_v23  ;;  %v9653_v52 = vpop.f32.mrb[123].mxu0 }
0x1f70   :  { %v10525_v4 = vpop.eup %10524  ;;  %10528 = vtanh.f32 %v4178_v53  ;;  %v4179_v59 = vmul.f32 0.7978846, %v4173_v31  ;;  %v4162_v6 = vmul.f32 %v4156_v20, %v4146_v48  ;;  %v4157_v62 = vmul.f32 %v4149_v58, %v4149_v58 }
0x1f71   :  { %v4188_v51 = vadd.f32 1.0, %v10525_v4 }
0x1f72   :  { %v10527_v13 = vpop.eup %10526  ;;  %10530 = vtanh.f32 %v4179_v59  ;;  %v4168_v3 = vmul.f32 0.044715, %v4162_v6  ;;  %v4163_v57 = vmul.f32 %v4157_v62, %v4149_v58 }
0x1f73   :  { %v4194_v60 = vmul.f32 0.5, %v4188_v51  ;;  %v4189_v12 = vadd.f32 1.0, %v10527_v13 }
0x1f74   :  { %v4174_v21 = vadd.f32 %v4168_v3, %v4146_v48  ;;  %v4169_v7 = vmul.f32 0.044715, %v4163_v57 }
0x1f75   :  { %v4195_v28 = vmul.f32 0.5, %v4189_v12  ;;  %v4200_v18 = vmul.f32 %v4194_v60, %v4130_v19 }
0x1f76   :  { %v4180_v15 = vmul.f32 0.7978846, %v4174_v21  ;;  %v4175_v33 = vadd.f32 %v4169_v7, %v4149_v58 }
0x1f77   :  { %v4201_v16 = vmul.f32 %v4195_v28, %v4133_v2 }
0x1f78   :  { %10532 = vtanh.f32 %v4180_v15  ;;  %v4181_v63 = vmul.f32 0.7978846, %v4175_v33 }
0x1f79   :  { %v4206_v9 = vpack.c.bf16 %v4201_v16, %v4200_v18 }
0x1f7a   :  { %v10529_v45 = vpop.eup %10528  ;;  %10534 = vtanh.f32 %v4181_v63 }
0x1f7b   :  { %9671 = vmatmul.mubr.bf16.vlgmr.msra.gmra.mrb[136].mxu1 %v4206_v9  ;;  %v4190_v25 = vadd.f32 1.0, %v10529_v45 }
0x1f7c   :  { %v10531_v29 = vpop.eup %10530  ;;  %9674 = vmatprep.mubr.msk.bf16.mxu1 %vm11290_vm0, %v11289_v0 }
0x1f7d   :  { %v4191_v24 = vadd.f32 1.0, %v10531_v29  ;;  %v4196_v50 = vmul.f32 0.5, %v4190_v25 }
0x1f7f   :  { %v4197_v26 = vmul.f32 0.5, %v4191_v24  ;;  %v4202_v38 = vmul.f32 %v4196_v50, %v4138_v56 }
0x1f81   :  { %v4203_v34 = vmul.f32 %v4197_v26, %v4141_v46 }
0x1f82   :  { %v10533_v11 = vpop.eup %10532 }
0x1f83   :  { %v4207_v32 = vpack.c.bf16 %v4203_v34, %v4202_v38  ;;  %v4192_v19 = vadd.f32 1.0, %v10533_v11 }
0x1f84   :  { %v10535_v2 = vpop.eup %10534 }
0x1f85   :  { %9675 = vmatmul.mubr.bf16.gmra.mrb[140].mxu1 %v4207_v32  ;;  %v4193_v37 = vadd.f32 1.0, %v10535_v2  ;;  %v4198_v49 = vmul.f32 0.5, %v4192_v19 }
0x1f86   :  { %9678 = vmatprep.mubr.msk.bf16.mxu1 %vm11290_vm0, %v11289_v0 }
0x1f87   :  { %v4199_v42 = vmul.f32 0.5, %v4193_v37  ;;  %v4204_v35 = vmul.f32 %v4198_v49, %v4146_v48 }
0x1f89   :  { %v4205_v43 = vmul.f32 %v4199_v42, %v4149_v58 }
0x1f8b   :  { %v4208_v36 = vpack.c.bf16 %v4205_v43, %v4204_v35 }
0x1f8d   :  { %9679 = vmatmul.mubr.bf16.gmra.mrb[144].mxu1 %v4208_v36 }
0x204e   :  { %v4307_v47 = vpop.f32.mrb[136].mxu1 }
0x204f   :  { %v4330_v56 = vadd.f32 %v4307_v47, %v12537_v17  ;;  %v9672_v46 = vpop.f32.mrb[137].mxu1 }
0x2050   :  { %v4310_v1 = vpop.f32.mrb[138].mxu1  ;;  %v10280_v46 = vld [vmem:[#allocation11 + $0x40] ss:$8 sps:$4 sm:$0xff]  }
0x2051   :  { %v12630_v5 = vadd.f32 %v8741_v40, %v4330_v56  ;;  %v4331_v44 = vadd.f32 %v4310_v1, %v12540_v30  ;;  %v9673_v39 = vpop.f32.mrb[139].mxu1  ;;  %v10282_v56 = vld [vmem:[#allocation11 + $0x44] ss:$8 sps:$4 sm:$0xff]   ;;  %v10285_v1 = vld [vmem:[#allocation11 + $0x54] ss:$8 sps:$4 sm:$0xff]  }
0x2052   :  { %4529 = vmatprep.subr.bf16.mxu0 %v10282_v56  ;;  %v10288_v39 = vld [vmem:[#allocation11 + $0x64] ss:$8 sps:$4 sm:$0xff]  }
0x2053   :  { %v12633_v41 = vadd.f32 %v8741_v40, %v4331_v44  ;;  %v4353_v23 = vsel %vm405_vm3, %v12630_v5, 0.0  ;;  %4530 = vmatpush1.bf16.msra.mxu0 %v10280_v46  ;;  %v10283_v44 = vld [vmem:[#allocation11 + $0x50] ss:$8 sps:$4 sm:$0xff]  }
0x2054   :  { %4354 = vadd.xlane.f32.xlu0 %v4353_v23  ;;  %4531 = vmatprep.subr.bf16.mxu0 %v10285_v1  ;;  %v10286_v23 = vld [vmem:[#allocation11 + $0x60] ss:$8 sps:$4 sm:$0xff]  }
0x2055   :  { %v4356_v48 = vsel %vm405_vm3, %v12633_v41, 0.0 }
0x2056   :  { %4357 = vadd.xlane.f32.xlu1 %v4356_v48  ;;  %v10291_v48 = vld [vmem:[#allocation11 + $0x74] ss:$8 sps:$4 sm:$0xff]  }
0x2057   :  { %4532 = vmatpush1.bf16.msra.mxu0 %v10283_v44 }
0x2058   :  { %v4315_v53 = vpop.f32.mrb[140].mxu1  ;;  %4533 = vmatprep.subr.bf16.mxu0 %v10288_v39  ;;  %v4468_v39 = vld [vmem:[#allocation13 + $0x2] sm:$0x3] }
0x2059   :  { %v4332_v17 = vadd.f32 %v4315_v53, %v12549_v22  ;;  %v9676_v31 = vpop.f32.mrb[141].mxu1  ;;  %v10289_v53 = vld [vmem:[#allocation11 + $0x70] ss:$8 sps:$4 sm:$0xff]  }
0x205a   :  { %v4318_v20 = vpop.f32.mrb[142].mxu1 }
0x205b   :  { %v12640_v58 = vadd.f32 %v8741_v40, %v4332_v17  ;;  %v4333_v30 = vadd.f32 %v4318_v20, %v12552_v55  ;;  %v9677_v52 = vpop.f32.mrb[143].mxu1  ;;  %4534 = vmatpush1.bf16.msra.mxu0 %v10286_v23  ;;  %v4473_v23 = vrot.slane %v4468_v39, %v524_v61 }
0x205c   :  { %4535 = vmatprep.subr.bf16.mxu0 %v10291_v48 }
0x205d   :  { %v12643_v4 = vadd.f32 %v8741_v40, %v4333_v30  ;;  %v4359_v59 = vsel %vm405_vm3, %v12640_v58, 0.0 }
0x205e   :  { %4360 = vadd.xlane.f32.xlu0 %v4359_v59 }
0x205f   :  { %v4362_v6 = vsel %vm405_vm3, %v12643_v4, 0.0  ;;  %4536 = vmatpush1.bf16.msra.mxu0 %v10289_v53 }
0x2060   :  { %4363 = vadd.xlane.f32.xlu1 %v4362_v6  ;;  %v4323_v62 = vpop.f32.mrb[144].mxu1 }
0x2061   :  { %v4334_v22 = vadd.f32 %v4323_v62, %v12561_v27  ;;  %v9680_v51 = vpop.f32.mrb[145].mxu1 }
0x2062   :  { %v4326_v13 = vpop.f32.mrb[146].mxu1 }
0x2063   :  { %v12650_v3 = vadd.f32 %v8741_v40, %v4334_v22  ;;  %v4335_v55 = vadd.f32 %v4326_v13, %v12564_v54  ;;  %v9681_v57 = vpop.f32.mrb[147].mxu1 }
0x2064   :  { %v8742_v57 = vld [vmem:[#allocation8 + $0x1] ss:$0 sm:$0xff] }
0x2065   :  { %v12653_v60 = vadd.f32 %v8741_v40, %v4335_v55  ;;  %v4365_v12 = vsel %vm405_vm3, %v12650_v3, 0.0 }
0x2066   :  { %4366 = vadd.xlane.f32.xlu0 %v4365_v12 }
0x2067   :  { %v4368_v21 = vsel %vm405_vm3, %v12653_v60, 0.0 }
0x2068   :  { %4369 = vadd.xlane.f32.xlu1 %v4368_v21 }
0x20e1   :  { %v4355_v7 = vpop.xlane.xlu0 %4354 }
0x20e2   :  { %v4371_v28 = vmul.f32 0.015625, %v4355_v7 }
0x20e3   :  { %v4358_v27 = vpop.xlane.xlu1 %4357 }
0x20e4   :  { %v12660_v15 = vsub.f32 %v12630_v5, %v4371_v28  ;;  %v4372_v33 = vmul.f32 0.015625, %v4358_v27 }
0x20e6   :  { %v12663_v54 = vsub.f32 %v12633_v41, %v4372_v33  ;;  %v4383_v18 = vmul.f32 %v12660_v15, %v12660_v15 }
0x20e8   :  { %v4389_v16 = vsel %vm405_vm3, %v4383_v18, 0.0  ;;  %v4384_v63 = vmul.f32 %v12663_v54, %v12663_v54  ;;  %v8743_v18 = vld [vmem:[#allocation10 + $0x1] ss:$0 sm:$0xff] }
0x20e9   :  { %4390 = vadd.xlane.f32.xlu0 %v4389_v16 }
0x20ea   :  { %v4392_v9 = vsel %vm405_vm3, %v4384_v63, 0.0 }
0x20eb   :  { %v4361_v45 = vpop.xlane.xlu0 %4360  ;;  %4393 = vadd.xlane.f32.xlu1 %v4392_v9 }
0x20ec   :  { %v4373_v25 = vmul.f32 0.015625, %v4361_v45 }
0x20ed   :  { %v4364_v29 = vpop.xlane.xlu1 %4363 }
0x20ee   :  { %v12672_v24 = vsub.f32 %v12640_v58, %v4373_v25  ;;  %v4374_v50 = vmul.f32 0.015625, %v4364_v29 }
0x20f0   :  { %v12675_v26 = vsub.f32 %v12643_v4, %v4374_v50  ;;  %v4385_v38 = vmul.f32 %v12672_v24, %v12672_v24 }
0x20f2   :  { %v4395_v34 = vsel %vm405_vm3, %v4385_v38, 0.0  ;;  %v4386_v11 = vmul.f32 %v12675_v26, %v12675_v26 }
0x20f3   :  { %4396 = vadd.xlane.f32.xlu0 %v4395_v34  ;;  %v4367_v32 = vpop.xlane.xlu0 %4366 }
0x20f4   :  { %v4375_v19 = vmul.f32 0.015625, %v4367_v32  ;;  %v4398_v2 = vsel %vm405_vm3, %v4386_v11, 0.0 }
0x20f5   :  { %4399 = vadd.xlane.f32.xlu1 %v4398_v2  ;;  %v4370_v37 = vpop.xlane.xlu1 %4369 }
0x20f6   :  { %v12684_v49 = vsub.f32 %v12650_v3, %v4375_v19  ;;  %v4376_v42 = vmul.f32 0.015625, %v4370_v37 }
0x20f8   :  { %v12687_v35 = vsub.f32 %v12653_v60, %v4376_v42  ;;  %v4387_v43 = vmul.f32 %v12684_v49, %v12684_v49 }
0x20fa   :  { %v4401_v36 = vsel %vm405_vm3, %v4387_v43, 0.0  ;;  %v4388_v47 = vmul.f32 %v12687_v35, %v12687_v35 }
0x20fb   :  { %4402 = vadd.xlane.f32.xlu0 %v4401_v36 }
0x20fc   :  { %v4404_v40 = vsel %vm405_vm3, %v4388_v47, 0.0 }
0x20fd   :  { %4405 = vadd.xlane.f32.xlu1 %v4404_v40 }
0x2176   :  { %v4391_v17 = vpop.xlane.xlu0 %4390 }
0x2177   :  { %v4407_v31 = vmul.f32 0.015625, %v4391_v17 }
0x2178   :  { %v4394_v20 = vpop.xlane.xlu1 %4393 }
0x2179   :  { %v4413_v30 = vadd.f32 1e-05, %v4407_v31  ;;  %v4408_v52 = vmul.f32 0.015625, %v4394_v20 }
0x217b   :  { %10536 = vrsqrt.f32 %v4413_v30  ;;  %v4414_v59 = vadd.f32 1e-05, %v4408_v52 }
0x217d   :  { %10538 = vrsqrt.f32 %v4414_v59 }
0x2180   :  { %v4397_v6 = vpop.xlane.xlu0 %4396 }
0x2181   :  { %v4409_v62 = vmul.f32 0.015625, %v4397_v6 }
0x2182   :  { %v4400_v22 = vpop.xlane.xlu1 %4399 }
0x2183   :  { %v4415_v51 = vadd.f32 1e-05, %v4409_v62  ;;  %v4410_v13 = vmul.f32 0.015625, %v4400_v22 }
0x2185   :  { %v10537_v55 = vpop.eup %10536  ;;  %10540 = vrsqrt.f32 %v4415_v51  ;;  %v4416_v12 = vadd.f32 1e-05, %v4410_v13 }
0x2186   :  { %v4425_v21 = vmul.f32 %v10537_v55, %v12660_v15 }
0x2187   :  { %v10539_v7 = vpop.eup %10538  ;;  %10542 = vrsqrt.f32 %v4416_v12 }
0x2188   :  { %v4437_v28 = vmul.f32 %v8742_v57, %v4425_v21  ;;  %v4426_v27 = vmul.f32 %v10539_v7, %v12663_v54  ;;  %v4403_v33 = vpop.xlane.xlu0 %4402 }
0x2189   :  { %v4411_v16 = vmul.f32 0.015625, %v4403_v33 }
0x218a   :  { %v4438_v63 = vmul.f32 %v8742_v57, %v4426_v27  ;;  %v4406_v9 = vpop.xlane.xlu1 %4405  ;;  %v4449_v29 = vadd.f32 %v8743_v18, %v4437_v28 }
0x218b   :  { %v4417_v45 = vadd.f32 1e-05, %v4411_v16  ;;  %v4412_v25 = vmul.f32 0.015625, %v4406_v9 }
0x218c   :  { %v4450_v50 = vadd.f32 %v8743_v18, %v4438_v63 }
0x218d   :  { %10544 = vrsqrt.f32 %v4417_v45  ;;  %v4418_v38 = vadd.f32 1e-05, %v4412_v25 }
0x218e   :  { %v4455_v34 = vpack.c.bf16 %v4450_v50, %v4449_v29 }
0x218f   :  { %v10541_v11 = vpop.eup %10540  ;;  %10546 = vrsqrt.f32 %v4418_v38 }
0x2190   :  { %8752 = vmatmul.mubr.msk.bf16.vlgmr.msra.gmra.mrb[124].mxu0 %vm405_vm3, %v4455_v34  ;;  %v4427_v15 = vmul.f32 %v10541_v11, %v12672_v24 }
0x2191   :  { %v10543_v32 = vpop.eup %10542  ;;  %4571 = vmatprep.mubr.bf16.mxu0 %v11291_v14 }
0x2192   :  { %v4428_v54 = vmul.f32 %v10543_v32, %v12675_v26  ;;  %v4439_v19 = vmul.f32 %v8742_v57, %v4427_v15 }
0x2194   :  { %v4440_v2 = vmul.f32 %v8742_v57, %v4428_v54  ;;  %v4451_v37 = vadd.f32 %v8743_v18, %v4439_v19 }
0x2196   :  { %v4452_v42 = vadd.f32 %v8743_v18, %v4440_v2 }
0x2197   :  { %v10545_v43 = vpop.eup %10544 }
0x2198   :  { %v4456_v36 = vpack.c.bf16 %v4452_v42, %v4451_v37  ;;  %v4429_v47 = vmul.f32 %v10545_v43, %v12684_v49  ;;  %v4477_v49 = vrot.slane %v4468_v39, %v528_v10 }
0x2199   :  { %v10547_v40 = vpop.eup %10546 }
0x219a   :  { %8753 = vmatmul.mubr.msk.bf16.gmra.mrb[128].mxu0 %vm405_vm3, %v4456_v36  ;;  %v4430_v56 = vmul.f32 %v10547_v40, %v12687_v35  ;;  %v4441_v46 = vmul.f32 %v8742_v57, %v4429_v47 }
0x219b   :  { %4581 = vmatprep.mubr.bf16.mxu0 %v11291_v14 }
0x219c   :  { %v4442_v24 = vmul.f32 %v8742_v57, %v4430_v56  ;;  %v4453_v1 = vadd.f32 %v8743_v18, %v4441_v46 }
0x219e   :  { %v4454_v44 = vadd.f32 %v8743_v18, %v4442_v24 }
0x21a0   :  { %v4457_v26 = vpack.c.bf16 %v4454_v44, %v4453_v1 }
0x21a2   :  { %8754 = vmatmul.mubr.msk.bf16.gmra.mrb[132].mxu0 %vm405_vm3, %v4457_v26 }
0x2263   :  { %v4563_v48 = vpop.f32.mrb[124].mxu0 }
0x2264   :  { %v4565_v53 = vpop.f32.mrb[125].mxu0  ;;  %v4564_v35 = vadd.f32 %v4563_v48, %v4473_v23 }
0x2265   :  { %v4567_v17 = vpop.f32.mrb[126].mxu0  ;;  %v4566_v14 = vadd.f32 %v4565_v53, %v4477_v49 }
0x2266   :  { %v4568_v31 = vadd.f32 %v4567_v17, %v4473_v23  ;;  %v4569_v20 = vpop.f32.mrb[127].mxu0 }
0x2267   :  { %v4570_v30 = vadd.f32 %v4569_v20, %v4477_v49 }
0x2268   :  { %v12710_v52 = vpack.c.bf16 %v4568_v31, %v4564_v35 }
0x2269   :  { %v12712_v59 = vpack.c.bf16 %v4570_v30, %v4566_v14 }
0x226a   :  { %4627 = vrot.lane.b32.xlu0 %v12710_v52, %s11270_s5  ;;  %9686 = vmatprep.mubr.msk.bf16.mxu1 %vm323_vm2, %v12710_v52 }
0x226d   :  { %v4573_v61 = vpop.f32.mrb[128].mxu0 }
0x226e   :  { %v4574_v8 = vadd.f32 %v4573_v61, %v4473_v23  ;;  %v4575_v10 = vpop.f32.mrb[129].mxu0 }
0x226f   :  { %v4577_v6 = vpop.f32.mrb[130].mxu0  ;;  %v4576_v13 = vadd.f32 %v4575_v10, %v4477_v49 }
0x2270   :  { %v12718_v62 = vpack.c.bf16 %v4574_v8, %v4574_v8  ;;  %v4578_v22 = vadd.f32 %v4577_v6, %v4473_v23  ;;  %v4579_v51 = vpop.f32.mrb[131].mxu0 }
0x2271   :  { %v4580_v55 = vadd.f32 %v4579_v51, %v4477_v49  ;;  %v12739_v37 = vpack.c.bf16 %v4576_v13, %v4576_v13 }
0x2272   :  { %v4594_v57 = vpack.c.bf16 %v4578_v22, %v4574_v8  ;;  %4629 = vrot.lane.b32.xlu1 %v12718_v62, %s11270_s5 }
0x2273   :  { %v4595_v12 = vpack.c.bf16 %v4580_v55, %v4576_v13  ;;  %v4837_v42 = vsel %vm333_vm1, %v12739_v37, 0 }
0x2274   :  { %v4604_v25 = vunpack.c.h.b16 %v4594_v57 }
0x2275   :  { %v4583_v21 = vpop.f32.mrb[132].mxu0  ;;  %v4613_v50 = vunpack.c.h.b16 %v4595_v12 }
0x2276   :  { %v4585_v7 = vpop.f32.mrb[133].mxu0  ;;  %v4584_v27 = vadd.f32 %v4583_v21, %v4473_v23 }
0x2277   :  { %v4587_v28 = vpop.f32.mrb[134].mxu0  ;;  %v4586_v16 = vadd.f32 %v4585_v7, %v4477_v49 }
0x2278   :  { %v4588_v33 = vadd.f32 %v4587_v28, %v4473_v23  ;;  %v4589_v18 = vpop.f32.mrb[135].mxu0 }
0x2279   :  { %v4590_v63 = vadd.f32 %v4589_v18, %v4477_v49 }
0x227a   :  { %v4596_v9 = vpack.c.bf16 %v4588_v33, %v4584_v27  ;;  %v12730_v15 = vpack.c.bf16 %v4588_v33, %v4588_v33 }
0x227b   :  { %v4597_v45 = vpack.c.bf16 %v4590_v63, %v4586_v16  ;;  %v12753_v56 = vpack.c.bf16 %v4590_v63, %v4590_v63 }
0x227c   :  { %v4605_v29 = vunpack.c.l.b16 %v4596_v9 }
0x227d   :  { %v4614_v38 = vunpack.c.l.b16 %v4597_v45  ;;  %v4897_v46 = vsel %vm333_vm1, %v12753_v56, 0 }
0x227e   :  { %v12722_v34 = vpack.c.b16 %v4605_v29, %v4604_v25 }
0x227f   :  { %v12724_v11 = vpack.c.b16 %v4614_v38, %v4613_v50 }
0x2280   :  { %4693 = vrot.lane.b32.xlu1 %v12722_v34, %s11270_s5  ;;  %9694 = vmatprep.mubr.msk.bf16.mxu0 %vm323_vm2, %v12722_v34 }
0x2284   :  { %4695 = vrot.lane.b32.xlu1 %v12730_v15, %s11270_s5  ;;  %s11303_s5 = smov [#allocation32]  }
0x22dc   :  { %v4628_v32 = vpop.permute.xlu0 %4627 }
0x22dd   :  { %10166 = vmatprep.subr.msk.bf16.mxu1 %vm323_vm2, %v4628_v32  ;;  %v4638_v54 = vsel %vm323_vm2, %v4628_v32, 0 }
0x22de   :  { %9683 = vmatpush3.bf16.xpose.msra.mxu1 %v4638_v54 }
0x22e4   :  { %v4630_v19 = vpop.permute.xlu1 %4629 }
0x22e5   :  { %10167 = vmatprep.subr.msk.bf16.mxu1 %vm323_vm2, %v4630_v19  ;;  %v4641_v2 = vsel %vm323_vm2, %v4630_v19, 0 }
0x22e6   :  { %9685 = vmatpush3.bf16.xpose.msra.mxu1 %v4641_v2 }
0x22e7   :  { %9698 = vmatprep.subr.bf16.mxu1 %v12712_v59 }
0x22ed   :  { %9687 = vmatmul.mubr.msk.bf16.vlgmr.msra.gmra.mrb[148].mxu1 %vm323_vm2, %v12718_v62 }
0x22ee   :  { %9699 = vmatpush3.bf16.msra.mxu1 %v12712_v59 }
0x22ef   :  { %10170 = vmatprep.subr.msk.bf16.mxu1 %vm333_vm1, %v12739_v37 }
0x22f2   :  { %9701 = vmatpush3.bf16.msra.mxu1 %v4837_v42  ;;  %v4694_v43 = vpop.permute.xlu1 %4693 }
0x22f3   :  { %10168 = vmatprep.subr.msk.bf16.mxu0 %vm323_vm2, %v4694_v43  ;;  %v4704_v36 = vsel %vm323_vm2, %v4694_v43, 0 }
0x22f4   :  { %9691 = vmatpush3.bf16.xpose.msra.mxu0 %v4704_v36 }
0x22f6   :  { %v4696_v47 = vpop.permute.xlu1 %4695 }
0x22f7   :  { %10169 = vmatprep.subr.msk.bf16.mxu0 %vm323_vm2, %v4696_v47  ;;  %v4707_v40 = vsel %vm323_vm2, %v4696_v47, 0 }
0x22fc   :  { %9693 = vmatpush3.bf16.xpose.msra.mxu0 %v4707_v40 }
0x22fd   :  { %9706 = vmatprep.subr.bf16.mxu0 %v12724_v11 }
0x2303   :  { %9695 = vmatmul.mubr.msk.bf16.vlgmr.msra.gmra.mrb[136].mxu0 %vm323_vm2, %v12730_v15 }
0x2304   :  { %9707 = vmatpush3.bf16.msra.mxu0 %v12724_v11 }
0x2305   :  { %10171 = vmatprep.subr.msk.bf16.mxu0 %vm333_vm1, %v12753_v56 }
0x2308   :  { %9709 = vmatpush3.bf16.msra.mxu0 %v4897_v46 }
0x23c0   :  { %v9688_v24 = vpop.f32.mrb[148].mxu1 }
0x23c1   :  { %v4677_v1 = vpop.f32.mrb[149].mxu1  ;;  %v4763_v48 = vsel %vm808_vm4, %v9688_v24, -inf }
0x23c2   :  { %v9689_v44 = vpop.f32.mrb[150].mxu1  ;;  %v4757_v26 = vsel %vm808_vm4, %v4677_v1, -inf }
0x23c3   :  { %4758 = vmax.xlane.f32.xlu0 %v4757_v26  ;;  %v4680_v39 = vpop.f32.mrb[151].mxu1 }
0x23c4   :  { %v4760_v23 = vsel %vm808_vm4, %v4680_v39, -inf }
0x23c5   :  { %4761 = vmax.xlane.f32.xlu1 %v4760_v23 }
0x23c7   :  { %4764 = vmax.xlane.f32.xlu0 %v4763_v48 }
0x23d6   :  { %v9696_v49 = vpop.f32.mrb[136].mxu0 }
0x23d7   :  { %v4743_v53 = vpop.f32.mrb[137].mxu0  ;;  %v4772_v17 = vsel %vm808_vm4, %v9696_v49, -inf }
0x23d8   :  { %4773 = vmax.xlane.f32.xlu1 %v4772_v17  ;;  %v9697_v35 = vpop.f32.mrb[138].mxu0  ;;  %v4766_v31 = vsel %vm808_vm4, %v4743_v53, -inf }
0x23d9   :  { %4767 = vmax.xlane.f32.xlu0 %v4766_v31  ;;  %v4746_v20 = vpop.f32.mrb[139].mxu0 }
0x23da   :  { %v4769_v14 = vsel %vm808_vm4, %v4746_v20, -inf }
0x23dd   :  { %4770 = vmax.xlane.f32.xlu0 %v4769_v14 }
0x2450   :  { %v4759_v30 = vpop.xlane.xlu0 %4758 }
0x2451   :  { %v4775_v8 = vsub.f32 %v4677_v1, %v4759_v30 }
0x2452   :  { %v4762_v61 = vpop.xlane.xlu1 %4761 }
0x2453   :  { %v4776_v10 = vsub.f32 %v4680_v39, %v4762_v61  ;;  %v4781_v13 = vmul.f32 1.442695, %v4775_v8 }
0x2454   :  { %v4765_v6 = vpop.xlane.xlu0 %4764 }
0x2455   :  { %v4783_v22 = vmul.f32 1.442695, %v4776_v10  ;;  %v4777_v51 = vsub.f32 %v9688_v24, %v4765_v6 }
0x2457   :  { %10548 = vpow2.f32 %v4783_v22  ;;  %v4785_v55 = vmul.f32 1.442695, %v4777_v51 }
0x2459   :  { %10550 = vpow2.f32 %v4785_v55 }
0x245a   :  { %10552 = vpow2.f32 %v4781_v13 }
0x2461   :  { %v10549_v57 = vpop.eup %10548 }
0x2462   :  { %v4796_v12 = vsel %vm808_vm4, %v10549_v57, 0.0 }
0x2463   :  { %v10551_v21 = vpop.eup %10550  ;;  %4797 = vadd.xlane.f32.xlu1 %v4796_v12 }
0x2464   :  { %v4799_v7 = vsel %vm808_vm4, %v10551_v21, 0.0  ;;  %v10553_v28 = vpop.eup %10552 }
0x2465   :  { %4800 = vadd.xlane.f32.xlu0 %v4799_v7  ;;  %v4774_v27 = vpop.xlane.xlu1 %4773  ;;  %v4793_v9 = vsel %vm808_vm4, %v10553_v28, 0.0 }
0x2466   :  { %v4780_v33 = vsub.f32 %v9696_v49, %v4774_v27  ;;  %v4768_v18 = vpop.xlane.xlu0 %4767 }
0x2467   :  { %v4778_v16 = vsub.f32 %v4743_v53, %v4768_v18 }
0x2468   :  { %v4791_v63 = vmul.f32 1.442695, %v4780_v33 }
0x2469   :  { %v4787_v45 = vmul.f32 1.442695, %v4778_v16  ;;  %4794 = vadd.xlane.f32.xlu0 %v4793_v9 }
0x246a   :  { %10554 = vpow2.f32 %v4791_v63  ;;  %v4771_v25 = vpop.xlane.xlu0 %4770 }
0x246b   :  { %v4779_v29 = vsub.f32 %v4746_v20, %v4771_v25  ;;  %10556 = vpow2.f32 %v4787_v45 }
0x246d   :  { %v4789_v50 = vmul.f32 1.442695, %v4779_v29 }
0x246f   :  { %10558 = vpow2.f32 %v4789_v50 }
0x2474   :  { %v10555_v38 = vpop.eup %10554 }
0x2475   :  { %v4808_v32 = vsel %vm808_vm4, %v10555_v38, 0.0  ;;  %v10557_v54 = vpop.eup %10556 }
0x2476   :  { %4809 = vadd.xlane.f32.xlu1 %v4808_v32  ;;  %v4802_v2 = vsel %vm808_vm4, %v10557_v54, 0.0 }
0x2479   :  { %v10559_v19 = vpop.eup %10558 }
0x247a   :  { %4803 = vadd.xlane.f32.xlu1 %v4802_v2  ;;  %v4805_v42 = vsel %vm808_vm4, %v10559_v19, 0.0 }
0x247b   :  { %4806 = vadd.xlane.f32.xlu0 %v4805_v42 }
0x248b   :  { %4956 = vrot.lane.b32.xlu1 %v12718_v62, %s11292_s26 }
0x248f   :  { %5022 = vrot.lane.b32.xlu1 %v12722_v34, %s11292_s26 }
0x2491   :  { %4954 = vrot.lane.b32.xlu0 %v12710_v52, %s11292_s26 }
0x2493   :  { %4950 = vrot.lane.b32.xlu1 %v12710_v52, %s11293_s18 }
0x2495   :  { %4952 = vrot.lane.b32.xlu0 %v12718_v62, %s11293_s18 }
0x2497   :  { %5024 = vrot.lane.b32.xlu1 %v12730_v15, %s11292_s26 }
0x2499   :  { %5018 = vrot.lane.b32.xlu0 %v12722_v34, %s11293_s18 }
0x249b   :  { %5020 = vrot.lane.b32.xlu1 %v12730_v15, %s11293_s18 }
0x24f0   :  { %v4798_v43 = vpop.xlane.xlu1 %4797 }
0x24f2   :  { %v4801_v36 = vpop.xlane.xlu0 %4800 }
0x24f3   :  { %10560 = vrcp.f32 %v4801_v36 }
0x24f4   :  { %10562 = vrcp.f32 %v4798_v43 }
0x24f6   :  { %v4795_v47 = vpop.xlane.xlu0 %4794 }
0x24f7   :  { %10564 = vrcp.f32 %v4795_v47 }
0x24fd   :  { %v10561_v40 = vpop.eup %10560 }
0x24fe   :  { %v10563_v46 = vpop.eup %10562  ;;  %v4819_v1 = vmul.f32 %v10561_v40, %v10551_v21 }
0x24ff   :  { %v4818_v26 = vmul.f32 %v10563_v46, %v10549_v57 }
0x2500   :  { %v4824_v48 = vpack.c.bf16 %v4819_v1, %v4819_v1 }
0x2501   :  { %v10565_v24 = vpop.eup %10564 }
0x2502   :  { %v4817_v44 = vmul.f32 %v10565_v24, %v10553_v28 }
0x2503   :  { %v4810_v39 = vpop.xlane.xlu1 %4809 }
0x2504   :  { %v4823_v23 = vpack.c.bf16 %v4818_v26, %v4817_v44  ;;  %10566 = vrcp.f32 %v4810_v39 }
0x2506   :  { %9702 = vmatprep.mubr.msk.bf16.mxu1 %vm808_vm4, %v4823_v23 }
0x2507   :  { %9703 = vmatmul.mubr.msk.bf16.vlgmr.msra.gmra.mrb[152].mxu1 %vm808_vm4, %v4824_v48  ;;  %v4804_v49 = vpop.xlane.xlu1 %4803 }
0x2508   :  { %10568 = vrcp.f32 %v4804_v49  ;;  %v4807_v53 = vpop.xlane.xlu0 %4806 }
0x2509   :  { %10570 = vrcp.f32 %v4807_v53 }
0x250b   :  { %v4957_v17 = vpop.permute.xlu1 %4956 }
0x250c   :  { %v4955_v35 = vpop.permute.xlu0 %4954  ;;  %v4968_v13 = vsel %vm323_vm2, %v4957_v17, 0 }
0x250d   :  { %10172 = vmatprep.subr.msk.bf16.mxu1 %vm323_vm2, %v4955_v35  ;;  %v4965_v31 = vsel %vm323_vm2, %v4955_v35, 0 }
0x250e   :  { %9715 = vmatpush3.bf16.xpose.msra.mxu1 %v4965_v31  ;;  %v10567_v14 = vpop.eup %10566 }
0x250f   :  { %10173 = vmatprep.subr.msk.bf16.mxu1 %vm323_vm2, %v4957_v17  ;;  %v5023_v20 = vpop.permute.xlu1 %5022  ;;  %v4822_v22 = vmul.f32 %v10567_v14, %v10555_v38 }
0x2510   :  { %10174 = vmatprep.subr.msk.bf16.mxu0 %vm323_vm2, %v5023_v20  ;;  %v4953_v8 = vpop.permute.xlu0 %4952  ;;  %v5033_v21 = vsel %vm323_vm2, %v5023_v20, 0 }
0x2511   :  { %v4826_v57 = vpack.c.bf16 %v4822_v22, %v4822_v22 }
0x2512   :  { %v10569_v30 = vpop.eup %10568 }
0x2513   :  { %v10571_v61 = vpop.eup %10570  ;;  %v4951_v10 = vpop.permute.xlu1 %4950  ;;  %v4820_v6 = vmul.f32 %v10569_v30, %v10557_v54 }
0x2514   :  { %9718 = vmatprep.mubr.msk.bf16.mxu1 %vm323_vm2, %v4951_v10  ;;  %v4821_v51 = vmul.f32 %v10571_v61, %v10559_v19  ;;  %v5019_v12 = vpop.permute.xlu0 %5018 }
0x2516   :  { %9717 = vmatpush3.bf16.xpose.msra.mxu1 %v4968_v13  ;;  %v4825_v55 = vpack.c.bf16 %v4821_v51, %v4820_v6 }
0x2517   :  { %v5025_v7 = vpop.permute.xlu1 %5024 }
0x2518   :  { %9710 = vmatprep.mubr.msk.bf16.mxu0 %vm808_vm4, %v4825_v55  ;;  %v5036_v28 = vsel %vm323_vm2, %v5025_v7, 0 }
0x2519   :  { %9711 = vmatmul.mubr.msk.bf16.vlgmr.msra.gmra.mrb[140].mxu0 %vm808_vm4, %v4826_v57 }
0x251a   :  { %9723 = vmatpush3.bf16.xpose.msra.mxu0 %v5033_v21  ;;  %9726 = vmatprep.mubr.msk.bf16.mxu0 %vm323_vm2, %v5019_v12 }
0x251b   :  { %10175 = vmatprep.subr.msk.bf16.mxu0 %vm323_vm2, %v5025_v7  ;;  %v5021_v27 = vpop.permute.xlu1 %5020 }
0x251d   :  { %9719 = vmatmul.mubr.msk.bf16.vlgmr.msra.gmra.mrb[156].mxu1 %vm323_vm2, %v4953_v8 }
0x2522   :  { %9725 = vmatpush3.bf16.xpose.msra.mxu0 %v5036_v28 }
0x2529   :  { %9727 = vmatmul.mubr.msk.bf16.vlgmr.msra.gmra.mrb[144].mxu0 %vm323_vm2, %v5021_v27 }
0x25da   :  { %v12806_v33 = vpop.f32.mrb[152].mxu1 }
0x25db   :  { %v12808_v18 = vpop.f32.mrb[153].mxu1 }
0x25dc   :  { %v9705_v16 = vpop.f32.mrb[154].mxu1 }
0x25dd   :  { %v12810_v63 = vpop.f32.mrb[155].mxu1 }
0x25de   :  { %v4947_v9 = vpack.c.bf16 %v12810_v63, %v12808_v18 }
0x25ec   :  { %v12814_v45 = vpop.f32.mrb[140].mxu0 }
0x25ed   :  { %v12816_v25 = vpop.f32.mrb[141].mxu0 }
0x25ee   :  { %v4948_v29 = vpack.c.bf16 %v12816_v25, %v12806_v33  ;;  %v9713_v50 = vpop.f32.mrb[142].mxu0 }
0x25ef   :  { %v12820_v38 = vpop.f32.mrb[143].mxu0 }
0x25f0   :  { %v4949_v32 = vpack.c.bf16 %v12814_v45, %v12820_v38  ;;  %v9720_v54 = vpop.f32.mrb[156].mxu1 }
0x25f1   :  { %v5004_v19 = vpop.f32.mrb[157].mxu1  ;;  %v5092_v47 = vsel %vm808_vm4, %v9720_v54, -inf }
0x25f2   :  { %v9721_v2 = vpop.f32.mrb[158].mxu1  ;;  %v5086_v42 = vsel %vm808_vm4, %v5004_v19, -inf }
0x25f3   :  { %5087 = vmax.xlane.f32.xlu0 %v5086_v42  ;;  %v5007_v43 = vpop.f32.mrb[159].mxu1 }
0x25f4   :  { %v5089_v36 = vsel %vm808_vm4, %v5007_v43, -inf }
0x25f5   :  { %5090 = vmax.xlane.f32.xlu1 %v5089_v36 }
0x25f7   :  { %5093 = vmax.xlane.f32.xlu0 %v5092_v47 }
0x25fc   :  { %v9728_v40 = vpop.f32.mrb[144].mxu0 }
0x25fd   :  { %v5072_v46 = vpop.f32.mrb[145].mxu0  ;;  %v5101_v24 = vsel %vm808_vm4, %v9728_v40, -inf }
0x25fe   :  { %5102 = vmax.xlane.f32.xlu1 %v5101_v24  ;;  %v9729_v1 = vpop.f32.mrb[146].mxu0  ;;  %v5095_v44 = vsel %vm808_vm4, %v5072_v46, -inf }
0x25ff   :  { %5096 = vmax.xlane.f32.xlu0 %v5095_v44  ;;  %v5075_v26 = vpop.f32.mrb[147].mxu0 }
0x2600   :  { %v5098_v39 = vsel %vm808_vm4, %v5075_v26, -inf }
0x2603   :  { %5099 = vmax.xlane.f32.xlu0 %v5098_v39 }
0x2680   :  { %v5088_v23 = vpop.xlane.xlu0 %5087 }
0x2681   :  { %v5104_v49 = vsub.f32 %v5004_v19, %v5088_v23 }
0x2682   :  { %v5091_v48 = vpop.xlane.xlu1 %5090 }
0x2683   :  { %v5105_v53 = vsub.f32 %v5007_v43, %v5091_v48  ;;  %v5110_v20 = vmul.f32 1.442695, %v5104_v49 }
0x2684   :  { %v5094_v17 = vpop.xlane.xlu0 %5093 }
0x2685   :  { %v5112_v35 = vmul.f32 1.442695, %v5105_v53  ;;  %v5106_v31 = vsub.f32 %v9720_v54, %v5094_v17 }
0x2687   :  { %10572 = vpow2.f32 %v5112_v35  ;;  %v5114_v14 = vmul.f32 1.442695, %v5106_v31 }
0x2689   :  { %10574 = vpow2.f32 %v5114_v14 }
0x268a   :  { %10576 = vpow2.f32 %v5110_v20  ;;  %v4618_v20 = vld [vmem:[#allocation14 + $0x24] sm:$0xf] }
0x268b   :  { %v5103_v30 = vpop.xlane.xlu1 %5102 }
0x268c   :  { %v5109_v61 = vsub.f32 %v9728_v40, %v5103_v30  ;;  %v5097_v8 = vpop.xlane.xlu0 %5096 }
0x268d   :  { %v5107_v10 = vsub.f32 %v5072_v46, %v5097_v8 }
0x268e   :  { %v5120_v6 = vmul.f32 1.442695, %v5109_v61 }
0x268f   :  { %v5116_v22 = vmul.f32 1.442695, %v5107_v10 }
0x2690   :  { %10578 = vpow2.f32 %v5120_v6  ;;  %v5100_v51 = vpop.xlane.xlu0 %5099  ;;  %v5293_v6 = vsel %vm333_vm1, %v4618_v20, 0 }
0x2691   :  { %v10573_v13 = vpop.eup %10572  ;;  %v5108_v55 = vsub.f32 %v5075_v26, %v5100_v51  ;;  %10580 = vpow2.f32 %v5116_v22 }
0x2692   :  { %v5125_v57 = vsel %vm808_vm4, %v10573_v13, 0.0 }
0x2693   :  { %v10575_v12 = vpop.eup %10574  ;;  %v5118_v21 = vmul.f32 1.442695, %v5108_v55  ;;  %5126 = vadd.xlane.f32.xlu1 %v5125_v57 }
0x2694   :  { %v5128_v7 = vsel %vm808_vm4, %v10575_v12, 0.0  ;;  %v10577_v28 = vpop.eup %10576 }
0x2695   :  { %10582 = vpow2.f32 %v5118_v21  ;;  %5129 = vadd.xlane.f32.xlu0 %v5128_v7  ;;  %v5122_v27 = vsel %vm808_vm4, %v10577_v28, 0.0 }
0x2699   :  { %5123 = vadd.xlane.f32.xlu0 %v5122_v27 }
0x269a   :  { %v10579_v16 = vpop.eup %10578 }
0x269b   :  { %v5137_v50 = vsel %vm808_vm4, %v10579_v16, 0.0  ;;  %v10581_v54 = vpop.eup %10580 }
0x269c   :  { %5138 = vadd.xlane.f32.xlu1 %v5137_v50  ;;  %v5131_v2 = vsel %vm808_vm4, %v10581_v54, 0.0 }
0x269f   :  { %v10583_v19 = vpop.eup %10582 }
0x26a0   :  { %5132 = vadd.xlane.f32.xlu1 %v5131_v2  ;;  %v5134_v42 = vsel %vm808_vm4, %v10583_v19, 0.0 }
0x26a1   :  { %5135 = vadd.xlane.f32.xlu0 %v5134_v42 }
0x26b1   :  { %5158 = vrot.lane.b32.xlu1 %v12739_v37, %s11293_s18 }
0x26b5   :  { %5218 = vrot.lane.b32.xlu1 %v12724_v11, %s11293_s18 }
0x26b7   :  { %5156 = vrot.lane.b32.xlu0 %v12712_v59, %s11293_s18 }
0x26b9   :  { %5220 = vrot.lane.b32.xlu1 %v12753_v56, %s11293_s18 }
0x26bb   :  { %5425 = vrot.lane.b32.xlu0 %v12710_v52, %s11294_s28 }
0x26bd   :  { %5427 = vrot.lane.b32.xlu1 %v12718_v62, %s11294_s28 }
0x26bf   :  { %5493 = vrot.lane.b32.xlu0 %v12722_v34, %s11294_s28 }
0x26c1   :  { %5421 = vrot.lane.b32.xlu1 %v12710_v52, %s11295_s9 }
0x26c3   :  { %5423 = vrot.lane.b32.xlu0 %v12718_v62, %s11295_s9 }
0x26c5   :  { %5495 = vrot.lane.b32.xlu1 %v12730_v15, %s11294_s28 }
0x26c7   :  { %5489 = vrot.lane.b32.xlu0 %v12722_v34, %s11295_s9 }
0x26c9   :  { %5491 = vrot.lane.b32.xlu1 %v12730_v15, %s11295_s9 }
0x2720   :  { %v5127_v43 = vpop.xlane.xlu1 %5126 }
0x2721   :  { %10584 = vrcp.f32 %v5127_v43 }
0x2722   :  { %v5130_v36 = vpop.xlane.xlu0 %5129 }
0x2726   :  { %v5124_v47 = vpop.xlane.xlu0 %5123 }
0x2727   :  { %10586 = vrcp.f32 %v5124_v47 }
0x2728   :  { %10588 = vrcp.f32 %v5130_v36 }
0x2729   :  { %v5139_v40 = vpop.xlane.xlu1 %5138 }
0x272a   :  { %10590 = vrcp.f32 %v5139_v40 }
0x272b   :  { %v10585_v1 = vpop.eup %10584 }
0x272c   :  { %v5147_v49 = vmul.f32 %v10585_v1, %v10573_v13 }
0x272d   :  { %v5133_v46 = vpop.xlane.xlu1 %5132 }
0x272e   :  { %10592 = vrcp.f32 %v5133_v46  ;;  %v5136_v24 = vpop.xlane.xlu0 %5135 }
0x272f   :  { %10594 = vrcp.f32 %v5136_v24 }
0x2731   :  { %v10587_v44 = vpop.eup %10586  ;;  %v5159_v26 = vpop.permute.xlu1 %5158 }
0x2732   :  { %v10589_v39 = vpop.eup %10588  ;;  %v5157_v23 = vpop.permute.xlu0 %5156  ;;  %v5146_v48 = vmul.f32 %v10587_v44, %v10577_v28  ;;  %v5168_v14 = vsel %vm333_vm1, %v5159_v26, 0 }
0x2733   :  { %9730 = vmatprep.subr.bf16.mxu1 %v5157_v23  ;;  %v5148_v35 = vmul.f32 %v10589_v39, %v10575_v12  ;;  %v4617_v12 = vld [vmem:[#allocation14 + $0x20] sm:$0xf] }
0x2734   :  { %9731 = vmatpush3.bf16.msra.mxu1 %v5157_v23  ;;  %v5152_v53 = vpack.c.bf16 %v5147_v49, %v5146_v48  ;;  %v10591_v31 = vpop.eup %10590  ;;  %v5362_v27 = vsel %vm333_vm1, %v4617_v12, 0 }
0x2735   :  { %10176 = vmatprep.subr.msk.bf16.mxu1 %vm333_vm1, %v5159_v26  ;;  %v5219_v17 = vpop.permute.xlu1 %5218  ;;  %v5153_v10 = vpack.c.bf16 %v5148_v35, %v5148_v35  ;;  %v5151_v51 = vmul.f32 %v10591_v31, %v10579_v16 }
0x2736   :  { %9738 = vmatprep.subr.bf16.mxu0 %v5219_v17  ;;  %9734 = vmatprep.mubr.msk.bf16.mxu1 %vm808_vm4, %v5152_v53  ;;  %v5426_v13 = vpop.permute.xlu0 %5425 }
0x2737   :  { %9739 = vmatpush3.bf16.msra.mxu0 %v5219_v17  ;;  %v5155_v28 = vpack.c.bf16 %v5151_v51, %v5151_v51  ;;  %v5436_v45 = vsel %vm323_vm2, %v5426_v13, 0 }
0x2738   :  { %v10593_v30 = vpop.eup %10592  ;;  %9733 = vmatpush3.bf16.msra.mxu1 %v5168_v14 }
0x2739   :  { %v10595_v61 = vpop.eup %10594  ;;  %v5221_v8 = vpop.permute.xlu1 %5220  ;;  %9746 = vmatprep.subr.bf16.mxu1 %v11289_v0  ;;  %v5149_v22 = vmul.f32 %v10593_v30, %v10581_v54 }
0x273a   :  { %10177 = vmatprep.subr.msk.bf16.mxu0 %vm333_vm1, %v5221_v8  ;;  %v5230_v55 = vsel %vm333_vm1, %v5221_v8, 0  ;;  %v5150_v57 = vmul.f32 %v10595_v61, %v10583_v19  ;;  %v5494_v16 = vpop.permute.xlu0 %5493 }
0x273b   :  { %9735 = vmatmul.mubr.msk.bf16.vlgmr.msra.gmra.mrb[160].mxu1 %vm808_vm4, %v5153_v10  ;;  %9741 = vmatpush3.bf16.msra.mxu0 %v5230_v55  ;;  %v5504_v54 = vsel %vm323_vm2, %v5494_v16, 0 }
0x273c   :  { %9747 = vmatpush3.bf16.msra.mxu1 %v5293_v6  ;;  %v5154_v21 = vpack.c.bf16 %v5150_v57, %v5149_v22  ;;  %9760 = vmatprep.subr.bf16.mxu0 %v11289_v0 }
0x273d   :  { %10178 = vmatprep.subr.msk.bf16.mxu1 %vm323_vm2, %v5426_v13  ;;  %v5428_v7 = vpop.permute.xlu1 %5427  ;;  %9748 = vmatprep.mubr.msk.bf16.mxu1 %vm11290_vm0, %v11289_v0 }
0x273e   :  { %9742 = vmatprep.mubr.msk.bf16.mxu0 %vm808_vm4, %v5154_v21  ;;  %v5424_v18 = vpop.permute.xlu0 %5423  ;;  %v5439_v26 = vsel %vm323_vm2, %v5428_v7, 0 }
0x273f   :  { %9743 = vmatmul.mubr.msk.bf16.vlgmr.msra.gmra.mrb[148].mxu0 %vm808_vm4, %v5155_v28 }
0x2740   :  { %9761 = vmatpush3.bf16.msra.mxu0 %v5362_v27  ;;  %9762 = vmatprep.mubr.msk.bf16.mxu0 %vm11290_vm0, %v11289_v0 }
0x2741   :  { %10180 = vmatprep.subr.msk.bf16.mxu0 %vm323_vm2, %v5494_v16  ;;  %v5422_v50 = vpop.permute.xlu1 %5421 }
0x2742   :  { %v5490_v63 = vpop.permute.xlu0 %5489 }
0x2745   :  { %v5496_v19 = vpop.permute.xlu1 %5495 }
0x2746   :  { %v5507_v2 = vsel %vm323_vm2, %v5496_v19, 0 }
0x2747   :  { %9763 = vmatmul.mubr.msk.bf16.vlgmr.msra.gmra.mrb[152].mxu0 %vm323_vm2, %v4947_v9 }
0x2748   :  { %9766 = vmatprep.mubr.msk.bf16.mxu0 %vm11290_vm0, %v11289_v0 }
0x2749   :  { %9783 = vmatpush3.bf16.xpose.msra.mxu0 %v5504_v54  ;;  %v5492_v9 = vpop.permute.xlu1 %5491 }
0x274a   :  { %10181 = vmatprep.subr.msk.bf16.mxu0 %vm323_vm2, %v5496_v19 }
0x274f   :  { %9767 = vmatmul.mubr.msk.bf16.gmra.mrb[156].mxu0 %vm323_vm2, %v4948_v29 }
0x2750   :  { %9770 = vmatprep.mubr.msk.bf16.mxu0 %vm11290_vm0, %v11289_v0 }
0x2751   :  { %9785 = vmatpush3.bf16.xpose.msra.mxu0 %v5507_v2 }
0x2757   :  { %9771 = vmatmul.mubr.msk.bf16.gmra.mrb[160].mxu0 %vm323_vm2, %v4949_v32 }
0x2758   :  { %9786 = vmatprep.mubr.msk.bf16.mxu0 %vm323_vm2, %v5490_v63 }
0x275f   :  { %9787 = vmatmul.mubr.msk.bf16.vlgmr.msra.gmra.mrb[164].mxu0 %vm323_vm2, %v5492_v9 }
0x280e   :  { %v9736_v33 = vpop.f32.mrb[160].mxu1 }
0x280f   :  { %v5204_v25 = vpop.f32.mrb[161].mxu1 }
0x2810   :  { %v9737_v29 = vpop.f32.mrb[162].mxu1 }
0x2811   :  { %v5207_v42 = vpop.f32.mrb[163].mxu1 }
0x2812   :  { %v5280_v43 = vpack.c.bf16 %v5207_v42, %v5204_v25  ;;  %v9744_v36 = vpop.f32.mrb[148].mxu0 }
0x2813   :  { %v5266_v47 = vpop.f32.mrb[149].mxu0 }
0x2814   :  { %v5281_v40 = vpack.c.bf16 %v5266_v47, %v9736_v33  ;;  %v9745_v46 = vpop.f32.mrb[150].mxu0  ;;  %9749 = vmatmul.mubr.msk.bf16.vlgmr.msra.gmra.mrb[164].mxu1 %vm323_vm2, %v5280_v43 }
0x2815   :  { %9775 = vmatpush3.bf16.xpose.msra.mxu1 %v5436_v45  ;;  %v5269_v38 = vpop.f32.mrb[151].mxu0  ;;  %9752 = vmatprep.mubr.msk.bf16.mxu1 %vm11290_vm0, %v11289_v0 }
0x2816   :  { %v5282_v32 = vpack.c.bf16 %v9744_v36, %v5269_v38  ;;  %10179 = vmatprep.subr.msk.bf16.mxu1 %vm323_vm2, %v5428_v7 }
0x281a   :  { %v5398_v24 = vpop.f32.mrb[152].mxu0 }
0x281b   :  { %v9764_v1 = vpop.f32.mrb[153].mxu0 }
0x281c   :  { %9753 = vmatmul.mubr.msk.bf16.gmra.mrb[168].mxu1 %vm323_vm2, %v5281_v40  ;;  %v5401_v44 = vpop.f32.mrb[154].mxu0 }
0x281d   :  { %9777 = vmatpush3.bf16.xpose.msra.mxu1 %v5439_v26  ;;  %v9765_v39 = vpop.f32.mrb[155].mxu0  ;;  %9756 = vmatprep.mubr.msk.bf16.mxu1 %vm11290_vm0, %v11289_v0 }
0x2822   :  { %v5406_v23 = vpop.f32.mrb[156].mxu0 }
0x2823   :  { %v9768_v48 = vpop.f32.mrb[157].mxu0 }
0x2824   :  { %9757 = vmatmul.mubr.msk.bf16.gmra.mrb[172].mxu1 %vm323_vm2, %v5282_v32  ;;  %v5409_v49 = vpop.f32.mrb[158].mxu0 }
0x2825   :  { %v9769_v53 = vpop.f32.mrb[159].mxu0  ;;  %9778 = vmatprep.mubr.msk.bf16.mxu1 %vm323_vm2, %v5422_v50 }
0x282a   :  { %v5414_v17 = vpop.f32.mrb[160].mxu0 }
0x282b   :  { %v9772_v35 = vpop.f32.mrb[161].mxu0 }
0x282c   :  { %v5417_v31 = vpop.f32.mrb[162].mxu0  ;;  %9779 = vmatmul.mubr.msk.bf16.vlgmr.msra.gmra.mrb[176].mxu1 %vm323_vm2, %v5424_v18 }
0x282d   :  { %v9773_v20 = vpop.f32.mrb[163].mxu0 }
0x2832   :  { %v9788_v14 = vpop.f32.mrb[164].mxu0 }
0x2833   :  { %v5543_v30 = vpop.f32.mrb[165].mxu0  ;;  %v5572_v36 = vsel %vm808_vm4, %v9788_v14, -inf }
0x2834   :  { %v9789_v61 = vpop.f32.mrb[166].mxu0  ;;  %v5566_v47 = vsel %vm808_vm4, %v5543_v30, -inf }
0x2835   :  { %v5546_v8 = vpop.f32.mrb[167].mxu0 }
0x2836   :  { %v5569_v40 = vsel %vm808_vm4, %v5546_v8, -inf }
0x28e7   :  { %v5329_v10 = vpop.f32.mrb[164].mxu1 }
0x28e8   :  { %v12911_v6 = vadd.f32 %v5398_v24, %v5329_v10  ;;  %v9750_v22 = vpop.f32.mrb[165].mxu1 }
0x28e9   :  { %v5332_v51 = vpop.f32.mrb[166].mxu1 }
0x28ea   :  { %v12913_v13 = vadd.f32 %v5401_v44, %v5332_v51  ;;  %v9751_v55 = vpop.f32.mrb[167].mxu1 }
0x28ef   :  { %v5337_v57 = vpop.f32.mrb[168].mxu1 }
0x28f0   :  { %v12915_v12 = vadd.f32 %v5406_v23, %v5337_v57  ;;  %v9754_v21 = vpop.f32.mrb[169].mxu1 }
0x28f1   :  { %v5340_v7 = vpop.f32.mrb[170].mxu1 }
0x28f2   :  { %v12917_v28 = vadd.f32 %v5409_v49, %v5340_v7  ;;  %v9755_v27 = vpop.f32.mrb[171].mxu1 }
0x28f7   :  { %v5345_v16 = vpop.f32.mrb[172].mxu1 }
0x28f8   :  { %v12919_v50 = vadd.f32 %v5414_v17, %v5345_v16  ;;  %v9758_v54 = vpop.f32.mrb[173].mxu1 }
0x28f9   :  { %v5348_v19 = vpop.f32.mrb[174].mxu1 }
0x28fa   :  { %v12921_v2 = vadd.f32 %v5417_v31, %v5348_v19  ;;  %v9759_v18 = vpop.f32.mrb[175].mxu1 }
0x28ff   :  { %v9780_v63 = vpop.f32.mrb[176].mxu1 }
0x2900   :  { %v5475_v9 = vpop.f32.mrb[177].mxu1  ;;  %v5563_v43 = vsel %vm808_vm4, %v9780_v63, -inf }
0x2901   :  { %v9781_v33 = vpop.f32.mrb[178].mxu1  ;;  %v5557_v25 = vsel %vm808_vm4, %v5475_v9, -inf }
0x2902   :  { %5558 = vmax.xlane.f32.xlu0 %v5557_v25  ;;  %v5478_v29 = vpop.f32.mrb[179].mxu1 }
0x2903   :  { %v5560_v42 = vsel %vm808_vm4, %v5478_v29, -inf }
0x2904   :  { %5561 = vmax.xlane.f32.xlu1 %v5560_v42 }
0x2906   :  { %5564 = vmax.xlane.f32.xlu0 %v5563_v43 }
0x2908   :  { %5573 = vmax.xlane.f32.xlu1 %v5572_v36 }
0x290a   :  { %5567 = vmax.xlane.f32.xlu0 %v5566_v47 }
0x290e   :  { %5570 = vmax.xlane.f32.xlu0 %v5569_v40 }
0x298f   :  { %v5559_v46 = vpop.xlane.xlu0 %5558 }
0x2990   :  { %v5575_v53 = vsub.f32 %v5475_v9, %v5559_v46 }
0x2991   :  { %v5562_v45 = vpop.xlane.xlu1 %5561 }
0x2992   :  { %v5581_v31 = vmul.f32 1.442695, %v5575_v53  ;;  %v5576_v21 = vsub.f32 %v5478_v29, %v5562_v45 }
0x2993   :  { %v5565_v38 = vpop.xlane.xlu0 %5564 }
0x2994   :  { %v5577_v26 = vsub.f32 %v9780_v63, %v5565_v38  ;;  %v5583_v7 = vmul.f32 1.442695, %v5576_v21 }
0x2995   :  { %v5574_v32 = vpop.xlane.xlu1 %5573 }
0x2996   :  { %v5580_v24 = vsub.f32 %v9788_v14, %v5574_v32  ;;  %v5585_v17 = vmul.f32 1.442695, %v5577_v26 }
0x2997   :  { %v5568_v1 = vpop.xlane.xlu0 %5567 }
0x2998   :  { %v5578_v44 = vsub.f32 %v5543_v30, %v5568_v1  ;;  %v5591_v39 = vmul.f32 1.442695, %v5580_v24 }
0x299a   :  { %v5587_v23 = vmul.f32 1.442695, %v5578_v44 }
0x299b   :  { %v5571_v48 = vpop.xlane.xlu0 %5570 }
0x299c   :  { %10596 = vpow2.f32 %v5587_v23  ;;  %v5579_v49 = vsub.f32 %v5546_v8, %v5571_v48 }
0x299d   :  { %10598 = vpow2.f32 %v5591_v39 }
0x299e   :  { %v5589_v35 = vmul.f32 1.442695, %v5579_v49 }
0x29a0   :  { %10600 = vpow2.f32 %v5589_v35 }
0x29a1   :  { %10602 = vpow2.f32 %v5585_v17 }
0x29a2   :  { %10604 = vpow2.f32 %v5581_v31 }
0x29a3   :  { %10606 = vpow2.f32 %v5583_v7 }
0x29a6   :  { %v10597_v20 = vpop.eup %10596 }
0x29a7   :  { %v5602_v61 = vsel %vm808_vm4, %v10597_v20, 0.0  ;;  %v10599_v14 = vpop.eup %10598 }
0x29a8   :  { %5603 = vadd.xlane.f32.xlu1 %v5602_v61  ;;  %v5608_v22 = vsel %vm808_vm4, %v10599_v14, 0.0 }
0x29aa   :  { %v10601_v30 = vpop.eup %10600 }
0x29ab   :  { %v5605_v10 = vsel %vm808_vm4, %v10601_v30, 0.0  ;;  %v12932_v51 = vpop.eup %10602 }
0x29ac   :  { %5606 = vadd.xlane.f32.xlu0 %v5605_v10  ;;  %5609 = vadd.xlane.f32.xlu1 %v5608_v22  ;;  %v5599_v8 = vsel %vm808_vm4, %v12932_v51, 0.0  ;;  %v12936_v55 = vpop.eup %10604 }
0x29ad   :  { %v5593_v57 = vsel %vm808_vm4, %v12936_v55, 0.0  ;;  %v10607_v27 = vpop.eup %10606 }
0x29ae   :  { %v5596_v16 = vsel %vm808_vm4, %v10607_v27, 0.0 }
0x29b0   :  { %5600 = vadd.xlane.f32.xlu0 %v5599_v8 }
0x29b4   :  { %5594 = vadd.xlane.f32.xlu0 %v5593_v57 }
0x29bd   :  { %5629 = vrot.lane.b32.xlu1 %v12739_v37, %s11295_s9 }
0x29c1   :  { %5689 = vrot.lane.b32.xlu1 %v12724_v11, %s11295_s9 }
0x29ca   :  { %5627 = vrot.lane.b32.xlu0 %v12712_v59, %s11295_s9 }
0x29ce   :  { %5833 = vrot.lane.b32.xlu0 %v12710_v52, %s11296_s6 }
0x29d2   :  { %5901 = vrot.lane.b32.xlu0 %v12722_v34, %s11296_s6 }
0x29d6   :  { %5831 = vrot.lane.b32.xlu0 %v12718_v62, %s11297_s13 }
0x29da   :  { %5897 = vrot.lane.b32.xlu0 %v12722_v34, %s11297_s13 }
0x29e5   :  { %5597 = vadd.xlane.f32.xlu1 %v5596_v16 }
0x29f6   :  { %5691 = vrot.lane.b32.xlu1 %v12753_v56, %s11295_s9 }
0x29fa   :  { %5835 = vrot.lane.b32.xlu1 %v12718_v62, %s11296_s6 }
0x29fe   :  { %5829 = vrot.lane.b32.xlu1 %v12710_v52, %s11297_s13 }
0x2a02   :  { %5903 = vrot.lane.b32.xlu1 %v12730_v15, %s11296_s6 }
0x2a06   :  { %5899 = vrot.lane.b32.xlu1 %v12730_v15, %s11297_s13 }
0x2a35   :  { %v5604_v54 = vpop.xlane.xlu1 %5603 }
0x2a36   :  { %10608 = vrcp.f32 %v5604_v54 }
0x2a39   :  { %v5607_v19 = vpop.xlane.xlu0 %5606  ;;  %v5610_v18 = vpop.xlane.xlu1 %5609 }
0x2a3a   :  { %10610 = vrcp.f32 %v5607_v19 }
0x2a3b   :  { %10612 = vrcp.f32 %v5610_v18 }
0x2a3d   :  { %v5601_v63 = vpop.xlane.xlu0 %5600  ;;  %v5630_v9 = vpop.permute.xlu1 %5629 }
0x2a3e   :  { %v5639_v46 = vsel %vm333_vm1, %v5630_v9, 0  ;;  %10614 = vrcp.f32 %v5601_v63 }
0x2a40   :  { %v10609_v29 = vpop.eup %10608 }
0x2a41   :  { %v5595_v33 = vpop.xlane.xlu0 %5594  ;;  %v5690_v25 = vpop.permute.xlu1 %5689  ;;  %v5620_v36 = vmul.f32 %v10609_v29, %v10597_v20  ;;  %v4619_v20 = vld [vmem:[#allocation14 + $0x28] sm:$0xf] }
0x2a42   :  { %9798 = vmatprep.subr.bf16.mxu0 %v5690_v25  ;;  %10616 = vrcp.f32 %v5595_v33  ;;  %v5764_v10 = vsel %vm333_vm1, %v4619_v20, 0 }
0x2a43   :  { %9799 = vmatpush3.bf16.msra.mxu0 %v5690_v25 }
0x2a44   :  { %v10611_v42 = vpop.eup %10610 }
0x2a45   :  { %v5628_v43 = vpop.permute.xlu0 %5627  ;;  %v5621_v47 = vmul.f32 %v10611_v42, %v10601_v30  ;;  %v10613_v45 = vpop.eup %10612 }
0x2a46   :  { %9790 = vmatprep.subr.bf16.mxu1 %v5628_v43  ;;  %v5622_v32 = vmul.f32 %v10613_v45, %v10599_v14 }
0x2a47   :  { %9791 = vmatpush3.bf16.msra.mxu1 %v5628_v43  ;;  %v5625_v40 = vpack.c.bf16 %v5621_v47, %v5620_v36 }
0x2a48   :  { %10182 = vmatprep.subr.msk.bf16.mxu1 %vm333_vm1, %v5630_v9  ;;  %v5626_v26 = vpack.c.bf16 %v5622_v32, %v5622_v32  ;;  %v10615_v39 = vpop.eup %10614 }
0x2a49   :  { %9802 = vmatprep.mubr.msk.bf16.mxu0 %vm808_vm4, %v5625_v40  ;;  %v5834_v44 = vpop.permute.xlu0 %5833  ;;  %v5619_v53 = vmul.f32 %v10615_v39, %v12932_v51 }
0x2a4a   :  { %v5844_v61 = vsel %vm323_vm2, %v5834_v44, 0 }
0x2a4b   :  { %9793 = vmatpush3.bf16.msra.mxu1 %v5639_v46  ;;  %v5624_v30 = vpack.c.bf16 %v5619_v53, %v5619_v53 }
0x2a4c   :  { %9806 = vmatprep.subr.bf16.mxu1 %v11289_v0  ;;  %v10617_v48 = vpop.eup %10616 }
0x2a4d   :  { %v5617_v35 = vmul.f32 %v10617_v48, %v12936_v55  ;;  %v5902_v22 = vpop.permute.xlu0 %5901 }
0x2a4e   :  { %v5912_v33 = vsel %vm323_vm2, %v5902_v22, 0 }
0x2a51   :  { %v5832_v8 = vpop.permute.xlu0 %5831 }
0x2a72   :  { %v5598_v38 = vpop.xlane.xlu1 %5597 }
0x2a73   :  { %10618 = vrcp.f32 %v5598_v38  ;;  %v5898_v38 = vpop.permute.xlu0 %5897 }
0x2a76   :  { %v5692_v24 = vpop.permute.xlu1 %5691 }
0x2a77   :  { %10183 = vmatprep.subr.msk.bf16.mxu0 %vm333_vm1, %v5692_v24  ;;  %v5701_v1 = vsel %vm333_vm1, %v5692_v24, 0 }
0x2a78   :  { %9801 = vmatpush3.bf16.msra.mxu0 %v5701_v1 }
0x2a79   :  { %10184 = vmatprep.subr.msk.bf16.mxu0 %vm323_vm2, %v5834_v44 }
0x2a7a   :  { %v5836_v23 = vpop.permute.xlu1 %5835 }
0x2a7b   :  { %9803 = vmatmul.mubr.msk.bf16.vlgmr.msra.gmra.mrb[168].mxu0 %vm808_vm4, %v5626_v26  ;;  %v5847_v51 = vsel %vm323_vm2, %v5836_v23, 0 }
0x2a7d   :  { %v10619_v49 = vpop.eup %10618 }
0x2a7e   :  { %v5830_v17 = vpop.permute.xlu1 %5829  ;;  %v5618_v31 = vmul.f32 %v10619_v49, %v10607_v27 }
0x2a7f   :  { %9824 = vmatprep.mubr.msk.bf16.mxu0 %vm323_vm2, %v5830_v17 }
0x2a80   :  { %v5623_v14 = vpack.c.bf16 %v5618_v31, %v5617_v35 }
0x2a81   :  { %9821 = vmatpush3.bf16.xpose.msra.mxu0 %v5844_v61 }
0x2a82   :  { %9794 = vmatprep.mubr.msk.bf16.mxu1 %vm808_vm4, %v5623_v14  ;;  %10185 = vmatprep.subr.msk.bf16.mxu0 %vm323_vm2, %v5836_v23  ;;  %v5904_v25 = vpop.permute.xlu1 %5903 }
0x2a83   :  { %9795 = vmatmul.mubr.msk.bf16.vlgmr.msra.gmra.mrb[180].mxu1 %vm808_vm4, %v5624_v30  ;;  %v5915_v43 = vsel %vm323_vm2, %v5904_v25, 0 }
0x2a84   :  { %9807 = vmatpush3.bf16.msra.mxu1 %v5764_v10  ;;  %9808 = vmatprep.mubr.msk.bf16.mxu1 %vm11290_vm0, %v11289_v0 }
0x2a85   :  { %10186 = vmatprep.subr.msk.bf16.mxu1 %vm323_vm2, %v5902_v22 }
0x2a86   :  { %v5900_v32 = vpop.permute.xlu1 %5899 }
0x2a89   :  { %9823 = vmatpush3.bf16.xpose.msra.mxu0 %v5847_v51 }
0x2a90   :  { %9825 = vmatmul.mubr.msk.bf16.vlgmr.msra.gmra.mrb[172].mxu0 %vm323_vm2, %v5832_v8 }
0x2b4e   :  { %v9804_v55 = vpop.f32.mrb[168].mxu0 }
0x2b4f   :  { %v5737_v57 = vpop.f32.mrb[169].mxu0 }
0x2b50   :  { %v9805_v21 = vpop.f32.mrb[170].mxu0 }
0x2b51   :  { %v5740_v7 = vpop.f32.mrb[171].mxu0 }
0x2b52   :  { %v5753_v27 = vpack.c.bf16 %v9804_v55, %v5740_v7 }
0x2b56   :  { %v9796_v16 = vpop.f32.mrb[180].mxu1 }
0x2b57   :  { %v5752_v54 = vpack.c.bf16 %v5737_v57, %v9796_v16  ;;  %v5675_v19 = vpop.f32.mrb[181].mxu1 }
0x2b58   :  { %v9797_v18 = vpop.f32.mrb[182].mxu1 }
0x2b59   :  { %v5678_v63 = vpop.f32.mrb[183].mxu1 }
0x2b5a   :  { %v5751_v9 = vpack.c.bf16 %v5678_v63, %v5675_v19 }
0x2b5c   :  { %9809 = vmatmul.mubr.msk.bf16.vlgmr.msra.gmra.mrb[184].mxu1 %vm323_vm2, %v5751_v9 }
0x2b5d   :  { %9829 = vmatpush3.bf16.xpose.msra.mxu1 %v5912_v33  ;;  %9812 = vmatprep.mubr.msk.bf16.mxu1 %vm11290_vm0, %v11289_v0 }
0x2b5e   :  { %10187 = vmatprep.subr.msk.bf16.mxu1 %vm323_vm2, %v5904_v25 }
0x2b63   :  { %v9826_v29 = vpop.f32.mrb[172].mxu0 }
0x2b64   :  { %9813 = vmatmul.mubr.msk.bf16.gmra.mrb[188].mxu1 %vm323_vm2, %v5752_v54  ;;  %v5883_v42 = vpop.f32.mrb[173].mxu0  ;;  %v5971_v45 = vsel %vm808_vm4, %v9826_v29, -inf }
0x2b65   :  { %9831 = vmatpush3.bf16.xpose.msra.mxu1 %v5915_v43  ;;  %v9827_v36 = vpop.f32.mrb[174].mxu0  ;;  %v5965_v47 = vsel %vm808_vm4, %v5883_v42, -inf  ;;  %9816 = vmatprep.mubr.msk.bf16.mxu1 %vm11290_vm0, %v11289_v0 }
0x2b66   :  { %5966 = vmax.xlane.f32.xlu0 %v5965_v47  ;;  %v5886_v40 = vpop.f32.mrb[175].mxu0  ;;  %9852 = vmatprep.subr.bf16.mxu1 %v11289_v0 }
0x2b67   :  { %v5968_v46 = vsel %vm808_vm4, %v5886_v40, -inf }
0x2b68   :  { %5969 = vmax.xlane.f32.xlu1 %v5968_v46 }
0x2b6a   :  { %5972 = vmax.xlane.f32.xlu0 %v5971_v45 }
0x2b6c   :  { %9817 = vmatmul.mubr.msk.bf16.gmra.mrb[192].mxu1 %vm323_vm2, %v5753_v27 }
0x2b6d   :  { %9832 = vmatprep.mubr.msk.bf16.mxu1 %vm323_vm2, %v5898_v38 }
0x2b74   :  { %9833 = vmatmul.mubr.msk.bf16.vlgmr.msra.gmra.mrb[196].mxu1 %vm323_vm2, %v5900_v32 }
0x2b75   :  { %9854 = vmatprep.mubr.msk.bf16.mxu1 %vm11290_vm0, %v11289_v0 }
0x2bf3   :  { %v5967_v49 = vpop.xlane.xlu0 %5966 }
0x2bf4   :  { %v5983_v30 = vsub.f32 %v5883_v42, %v5967_v49 }
0x2bf5   :  { %v5970_v48 = vpop.xlane.xlu1 %5969 }
0x2bf6   :  { %v5984_v53 = vsub.f32 %v5886_v40, %v5970_v48  ;;  %v5989_v22 = vmul.f32 1.442695, %v5983_v30 }
0x2bf7   :  { %v5973_v10 = vpop.xlane.xlu0 %5972 }
0x2bf8   :  { %v5991_v14 = vmul.f32 1.442695, %v5984_v53  ;;  %v5985_v51 = vsub.f32 %v9826_v29, %v5973_v10  ;;  %v4620_v10 = vld [vmem:[#allocation14 + $0x2c] sm:$0xf] }
0x2bfa   :  { %10620 = vpow2.f32 %v5991_v14 }
0x2bfb   :  { %10622 = vpow2.f32 %v5989_v22 }
0x2c04   :  { %v10621_v54 = vpop.eup %10620 }
0x2c05   :  { %v6004_v63 = vsel %vm808_vm4, %v10621_v54, 0.0  ;;  %v10623_v9 = vpop.eup %10622 }
0x2c06   :  { %v6001_v33 = vsel %vm808_vm4, %v10623_v9, 0.0 }
0x2c2f   :  { %v5800_v24 = vpop.f32.mrb[184].mxu1 }
0x2c30   :  { %v13005_v1 = vadd.f32 %v5800_v24, %v12911_v6  ;;  %v9810_v44 = vpop.f32.mrb[185].mxu1 }
0x2c31   :  { %v5803_v26 = vpop.f32.mrb[186].mxu1 }
0x2c32   :  { %v13008_v39 = vadd.f32 %v5803_v26, %v12913_v13  ;;  %v9811_v23 = vpop.f32.mrb[187].mxu1 }
0x2c37   :  { %v5808_v17 = vpop.f32.mrb[188].mxu1 }
0x2c38   :  { %v13011_v35 = vadd.f32 %v5808_v17, %v12915_v12  ;;  %v9814_v31 = vpop.f32.mrb[189].mxu1 }
0x2c39   :  { %v5811_v20 = vpop.f32.mrb[190].mxu1 }
0x2c3a   :  { %v13014_v61 = vadd.f32 %v5811_v20, %v12917_v28  ;;  %v9815_v6 = vpop.f32.mrb[191].mxu1  ;;  %v5993_v28 = vmul.f32 1.442695, %v5985_v51 }
0x2c3c   :  { %10624 = vpow2.f32 %v5993_v28 }
0x2c3f   :  { %v5816_v13 = vpop.f32.mrb[192].mxu1 }
0x2c40   :  { %v13017_v8 = vadd.f32 %v5816_v13, %v12919_v50  ;;  %v9818_v55 = vpop.f32.mrb[193].mxu1  ;;  %v6172_v13 = vsel %vm333_vm1, %v4620_v10, 0 }
0x2c41   :  { %v5819_v57 = vpop.f32.mrb[194].mxu1  ;;  %9853 = vmatpush3.bf16.msra.mxu1 %v6172_v13 }
0x2c42   :  { %v13020_v12 = vadd.f32 %v5819_v57, %v12921_v2  ;;  %v9819_v21 = vpop.f32.mrb[195].mxu1 }
0x2c46   :  { %v13027_v25 = vpop.eup %10624 }
0x2c47   :  { %v9834_v7 = vpop.f32.mrb[196].mxu1  ;;  %v6007_v29 = vsel %vm808_vm4, %v13027_v25, 0.0 }
0x2c48   :  { %v5951_v27 = vpop.f32.mrb[197].mxu1  ;;  %v5980_v16 = vsel %vm808_vm4, %v9834_v7, -inf }
0x2c49   :  { %5981 = vmax.xlane.f32.xlu1 %v5980_v16  ;;  %v9835_v19 = vpop.f32.mrb[198].mxu1  ;;  %v5974_v18 = vsel %vm808_vm4, %v5951_v27, -inf }
0x2c4a   :  { %5975 = vmax.xlane.f32.xlu0 %v5974_v18  ;;  %v5954_v50 = vpop.f32.mrb[199].mxu1 }
0x2c4b   :  { %v5977_v2 = vsel %vm808_vm4, %v5954_v50, -inf }
0x2c4d   :  { %6005 = vadd.xlane.f32.xlu1 %v6004_v63 }
0x2c4e   :  { %5978 = vmax.xlane.f32.xlu0 %v5977_v2 }
0x2c52   :  { %6002 = vadd.xlane.f32.xlu0 %v6001_v33 }
0x2c56   :  { %6008 = vadd.xlane.f32.xlu0 %v6007_v29 }
0x2cd6   :  { %v5982_v42 = vpop.xlane.xlu1 %5981 }
0x2cd7   :  { %v5988_v43 = vsub.f32 %v9834_v7, %v5982_v42  ;;  %v5976_v36 = vpop.xlane.xlu0 %5975 }
0x2cd8   :  { %v5986_v47 = vsub.f32 %v5951_v27, %v5976_v36 }
0x2cd9   :  { %v5999_v40 = vmul.f32 1.442695, %v5988_v43 }
0x2cda   :  { %v5995_v46 = vmul.f32 1.442695, %v5986_v47  ;;  %v6006_v38 = vpop.xlane.xlu1 %6005 }
0x2cdb   :  { %10626 = vpow2.f32 %v5999_v40  ;;  %v5979_v45 = vpop.xlane.xlu0 %5978 }
0x2cdc   :  { %v5987_v32 = vsub.f32 %v5954_v50, %v5979_v45  ;;  %10628 = vpow2.f32 %v5995_v46 }
0x2cdd   :  { %10630 = vrcp.f32 %v6006_v38 }
0x2cde   :  { %v5997_v24 = vmul.f32 1.442695, %v5987_v32 }
0x2cdf   :  { %v6003_v44 = vpop.xlane.xlu0 %6002 }
0x2ce0   :  { %10632 = vpow2.f32 %v5997_v24 }
0x2ce1   :  { %10634 = vrcp.f32 %v6003_v44 }
0x2ce3   :  { %v6009_v22 = vpop.xlane.xlu0 %6008 }
0x2ce4   :  { %10636 = vrcp.f32 %v6009_v22 }
0x2ce5   :  { %v13031_v26 = vpop.eup %10626 }
0x2ce6   :  { %v6016_v23 = vsel %vm808_vm4, %v13031_v26, 0.0  ;;  %v10629_v48 = vpop.eup %10628 }
0x2ce7   :  { %6017 = vadd.xlane.f32.xlu1 %v6016_v23  ;;  %v10631_v49 = vpop.eup %10630  ;;  %v6010_v17 = vsel %vm808_vm4, %v10629_v48, 0.0 }
0x2ce8   :  { %v6026_v14 = vmul.f32 %v10631_v49, %v10621_v54 }
0x2cea   :  { %v10633_v53 = vpop.eup %10632 }
0x2ceb   :  { %v10635_v31 = vpop.eup %10634  ;;  %6011 = vadd.xlane.f32.xlu1 %v6010_v17  ;;  %v6013_v20 = vsel %vm808_vm4, %v10633_v53, 0.0 }
0x2cec   :  { %6014 = vadd.xlane.f32.xlu0 %v6013_v20  ;;  %v6025_v6 = vmul.f32 %v10635_v31, %v10623_v9 }
0x2cee   :  { %v6031_v30 = vpack.c.bf16 %v6026_v14, %v6025_v6  ;;  %v10637_v28 = vpop.eup %10636 }
0x2cef   :  { %v6027_v16 = vmul.f32 %v10637_v28, %v13027_v25 }
0x2cf0   :  { %9840 = vmatprep.mubr.msk.bf16.mxu0 %vm808_vm4, %v6031_v30 }
0x2cf1   :  { %v6032_v2 = vpack.c.bf16 %v6027_v16, %v6027_v16 }
0x2cfc   :  { %6037 = vrot.lane.b32.xlu1 %v12739_v37, %s11297_s13 }
0x2d00   :  { %6097 = vrot.lane.b32.xlu1 %v12724_v11, %s11297_s13 }
0x2d02   :  { %6035 = vrot.lane.b32.xlu0 %v12712_v59, %s11297_s13 }
0x2d04   :  { %6099 = vrot.lane.b32.xlu1 %v12753_v56, %s11297_s13 }
0x2d06   :  { %6241 = vrot.lane.b32.xlu0 %v12710_v52, %s11281_s4 }
0x2d08   :  { %6243 = vrot.lane.b32.xlu1 %v12718_v62, %s11281_s4 }
0x2d0a   :  { %6309 = vrot.lane.b32.xlu0 %v12722_v34, %s11281_s4 }
0x2d0c   :  { %6237 = vrot.lane.b32.xlu1 %v12710_v52, %s11298_s20 }
0x2d0e   :  { %6239 = vrot.lane.b32.xlu0 %v12718_v62, %s11298_s20 }
0x2d10   :  { %6311 = vrot.lane.b32.xlu1 %v12730_v15, %s11281_s4 }
0x2d12   :  { %6305 = vrot.lane.b32.xlu0 %v12722_v34, %s11298_s20 }
0x2d14   :  { %6307 = vrot.lane.b32.xlu1 %v12730_v15, %s11298_s20 }
0x2d74   :  { %v6018_v51 = vpop.xlane.xlu1 %6017 }
0x2d78   :  { %v6012_v55 = vpop.xlane.xlu1 %6011 }
0x2d79   :  { %10638 = vrcp.f32 %v6012_v55  ;;  %v6015_v57 = vpop.xlane.xlu0 %6014 }
0x2d7a   :  { %10640 = vrcp.f32 %v6015_v57 }
0x2d7b   :  { %10642 = vrcp.f32 %v6018_v51 }
0x2d7c   :  { %v6038_v21 = vpop.permute.xlu1 %6037 }
0x2d7d   :  { %v6036_v7 = vpop.permute.xlu0 %6035  ;;  %v6047_v19 = vsel %vm333_vm1, %v6038_v21, 0 }
0x2d7e   :  { %9836 = vmatprep.subr.bf16.mxu0 %v6036_v7 }
0x2d7f   :  { %9837 = vmatpush3.bf16.msra.mxu0 %v6036_v7 }
0x2d80   :  { %10188 = vmatprep.subr.msk.bf16.mxu0 %vm333_vm1, %v6038_v21  ;;  %v6098_v27 = vpop.permute.xlu1 %6097 }
0x2d81   :  { %v6242_v54 = vpop.permute.xlu0 %6241 }
0x2d82   :  { %v6252_v45 = vsel %vm323_vm2, %v6242_v54, 0 }
0x2d83   :  { %v10639_v18 = vpop.eup %10638  ;;  %9839 = vmatpush3.bf16.msra.mxu0 %v6047_v19 }
0x2d84   :  { %v10641_v50 = vpop.eup %10640  ;;  %9844 = vmatprep.subr.bf16.mxu0 %v6098_v27  ;;  %v6100_v63 = vpop.permute.xlu1 %6099  ;;  %v6028_v9 = vmul.f32 %v10639_v18, %v10629_v48 }
0x2d85   :  { %v10643_v33 = vpop.eup %10642  ;;  %v6310_v29 = vpop.permute.xlu0 %6309  ;;  %v6029_v42 = vmul.f32 %v10641_v50, %v10633_v53  ;;  %v6109_v47 = vsel %vm333_vm1, %v6100_v63, 0 }
0x2d86   :  { %9841 = vmatmul.mubr.msk.bf16.vlgmr.msra.gmra.mrb[176].mxu0 %vm808_vm4, %v6032_v2  ;;  %10192 = vmatprep.subr.msk.bf16.mxu1 %vm323_vm2, %v6310_v29  ;;  %v6030_v36 = vmul.f32 %v10643_v33, %v13031_v26  ;;  %v6320_v49 = vsel %vm323_vm2, %v6310_v29, 0 }
0x2d87   :  { %9845 = vmatpush3.bf16.msra.mxu0 %v6098_v27  ;;  %v6033_v43 = vpack.c.bf16 %v6029_v42, %v6028_v9 }
0x2d88   :  { %10189 = vmatprep.subr.msk.bf16.mxu0 %vm333_vm1, %v6100_v63  ;;  %v6244_v25 = vpop.permute.xlu1 %6243  ;;  %v6034_v40 = vpack.c.bf16 %v6030_v36, %v6030_v36 }
0x2d89   :  { %9848 = vmatprep.mubr.msk.bf16.mxu0 %vm808_vm4, %v6033_v43  ;;  %v6255_v38 = vsel %vm323_vm2, %v6244_v25, 0  ;;  %v6240_v32 = vpop.permute.xlu0 %6239 }
0x2d8b   :  { %9847 = vmatpush3.bf16.msra.mxu0 %v6109_v47 }
0x2d8c   :  { %10190 = vmatprep.subr.msk.bf16.mxu0 %vm323_vm2, %v6242_v54  ;;  %v6238_v46 = vpop.permute.xlu1 %6237 }
0x2d8d   :  { %v6306_v13 = vpop.permute.xlu0 %6305 }
0x2d8e   :  { %9849 = vmatmul.mubr.msk.bf16.vlgmr.msra.gmra.mrb[180].mxu0 %vm808_vm4, %v6034_v40 }
0x2d8f   :  { %9870 = vmatprep.mubr.msk.bf16.mxu0 %vm323_vm2, %v6238_v46 }
0x2d90   :  { %v6312_v53 = vpop.permute.xlu1 %6311 }
0x2d91   :  { %v6323_v10 = vsel %vm323_vm2, %v6312_v53, 0 }
0x2d94   :  { %9867 = vmatpush3.bf16.xpose.msra.mxu0 %v6252_v45  ;;  %v6308_v22 = vpop.permute.xlu1 %6307 }
0x2d95   :  { %10191 = vmatprep.subr.msk.bf16.mxu0 %vm323_vm2, %v6244_v25 }
0x2d9c   :  { %9869 = vmatpush3.bf16.xpose.msra.mxu0 %v6255_v38 }
0x2da3   :  { %9871 = vmatmul.mubr.msk.bf16.vlgmr.msra.gmra.mrb[184].mxu0 %vm323_vm2, %v6240_v32 }
0x2e59   :  { %v9842_v24 = vpop.f32.mrb[176].mxu0 }
0x2e5a   :  { %v6083_v44 = vpop.f32.mrb[177].mxu0 }
0x2e5b   :  { %v9843_v26 = vpop.f32.mrb[178].mxu0 }
0x2e5c   :  { %v6086_v23 = vpop.f32.mrb[179].mxu0 }
0x2e5d   :  { %v6159_v48 = vpack.c.bf16 %v6086_v23, %v6083_v44 }
0x2e5f   :  { %9855 = vmatmul.mubr.msk.bf16.vlgmr.msra.gmra.mrb[200].mxu1 %vm323_vm2, %v6159_v48 }
0x2e60   :  { %9875 = vmatpush3.bf16.xpose.msra.mxu1 %v6320_v49  ;;  %9858 = vmatprep.mubr.msk.bf16.mxu1 %vm11290_vm0, %v11289_v0 }
0x2e61   :  { %10193 = vmatprep.subr.msk.bf16.mxu1 %vm323_vm2, %v6312_v53  ;;  %v9850_v17 = vpop.f32.mrb[180].mxu0 }
0x2e62   :  { %v6145_v31 = vpop.f32.mrb[181].mxu0 }
0x2e63   :  { %v6160_v20 = vpack.c.bf16 %v6145_v31, %v9842_v24  ;;  %v9851_v6 = vpop.f32.mrb[182].mxu0 }
0x2e64   :  { %v6148_v14 = vpop.f32.mrb[183].mxu0 }
0x2e65   :  { %v6161_v30 = vpack.c.bf16 %v9850_v17, %v6148_v14 }
0x2e67   :  { %9859 = vmatmul.mubr.msk.bf16.gmra.mrb[204].mxu1 %vm323_vm2, %v6160_v20 }
0x2e68   :  { %9877 = vmatpush3.bf16.xpose.msra.mxu1 %v6323_v10  ;;  %9862 = vmatprep.mubr.msk.bf16.mxu1 %vm11290_vm0, %v11289_v0 }
0x2e69   :  { %9898 = vmatprep.subr.bf16.mxu1 %v11289_v0 }
0x2e6f   :  { %9863 = vmatmul.mubr.msk.bf16.gmra.mrb[208].mxu1 %vm323_vm2, %v6161_v30 }
0x2e70   :  { %9878 = vmatprep.mubr.msk.bf16.mxu1 %vm323_vm2, %v6306_v13 }
0x2e76   :  { %v9872_v51 = vpop.f32.mrb[184].mxu0 }
0x2e77   :  { %v6291_v55 = vpop.f32.mrb[185].mxu0  ;;  %9879 = vmatmul.mubr.msk.bf16.vlgmr.msra.gmra.mrb[212].mxu1 %vm323_vm2, %v6308_v22  ;;  %v6379_v27 = vsel %vm808_vm4, %v9872_v51, -inf }
0x2e78   :  { %v9873_v57 = vpop.f32.mrb[186].mxu0  ;;  %v6373_v21 = vsel %vm808_vm4, %v6291_v55, -inf  ;;  %9900 = vmatprep.mubr.msk.bf16.mxu1 %vm11290_vm0, %v11289_v0 }
0x2e79   :  { %6374 = vmax.xlane.f32.xlu0 %v6373_v21  ;;  %v6294_v28 = vpop.f32.mrb[187].mxu0 }
0x2e7a   :  { %v6376_v7 = vsel %vm808_vm4, %v6294_v28, -inf }
0x2e7b   :  { %6377 = vmax.xlane.f32.xlu1 %v6376_v7 }
0x2e7d   :  { %6380 = vmax.xlane.f32.xlu0 %v6379_v27 }
0x2f06   :  { %v6375_v9 = vpop.xlane.xlu0 %6374 }
0x2f07   :  { %v6391_v40 = vsub.f32 %v6291_v55, %v6375_v9 }
0x2f08   :  { %v6378_v2 = vpop.xlane.xlu1 %6377 }
0x2f09   :  { %v6392_v33 = vsub.f32 %v6294_v28, %v6378_v2  ;;  %v6397_v45 = vmul.f32 1.442695, %v6391_v40 }
0x2f0a   :  { %v6381_v46 = vpop.xlane.xlu0 %6380 }
0x2f0b   :  { %v6399_v47 = vmul.f32 1.442695, %v6392_v33  ;;  %v6393_v38 = vsub.f32 %v9872_v51, %v6381_v46  ;;  %v4621_v46 = vld [vmem:[#allocation14 + $0x30] sm:$0xf] }
0x2f0d   :  { %10644 = vpow2.f32 %v6399_v47 }
0x2f0e   :  { %10646 = vpow2.f32 %v6397_v45 }
0x2f17   :  { %v10645_v53 = vpop.eup %10644 }
0x2f18   :  { %v6412_v20 = vsel %vm808_vm4, %v10645_v53, 0.0  ;;  %v10647_v6 = vpop.eup %10646 }
0x2f19   :  { %v6409_v14 = vsel %vm808_vm4, %v10647_v6, 0.0 }
0x2f32   :  { %v6208_v16 = vpop.f32.mrb[200].mxu1 }
0x2f33   :  { %v13098_v54 = vadd.f32 %v6208_v16, %v13005_v1  ;;  %v9856_v19 = vpop.f32.mrb[201].mxu1 }
0x2f34   :  { %v6211_v18 = vpop.f32.mrb[202].mxu1 }
0x2f35   :  { %v13101_v50 = vadd.f32 %v6211_v18, %v13008_v39  ;;  %v9857_v63 = vpop.f32.mrb[203].mxu1 }
0x2f3a   :  { %v6216_v29 = vpop.f32.mrb[204].mxu1 }
0x2f3b   :  { %v13104_v42 = vadd.f32 %v6216_v29, %v13011_v35  ;;  %v9860_v43 = vpop.f32.mrb[205].mxu1 }
0x2f3c   :  { %v6219_v25 = vpop.f32.mrb[206].mxu1 }
0x2f3d   :  { %v13107_v36 = vadd.f32 %v6219_v25, %v13014_v61  ;;  %v9861_v1 = vpop.f32.mrb[207].mxu1  ;;  %v6401_v61 = vmul.f32 1.442695, %v6393_v38 }
0x2f3f   :  { %10648 = vpow2.f32 %v6401_v61 }
0x2f42   :  { %v6224_v39 = vpop.f32.mrb[208].mxu1 }
0x2f43   :  { %v13110_v32 = vadd.f32 %v6224_v39, %v13017_v8  ;;  %v9864_v24 = vpop.f32.mrb[209].mxu1  ;;  %v6580_v39 = vsel %vm333_vm1, %v4621_v46, 0 }
0x2f44   :  { %v6227_v44 = vpop.f32.mrb[210].mxu1  ;;  %9899 = vmatpush3.bf16.msra.mxu1 %v6580_v39 }
0x2f45   :  { %v13113_v35 = vadd.f32 %v6227_v44, %v13020_v12  ;;  %v9865_v26 = vpop.f32.mrb[211].mxu1 }
0x2f49   :  { %v13120_v30 = vpop.eup %10648 }
0x2f4a   :  { %v9880_v23 = vpop.f32.mrb[212].mxu1  ;;  %v6415_v10 = vsel %vm808_vm4, %v13120_v30, 0.0 }
0x2f4b   :  { %v6359_v48 = vpop.f32.mrb[213].mxu1  ;;  %v6388_v49 = vsel %vm808_vm4, %v9880_v23, -inf }
0x2f4c   :  { %6389 = vmax.xlane.f32.xlu1 %v6388_v49  ;;  %v9881_v17 = vpop.f32.mrb[214].mxu1  ;;  %v6382_v31 = vsel %vm808_vm4, %v6359_v48, -inf }
0x2f4d   :  { %6383 = vmax.xlane.f32.xlu0 %v6382_v31  ;;  %v6362_v8 = vpop.f32.mrb[215].mxu1 }
0x2f4e   :  { %v6385_v12 = vsel %vm808_vm4, %v6362_v8, -inf }
0x2f50   :  { %6413 = vadd.xlane.f32.xlu1 %v6412_v20 }
0x2f51   :  { %6386 = vmax.xlane.f32.xlu0 %v6385_v12 }
0x2f55   :  { %6410 = vadd.xlane.f32.xlu0 %v6409_v14 }
0x2f59   :  { %6416 = vadd.xlane.f32.xlu0 %v6415_v10 }
0x2fd9   :  { %v6390_v13 = vpop.xlane.xlu1 %6389 }
0x2fda   :  { %v6396_v22 = vsub.f32 %v9880_v23, %v6390_v13  ;;  %v6384_v51 = vpop.xlane.xlu0 %6383 }
0x2fdb   :  { %v6394_v55 = vsub.f32 %v6359_v48, %v6384_v51 }
0x2fdc   :  { %v6407_v57 = vmul.f32 1.442695, %v6396_v22 }
0x2fdd   :  { %v6403_v21 = vmul.f32 1.442695, %v6394_v55  ;;  %v6414_v7 = vpop.xlane.xlu1 %6413 }
0x2fde   :  { %10650 = vpow2.f32 %v6407_v57  ;;  %v6387_v28 = vpop.xlane.xlu0 %6386 }
0x2fdf   :  { %v6395_v27 = vsub.f32 %v6362_v8, %v6387_v28  ;;  %10652 = vpow2.f32 %v6403_v21 }
0x2fe0   :  { %10654 = vrcp.f32 %v6414_v7 }
0x2fe1   :  { %v6405_v16 = vmul.f32 1.442695, %v6395_v27 }
0x2fe2   :  { %v6411_v19 = vpop.xlane.xlu0 %6410 }
0x2fe3   :  { %10656 = vpow2.f32 %v6405_v16 }
0x2fe4   :  { %10658 = vrcp.f32 %v6411_v19 }
0x2fe6   :  { %v6417_v45 = vpop.xlane.xlu0 %6416 }
0x2fe7   :  { %10660 = vrcp.f32 %v6417_v45 }
0x2fe8   :  { %v13124_v18 = vpop.eup %10650 }
0x2fe9   :  { %v6424_v63 = vsel %vm808_vm4, %v13124_v18, 0.0  ;;  %v10653_v2 = vpop.eup %10652 }
0x2fea   :  { %6425 = vadd.xlane.f32.xlu1 %v6424_v63  ;;  %v10655_v9 = vpop.eup %10654  ;;  %v6418_v29 = vsel %vm808_vm4, %v10653_v2, 0.0 }
0x2feb   :  { %v6434_v47 = vmul.f32 %v10655_v9, %v10645_v53 }
0x2fed   :  { %v10657_v33 = vpop.eup %10656 }
0x2fee   :  { %v10659_v43 = vpop.eup %10658  ;;  %6419 = vadd.xlane.f32.xlu1 %v6418_v29  ;;  %v6421_v25 = vsel %vm808_vm4, %v10657_v33, 0.0 }
0x2fef   :  { %6422 = vadd.xlane.f32.xlu0 %v6421_v25  ;;  %v6433_v1 = vmul.f32 %v10659_v43, %v10647_v6 }
0x2ff1   :  { %v6439_v40 = vpack.c.bf16 %v6434_v47, %v6433_v1  ;;  %v10661_v61 = vpop.eup %10660 }
0x2ff2   :  { %v6435_v49 = vmul.f32 %v10661_v61, %v13120_v30 }
0x2ff3   :  { %9886 = vmatprep.mubr.msk.bf16.mxu0 %vm808_vm4, %v6439_v40 }
0x2ff4   :  { %v6440_v12 = vpack.c.bf16 %v6435_v49, %v6435_v49 }
0x2fff   :  { %6445 = vrot.lane.b32.xlu1 %v12739_v37, %s11298_s20 }
0x3003   :  { %6505 = vrot.lane.b32.xlu1 %v12724_v11, %s11298_s20 }
0x3005   :  { %6443 = vrot.lane.b32.xlu0 %v12712_v59, %s11298_s20 }
0x3007   :  { %6507 = vrot.lane.b32.xlu1 %v12753_v56, %s11298_s20 }
0x3009   :  { %6649 = vrot.lane.b32.xlu0 %v12710_v52, %s11299_s7 }
0x300b   :  { %6651 = vrot.lane.b32.xlu1 %v12718_v62, %s11299_s7 }
0x300d   :  { %6717 = vrot.lane.b32.xlu0 %v12722_v34, %s11299_s7 }
0x300f   :  { %6645 = vrot.lane.b32.xlu1 %v12710_v52, %s11300_s10 }
0x3011   :  { %6647 = vrot.lane.b32.xlu0 %v12718_v62, %s11300_s10 }
0x3013   :  { %6719 = vrot.lane.b32.xlu1 %v12730_v15, %s11299_s7 }
0x3015   :  { %6713 = vrot.lane.b32.xlu0 %v12722_v34, %s11300_s10 }
0x3017   :  { %6715 = vrot.lane.b32.xlu1 %v12730_v15, %s11300_s10 }
0x3077   :  { %v6426_v38 = vpop.xlane.xlu1 %6425 }
0x307b   :  { %v6420_v24 = vpop.xlane.xlu1 %6419 }
0x307c   :  { %10662 = vrcp.f32 %v6420_v24  ;;  %v6423_v44 = vpop.xlane.xlu0 %6422 }
0x307d   :  { %10664 = vrcp.f32 %v6423_v44 }
0x307e   :  { %10666 = vrcp.f32 %v6426_v38 }
0x307f   :  { %v6446_v26 = vpop.permute.xlu1 %6445 }
0x3080   :  { %v6444_v23 = vpop.permute.xlu0 %6443  ;;  %v6455_v17 = vsel %vm333_vm1, %v6446_v26, 0 }
0x3081   :  { %9882 = vmatprep.subr.bf16.mxu0 %v6444_v23 }
0x3082   :  { %9883 = vmatpush3.bf16.msra.mxu0 %v6444_v23 }
0x3083   :  { %10194 = vmatprep.subr.msk.bf16.mxu0 %vm333_vm1, %v6446_v26  ;;  %v6506_v48 = vpop.permute.xlu1 %6505 }
0x3084   :  { %v6650_v53 = vpop.permute.xlu0 %6649 }
0x3085   :  { %v6660_v28 = vsel %vm323_vm2, %v6650_v53, 0 }
0x3086   :  { %v10663_v31 = vpop.eup %10662  ;;  %9885 = vmatpush3.bf16.msra.mxu0 %v6455_v17 }
0x3087   :  { %v10665_v8 = vpop.eup %10664  ;;  %9890 = vmatprep.subr.bf16.mxu0 %v6506_v48  ;;  %v6508_v20 = vpop.permute.xlu1 %6507  ;;  %v6436_v6 = vmul.f32 %v10663_v31, %v10653_v2 }
0x3088   :  { %v10667_v14 = vpop.eup %10666  ;;  %v6718_v10 = vpop.permute.xlu0 %6717  ;;  %v6437_v13 = vmul.f32 %v10665_v8, %v10657_v33  ;;  %v6517_v55 = vsel %vm333_vm1, %v6508_v20, 0 }
0x3089   :  { %9887 = vmatmul.mubr.msk.bf16.vlgmr.msra.gmra.mrb[188].mxu0 %vm808_vm4, %v6440_v12  ;;  %10198 = vmatprep.subr.msk.bf16.mxu1 %vm323_vm2, %v6718_v10  ;;  %v6438_v51 = vmul.f32 %v10667_v14, %v13124_v18  ;;  %v6728_v9 = vsel %vm323_vm2, %v6718_v10, 0 }
0x308a   :  { %9891 = vmatpush3.bf16.msra.mxu0 %v6506_v48  ;;  %v6441_v22 = vpack.c.bf16 %v6437_v13, %v6436_v6 }
0x308b   :  { %10195 = vmatprep.subr.msk.bf16.mxu0 %vm333_vm1, %v6508_v20  ;;  %v6652_v30 = vpop.permute.xlu1 %6651  ;;  %v6442_v57 = vpack.c.bf16 %v6438_v51, %v6438_v51 }
0x308c   :  { %9894 = vmatprep.mubr.msk.bf16.mxu0 %vm808_vm4, %v6441_v22  ;;  %v6663_v7 = vsel %vm323_vm2, %v6652_v30, 0  ;;  %v6648_v27 = vpop.permute.xlu0 %6647 }
0x308e   :  { %9893 = vmatpush3.bf16.msra.mxu0 %v6517_v55 }
0x308f   :  { %10196 = vmatprep.subr.msk.bf16.mxu0 %vm323_vm2, %v6650_v53  ;;  %v6646_v21 = vpop.permute.xlu1 %6645 }
0x3090   :  { %v6714_v39 = vpop.permute.xlu0 %6713 }
0x3091   :  { %9895 = vmatmul.mubr.msk.bf16.vlgmr.msra.gmra.mrb[192].mxu0 %vm808_vm4, %v6442_v57 }
0x3092   :  { %9916 = vmatprep.mubr.msk.bf16.mxu0 %vm323_vm2, %v6646_v21 }
0x3093   :  { %v6720_v33 = vpop.permute.xlu1 %6719 }
0x3094   :  { %v6731_v46 = vsel %vm323_vm2, %v6720_v33, 0 }
0x3097   :  { %9913 = vmatpush3.bf16.xpose.msra.mxu0 %v6660_v28  ;;  %v6716_v45 = vpop.permute.xlu1 %6715 }
0x3098   :  { %10197 = vmatprep.subr.msk.bf16.mxu0 %vm323_vm2, %v6652_v30 }
0x309f   :  { %9915 = vmatpush3.bf16.xpose.msra.mxu0 %v6663_v7 }
0x30a6   :  { %9917 = vmatmul.mubr.msk.bf16.vlgmr.msra.gmra.mrb[196].mxu0 %vm323_vm2, %v6648_v27 }
0x315c   :  { %v9888_v16 = vpop.f32.mrb[188].mxu0 }
0x315d   :  { %v6491_v19 = vpop.f32.mrb[189].mxu0 }
0x315e   :  { %v9889_v18 = vpop.f32.mrb[190].mxu0 }
0x315f   :  { %v6494_v63 = vpop.f32.mrb[191].mxu0 }
0x3160   :  { %v6567_v2 = vpack.c.bf16 %v6494_v63, %v6491_v19 }
0x3162   :  { %9901 = vmatmul.mubr.msk.bf16.vlgmr.msra.gmra.mrb[216].mxu1 %vm323_vm2, %v6567_v2 }
0x3163   :  { %9921 = vmatpush3.bf16.xpose.msra.mxu1 %v6728_v9  ;;  %9904 = vmatprep.mubr.msk.bf16.mxu1 %vm11290_vm0, %v11289_v0 }
0x3164   :  { %10199 = vmatprep.subr.msk.bf16.mxu1 %vm323_vm2, %v6720_v33  ;;  %v9896_v29 = vpop.f32.mrb[192].mxu0 }
0x3165   :  { %v6553_v43 = vpop.f32.mrb[193].mxu0 }
0x3166   :  { %v6568_v25 = vpack.c.bf16 %v6553_v43, %v9888_v16  ;;  %v9897_v1 = vpop.f32.mrb[194].mxu0 }
0x3167   :  { %v6556_v47 = vpop.f32.mrb[195].mxu0 }
0x3168   :  { %v6569_v40 = vpack.c.bf16 %v9896_v29, %v6556_v47 }
0x316a   :  { %9905 = vmatmul.mubr.msk.bf16.gmra.mrb[220].mxu1 %vm323_vm2, %v6568_v25 }
0x316b   :  { %9923 = vmatpush3.bf16.xpose.msra.mxu1 %v6731_v46  ;;  %9908 = vmatprep.mubr.msk.bf16.mxu1 %vm11290_vm0, %v11289_v0 }
0x316c   :  { %9944 = vmatprep.subr.bf16.mxu1 %v11289_v0 }
0x3172   :  { %9909 = vmatmul.mubr.msk.bf16.gmra.mrb[224].mxu1 %vm323_vm2, %v6569_v40 }
0x3173   :  { %9924 = vmatprep.mubr.msk.bf16.mxu1 %vm323_vm2, %v6714_v39 }
0x3179   :  { %v9918_v38 = vpop.f32.mrb[196].mxu0 }
0x317a   :  { %v6699_v24 = vpop.f32.mrb[197].mxu0  ;;  %9925 = vmatmul.mubr.msk.bf16.vlgmr.msra.gmra.mrb[228].mxu1 %vm323_vm2, %v6716_v45  ;;  %v6787_v48 = vsel %vm808_vm4, %v9918_v38, -inf }
0x317b   :  { %v9919_v44 = vpop.f32.mrb[198].mxu0  ;;  %v6781_v26 = vsel %vm808_vm4, %v6699_v24, -inf  ;;  %9946 = vmatprep.mubr.msk.bf16.mxu1 %vm11290_vm0, %v11289_v0 }
0x317c   :  { %6782 = vmax.xlane.f32.xlu0 %v6781_v26  ;;  %v6702_v61 = vpop.f32.mrb[199].mxu0 }
0x317d   :  { %v6784_v23 = vsel %vm808_vm4, %v6702_v61, -inf }
0x317e   :  { %6785 = vmax.xlane.f32.xlu1 %v6784_v23 }
0x3180   :  { %6788 = vmax.xlane.f32.xlu0 %v6787_v48 }
0x3209   :  { %v6783_v6 = vpop.xlane.xlu0 %6782 }
0x320a   :  { %v6799_v57 = vsub.f32 %v6699_v24, %v6783_v6 }
0x320b   :  { %v6786_v12 = vpop.xlane.xlu1 %6785 }
0x320c   :  { %v6800_v14 = vsub.f32 %v6702_v61, %v6786_v12  ;;  %v6805_v28 = vmul.f32 1.442695, %v6799_v57 }
0x320d   :  { %v6789_v21 = vpop.xlane.xlu0 %6788 }
0x320e   :  { %v6807_v55 = vmul.f32 1.442695, %v6800_v14  ;;  %v6801_v7 = vsub.f32 %v9918_v38, %v6789_v21  ;;  %v4622_v21 = vld [vmem:[#allocation14 + $0x34] sm:$0xf] }
0x3210   :  { %10668 = vpow2.f32 %v6807_v55 }
0x3211   :  { %10670 = vpow2.f32 %v6805_v28 }
0x321a   :  { %v10669_v33 = vpop.eup %10668 }
0x321b   :  { %v6820_v25 = vsel %vm808_vm4, %v10669_v33, 0.0  ;;  %v10671_v1 = vpop.eup %10670 }
0x321c   :  { %v6817_v47 = vsel %vm808_vm4, %v10671_v1, 0.0 }
0x3235   :  { %v6616_v49 = vpop.f32.mrb[216].mxu1 }
0x3236   :  { %v13191_v53 = vadd.f32 %v6616_v49, %v13098_v54  ;;  %v9902_v17 = vpop.f32.mrb[217].mxu1 }
0x3237   :  { %v6619_v31 = vpop.f32.mrb[218].mxu1 }
0x3238   :  { %v13194_v8 = vadd.f32 %v6619_v31, %v13101_v50  ;;  %v9903_v20 = vpop.f32.mrb[219].mxu1 }
0x323d   :  { %v6624_v10 = vpop.f32.mrb[220].mxu1 }
0x323e   :  { %v13197_v13 = vadd.f32 %v6624_v10, %v13104_v42  ;;  %v9906_v22 = vpop.f32.mrb[221].mxu1 }
0x323f   :  { %v6627_v30 = vpop.f32.mrb[222].mxu1 }
0x3240   :  { %v13200_v51 = vadd.f32 %v6627_v30, %v13107_v36  ;;  %v9907_v54 = vpop.f32.mrb[223].mxu1  ;;  %v6809_v36 = vmul.f32 1.442695, %v6801_v7 }
0x3242   :  { %10672 = vpow2.f32 %v6809_v36 }
0x3245   :  { %v6632_v50 = vpop.f32.mrb[224].mxu1 }
0x3246   :  { %v13203_v27 = vadd.f32 %v6632_v50, %v13110_v32  ;;  %v9910_v16 = vpop.f32.mrb[225].mxu1  ;;  %v6988_v50 = vsel %vm333_vm1, %v4622_v21, 0 }
0x3247   :  { %v6635_v19 = vpop.f32.mrb[226].mxu1  ;;  %9945 = vmatpush3.bf16.msra.mxu1 %v6988_v50 }
0x3248   :  { %v13206_v42 = vadd.f32 %v6635_v19, %v13113_v35  ;;  %v9911_v18 = vpop.f32.mrb[227].mxu1 }
0x324c   :  { %v13213_v40 = vpop.eup %10672 }
0x324d   :  { %v9926_v63 = vpop.f32.mrb[228].mxu1  ;;  %v6823_v46 = vsel %vm808_vm4, %v13213_v40, 0.0 }
0x324e   :  { %v6767_v2 = vpop.f32.mrb[229].mxu1  ;;  %v6796_v9 = vsel %vm808_vm4, %v9926_v63, -inf }
0x324f   :  { %6797 = vmax.xlane.f32.xlu1 %v6796_v9  ;;  %v9927_v29 = vpop.f32.mrb[230].mxu1  ;;  %v6790_v43 = vsel %vm808_vm4, %v6767_v2, -inf }
0x3250   :  { %6791 = vmax.xlane.f32.xlu0 %v6790_v43  ;;  %v6770_v32 = vpop.f32.mrb[231].mxu1 }
0x3251   :  { %v6793_v35 = vsel %vm808_vm4, %v6770_v32, -inf }
0x3253   :  { %6821 = vadd.xlane.f32.xlu1 %v6820_v25 }
0x3254   :  { %6794 = vmax.xlane.f32.xlu0 %v6793_v35 }
0x3258   :  { %6818 = vadd.xlane.f32.xlu0 %v6817_v47 }
0x325c   :  { %6824 = vadd.xlane.f32.xlu0 %v6823_v46 }
0x32dc   :  { %v6798_v39 = vpop.xlane.xlu1 %6797 }
0x32dd   :  { %v6804_v45 = vsub.f32 %v9926_v63, %v6798_v39  ;;  %v6792_v38 = vpop.xlane.xlu0 %6791 }
0x32de   :  { %v6802_v24 = vsub.f32 %v6767_v2, %v6792_v38 }
0x32df   :  { %v6815_v44 = vmul.f32 1.442695, %v6804_v45 }
0x32e0   :  { %v6811_v26 = vmul.f32 1.442695, %v6802_v24  ;;  %v6822_v23 = vpop.xlane.xlu1 %6821 }
0x32e1   :  { %10674 = vpow2.f32 %v6815_v44  ;;  %v6795_v61 = vpop.xlane.xlu0 %6794 }
0x32e2   :  { %v6803_v48 = vsub.f32 %v6770_v32, %v6795_v61  ;;  %10676 = vpow2.f32 %v6811_v26 }
0x32e3   :  { %10678 = vrcp.f32 %v6822_v23 }
0x32e4   :  { %v6813_v49 = vmul.f32 1.442695, %v6803_v48 }
0x32e5   :  { %v6819_v17 = vpop.xlane.xlu0 %6818 }
0x32e6   :  { %10680 = vpow2.f32 %v6813_v49 }
0x32e7   :  { %10682 = vrcp.f32 %v6819_v17 }
0x32e9   :  { %v6825_v28 = vpop.xlane.xlu0 %6824 }
0x32ea   :  { %10684 = vrcp.f32 %v6825_v28 }
0x32eb   :  { %v10675_v31 = vpop.eup %10674 }
0x32ec   :  { %v6832_v20 = vsel %vm808_vm4, %v10675_v31, 0.0  ;;  %v10677_v12 = vpop.eup %10676 }
0x32ed   :  { %6833 = vadd.xlane.f32.xlu1 %v6832_v20  ;;  %v10679_v6 = vpop.eup %10678  ;;  %v6826_v10 = vsel %vm808_vm4, %v10677_v12, 0.0 }
0x32ee   :  { %v6842_v55 = vmul.f32 %v10679_v6, %v10669_v33 }
0x32f0   :  { %v10681_v14 = vpop.eup %10680 }
0x32f1   :  { %v10683_v22 = vpop.eup %10682  ;;  %6827 = vadd.xlane.f32.xlu1 %v6826_v10  ;;  %v6829_v30 = vsel %vm808_vm4, %v10681_v14, 0.0 }
0x32f2   :  { %6830 = vadd.xlane.f32.xlu0 %v6829_v30  ;;  %v6841_v54 = vmul.f32 %v10683_v22, %v10671_v1 }
0x32f4   :  { %v6847_v57 = vpack.c.bf16 %v6842_v55, %v6841_v54  ;;  %v10685_v36 = vpop.eup %10684 }
0x32f5   :  { %v6843_v2 = vmul.f32 %v10685_v36, %v13213_v40 }
0x32f6   :  { %9932 = vmatprep.mubr.msk.bf16.mxu0 %vm808_vm4, %v6847_v57 }
0x32f7   :  { %v6848_v35 = vpack.c.bf16 %v6843_v2, %v6843_v2 }
0x3302   :  { %6853 = vrot.lane.b32.xlu1 %v12739_v37, %s11300_s10 }
0x3306   :  { %6913 = vrot.lane.b32.xlu1 %v12724_v11, %s11300_s10 }
0x3308   :  { %6851 = vrot.lane.b32.xlu0 %v12712_v59, %s11300_s10 }
0x330a   :  { %6915 = vrot.lane.b32.xlu1 %v12753_v56, %s11300_s10 }
0x330c   :  { %7057 = vrot.lane.b32.xlu0 %v12710_v52, %s13665_s21 }
0x330e   :  { %7059 = vrot.lane.b32.xlu1 %v12718_v62, %s13665_s21 }
0x3310   :  { %7125 = vrot.lane.b32.xlu0 %v12722_v34, %s13665_s21 }
0x3312   :  { %7053 = vrot.lane.b32.xlu1 %v12710_v52, %s11301_s24 }
0x3314   :  { %7055 = vrot.lane.b32.xlu0 %v12718_v62, %s11301_s24 }
0x3316   :  { %7127 = vrot.lane.b32.xlu1 %v12730_v15, %s13665_s21  ;;  %s8593_s21 = sshll.u32 %s11303_s5, 4  ;;  %s8594_s21 = int_to_ptr.vmem [resolvable:$true] %s8593_s21 }
0x3317   :  { %s11218_s4 = scalar_lea.vmem %s8594_s21, 768  ;;  %p11223_p13 = scmp.lt.s32.totalorder %s8594_s21, %s8594_s21 }
0x3318   :  { %7121 = vrot.lane.b32.xlu0 %v12722_v34, %s11301_s24  ;;  %p11219_p12 = scmp.ne.s32.totalorder %s8594_s21, %s11218_s4  ;;  %p11224_p0 = scmp.lt.s32.totalorder %s11218_s4, %s11218_s4 }
0x331a   :  { %7123 = vrot.lane.b32.xlu1 %v12730_v15, %s11301_s24  ;;  %p11225_p1 = por %p11224_p0, %p11223_p13 }
0x331c   :  { %p11226_p2 = pnand %p11225_p1, %p11219_p12 }
0x337a   :  { %v6834_v7 = vpop.xlane.xlu1 %6833 }
0x337e   :  { %v6828_v16 = vpop.xlane.xlu1 %6827 }
0x337f   :  { %10686 = vrcp.f32 %v6828_v16  ;;  %v6831_v19 = vpop.xlane.xlu0 %6830 }
0x3380   :  { %10688 = vrcp.f32 %v6831_v19 }
0x3381   :  { %10690 = vrcp.f32 %v6834_v7 }
0x3382   :  { %v6854_v18 = vpop.permute.xlu1 %6853 }
0x3383   :  { %v6852_v63 = vpop.permute.xlu0 %6851  ;;  %v6863_v29 = vsel %vm333_vm1, %v6854_v18, 0 }
0x3384   :  { %9928 = vmatprep.subr.bf16.mxu0 %v6852_v63 }
0x3385   :  { %9929 = vmatpush3.bf16.msra.mxu0 %v6852_v63 }
0x3386   :  { %10200 = vmatprep.subr.msk.bf16.mxu0 %vm333_vm1, %v6854_v18  ;;  %v6914_v9 = vpop.permute.xlu1 %6913 }
0x3387   :  { %v7058_v33 = vpop.permute.xlu0 %7057 }
0x3388   :  { %v7068_v61 = vsel %vm323_vm2, %v7058_v33, 0 }
0x3389   :  { %v10687_v43 = vpop.eup %10686  ;;  %9931 = vmatpush3.bf16.msra.mxu0 %v6863_v29 }
0x338a   :  { %v10689_v32 = vpop.eup %10688  ;;  %9936 = vmatprep.subr.bf16.mxu0 %v6914_v9  ;;  %v6916_v25 = vpop.permute.xlu1 %6915  ;;  %v6844_v1 = vmul.f32 %v10687_v43, %v10677_v12 }
0x338b   :  { %v10691_v47 = vpop.eup %10690  ;;  %v7126_v46 = vpop.permute.xlu0 %7125  ;;  %v6845_v39 = vmul.f32 %v10689_v32, %v10681_v14  ;;  %v6925_v24 = vsel %vm333_vm1, %v6916_v25, 0 }
0x338c   :  { %9933 = vmatmul.mubr.msk.bf16.vlgmr.msra.gmra.mrb[200].mxu0 %vm808_vm4, %v6848_v35  ;;  %10204 = vmatprep.subr.msk.bf16.mxu1 %vm323_vm2, %v7126_v46  ;;  %v6846_v45 = vmul.f32 %v10691_v47, %v10675_v31  ;;  %v7136_v6 = vsel %vm323_vm2, %v7126_v46, 0 }
0x338d   :  { %9937 = vmatpush3.bf16.msra.mxu0 %v6914_v9  ;;  %v6849_v40 = vpack.c.bf16 %v6845_v39, %v6844_v1 }
0x338e   :  { %10201 = vmatprep.subr.msk.bf16.mxu0 %vm333_vm1, %v6916_v25  ;;  %v7060_v38 = vpop.permute.xlu1 %7059  ;;  %v6850_v44 = vpack.c.bf16 %v6846_v45, %v6846_v45 }
0x338f   :  { %9940 = vmatprep.mubr.msk.bf16.mxu0 %vm808_vm4, %v6849_v40  ;;  %v7071_v23 = vsel %vm323_vm2, %v7060_v38, 0  ;;  %v7056_v48 = vpop.permute.xlu0 %7055 }
0x3391   :  { %9939 = vmatpush3.bf16.msra.mxu0 %v6925_v24 }
0x3392   :  { %10202 = vmatprep.subr.msk.bf16.mxu0 %vm323_vm2, %v7058_v33  ;;  %v7054_v26 = vpop.permute.xlu1 %7053 }
0x3393   :  { %v7122_v50 = vpop.permute.xlu0 %7121 }
0x3394   :  { %9941 = vmatmul.mubr.msk.bf16.vlgmr.msra.gmra.mrb[204].mxu0 %vm808_vm4, %v6850_v44 }
0x3395   :  { %9962 = vmatprep.mubr.msk.bf16.mxu0 %vm323_vm2, %v7054_v26 }
0x3396   :  { %v7128_v14 = vpop.permute.xlu1 %7127 }
0x3397   :  { %v7139_v21 = vsel %vm323_vm2, %v7128_v14, 0 }
0x339a   :  { %9959 = vmatpush3.bf16.xpose.msra.mxu0 %v7068_v61  ;;  %v7124_v28 = vpop.permute.xlu1 %7123 }
0x339b   :  { %10203 = vmatprep.subr.msk.bf16.mxu0 %vm323_vm2, %v7060_v38 }
0x33a2   :  { %9961 = vmatpush3.bf16.xpose.msra.mxu0 %v7071_v23 }
0x33a9   :  { %9963 = vmatmul.mubr.msk.bf16.vlgmr.msra.gmra.mrb[208].mxu0 %vm323_vm2, %v7056_v48 }
0x345f   :  { %v9934_v49 = vpop.f32.mrb[200].mxu0 }
0x3460   :  { %v6899_v17 = vpop.f32.mrb[201].mxu0 }
0x3461   :  { %v9935_v31 = vpop.f32.mrb[202].mxu0 }
0x3462   :  { %v6902_v20 = vpop.f32.mrb[203].mxu0 }
0x3463   :  { %v6975_v12 = vpack.c.bf16 %v6902_v20, %v6899_v17 }
0x3465   :  { %9947 = vmatmul.mubr.msk.bf16.vlgmr.msra.gmra.mrb[232].mxu1 %vm323_vm2, %v6975_v12 }
0x3466   :  { %9967 = vmatpush3.bf16.xpose.msra.mxu1 %v7136_v6  ;;  %9950 = vmatprep.mubr.msk.bf16.mxu1 %vm11290_vm0, %v11289_v0 }
0x3467   :  { %10205 = vmatprep.subr.msk.bf16.mxu1 %vm323_vm2, %v7128_v14  ;;  %v9942_v10 = vpop.f32.mrb[204].mxu0 }
0x3468   :  { %v6961_v22 = vpop.f32.mrb[205].mxu0 }
0x3469   :  { %v6976_v30 = vpack.c.bf16 %v6961_v22, %v9934_v49  ;;  %v9943_v54 = vpop.f32.mrb[206].mxu0 }
0x346a   :  { %v6964_v55 = vpop.f32.mrb[207].mxu0 }
0x346b   :  { %v6977_v57 = vpack.c.bf16 %v9942_v10, %v6964_v55 }
0x346d   :  { %9951 = vmatmul.mubr.msk.bf16.gmra.mrb[236].mxu1 %vm323_vm2, %v6976_v30 }
0x346e   :  { %9969 = vmatpush3.bf16.xpose.msra.mxu1 %v7139_v21  ;;  %9954 = vmatprep.mubr.msk.bf16.mxu1 %vm11290_vm0, %v11289_v0 }
0x346f   :  { %9990 = vmatprep.subr.bf16.mxu1 %v11289_v0 }
0x3475   :  { %9955 = vmatmul.mubr.msk.bf16.gmra.mrb[240].mxu1 %vm323_vm2, %v6977_v57 }
0x3476   :  { %9970 = vmatprep.mubr.msk.bf16.mxu1 %vm323_vm2, %v7122_v50 }
0x347c   :  { %v9964_v7 = vpop.f32.mrb[208].mxu0 }
0x347d   :  { %v7107_v16 = vpop.f32.mrb[209].mxu0  ;;  %9971 = vmatmul.mubr.msk.bf16.vlgmr.msra.gmra.mrb[244].mxu1 %vm323_vm2, %v7124_v28  ;;  %v7195_v2 = vsel %vm808_vm4, %v9964_v7, -inf }
0x347e   :  { %v9965_v19 = vpop.f32.mrb[210].mxu0  ;;  %v7189_v18 = vsel %vm808_vm4, %v7107_v16, -inf  ;;  %9992 = vmatprep.mubr.msk.bf16.mxu1 %vm11290_vm0, %v11289_v0 }
0x347f   :  { %7190 = vmax.xlane.f32.xlu0 %v7189_v18  ;;  %v7110_v36 = vpop.f32.mrb[211].mxu0 }
0x3480   :  { %v7192_v63 = vsel %vm808_vm4, %v7110_v36, -inf }
0x3481   :  { %7193 = vmax.xlane.f32.xlu1 %v7192_v63 }
0x3483   :  { %7196 = vmax.xlane.f32.xlu0 %v7195_v2 }
0x350c   :  { %v7191_v1 = vpop.xlane.xlu0 %7190 }
0x350d   :  { %v7207_v44 = vsub.f32 %v7107_v16, %v7191_v1 }
0x350e   :  { %v7194_v35 = vpop.xlane.xlu1 %7193 }
0x350f   :  { %v7208_v47 = vsub.f32 %v7110_v36, %v7194_v35  ;;  %v7213_v61 = vmul.f32 1.442695, %v7207_v44 }
0x3510   :  { %v7197_v26 = vpop.xlane.xlu0 %7196 }
0x3511   :  { %v7215_v24 = vmul.f32 1.442695, %v7208_v47  ;;  %v7209_v23 = vsub.f32 %v9964_v7, %v7197_v26  ;;  %v4623_v26 = vld [vmem:[#allocation14 + $0x38] sm:$0xf] }
0x3513   :  { %10692 = vpow2.f32 %v7215_v24 }
0x3514   :  { %10694 = vpow2.f32 %v7213_v61 }
0x351d   :  { %v10693_v14 = vpop.eup %10692 }
0x351e   :  { %v7228_v30 = vsel %vm808_vm4, %v10693_v14, 0.0  ;;  %v10695_v54 = vpop.eup %10694 }
0x351f   :  { %v7225_v55 = vsel %vm808_vm4, %v10695_v54, 0.0 }
0x3538   :  { %v7024_v9 = vpop.f32.mrb[232].mxu1 }
0x3539   :  { %v13280_v33 = vadd.f32 %v7024_v9, %v13191_v53  ;;  %v9948_v29 = vpop.f32.mrb[233].mxu1 }
0x353a   :  { %v7027_v43 = vpop.f32.mrb[234].mxu1 }
0x353b   :  { %v13283_v32 = vadd.f32 %v7027_v43, %v13194_v8  ;;  %v9949_v25 = vpop.f32.mrb[235].mxu1 }
0x3540   :  { %v7032_v46 = vpop.f32.mrb[236].mxu1 }
0x3541   :  { %v13286_v39 = vadd.f32 %v7032_v46, %v13197_v13  ;;  %v9952_v40 = vpop.f32.mrb[237].mxu1 }
0x3542   :  { %v7035_v45 = vpop.f32.mrb[238].mxu1 }
0x3543   :  { %v13289_v38 = vadd.f32 %v7035_v45, %v13200_v51  ;;  %v9953_v53 = vpop.f32.mrb[239].mxu1  ;;  %v7217_v51 = vmul.f32 1.442695, %v7209_v23 }
0x3545   :  { %10696 = vpow2.f32 %v7217_v51 }
0x3548   :  { %v7040_v8 = vpop.f32.mrb[240].mxu1 }
0x3549   :  { %v13292_v48 = vadd.f32 %v7040_v8, %v13203_v27  ;;  %v9956_v49 = vpop.f32.mrb[241].mxu1  ;;  %v7396_v8 = vsel %vm333_vm1, %v4623_v26, 0 }
0x354a   :  { %v7043_v17 = vpop.f32.mrb[242].mxu1  ;;  %9991 = vmatpush3.bf16.msra.mxu1 %v7396_v8 }
0x354b   :  { %v13295_v13 = vadd.f32 %v7043_v17, %v13206_v42  ;;  %v9957_v31 = vpop.f32.mrb[243].mxu1 }
0x354f   :  { %v13302_v57 = vpop.eup %10696 }
0x3550   :  { %v9972_v20 = vpop.f32.mrb[244].mxu1  ;;  %v7231_v21 = vsel %vm808_vm4, %v13302_v57, 0.0 }
0x3551   :  { %v7175_v12 = vpop.f32.mrb[245].mxu1  ;;  %v7204_v6 = vsel %vm808_vm4, %v9972_v20, -inf }
0x3552   :  { %7205 = vmax.xlane.f32.xlu1 %v7204_v6  ;;  %v9973_v10 = vpop.f32.mrb[246].mxu1  ;;  %v7198_v22 = vsel %vm808_vm4, %v7175_v12, -inf }
0x3553   :  { %7199 = vmax.xlane.f32.xlu0 %v7198_v22  ;;  %v7178_v27 = vpop.f32.mrb[247].mxu1 }
0x3554   :  { %v7201_v42 = vsel %vm808_vm4, %v7178_v27, -inf }
0x3556   :  { %7229 = vadd.xlane.f32.xlu1 %v7228_v30 }
0x3557   :  { %7202 = vmax.xlane.f32.xlu0 %v7201_v42 }
0x355b   :  { %7226 = vadd.xlane.f32.xlu0 %v7225_v55 }
0x355f   :  { %7232 = vadd.xlane.f32.xlu0 %v7231_v21 }
0x35df   :  { %v7206_v50 = vpop.xlane.xlu1 %7205 }
0x35e0   :  { %v7212_v28 = vsub.f32 %v9972_v20, %v7206_v50  ;;  %v7200_v7 = vpop.xlane.xlu0 %7199 }
0x35e1   :  { %v7210_v16 = vsub.f32 %v7175_v12, %v7200_v7 }
0x35e2   :  { %v7223_v19 = vmul.f32 1.442695, %v7212_v28 }
0x35e3   :  { %v7219_v18 = vmul.f32 1.442695, %v7210_v16  ;;  %v7230_v63 = vpop.xlane.xlu1 %7229 }
0x35e4   :  { %10698 = vpow2.f32 %v7223_v19  ;;  %v7203_v36 = vpop.xlane.xlu0 %7202 }
0x35e5   :  { %v7211_v2 = vsub.f32 %v7178_v27, %v7203_v36  ;;  %10700 = vpow2.f32 %v7219_v18 }
0x35e6   :  { %10702 = vrcp.f32 %v7230_v63 }
0x35e7   :  { %v7221_v9 = vmul.f32 1.442695, %v7211_v2 }
0x35e8   :  { %v7227_v29 = vpop.xlane.xlu0 %7226 }
0x35e9   :  { %10704 = vpow2.f32 %v7221_v9 }
0x35ea   :  { %10706 = vrcp.f32 %v7227_v29 }
0x35ec   :  { %v7233_v61 = vpop.xlane.xlu0 %7232 }
0x35ed   :  { %10708 = vrcp.f32 %v7233_v61 }
0x35ee   :  { %v10699_v43 = vpop.eup %10698 }
0x35ef   :  { %v7240_v25 = vsel %vm808_vm4, %v10699_v43, 0.0  ;;  %v10701_v35 = vpop.eup %10700 }
0x35f0   :  { %7241 = vadd.xlane.f32.xlu1 %v7240_v25  ;;  %v10703_v1 = vpop.eup %10702  ;;  %v7234_v46 = vsel %vm808_vm4, %v10701_v35, 0.0 }
0x35f1   :  { %v7250_v24 = vmul.f32 %v10703_v1, %v10693_v14 }
0x35f3   :  { %v10705_v47 = vpop.eup %10704 }
0x35f4   :  { %v10707_v40 = vpop.eup %10706  ;;  %7235 = vadd.xlane.f32.xlu1 %v7234_v46  ;;  %v7237_v45 = vsel %vm808_vm4, %v10705_v47, 0.0 }
0x35f5   :  { %7238 = vadd.xlane.f32.xlu0 %v7237_v45  ;;  %v7249_v53 = vmul.f32 %v10707_v40, %v10695_v54 }
0x35f7   :  { %v7255_v44 = vpack.c.bf16 %v7250_v24, %v7249_v53  ;;  %v10709_v31 = vpop.eup %10708 }
0x35f8   :  { %v7251_v51 = vmul.f32 %v10709_v31, %v13302_v57 }
0x35f9   :  { %9978 = vmatprep.mubr.msk.bf16.mxu0 %vm808_vm4, %v7255_v44 }
0x35fa   :  { %v7256_v10 = vpack.c.bf16 %v7251_v51, %v7251_v51 }
0x3605   :  { %7261 = vrot.lane.b32.xlu1 %v12739_v37, %s11301_s24 }
0x3609   :  { %7321 = vrot.lane.b32.xlu1 %v12724_v11, %s11301_s24 }
0x360b   :  { %7259 = vrot.lane.b32.xlu0 %v12712_v59, %s11301_s24 }
0x360d   :  { %7323 = vrot.lane.b32.xlu1 %v12753_v56, %s11301_s24 }
0x360f   :  { %7465 = vrot.lane.b32.xlu0 %v12710_v52, %s13662_s23 }
0x3611   :  { %7467 = vrot.lane.b32.xlu1 %v12718_v62, %s13662_s23 }
0x3613   :  { %7533 = vrot.lane.b32.xlu0 %v12722_v34, %s13662_s23 }
0x3615   :  { %7461 = vrot.lane.b32.xlu1 %v12710_v52, %s11302_s14 }
0x3617   :  { %7463 = vrot.lane.b32.xlu0 %v12718_v62, %s11302_s14 }
0x3619   :  { %7535 = vrot.lane.b32.xlu1 %v12730_v15, %s13662_s23 }
0x361b   :  { %7529 = vrot.lane.b32.xlu0 %v12722_v34, %s11302_s14 }
0x361d   :  { %7531 = vrot.lane.b32.xlu1 %v12730_v15, %s11302_s14 }
0x367d   :  { %v7242_v23 = vpop.xlane.xlu1 %7241 }
0x3681   :  { %v7236_v49 = vpop.xlane.xlu1 %7235 }
0x3682   :  { %10710 = vrcp.f32 %v7236_v49  ;;  %v7239_v17 = vpop.xlane.xlu0 %7238 }
0x3683   :  { %10712 = vrcp.f32 %v7239_v17 }
0x3684   :  { %10714 = vrcp.f32 %v7242_v23 }
0x3685   :  { %v7262_v52 = vpop.permute.xlu1 %7261 }
0x3686   :  { %v7260_v62 = vpop.permute.xlu0 %7259  ;;  %v7271_v15 = vsel %vm333_vm1, %v7262_v52, 0 }
0x3687   :  { %9974 = vmatprep.subr.bf16.mxu0 %v7260_v62 }
0x3688   :  { %9975 = vmatpush3.bf16.msra.mxu0 %v7260_v62 }
0x3689   :  { %10206 = vmatprep.subr.msk.bf16.mxu0 %vm333_vm1, %v7262_v52  ;;  %v7322_v34 = vpop.permute.xlu1 %7321 }
0x368a   :  { %v7466_v20 = vpop.permute.xlu0 %7465 }
0x368b   :  { %v7476_v7 = vsel %vm323_vm2, %v7466_v20, 0 }
0x368c   :  { %v10711_v12 = vpop.eup %10710  ;;  %9977 = vmatpush3.bf16.msra.mxu0 %v7271_v15 }
0x368d   :  { %v10713_v6 = vpop.eup %10712  ;;  %9982 = vmatprep.subr.bf16.mxu0 %v7322_v34  ;;  %v7324_v14 = vpop.permute.xlu1 %7323  ;;  %v7252_v22 = vmul.f32 %v10711_v12, %v10701_v35 }
0x368e   :  { %v10715_v27 = vpop.eup %10714  ;;  %v7534_v30 = vpop.permute.xlu0 %7533  ;;  %v7253_v42 = vmul.f32 %v10713_v6, %v10705_v47  ;;  %v7333_v21 = vsel %vm333_vm1, %v7324_v14, 0 }
0x368f   :  { %9979 = vmatmul.mubr.msk.bf16.vlgmr.msra.gmra.mrb[212].mxu0 %vm808_vm4, %v7256_v10  ;;  %10210 = vmatprep.subr.msk.bf16.mxu1 %vm323_vm2, %v7534_v30  ;;  %v7254_v55 = vmul.f32 %v10715_v27, %v10699_v43  ;;  %v7544_v29 = vsel %vm323_vm2, %v7534_v30, 0 }
0x3690   :  { %9983 = vmatpush3.bf16.msra.mxu0 %v7322_v34  ;;  %v7257_v54 = vpack.c.bf16 %v7253_v42, %v7252_v22 }
0x3691   :  { %10207 = vmatprep.subr.msk.bf16.mxu0 %vm333_vm1, %v7324_v14  ;;  %v7468_v57 = vpop.permute.xlu1 %7467  ;;  %v7258_v50 = vpack.c.bf16 %v7254_v55, %v7254_v55 }
0x3692   :  { %9986 = vmatprep.mubr.msk.bf16.mxu0 %vm808_vm4, %v7257_v54  ;;  %v7479_v16 = vsel %vm323_vm2, %v7468_v57, 0  ;;  %v7464_v19 = vpop.permute.xlu0 %7463 }
0x3694   :  { %9985 = vmatpush3.bf16.msra.mxu0 %v7333_v21 }
0x3695   :  { %10208 = vmatprep.subr.msk.bf16.mxu0 %vm323_vm2, %v7466_v20  ;;  %v7462_v28 = vpop.permute.xlu1 %7461 }
0x3696   :  { %v7530_v53 = vpop.permute.xlu0 %7529 }
0x3697   :  { %9987 = vmatmul.mubr.msk.bf16.vlgmr.msra.gmra.mrb[216].mxu0 %vm808_vm4, %v7258_v50 }
0x3698   :  { %10008 = vmatprep.mubr.msk.bf16.mxu0 %vm323_vm2, %v7462_v28 }
0x3699   :  { %v7536_v43 = vpop.permute.xlu1 %7535 }
0x369a   :  { %v7547_v45 = vsel %vm323_vm2, %v7536_v43, 0 }
0x369d   :  { %10005 = vmatpush3.bf16.xpose.msra.mxu0 %v7476_v7  ;;  %v7532_v24 = vpop.permute.xlu1 %7531 }
0x369e   :  { %10209 = vmatprep.subr.msk.bf16.mxu0 %vm323_vm2, %v7468_v57 }
0x36a5   :  { %10007 = vmatpush3.bf16.xpose.msra.mxu0 %v7479_v16 }
0x36ac   :  { %10009 = vmatmul.mubr.msk.bf16.vlgmr.msra.gmra.mrb[220].mxu0 %vm323_vm2, %v7464_v19 }
0x3762   :  { %v9980_v18 = vpop.f32.mrb[212].mxu0 }
0x3763   :  { %v7307_v36 = vpop.f32.mrb[213].mxu0 }
0x3764   :  { %v9981_v63 = vpop.f32.mrb[214].mxu0 }
0x3765   :  { %v7310_v2 = vpop.f32.mrb[215].mxu0 }
0x3766   :  { %v7383_v9 = vpack.c.bf16 %v7310_v2, %v7307_v36 }
0x3768   :  { %9993 = vmatmul.mubr.msk.bf16.vlgmr.msra.gmra.mrb[248].mxu1 %vm323_vm2, %v7383_v9 }
0x3769   :  { %10013 = vmatpush3.bf16.xpose.msra.mxu1 %v7544_v29  ;;  %9996 = vmatprep.mubr.msk.bf16.mxu1 %vm11290_vm0, %v11289_v0 }
0x376a   :  { %10211 = vmatprep.subr.msk.bf16.mxu1 %vm323_vm2, %v7536_v43  ;;  %v9988_v25 = vpop.f32.mrb[216].mxu0 }
0x376b   :  { %v7369_v35 = vpop.f32.mrb[217].mxu0 }
0x376c   :  { %v7384_v1 = vpack.c.bf16 %v7369_v35, %v9980_v18  ;;  %v9989_v47 = vpop.f32.mrb[218].mxu0 }
0x376d   :  { %v7372_v46 = vpop.f32.mrb[219].mxu0 }
0x376e   :  { %v7385_v40 = vpack.c.bf16 %v9988_v25, %v7372_v46 }
0x3770   :  { %9997 = vmatmul.mubr.msk.bf16.gmra.mrb[252].mxu1 %vm323_vm2, %v7384_v1 }
0x3771   :  { %10015 = vmatpush3.bf16.xpose.msra.mxu1 %v7547_v45  ;;  %10000 = vmatprep.mubr.msk.bf16.mxu1 %vm11290_vm0, %v11289_v0 }
0x3772   :  { %10036 = vmatprep.subr.bf16.mxu1 %v11289_v0 }
0x3778   :  { %10001 = vmatmul.mubr.msk.bf16.gmra.mrb[0].mxu1 %vm323_vm2, %v7385_v40 }
0x3779   :  { %10016 = vmatprep.mubr.msk.bf16.mxu1 %vm323_vm2, %v7530_v53 }
0x377f   :  { %v10010_v44 = vpop.f32.mrb[220].mxu0 }
0x3780   :  { %v7515_v26 = vpop.f32.mrb[221].mxu0  ;;  %10017 = vmatmul.mubr.msk.bf16.vlgmr.msra.gmra.mrb[4].mxu1 %vm323_vm2, %v7532_v24  ;;  %v7603_v17 = vsel %vm808_vm4, %v10010_v44, -inf }
0x3781   :  { %v10011_v8 = vpop.f32.mrb[222].mxu0  ;;  %v7597_v61 = vsel %vm808_vm4, %v7515_v26, -inf  ;;  %10038 = vmatprep.mubr.msk.bf16.mxu1 %vm11290_vm0, %v11289_v0 }
0x3782   :  { %7598 = vmax.xlane.f32.xlu0 %v7597_v61  ;;  %v7518_v23 = vpop.f32.mrb[223].mxu0 }
0x3783   :  { %v7600_v49 = vsel %vm808_vm4, %v7518_v23, -inf }
0x3784   :  { %7601 = vmax.xlane.f32.xlu1 %v7600_v49 }
0x3786   :  { %7604 = vmax.xlane.f32.xlu0 %v7603_v17 }
0x380f   :  { %v7599_v12 = vpop.xlane.xlu0 %7598 }
0x3810   :  { %v7615_v54 = vsub.f32 %v7515_v26, %v7599_v12 }
0x3811   :  { %v7602_v15 = vpop.xlane.xlu1 %7601 }
0x3812   :  { %v7616_v6 = vsub.f32 %v7518_v23, %v7602_v15  ;;  %v7621_v57 = vmul.f32 1.442695, %v7615_v54 }
0x3813   :  { %v7605_v55 = vpop.xlane.xlu0 %7604 }
0x3814   :  { %v7623_v42 = vmul.f32 1.442695, %v7616_v6  ;;  %v7617_v21 = vsub.f32 %v10010_v44, %v7605_v55 }
0x3816   :  { %10716 = vpow2.f32 %v7623_v42 }
0x3817   :  { %10718 = vpow2.f32 %v7621_v57 }
0x3820   :  { %v10717_v63 = vpop.eup %10716 }
0x3821   :  { %v7636_v29 = vsel %vm808_vm4, %v10717_v63, 0.0  ;;  %v10719_v43 = vpop.eup %10718 }
0x3822   :  { %v7633_v25 = vsel %vm808_vm4, %v10719_v43, 0.0 }
0x383b   :  { %v7432_v52 = vpop.f32.mrb[248].mxu1 }
0x383c   :  { %v13369_v31 = vadd.f32 %v7432_v52, %v13280_v33  ;;  %v9994_v62 = vpop.f32.mrb[249].mxu1 }
0x383d   :  { %v7435_v51 = vpop.f32.mrb[250].mxu1 }
0x383e   :  { %v13372_v34 = vadd.f32 %v7435_v51, %v13283_v32  ;;  %v9995_v20 = vpop.f32.mrb[251].mxu1 }
0x3843   :  { %v7440_v14 = vpop.f32.mrb[252].mxu1 }
0x3844   :  { %v13375_v10 = vadd.f32 %v7440_v14, %v13286_v39  ;;  %v9998_v22 = vpop.f32.mrb[253].mxu1 }
0x3845   :  { %v7443_v27 = vpop.f32.mrb[254].mxu1 }
0x3846   :  { %v13378_v30 = vadd.f32 %v7443_v27, %v13289_v38  ;;  %v9999_v33 = vpop.f32.mrb[255].mxu1  ;;  %v7625_v38 = vmul.f32 1.442695, %v7617_v21 }
0x3848   :  { %10720 = vpow2.f32 %v7625_v38 }
0x384b   :  { %v7448_v32 = vpop.f32.mrb[0].mxu1 }
0x384c   :  { %v13381_v50 = vadd.f32 %v7448_v32, %v13292_v48  ;;  %v10002_v28 = vpop.f32.mrb[1].mxu1 }
0x384d   :  { %v7451_v7 = vpop.f32.mrb[2].mxu1 }
0x384e   :  { %v13384_v39 = vadd.f32 %v7451_v7, %v13295_v13  ;;  %v10003_v16 = vpop.f32.mrb[3].mxu1 }
0x3852   :  { %v10721_v35 = vpop.eup %10720 }
0x3853   :  { %v10018_v19 = vpop.f32.mrb[4].mxu1  ;;  %v7639_v1 = vsel %vm808_vm4, %v10721_v35, 0.0 }
0x3854   :  { %v7583_v18 = vpop.f32.mrb[5].mxu1  ;;  %v7612_v36 = vsel %vm808_vm4, %v10018_v19, -inf }
0x3855   :  { %7613 = vmax.xlane.f32.xlu1 %v7612_v36  ;;  %v10019_v2 = vpop.f32.mrb[6].mxu1  ;;  %v7606_v9 = vsel %vm808_vm4, %v7583_v18, -inf }
0x3856   :  { %7607 = vmax.xlane.f32.xlu0 %v7606_v9  ;;  %v7586_v48 = vpop.f32.mrb[7].mxu1  ;;  %v4624_v9 = vld [vmem:[#allocation14 + $0x3c] sm:$0xf] }
0x3857   :  { %v7609_v13 = vsel %vm808_vm4, %v7586_v48, -inf }
0x3859   :  { %7637 = vadd.xlane.f32.xlu1 %v7636_v29 }
0x385a   :  { %7610 = vmax.xlane.f32.xlu0 %v7609_v13 }
0x385e   :  { %7634 = vadd.xlane.f32.xlu0 %v7633_v25 }
0x3862   :  { %7640 = vadd.xlane.f32.xlu0 %v7639_v1 }
0x38e2   :  { %v7614_v47 = vpop.xlane.xlu1 %7613 }
0x38e3   :  { %v7620_v46 = vsub.f32 %v10018_v19, %v7614_v47  ;;  %v7608_v40 = vpop.xlane.xlu0 %7607 }
0x38e4   :  { %v7618_v45 = vsub.f32 %v7583_v18, %v7608_v40 }
0x38e5   :  { %v7631_v53 = vmul.f32 1.442695, %v7620_v46 }
0x38e6   :  { %v7627_v24 = vmul.f32 1.442695, %v7618_v45  ;;  %v7638_v26 = vpop.xlane.xlu1 %7637 }
0x38e7   :  { %10722 = vpow2.f32 %v7631_v53  ;;  %v7611_v44 = vpop.xlane.xlu0 %7610 }
0x38e8   :  { %v7619_v8 = vsub.f32 %v7586_v48, %v7611_v44  ;;  %10724 = vpow2.f32 %v7627_v24  ;;  %v7804_v48 = vsel %vm333_vm1, %v4624_v9, 0 }
0x38e9   :  { %10726 = vrcp.f32 %v7638_v26  ;;  %10037 = vmatpush3.bf16.msra.mxu1 %v7804_v48 }
0x38ea   :  { %v7629_v61 = vmul.f32 1.442695, %v7619_v8  ;;  %10070 = vmatprep.subr.bf16.mxu1 %v11289_v0  ;;  %v8847_v8 = vld [vmem:[#allocation16 + $0x1] ss:$0 sm:$0xff] }
0x38eb   :  { %v7635_v23 = vpop.xlane.xlu0 %7634 }
0x38ec   :  { %10728 = vpow2.f32 %v7629_v61 }
0x38ed   :  { %10730 = vrcp.f32 %v7635_v23 }
0x38ef   :  { %v7641_v27 = vpop.xlane.xlu0 %7640 }
0x38f0   :  { %10732 = vrcp.f32 %v7641_v27 }
0x38f1   :  { %v10723_v49 = vpop.eup %10722 }
0x38f2   :  { %v7648_v17 = vsel %vm808_vm4, %v10723_v49, 0.0  ;;  %v10725_v52 = vpop.eup %10724 }
0x38f3   :  { %7649 = vadd.xlane.f32.xlu1 %v7648_v17  ;;  %v10727_v62 = vpop.eup %10726  ;;  %v7642_v20 = vsel %vm808_vm4, %v10725_v52, 0.0 }
0x38f4   :  { %v7658_v14 = vmul.f32 %v10727_v62, %v10717_v63 }
0x38f6   :  { %v10729_v51 = vpop.eup %10728 }
0x38f7   :  { %v10731_v15 = vpop.eup %10730  ;;  %7643 = vadd.xlane.f32.xlu1 %v7642_v20  ;;  %v7645_v12 = vsel %vm808_vm4, %v10729_v51, 0.0 }
0x38f8   :  { %7646 = vadd.xlane.f32.xlu0 %v7645_v12  ;;  %v7657_v6 = vmul.f32 %v10731_v15, %v10719_v43 }
0x38fa   :  { %v7663_v22 = vpack.c.bf16 %v7658_v14, %v7657_v6  ;;  %v10733_v32 = vpop.eup %10732 }
0x38fc   :  { %10024 = vmatprep.mubr.msk.bf16.mxu0 %vm808_vm4, %v7663_v22 }
0x3908   :  { %7669 = vrot.lane.b32.xlu1 %v12739_v37, %s11302_s14 }
0x390c   :  { %7729 = vrot.lane.b32.xlu1 %v12724_v11, %s11302_s14  ;;  %v7659_v11 = vmul.f32 %v10733_v32, %v10721_v35 }
0x390e   :  { %7667 = vrot.lane.b32.xlu0 %v12712_v59, %s11302_s14  ;;  %v7664_v28 = vpack.c.bf16 %v7659_v11, %v7659_v11 }
0x3910   :  { %7731 = vrot.lane.b32.xlu1 %v12753_v56, %s11302_s14 }
0x3980   :  { %v7650_v33 = vpop.xlane.xlu1 %7649 }
0x3984   :  { %v7644_v42 = vpop.xlane.xlu1 %7643 }
0x3985   :  { %10734 = vrcp.f32 %v7644_v42  ;;  %v7647_v54 = vpop.xlane.xlu0 %7646 }
0x3986   :  { %10736 = vrcp.f32 %v7647_v54 }
0x3987   :  { %10738 = vrcp.f32 %v7650_v33 }
0x3988   :  { %v7670_v55 = vpop.permute.xlu1 %7669 }
0x3989   :  { %v7668_v37 = vpop.permute.xlu0 %7667  ;;  %v7679_v57 = vsel %vm333_vm1, %v7670_v55, 0 }
0x398a   :  { %10020 = vmatprep.subr.bf16.mxu0 %v7668_v37 }
0x398b   :  { %10021 = vmatpush3.bf16.msra.mxu0 %v7668_v37 }
0x398c   :  { %10212 = vmatprep.subr.msk.bf16.mxu0 %vm333_vm1, %v7670_v55  ;;  %v7730_v59 = vpop.permute.xlu1 %7729 }
0x398f   :  { %v10735_v56 = vpop.eup %10734  ;;  %10023 = vmatpush3.bf16.msra.mxu0 %v7679_v57 }
0x3990   :  { %v10737_v21 = vpop.eup %10736  ;;  %10028 = vmatprep.subr.bf16.mxu0 %v7730_v59  ;;  %v7660_v7 = vmul.f32 %v10735_v56, %v10725_v52  ;;  %v7732_v19 = vpop.permute.xlu1 %7731 }
0x3991   :  { %v10739_v16 = vpop.eup %10738  ;;  %v7661_v38 = vmul.f32 %v10737_v21, %v10729_v51  ;;  %v7741_v63 = vsel %vm333_vm1, %v7732_v19, 0 }
0x3992   :  { %10025 = vmatmul.mubr.msk.bf16.vlgmr.msra.gmra.mrb[224].mxu0 %vm808_vm4, %v7664_v28  ;;  %v7662_v36 = vmul.f32 %v10739_v16, %v10723_v49 }
0x3993   :  { %10029 = vmatpush3.bf16.msra.mxu0 %v7730_v59  ;;  %v7665_v18 = vpack.c.bf16 %v7661_v38, %v7660_v7 }
0x3994   :  { %10213 = vmatprep.subr.msk.bf16.mxu0 %vm333_vm1, %v7732_v19  ;;  %v7666_v2 = vpack.c.bf16 %v7662_v36, %v7662_v36 }
0x3995   :  { %10032 = vmatprep.mubr.msk.bf16.mxu0 %vm808_vm4, %v7665_v18 }
0x3997   :  { %10031 = vmatpush3.bf16.msra.mxu0 %v7741_v63 }
0x3998   :  { %10050 = vmatprep.subr.bf16.mxu0 %v11289_v0 }
0x399a   :  { %10033 = vmatmul.mubr.msk.bf16.vlgmr.msra.gmra.mrb[228].mxu0 %vm808_vm4, %v7666_v2 }
0x399b   :  { %10058 = vmatprep.mubr.msk.bf16.mxu0 %vm11290_vm0, %v11289_v0 }
0x3a65   :  { %v10026_v29 = vpop.f32.mrb[224].mxu0 }
0x3a66   :  { %v7715_v13 = vpop.f32.mrb[225].mxu0 }
0x3a67   :  { %v10027_v43 = vpop.f32.mrb[226].mxu0 }
0x3a68   :  { %v7718_v25 = vpop.f32.mrb[227].mxu0 }
0x3a69   :  { %v7791_v35 = vpack.c.bf16 %v7718_v25, %v7715_v13 }
0x3a6b   :  { %10039 = vmatmul.mubr.msk.bf16.vlgmr.msra.gmra.mrb[8].mxu1 %vm323_vm2, %v7791_v35 }
0x3a6c   :  { %10042 = vmatprep.mubr.msk.bf16.mxu1 %vm11290_vm0, %v11289_v0 }
0x3a6d   :  { %v10034_v1 = vpop.f32.mrb[228].mxu0 }
0x3a6e   :  { %v7777_v47 = vpop.f32.mrb[229].mxu0 }
0x3a6f   :  { %v7792_v46 = vpack.c.bf16 %v7777_v47, %v10026_v29  ;;  %v10035_v40 = vpop.f32.mrb[230].mxu0 }
0x3a70   :  { %v7780_v45 = vpop.f32.mrb[231].mxu0 }
0x3a71   :  { %v7793_v53 = vpack.c.bf16 %v10034_v1, %v7780_v45 }
0x3a73   :  { %10043 = vmatmul.mubr.msk.bf16.gmra.mrb[12].mxu1 %vm323_vm2, %v7792_v46 }
0x3a74   :  { %10046 = vmatprep.mubr.msk.bf16.mxu1 %vm11290_vm0, %v11289_v0 }
0x3a7b   :  { %10047 = vmatmul.mubr.msk.bf16.gmra.mrb[16].mxu1 %vm323_vm2, %v7793_v53 }
0x3a7c   :  { %10086 = vmatprep.mubr.msk.bf16.mxu1 %vm11290_vm0, %v11289_v0 }
0x3b3e   :  { %v7840_v24 = vpop.f32.mrb[8].mxu1 }
0x3b3f   :  { %v7863_v44 = vadd.f32 %v7840_v24, %v13369_v31  ;;  %v10040_v26 = vpop.f32.mrb[9].mxu1 }
0x3b40   :  { %v7843_v61 = vpop.f32.mrb[10].mxu1 }
0x3b41   :  { %v7869_v23 = vadd.f32 %v7863_v44, %v12630_v5  ;;  %v7864_v49 = vadd.f32 %v7843_v61, %v13372_v34  ;;  %v10041_v17 = vpop.f32.mrb[11].mxu1  ;;  %v10292_v61 = vld [vmem:[#allocation20 + $0x20] sm:$0xff]  }
0x3b42   :  { %10051 = vmatpush3.bf16.msra.mxu0 %v10292_v61  ;;  %v10295_v17 = vld [vmem:[#allocation20 + $0x38] sm:$0xff]  }
0x3b43   :  { %v13428_v52 = vadd.f32 %v8847_v8, %v7869_v23  ;;  %v7870_v62 = vadd.f32 %v7864_v49, %v12633_v41  ;;  %10052 = vmatprep.subr.bf16.mxu0 %v11289_v0  ;;  %v10293_v23 = vld [vmem:[#allocation20 + $0x28] sm:$0xff]   ;;  %v10294_v49 = vld [vmem:[#allocation20 + $0x30] sm:$0xff]  }
0x3b44   :  { %v10302_v61 = vld [vmem:[#allocation23 + $0x70] sm:$0xff]  }
0x3b45   :  { %v13431_v51 = vadd.f32 %v8847_v8, %v7870_v62  ;;  %v7893_v20 = vsel %vm405_vm3, %v13428_v52, 0.0 }
0x3b46   :  { %7894 = vadd.xlane.f32.xlu0 %v7893_v20  ;;  %v7848_v15 = vpop.f32.mrb[12].mxu1  ;;  %10053 = vmatpush3.bf16.msra.mxu0 %v10293_v23  ;;  %v10303_v23 = vld [vmem:[#allocation23 + $0x78] sm:$0xff]  }
0x3b47   :  { %v7865_v31 = vadd.f32 %v7848_v15, %v13375_v10  ;;  %v10044_v12 = vpop.f32.mrb[13].mxu1  ;;  %v7896_v5 = vsel %vm405_vm3, %v13431_v51, 0.0  ;;  %10054 = vmatprep.subr.bf16.mxu0 %v11289_v0 }
0x3b48   :  { %7897 = vadd.xlane.f32.xlu1 %v7896_v5  ;;  %v7851_v34 = vpop.f32.mrb[14].mxu1 }
0x3b49   :  { %v7871_v6 = vadd.f32 %v7865_v31, %v12640_v58  ;;  %v7866_v14 = vadd.f32 %v7851_v34, %v13378_v30  ;;  %v10045_v41 = vpop.f32.mrb[15].mxu1 }
0x3b4a   :  { %10055 = vmatpush3.bf16.msra.mxu0 %v10294_v49  ;;  %v8850_v49 = vld [vmem:[#allocation22 + $0x1] ss:$0 sm:$0xff] }
0x3b4b   :  { %v13440_v22 = vadd.f32 %v8847_v8, %v7871_v6  ;;  %v7872_v27 = vadd.f32 %v7866_v14, %v12643_v4  ;;  %10056 = vmatprep.subr.bf16.mxu0 %v11289_v0 }
0x3b4d   :  { %v13443_v33 = vadd.f32 %v8847_v8, %v7872_v27  ;;  %v7899_v10 = vsel %vm405_vm3, %v13440_v22, 0.0 }
0x3b4e   :  { %7900 = vadd.xlane.f32.xlu0 %v7899_v10  ;;  %v7856_v42 = vpop.f32.mrb[16].mxu1  ;;  %10057 = vmatpush3.bf16.msra.mxu0 %v10295_v17 }
0x3b4f   :  { %v7867_v54 = vadd.f32 %v7856_v42, %v13381_v50  ;;  %v10048_v55 = vpop.f32.mrb[17].mxu1  ;;  %v7902_v11 = vsel %vm405_vm3, %v13443_v33, 0.0  ;;  %10098 = vmatprep.subr.bf16.mxu0 %v11289_v0  ;;  %v8848_v42 = vld [vmem:[#allocation17 + $0x1] ss:$0 sm:$0xff] }
0x3b50   :  { %v7859_v32 = vpop.f32.mrb[18].mxu1 }
0x3b51   :  { %v7873_v58 = vadd.f32 %v7867_v54, %v12650_v3  ;;  %v7868_v30 = vadd.f32 %v7859_v32, %v13384_v39  ;;  %v10049_v37 = vpop.f32.mrb[19].mxu1 }
0x3b52   :  { %7903 = vadd.xlane.f32.xlu0 %v7902_v11 }
0x3b53   :  { %v13452_v4 = vadd.f32 %v8847_v8, %v7873_v58  ;;  %v7874_v59 = vadd.f32 %v7868_v30, %v12653_v60 }
0x3b55   :  { %v13455_v57 = vadd.f32 %v8847_v8, %v7874_v59  ;;  %v7905_v50 = vsel %vm405_vm3, %v13452_v4, 0.0 }
0x3b56   :  { %7906 = vadd.xlane.f32.xlu0 %v7905_v50 }
0x3b57   :  { %v7908_v3 = vsel %vm405_vm3, %v13455_v57, 0.0 }
0x3b58   :  { %7909 = vadd.xlane.f32.xlu1 %v7908_v3 }
0x3bd3   :  { %v7895_v39 = vpop.xlane.xlu0 %7894 }
0x3bd4   :  { %v7911_v56 = vmul.f32 0.015625, %v7895_v39  ;;  %v8849_v39 = vld [vmem:[#allocation19 + $0x1] ss:$0 sm:$0xff] }
0x3bd5   :  { %v7898_v21 = vpop.xlane.xlu1 %7897 }
0x3bd6   :  { %v7917_v28 = vsub.f32 %v13428_v52, %v7911_v56  ;;  %v7912_v7 = vmul.f32 0.015625, %v7898_v21 }
0x3bd8   :  { %v13463_v16 = vsub.f32 %v13431_v51, %v7912_v7  ;;  %v7923_v60 = vmul.f32 %v7917_v28, %v7917_v28 }
0x3bda   :  { %v7929_v38 = vsel %vm405_vm3, %v7923_v60, 0.0  ;;  %v7924_v19 = vmul.f32 %v13463_v16, %v13463_v16 }
0x3bdb   :  { %v7901_v18 = vpop.xlane.xlu0 %7900  ;;  %7930 = vadd.xlane.f32.xlu0 %v7929_v38 }
0x3bdc   :  { %v7913_v36 = vmul.f32 0.015625, %v7901_v18  ;;  %v7932_v63 = vsel %vm405_vm3, %v7924_v19, 0.0 }
0x3bdd   :  { %7933 = vadd.xlane.f32.xlu1 %v7932_v63 }
0x3bde   :  { %v13470_v2 = vsub.f32 %v13440_v22, %v7913_v36 }
0x3bdf   :  { %v7904_v9 = vpop.xlane.xlu0 %7903 }
0x3be0   :  { %v7914_v48 = vmul.f32 0.015625, %v7904_v9  ;;  %v7925_v29 = vmul.f32 %v13470_v2, %v13470_v2 }
0x3be2   :  { %v13475_v13 = vsub.f32 %v13443_v33, %v7914_v48  ;;  %v7935_v43 = vsel %vm405_vm3, %v7925_v29, 0.0 }
0x3be3   :  { %7936 = vadd.xlane.f32.xlu0 %v7935_v43  ;;  %v7907_v25 = vpop.xlane.xlu0 %7906 }
0x3be4   :  { %v7915_v35 = vmul.f32 0.015625, %v7907_v25  ;;  %v7926_v1 = vmul.f32 %v13475_v13, %v13475_v13 }
0x3be5   :  { %v7910_v47 = vpop.xlane.xlu1 %7909 }
0x3be6   :  { %v13481_v46 = vsub.f32 %v13452_v4, %v7915_v35  ;;  %v7916_v40 = vmul.f32 0.015625, %v7910_v47  ;;  %v7938_v45 = vsel %vm405_vm3, %v7926_v1, 0.0 }
0x3be7   :  { %7939 = vadd.xlane.f32.xlu1 %v7938_v45 }
0x3be8   :  { %v13485_v53 = vsub.f32 %v13455_v57, %v7916_v40  ;;  %v7927_v24 = vmul.f32 %v13481_v46, %v13481_v46 }
0x3bea   :  { %v7941_v44 = vsel %vm405_vm3, %v7927_v24, 0.0  ;;  %v7928_v26 = vmul.f32 %v13485_v53, %v13485_v53  ;;  %v10298_v24 = vld [vmem:[#allocation23 + $0x50] sm:$0xff]  }
0x3beb   :  { %7942 = vadd.xlane.f32.xlu0 %v7941_v44  ;;  %v10299_v44 = vld [vmem:[#allocation23 + $0x58] sm:$0xff]  }
0x3bec   :  { %v7944_v8 = vsel %vm405_vm3, %v7928_v26, 0.0  ;;  %v10300_v26 = vld [vmem:[#allocation23 + $0x60] sm:$0xff]  }
0x3bed   :  { %7945 = vadd.xlane.f32.xlu1 %v7944_v8  ;;  %v10301_v8 = vld [vmem:[#allocation23 + $0x68] sm:$0xff]  }
0x3c68   :  { %v7931_v62 = vpop.xlane.xlu0 %7930 }
0x3c69   :  { %v7947_v20 = vmul.f32 0.015625, %v7931_v62 }
0x3c6a   :  { %v7934_v15 = vpop.xlane.xlu1 %7933 }
0x3c6b   :  { %v7953_v31 = vadd.f32 1e-05, %v7947_v20  ;;  %v7948_v12 = vmul.f32 0.015625, %v7934_v15 }
0x3c6d   :  { %10740 = vrsqrt.f32 %v7953_v31  ;;  %v7954_v5 = vadd.f32 1e-05, %v7948_v12 }
0x3c6f   :  { %10742 = vrsqrt.f32 %v7954_v5 }
0x3c70   :  { %v7937_v34 = vpop.xlane.xlu0 %7936 }
0x3c71   :  { %v7949_v6 = vmul.f32 0.015625, %v7937_v34 }
0x3c73   :  { %v7955_v14 = vadd.f32 1e-05, %v7949_v6 }
0x3c74   :  { %v7940_v41 = vpop.xlane.xlu1 %7939 }
0x3c75   :  { %10744 = vrsqrt.f32 %v7955_v14  ;;  %v7950_v27 = vmul.f32 0.015625, %v7940_v41 }
0x3c77   :  { %v10741_v10 = vpop.eup %10740  ;;  %v7956_v54 = vadd.f32 1e-05, %v7950_v27 }
0x3c78   :  { %v7965_v55 = vmul.f32 %v10741_v10, %v7917_v28  ;;  %v7943_v32 = vpop.xlane.xlu0 %7942 }
0x3c79   :  { %v10743_v58 = vpop.eup %10742  ;;  %10746 = vrsqrt.f32 %v7956_v54  ;;  %v7951_v30 = vmul.f32 0.015625, %v7943_v32 }
0x3c7a   :  { %v7977_v37 = vmul.f32 %v8848_v42, %v7965_v55  ;;  %v7966_v11 = vmul.f32 %v10743_v58, %v13463_v16  ;;  %v7946_v59 = vpop.xlane.xlu1 %7945 }
0x3c7b   :  { %v7957_v50 = vadd.f32 1e-05, %v7951_v30  ;;  %v7952_v3 = vmul.f32 0.015625, %v7946_v59 }
0x3c7c   :  { %v7978_v56 = vmul.f32 %v8848_v42, %v7966_v11  ;;  %v7989_v7 = vadd.f32 %v8849_v39, %v7977_v37 }
0x3c7d   :  { %10748 = vrsqrt.f32 %v7957_v50  ;;  %v7958_v21 = vadd.f32 1e-05, %v7952_v3 }
0x3c7e   :  { %v7990_v60 = vadd.f32 %v8849_v39, %v7978_v56 }
0x3c7f   :  { %v10745_v38 = vpop.eup %10744  ;;  %10750 = vrsqrt.f32 %v7958_v21 }
0x3c80   :  { %v7967_v28 = vmul.f32 %v10745_v38, %v13470_v2  ;;  %v7995_v19 = vpack.c.bf16 %v7990_v60, %v7989_v7 }
0x3c82   :  { %10059 = vmatmul.mubr.msk.bf16.vlgmr.msra.gmra.mrb[232].mxu0 %vm405_vm3, %v7995_v19  ;;  %v7979_v36 = vmul.f32 %v8848_v42, %v7967_v28 }
0x3c83   :  { %v10747_v18 = vpop.eup %10746  ;;  %10062 = vmatprep.mubr.msk.bf16.mxu0 %vm11290_vm0, %v11289_v0 }
0x3c84   :  { %v7968_v16 = vmul.f32 %v10747_v18, %v13475_v13  ;;  %v7991_v29 = vadd.f32 %v8849_v39, %v7979_v36 }
0x3c86   :  { %v7980_v63 = vmul.f32 %v8848_v42, %v7968_v16 }
0x3c87   :  { %v10749_v9 = vpop.eup %10748 }
0x3c88   :  { %v7969_v48 = vmul.f32 %v10749_v9, %v13481_v46  ;;  %v7992_v43 = vadd.f32 %v8849_v39, %v7980_v63  ;;  %v10296_v46 = vld [vmem:[#allocation23 + $0x40] sm:$0xff]  }
0x3c89   :  { %v10751_v25 = vpop.eup %10750  ;;  %10071 = vmatpush3.bf16.msra.mxu1 %v10296_v46 }
0x3c8a   :  { %v7970_v35 = vmul.f32 %v10751_v25, %v13485_v53  ;;  %v7996_v2 = vpack.c.bf16 %v7992_v43, %v7991_v29  ;;  %v7981_v1 = vmul.f32 %v8848_v42, %v7969_v48  ;;  %10072 = vmatprep.subr.bf16.mxu1 %v11289_v0  ;;  %v10297_v53 = vld [vmem:[#allocation23 + $0x48] sm:$0xff]  }
0x3c8c   :  { %10063 = vmatmul.mubr.msk.bf16.gmra.mrb[236].mxu0 %vm405_vm3, %v7996_v2  ;;  %v7982_v47 = vmul.f32 %v8848_v42, %v7970_v35  ;;  %v7993_v13 = vadd.f32 %v8849_v39, %v7981_v1 }
0x3c8d   :  { %10066 = vmatprep.mubr.msk.bf16.mxu0 %vm11290_vm0, %v11289_v0  ;;  %10073 = vmatpush3.bf16.msra.mxu1 %v10297_v53 }
0x3c8e   :  { %v7994_v40 = vadd.f32 %v8849_v39, %v7982_v47  ;;  %10074 = vmatprep.subr.bf16.mxu1 %v11289_v0 }
0x3c90   :  { %v7997_v45 = vpack.c.bf16 %v7994_v40, %v7993_v13 }
0x3c91   :  { %10075 = vmatpush3.bf16.msra.mxu1 %v10298_v24 }
0x3c92   :  { %10076 = vmatprep.subr.bf16.mxu1 %v11289_v0 }
0x3c94   :  { %10067 = vmatmul.mubr.msk.bf16.gmra.mrb[240].mxu0 %vm405_vm3, %v7997_v45 }
0x3c95   :  { %10106 = vmatprep.mubr.msk.bf16.mxu0 %vm11290_vm0, %v11289_v0  ;;  %10077 = vmatpush3.bf16.msra.mxu1 %v10299_v44 }
0x3c96   :  { %10078 = vmatprep.subr.bf16.mxu1 %v11289_v0 }
0x3c99   :  { %10079 = vmatpush3.bf16.msra.mxu1 %v10300_v26 }
0x3c9a   :  { %10080 = vmatprep.subr.bf16.mxu1 %v11289_v0 }
0x3c9d   :  { %10081 = vmatpush3.bf16.msra.mxu1 %v10301_v8 }
0x3c9e   :  { %10082 = vmatprep.subr.bf16.mxu1 %v11289_v0 }
0x3ca1   :  { %10083 = vmatpush3.bf16.msra.mxu1 %v10302_v61 }
0x3ca2   :  { %10084 = vmatprep.subr.bf16.mxu1 %v11289_v0 }
0x3ca5   :  { %10085 = vmatpush3.bf16.msra.mxu1 %v10303_v23 }
0x3d55   :  { %v8082_v17 = vpop.f32.mrb[232].mxu0 }
0x3d56   :  { %v8083_v62 = vadd.f32 %v8850_v49, %v8082_v17  ;;  %v10060_v20 = vpop.f32.mrb[233].mxu0 }
0x3d57   :  { %v8085_v15 = vpop.f32.mrb[234].mxu0 }
0x3d58   :  { %v8105_v31 = vmul.f32 %v8083_v62, %v8083_v62  ;;  %v8086_v12 = vadd.f32 %v8850_v49, %v8085_v15  ;;  %v10061_v5 = vpop.f32.mrb[235].mxu0 }
0x3d5a   :  { %v8111_v34 = vmul.f32 %v8105_v31, %v8083_v62  ;;  %v8106_v6 = vmul.f32 %v8086_v12, %v8086_v12 }
0x3d5c   :  { %v8117_v14 = vmul.f32 0.044715, %v8111_v34  ;;  %v8112_v41 = vmul.f32 %v8106_v6, %v8086_v12 }
0x3d5e   :  { %v8123_v27 = vadd.f32 %v8117_v14, %v8083_v62  ;;  %v8118_v10 = vmul.f32 0.044715, %v8112_v41 }
0x3d5f   :  { %v8090_v42 = vpop.f32.mrb[236].mxu0 }
0x3d60   :  { %v8129_v54 = vmul.f32 0.7978846, %v8123_v27  ;;  %v8124_v55 = vadd.f32 %v8118_v10, %v8086_v12  ;;  %v8091_v32 = vadd.f32 %v8850_v49, %v8090_v42  ;;  %v10064_v58 = vpop.f32.mrb[237].mxu0 }
0x3d61   :  { %v8093_v30 = vpop.f32.mrb[238].mxu0 }
0x3d62   :  { %10752 = vtanh.f32 %v8129_v54  ;;  %v8130_v37 = vmul.f32 0.7978846, %v8124_v55  ;;  %v8107_v11 = vmul.f32 %v8091_v32, %v8091_v32  ;;  %v8094_v59 = vadd.f32 %v8850_v49, %v8093_v30  ;;  %v10065_v50 = vpop.f32.mrb[239].mxu0 }
0x3d64   :  { %10754 = vtanh.f32 %v8130_v37  ;;  %v8113_v3 = vmul.f32 %v8107_v11, %v8091_v32  ;;  %v8108_v39 = vmul.f32 %v8094_v59, %v8094_v59  ;;  %v8866_v11 = vld [vmem:[#allocation25 + $0x1] ss:$0 sm:$0xff] }
0x3d66   :  { %v8119_v56 = vmul.f32 0.044715, %v8113_v3  ;;  %v8114_v21 = vmul.f32 %v8108_v39, %v8094_v59 }
0x3d67   :  { %v8098_v7 = vpop.f32.mrb[240].mxu0 }
0x3d68   :  { %v8125_v60 = vadd.f32 %v8119_v56, %v8091_v32  ;;  %v8120_v38 = vmul.f32 0.044715, %v8114_v21  ;;  %v8099_v28 = vadd.f32 %v8850_v49, %v8098_v7  ;;  %v10068_v19 = vpop.f32.mrb[241].mxu0 }
0x3d69   :  { %v8101_v18 = vpop.f32.mrb[242].mxu0 }
0x3d6a   :  { %v8131_v16 = vmul.f32 0.7978846, %v8125_v60  ;;  %v8126_v36 = vadd.f32 %v8120_v38, %v8094_v59  ;;  %v8109_v63 = vmul.f32 %v8099_v28, %v8099_v28  ;;  %v8102_v9 = vadd.f32 %v8850_v49, %v8101_v18  ;;  %v10069_v48 = vpop.f32.mrb[243].mxu0 }
0x3d6c   :  { %v10753_v29 = vpop.eup %10752  ;;  %10756 = vtanh.f32 %v8131_v16  ;;  %v8132_v43 = vmul.f32 0.7978846, %v8126_v36  ;;  %v8115_v25 = vmul.f32 %v8109_v63, %v8099_v28  ;;  %v8110_v35 = vmul.f32 %v8102_v9, %v8102_v9 }
0x3d6d   :  { %v8141_v2 = vadd.f32 1.0, %v10753_v29 }
0x3d6e   :  { %v10755_v1 = vpop.eup %10754  ;;  %10758 = vtanh.f32 %v8132_v43  ;;  %v8121_v47 = vmul.f32 0.044715, %v8115_v25  ;;  %v8116_v40 = vmul.f32 %v8110_v35, %v8102_v9 }
0x3d6f   :  { %v8147_v13 = vmul.f32 0.5, %v8141_v2  ;;  %v8142_v45 = vadd.f32 1.0, %v10755_v1 }
0x3d70   :  { %v8127_v46 = vadd.f32 %v8121_v47, %v8099_v28  ;;  %v8122_v53 = vmul.f32 0.044715, %v8116_v40 }
0x3d71   :  { %v8148_v24 = vmul.f32 0.5, %v8142_v45  ;;  %v8153_v8 = vmul.f32 %v8147_v13, %v8083_v62 }
0x3d72   :  { %v8133_v44 = vmul.f32 0.7978846, %v8127_v46  ;;  %v8128_v26 = vadd.f32 %v8122_v53, %v8102_v9 }
0x3d73   :  { %v8154_v61 = vmul.f32 %v8148_v24, %v8086_v12 }
0x3d74   :  { %10760 = vtanh.f32 %v8133_v44  ;;  %v8134_v23 = vmul.f32 0.7978846, %v8128_v26 }
0x3d75   :  { %v8159_v49 = vpack.c.bf16 %v8154_v61, %v8153_v8 }
0x3d76   :  { %v10757_v17 = vpop.eup %10756  ;;  %10762 = vtanh.f32 %v8134_v23 }
0x3d77   :  { %v8143_v20 = vadd.f32 1.0, %v10757_v17  ;;  %10087 = vmatmul.mubr.bf16.vlgmr.msra.gmra.mrb[20].mxu1 %v8159_v49 }
0x3d78   :  { %v10759_v15 = vpop.eup %10758  ;;  %10090 = vmatprep.mubr.msk.bf16.mxu1 %vm11290_vm0, %v11289_v0 }
0x3d79   :  { %v8149_v31 = vmul.f32 0.5, %v8143_v20  ;;  %v8144_v5 = vadd.f32 1.0, %v10759_v15 }
0x3d7b   :  { %v8150_v34 = vmul.f32 0.5, %v8144_v5  ;;  %v8155_v6 = vmul.f32 %v8149_v31, %v8091_v32 }
0x3d7d   :  { %v8156_v14 = vmul.f32 %v8150_v34, %v8094_v59 }
0x3d7e   :  { %v10761_v41 = vpop.eup %10760 }
0x3d7f   :  { %v8160_v27 = vpack.c.bf16 %v8156_v14, %v8155_v6  ;;  %v8145_v62 = vadd.f32 1.0, %v10761_v41 }
0x3d80   :  { %v10763_v12 = vpop.eup %10762 }
0x3d81   :  { %v8151_v10 = vmul.f32 0.5, %v8145_v62  ;;  %v8146_v42 = vadd.f32 1.0, %v10763_v12  ;;  %10091 = vmatmul.mubr.bf16.gmra.mrb[24].mxu1 %v8160_v27 }
0x3d82   :  { %10094 = vmatprep.mubr.msk.bf16.mxu1 %vm11290_vm0, %v11289_v0 }
0x3d83   :  { %v8152_v54 = vmul.f32 0.5, %v8146_v42  ;;  %v8157_v55 = vmul.f32 %v8151_v10, %v8099_v28 }
0x3d85   :  { %v8158_v58 = vmul.f32 %v8152_v54, %v8102_v9 }
0x3d87   :  { %v8161_v30 = vpack.c.bf16 %v8158_v58, %v8157_v55  ;;  %v10304_v58 = vld [vmem:[#allocation29] sm:$0xff]  }
0x3d88   :  { %10099 = vmatpush3.bf16.msra.mxu0 %v10304_v58 }
0x3d89   :  { %10095 = vmatmul.mubr.bf16.gmra.mrb[28].mxu1 %v8161_v30  ;;  %10100 = vmatprep.subr.bf16.mxu0 %v11289_v0  ;;  %v10305_v30 = vld [vmem:[#allocation29 + $0x8] sm:$0xff]  }
0x3d8c   :  { %10101 = vmatpush3.bf16.msra.mxu0 %v10305_v30 }
0x3d8d   :  { %10102 = vmatprep.subr.bf16.mxu0 %v11289_v0 }
0x3e4a   :  { %v8261_v37 = vpop.f32.mrb[20].mxu1 }
0x3e4b   :  { %v8284_v32 = vadd.f32 %v8261_v37, %v13428_v52  ;;  %v10088_v59 = vpop.f32.mrb[21].mxu1  ;;  %v10306_v37 = vld [vmem:[#allocation29 + $0x10] sm:$0xff]  }
0x3e4c   :  { %v8264_v50 = vpop.f32.mrb[22].mxu1  ;;  %10103 = vmatpush3.bf16.msra.mxu0 %v10306_v37 }
0x3e4d   :  { %v8298_v3 = vadd.f32 %v8866_v11, %v8284_v32  ;;  %v8285_v39 = vadd.f32 %v8264_v50, %v13431_v51  ;;  %v10089_v56 = vpop.f32.mrb[23].mxu1  ;;  %10104 = vmatprep.subr.bf16.mxu0 %v11289_v0 }
0x3e4f   :  { %v8299_v21 = vadd.f32 %v8866_v11, %v8285_v39  ;;  %v8306_v7 = vsel %vm405_vm3, %v8298_v3, 0.0 }
0x3e50   :  { %8307 = vadd.xlane.f32.xlu0 %v8306_v7 }
0x3e51   :  { %v8309_v60 = vsel %vm405_vm3, %v8299_v21, 0.0 }
0x3e52   :  { %8310 = vadd.xlane.f32.xlu1 %v8309_v60 }
0x3e54   :  { %v8269_v38 = vpop.f32.mrb[24].mxu1 }
0x3e55   :  { %v8286_v28 = vadd.f32 %v8269_v38, %v13440_v22  ;;  %v10092_v19 = vpop.f32.mrb[25].mxu1 }
0x3e56   :  { %v8272_v18 = vpop.f32.mrb[26].mxu1 }
0x3e57   :  { %v8300_v16 = vadd.f32 %v8866_v11, %v8286_v28  ;;  %v8287_v52 = vadd.f32 %v8272_v18, %v13443_v33  ;;  %v10093_v36 = vpop.f32.mrb[27].mxu1  ;;  %v8867_v18 = vld [vmem:[#allocation26] ss:$0 sm:$0xff] }
0x3e59   :  { %v8301_v63 = vadd.f32 %v8866_v11, %v8287_v52  ;;  %v8312_v51 = vsel %vm405_vm3, %v8300_v16, 0.0 }
0x3e5a   :  { %8313 = vadd.xlane.f32.xlu0 %v8312_v51 }
0x3e5b   :  { %v8315_v9 = vsel %vm405_vm3, %v8301_v63, 0.0 }
0x3e5c   :  { %8316 = vadd.xlane.f32.xlu1 %v8315_v9  ;;  %v8277_v48 = vpop.f32.mrb[28].mxu1 }
0x3e5d   :  { %v8288_v29 = vadd.f32 %v8277_v48, %v13452_v4  ;;  %v10096_v43 = vpop.f32.mrb[29].mxu1  ;;  %v8868_v48 = vld [vmem:[#allocation28] ss:$0 sm:$0xff] }
0x3e5e   :  { %v8280_v25 = vpop.f32.mrb[30].mxu1 }
0x3e5f   :  { %v8302_v35 = vadd.f32 %v8866_v11, %v8288_v29  ;;  %v8289_v22 = vadd.f32 %v8280_v25, %v13455_v57  ;;  %v10097_v2 = vpop.f32.mrb[31].mxu1 }
0x3e61   :  { %v8303_v1 = vadd.f32 %v8866_v11, %v8289_v22  ;;  %v8318_v33 = vsel %vm405_vm3, %v8302_v35, 0.0  ;;  %v10307_v11 = vld [vmem:[#allocation29 + $0x18] sm:$0xff]  }
0x3e62   :  { %8319 = vadd.xlane.f32.xlu0 %v8318_v33  ;;  %10105 = vmatpush3.bf16.msra.mxu0 %v10307_v11 }
0x3e63   :  { %v8321_v47 = vsel %vm405_vm3, %v8303_v1, 0.0 }
0x3e64   :  { %8322 = vadd.xlane.f32.xlu1 %v8321_v47 }
0x3edd   :  { %v8308_v40 = vpop.xlane.xlu0 %8307 }
0x3ede   :  { %v8324_v13 = vmul.f32 0.015625, %v8308_v40 }
0x3edf   :  { %v8311_v45 = vpop.xlane.xlu1 %8310 }
0x3ee0   :  { %v8330_v46 = vsub.f32 %v8298_v3, %v8324_v13  ;;  %v8325_v53 = vmul.f32 0.015625, %v8311_v45 }
0x3ee2   :  { %v13534_v24 = vsub.f32 %v8299_v21, %v8325_v53  ;;  %v8336_v4 = vmul.f32 %v8330_v46, %v8330_v46 }
0x3ee4   :  { %v8342_v44 = vsel %vm405_vm3, %v8336_v4, 0.0  ;;  %v8337_v57 = vmul.f32 %v13534_v24, %v13534_v24 }
0x3ee5   :  { %8343 = vadd.xlane.f32.xlu0 %v8342_v44 }
0x3ee6   :  { %v8345_v26 = vsel %vm405_vm3, %v8337_v57, 0.0 }
0x3ee7   :  { %v8314_v8 = vpop.xlane.xlu0 %8313  ;;  %8346 = vadd.xlane.f32.xlu1 %v8345_v26 }
0x3ee8   :  { %v8326_v61 = vmul.f32 0.015625, %v8314_v8 }
0x3ee9   :  { %v8317_v23 = vpop.xlane.xlu1 %8316 }
0x3eea   :  { %v13540_v49 = vsub.f32 %v8300_v16, %v8326_v61  ;;  %v8327_v17 = vmul.f32 0.015625, %v8317_v23 }
0x3eec   :  { %v13542_v20 = vsub.f32 %v8301_v63, %v8327_v17  ;;  %v8338_v15 = vmul.f32 %v13540_v49, %v13540_v49 }
0x3eee   :  { %v8348_v31 = vsel %vm405_vm3, %v8338_v15, 0.0  ;;  %v8339_v5 = vmul.f32 %v13542_v20, %v13542_v20 }
0x3eef   :  { %8349 = vadd.xlane.f32.xlu0 %v8348_v31  ;;  %v8320_v34 = vpop.xlane.xlu0 %8319 }
0x3ef0   :  { %v8328_v6 = vmul.f32 0.015625, %v8320_v34  ;;  %v8351_v14 = vsel %vm405_vm3, %v8339_v5, 0.0  ;;  %v8869_v5 = vld [vmem:[#allocation31] ss:$0 sm:$0xff] }
0x3ef1   :  { %8352 = vadd.xlane.f32.xlu1 %v8351_v14  ;;  %v8323_v41 = vpop.xlane.xlu1 %8322 }
0x3ef2   :  { %v13550_v27 = vsub.f32 %v8302_v35, %v8328_v6  ;;  %v8329_v62 = vmul.f32 0.015625, %v8323_v41 }
0x3ef4   :  { %v13552_v12 = vsub.f32 %v8303_v1, %v8329_v62  ;;  %v8340_v10 = vmul.f32 %v13550_v27, %v13550_v27 }
0x3ef6   :  { %v8354_v42 = vsel %vm405_vm3, %v8340_v10, 0.0  ;;  %v8341_v54 = vmul.f32 %v13552_v12, %v13552_v12 }
0x3ef7   :  { %8355 = vadd.xlane.f32.xlu0 %v8354_v42 }
0x3ef8   :  { %v8357_v55 = vsel %vm405_vm3, %v8341_v54, 0.0 }
0x3ef9   :  { %8358 = vadd.xlane.f32.xlu1 %v8357_v55 }
0x3f72   :  { %v8344_v32 = vpop.xlane.xlu0 %8343 }
0x3f73   :  { %v8360_v59 = vmul.f32 0.015625, %v8344_v32 }
0x3f74   :  { %v8347_v50 = vpop.xlane.xlu1 %8346 }
0x3f75   :  { %v8366_v3 = vadd.f32 1e-05, %v8360_v59  ;;  %v8361_v39 = vmul.f32 0.015625, %v8347_v50 }
0x3f77   :  { %10764 = vrsqrt.f32 %v8366_v3  ;;  %v8367_v56 = vadd.f32 1e-05, %v8361_v39 }
0x3f79   :  { %10766 = vrsqrt.f32 %v8367_v56 }
0x3f7c   :  { %v8350_v21 = vpop.xlane.xlu0 %8349 }
0x3f7d   :  { %v8362_v7 = vmul.f32 0.015625, %v8350_v21 }
0x3f7e   :  { %v8353_v60 = vpop.xlane.xlu1 %8352 }
0x3f7f   :  { %v8368_v38 = vadd.f32 1e-05, %v8362_v7  ;;  %v8363_v28 = vmul.f32 0.015625, %v8353_v60 }
0x3f81   :  { %v10765_v19 = vpop.eup %10764  ;;  %10768 = vrsqrt.f32 %v8368_v38  ;;  %v8369_v16 = vadd.f32 1e-05, %v8363_v28 }
0x3f82   :  { %v8378_v52 = vmul.f32 %v10765_v19, %v8330_v46 }
0x3f83   :  { %v10767_v36 = vpop.eup %10766  ;;  %10770 = vrsqrt.f32 %v8369_v16 }
0x3f84   :  { %v8390_v63 = vmul.f32 %v8867_v18, %v8378_v52  ;;  %v8379_v51 = vmul.f32 %v10767_v36, %v13534_v24  ;;  %v8356_v9 = vpop.xlane.xlu0 %8355 }
0x3f85   :  { %v8364_v29 = vmul.f32 0.015625, %v8356_v9 }
0x3f86   :  { %v8391_v43 = vmul.f32 %v8867_v18, %v8379_v51  ;;  %v8359_v25 = vpop.xlane.xlu1 %8358  ;;  %v8402_v2 = vadd.f32 %v8868_v48, %v8390_v63 }
0x3f87   :  { %v8370_v35 = vadd.f32 1e-05, %v8364_v29  ;;  %v8365_v22 = vmul.f32 0.015625, %v8359_v25 }
0x3f88   :  { %v8403_v1 = vadd.f32 %v8868_v48, %v8391_v43 }
0x3f89   :  { %10772 = vrsqrt.f32 %v8370_v35  ;;  %v8371_v33 = vadd.f32 1e-05, %v8365_v22 }
0x3f8a   :  { %v8408_v47 = vpack.c.bf16 %v8403_v1, %v8402_v2 }
0x3f8b   :  { %v10769_v40 = vpop.eup %10768  ;;  %10774 = vrsqrt.f32 %v8371_v33 }
0x3f8c   :  { %v8380_v13 = vmul.f32 %v10769_v40, %v13540_v49  ;;  %10107 = vmatmul.mubr.msk.bf16.vlgmr.msra.gmra.mrb[244].mxu0 %vm405_vm3, %v8408_v47 }
0x3f8d   :  { %v10771_v45 = vpop.eup %10770  ;;  %10110 = vmatprep.mubr.msk.bf16.mxu0 %vm11290_vm0, %v11289_v0 }
0x3f8e   :  { %v8381_v46 = vmul.f32 %v10771_v45, %v13542_v20  ;;  %v8392_v53 = vmul.f32 %v8867_v18, %v8380_v13 }
0x3f90   :  { %v8393_v24 = vmul.f32 %v8867_v18, %v8381_v46  ;;  %v8404_v4 = vadd.f32 %v8868_v48, %v8392_v53 }
0x3f92   :  { %v8405_v44 = vadd.f32 %v8868_v48, %v8393_v24 }
0x3f93   :  { %v10773_v57 = vpop.eup %10772 }
0x3f94   :  { %v8382_v26 = vmul.f32 %v10773_v57, %v13550_v27  ;;  %v8409_v8 = vpack.c.bf16 %v8405_v44, %v8404_v4 }
0x3f95   :  { %v10775_v61 = vpop.eup %10774 }
0x3f96   :  { %v8383_v23 = vmul.f32 %v10775_v61, %v13552_v12  ;;  %10111 = vmatmul.mubr.msk.bf16.gmra.mrb[248].mxu0 %vm405_vm3, %v8409_v8  ;;  %v8394_v49 = vmul.f32 %v8867_v18, %v8382_v26 }
0x3f97   :  { %10114 = vmatprep.mubr.msk.bf16.mxu0 %vm11290_vm0, %v11289_v0 }
0x3f98   :  { %v8395_v17 = vmul.f32 %v8867_v18, %v8383_v23  ;;  %v8406_v15 = vadd.f32 %v8868_v48, %v8394_v49 }
0x3f9a   :  { %v8407_v20 = vadd.f32 %v8868_v48, %v8395_v17 }
0x3f9c   :  { %v8410_v31 = vpack.c.bf16 %v8407_v20, %v8406_v15 }
0x3f9e   :  { %10115 = vmatmul.mubr.msk.bf16.gmra.mrb[252].mxu0 %vm405_vm3, %v8410_v31 }
0x405f   :  { %v8493_v34 = vpop.f32.mrb[244].mxu0 }
0x4060   :  { %v13575_v6 = vadd.f32 %v8869_v5, %v8493_v34  ;;  %v10108_v14 = vpop.f32.mrb[245].mxu0 }
0x4061   :  { %v8496_v41 = vpop.f32.mrb[246].mxu0 }
0x4062   :  { %v13577_v27 = vadd.f32 %v8869_v5, %v8496_v41  ;;  %8516 = vmax.xlane.f32.xlu0 %v13575_v6  ;;  %v10109_v62 = vpop.f32.mrb[247].mxu0 }
0x4064   :  { %8518 = vmax.xlane.f32.xlu1 %v13577_v27 }
0x4069   :  { %v8501_v0 = vpop.f32.mrb[248].mxu0 }
0x406a   :  { %v13581_v12 = vadd.f32 %v8869_v5, %v8501_v0  ;;  %v10112_v10 = vpop.f32.mrb[249].mxu0 }
0x406b   :  { %v8504_v42 = vpop.f32.mrb[250].mxu0 }
0x406c   :  { %v13583_v54 = vadd.f32 %v8869_v5, %v8504_v42  ;;  %8520 = vmax.xlane.f32.xlu0 %v13581_v12  ;;  %v10113_v55 = vpop.f32.mrb[251].mxu0 }
0x406e   :  { %8522 = vmax.xlane.f32.xlu1 %v13583_v54 }
0x4071   :  { %v8509_v58 = vpop.f32.mrb[252].mxu0 }
0x4072   :  { %v13587_v30 = vadd.f32 %v8869_v5, %v8509_v58  ;;  %v10116_v37 = vpop.f32.mrb[253].mxu0 }
0x4073   :  { %v8512_v11 = vpop.f32.mrb[254].mxu0 }
0x4074   :  { %v13589_v32 = vadd.f32 %v8869_v5, %v8512_v11  ;;  %8524 = vmax.xlane.f32.xlu0 %v13587_v30  ;;  %v10117_v59 = vpop.f32.mrb[255].mxu0 }
0x4076   :  { %8526 = vmax.xlane.f32.xlu1 %v13589_v32 }
0x40ef   :  { %v8517_v50 = vpop.xlane.xlu0 %8516 }
0x40f0   :  { %v8528_v3 = vsub.f32 %v13575_v6, %v8517_v50 }
0x40f1   :  { %v8519_v39 = vpop.xlane.xlu1 %8518 }
0x40f2   :  { %v8534_v56 = vmul.f32 1.442695, %v8528_v3  ;;  %v8529_v21 = vsub.f32 %v13577_v27, %v8519_v39 }
0x40f4   :  { %10776 = vpow2.f32 %v8534_v56  ;;  %v8536_v7 = vmul.f32 1.442695, %v8529_v21 }
0x40f6   :  { %10778 = vpow2.f32 %v8536_v7 }
0x40f9   :  { %v8521_v60 = vpop.xlane.xlu0 %8520 }
0x40fa   :  { %v8530_v38 = vsub.f32 %v13581_v12, %v8521_v60 }
0x40fb   :  { %v8523_v28 = vpop.xlane.xlu1 %8522 }
0x40fc   :  { %v8538_v19 = vmul.f32 1.442695, %v8530_v38  ;;  %v8531_v18 = vsub.f32 %v13583_v54, %v8523_v28 }
0x40fe   :  { %v10777_v16 = vpop.eup %10776  ;;  %10780 = vpow2.f32 %v8538_v19  ;;  %v8540_v52 = vmul.f32 1.442695, %v8531_v18 }
0x40ff   :  { %8546 = vadd.xlane.f32.xlu0 %v10777_v16 }
0x4100   :  { %v10779_v36 = vpop.eup %10778  ;;  %10782 = vpow2.f32 %v8540_v52 }
0x4101   :  { %v8525_v63 = vpop.xlane.xlu0 %8524  ;;  %8548 = vadd.xlane.f32.xlu1 %v10779_v36 }
0x4102   :  { %v8532_v51 = vsub.f32 %v13587_v30, %v8525_v63 }
0x4103   :  { %v8527_v9 = vpop.xlane.xlu1 %8526 }
0x4104   :  { %v8542_v48 = vmul.f32 1.442695, %v8532_v51  ;;  %v8533_v29 = vsub.f32 %v13589_v32, %v8527_v9 }
0x4106   :  { %10784 = vpow2.f32 %v8542_v48  ;;  %v8544_v43 = vmul.f32 1.442695, %v8533_v29 }
0x4108   :  { %v10781_v25 = vpop.eup %10780  ;;  %10786 = vpow2.f32 %v8544_v43 }
0x4109   :  { %8550 = vadd.xlane.f32.xlu0 %v10781_v25 }
0x410a   :  { %v10783_v35 = vpop.eup %10782 }
0x410b   :  { %8552 = vadd.xlane.f32.xlu1 %v10783_v35 }
0x4110   :  { %v10785_v22 = vpop.eup %10784 }
0x4111   :  { %8554 = vadd.xlane.f32.xlu0 %v10785_v22 }
0x4112   :  { %v10787_v2 = vpop.eup %10786 }
0x4113   :  { %8556 = vadd.xlane.f32.xlu1 %v10787_v2 }
0x418c   :  { %v8547_v1 = vpop.xlane.xlu0 %8546 }
0x418d   :  { %10788 = vlog2.f32 %v8547_v1 }
0x418e   :  { %v8549_v33 = vpop.xlane.xlu1 %8548 }
0x418f   :  { %10790 = vlog2.f32 %v8549_v33 }
0x4196   :  { %v8551_v47 = vpop.xlane.xlu0 %8550 }
0x4197   :  { %v10789_v40 = vpop.eup %10788  ;;  %10792 = vlog2.f32 %v8551_v47 }
0x4198   :  { %v8559_v13 = vmul.f32 0.6931472, %v10789_v40  ;;  %v8553_v45 = vpop.xlane.xlu1 %8552 }
0x4199   :  { %v10791_v46 = vpop.eup %10790  ;;  %10794 = vlog2.f32 %v8553_v45 }
0x419a   :  { %v8570_v53 = vadd.f32 %v8559_v13, %v8517_v50  ;;  %v8561_v24 = vmul.f32 0.6931472, %v10791_v46 }
0x419c   :  { %v8576_v4 = vsub.f32 %v13575_v6, %v8570_v53  ;;  %v8571_v44 = vadd.f32 %v8561_v24, %v8519_v39 }
0x419e   :  { %8582 = vst [vmem:[#allocation32] sm:$0xff] %v8576_v4  ;;  %v8577_v57 = vsub.f32 %v13577_v27, %v8571_v44  ;;  %v8555_v26 = vpop.xlane.xlu0 %8554 }
0x419f   :  { %10796 = vlog2.f32 %v8555_v26 }
0x41a0   :  { %8583 = vst [vmem:[#allocation32 + $0x8] sm:$0xff] %v8577_v57  ;;  %v8557_v8 = vpop.xlane.xlu1 %8556 }
0x41a1   :  { %v10793_v61 = vpop.eup %10792  ;;  %10798 = vlog2.f32 %v8557_v8 }
0x41a2   :  { %v8563_v23 = vmul.f32 0.6931472, %v10793_v61 }
0x41a3   :  { %v10795_v49 = vpop.eup %10794 }
0x41a4   :  { %v8572_v17 = vadd.f32 %v8563_v23, %v8521_v60  ;;  %v8565_v15 = vmul.f32 0.6931472, %v10795_v49 }
0x41a6   :  { %v8578_v20 = vsub.f32 %v13581_v12, %v8572_v17  ;;  %v8573_v31 = vadd.f32 %v8565_v15, %v8523_v28 }
0x41a8   :  { %8584 = vst [vmem:[#allocation32 + $0x10] sm:$0xff] %v8578_v20  ;;  %v8579_v5 = vsub.f32 %v13583_v54, %v8573_v31 }
0x41a9   :  { %v10797_v34 = vpop.eup %10796 }
0x41aa   :  { %8585 = vst [vmem:[#allocation32 + $0x18] sm:$0xff] %v8579_v5  ;;  %v8567_v6 = vmul.f32 0.6931472, %v10797_v34 }
0x41ab   :  { %v10799_v14 = vpop.eup %10798 }
0x41ac   :  { %v8574_v41 = vadd.f32 %v8567_v6, %v8525_v63  ;;  %v8569_v27 = vmul.f32 0.6931472, %v10799_v14 }
0x41ae   :  { %v8580_v62 = vsub.f32 %v13587_v30, %v8574_v41  ;;  %v8575_v0 = vadd.f32 %v8569_v27, %v8527_v9 }
0x41b0   :  { %8586 = vst [vmem:[#allocation32 + $0x20] sm:$0xff] %v8580_v62  ;;  %v8581_v10 = vsub.f32 %v13589_v32, %v8575_v0 }
0x41b2   :  { %8587 = vst [vmem:[#allocation32 + $0x28] sm:$0xff] %v8581_v10 }
0x41b3   :  { %11229 = shalt.err (!%p11226_p2)
}
0x41b4   :  { %s13669_s1 = sld [smem:[#allocation49_spill]] }
0x41ba   :  { %s11230_s29 = scalar_lea.hbm %s13669_s1, 768 }
0x41bb   :  { %p11231_p3 = scmp.ne.s32.totalorder %s13669_s1, %s11230_s29  ;;  %p11234_p4 = scmp.lt.u32.totalorder %s11230_s29, %s13669_s1 }
0x41bd   :  { %p11236_p5 = pnand %p11234_p4, %p11231_p3 }
0x41bf   :  { %11239 = shalt.err (!%p11236_p5)
}
0x41c0   :  { %8599 = dma.vmem_to_hbm [thread:$0]  %s8594_s21, 768, %s13669_s1, [#allocation4], %s13663_s0, %s13663_s0, %s13662_s23  }
0x41c1   :  { %11260 = dma.done.wait [#allocation4], 768  }
0x41c2   :  { %11261 = vsyncadd [#allocation4], 4294966528 }
0x41c3   :  { %8603 = vsyncpa [#allocation3], 1 }
0x41c4   :  { %8604 = vsyncpa [#allocation6], 1 }
0x41c5   :  { %8605 = vsyncpa [#allocation9], 1 }
0x41c6   :  { %8606 = vsyncpa [#allocation12], 1 }
0x41c7   :  { %8607 = vsyncpa [#allocation15], 1 }
0x41c8   :  { %8608 = vsyncpa [#allocation18], 1 }
0x41c9   :  { %8609 = vsyncpa [#allocation21], 1 }
0x41ca   :  { %8610 = vsyncpa [#allocation24], 1 }
0x41cb   :  { %8611 = vsyncpa [#allocation27], 1 }
0x41cc   :  { %8612 = vsyncpa [#allocation30], 1 }
0x41cd   :  { %8613 = vsyncpa [#allocation4], 1 }

</bundles_post_ra>
